<compile_context>
chip_gen: v6e
topology: v6e:2x2x1
jax: 0.10.0
libtpu: 0.0.40
codegen_flags: <defaults>
</compile_context>

<pallas_src>
import functools

import jax
import jax.numpy as jnp
from jax.experimental import pallas as pl
from jax.experimental.pallas import tpu as pltpu


def sinr2_kernel(xc_ref, a_ref,
                 ftr_w_ref, ftr_b_ref,
                 fw_w_ref, fw_b_ref,
                 code_w_ref, code_b_ref,
                 out_w_ref, out_bsum_ref,
                 o_ref, *, depth, hidden_dim):
    H = hidden_dim
    xc = xc_ref[...]                 # (tm, 3) = [theta, cos(phi), sin(phi)]
    a = a_ref[...]                   # (tm, C)

    theta = xc[:, 0:1]               # (tm, 1)
    cos_phi = xc[:, 1:2]
    sin_phi = xc[:, 2:3]

    # --- all depth+1 spherical filters in one lane-packed batch ------------
    fw = ftr_w_ref[...]              # (3, (depth+1)*H)
    fb = ftr_b_ref[...]              # (3, (depth+1)*H)
    filt = (jnp.sin(theta * fw[0:1, :] + fb[0:1, :])
            * jnp.sin(cos_phi * fw[1:2, :] + fb[1:2, :])
            * jnp.sin(sin_phi * fw[2:3, :] + fb[2:3, :]))   # (tm, (depth+1)*H)

    # --- all code-linear shifts with a single MXU matmul --------------------
    shifts = (jnp.dot(a, code_w_ref[...], preferred_element_type=jnp.float32)
              + code_b_ref[...])                            # (tm, depth*H)

    # --- sequential layer recursion (depth is static -> unrolled) ----------
    z = filt[:, 0:H]                                        # (tm, H)
    acc = z * out_w_ref[0]                                  # (tm, H) head acc
    for i in range(depth):
        z = (jnp.dot(z, fw_w_ref[i], preferred_element_type=jnp.float32)
             + fw_b_ref[i]
             + shifts[:, i * H:(i + 1) * H])
        z = z * filt[:, (i + 1) * H:(i + 2) * H]
        acc = acc + z * out_w_ref[i + 1]

    # Single cross-lane reduction; all out_linear biases pre-summed to (1,1).
    out = jnp.sum(acc, axis=-1, keepdims=True) + out_bsum_ref[...]
    o_ref[...] = out.astype(o_ref.dtype)


def _round_up(v, m):
    return -(-v // m) * m


def sinr2_forward(x, a, params, *, depth, tm=512):
    """x: (B, N, 2), a: (B, N, C) -> (out: (B, N), x)"""
    (ftr_w, ftr_b, fw_w, fw_b, code_w, code_b, out_w, out_b) = params
    B, N, _ = x.shape
    C = a.shape[-1]
    H = fw_w.shape[-1]
    M = B * N

    # Row tile: big tiles amortize per-step overhead; for v7x pick tm such that
    # the grid keeps >= 2 steps so both TensorCores get work.  VMEM is not a
    # constraint at these sizes on any generation.
    tm_eff = min(_round_up(M, 8), _round_up(tm, 8))
    Mp = _round_up(M, tm_eff)
    grid = Mp // tm_eff

    # Precompute [theta, cos(phi), sin(phi)] columns in the wrapper (cheap,
    # mem-bound XLA pass) so the kernel's EUP only runs the lane-dense sins.
    theta = x[..., 0:1].reshape(M, 1)
    phi = x[..., 1:2].reshape(M, 1)
    xc = jnp.concatenate([theta, jnp.cos(phi), jnp.sin(phi)],
                         axis=-1).astype(jnp.float32)        # (M, 3)
    af = a.reshape(M, C).astype(jnp.float32)
    if Mp != M:
        xc = jnp.pad(xc, ((0, Mp - M), (0, 0)))
        af = jnp.pad(af, ((0, Mp - M), (0, 0)))

    # Lane-pack parameters (feature dim last = lane axis).
    ftr_w_p = jnp.transpose(ftr_w, (1, 0, 2)).reshape(3, (depth + 1) * H)
    ftr_b_p = jnp.transpose(ftr_b, (1, 0, 2)).reshape(3, (depth + 1) * H)
    code_w_p = jnp.transpose(code_w, (1, 0, 2)).reshape(C, depth * H)
    code_b_p = code_b.reshape(1, depth * H)
    out_b_sum = jnp.sum(out_b).reshape(1, 1)

    # Whole-array weight blocks: constant index map -> resident in VMEM, not
    # re-DMA'd across grid steps (they are tiny anyway).
    full = lambda shape: pl.BlockSpec(shape, lambda i: (0,) * len(shape))

    out_flat = pl.pallas_call(
        functools.partial(sinr2_kernel, depth=depth, hidden_dim=H),
        out_shape=jax.ShapeDtypeStruct((Mp, 1), jnp.float32),
        grid_spec=pltpu.PrefetchScalarGridSpec(
            num_scalar_prefetch=0,
            grid=(grid,),
            in_specs=[
                pl.BlockSpec((tm_eff, 3), lambda i: (i, 0)),   # [theta,cos,sin]
                pl.BlockSpec((tm_eff, C), lambda i: (i, 0)),   # codes
                full(ftr_w_p.shape),                           # (3, (d+1)*H)
                full(ftr_b_p.shape),                           # (3, (d+1)*H)
                full(fw_w.shape),                              # (d, H, H)
                full(fw_b.shape),                              # (d, H)
                full(code_w_p.shape),                          # (C, d*H)
                full(code_b_p.shape),                          # (1, d*H)
                full(out_w.shape),                             # (d+1, H)
                full(out_b_sum.shape),                         # (1, 1)
            ],
            out_specs=pl.BlockSpec((tm_eff, 1), lambda i: (i, 0)),
        ),
        compiler_params=pltpu.CompilerParams(
            dimension_semantics=("parallel",)),
    )(xc, af, ftr_w_p, ftr_b_p, fw_w, fw_b, code_w_p, code_b_p, out_w,
      out_b_sum)

    return out_flat[:M].reshape(B, N), x


def init_params(key, depth, hidden_dim, code_dim):
    ks = jax.random.split(key, 8)
    n = jax.random.normal
    # SphericalFilter weights: three Linear(1, H) per layer -> (depth+1, 3, H)
    ftr_w = n(ks[0], (depth + 1, 3, hidden_dim), jnp.float32)
    ftr_b = n(ks[1], (depth + 1, 3, hidden_dim), jnp.float32) * 0.1
    # LayerStepper: forward_linear (H->H) stored as (in, out); code_linear (C->H)
    fw_w = n(ks[2], (depth, hidden_dim, hidden_dim), jnp.float32) / jnp.sqrt(hidden_dim)
    fw_b = n(ks[3], (depth, hidden_dim), jnp.float32) * 0.1
    code_w = n(ks[4], (depth, code_dim, hidden_dim), jnp.float32) / jnp.sqrt(code_dim)
    code_b = n(ks[5], (depth, hidden_dim), jnp.float32) * 0.1
    # out_linears: Linear(H, 1) -> weight row (H,), bias (1,)
    out_w = n(ks[6], (depth + 1, hidden_dim), jnp.float32) / jnp.sqrt(hidden_dim)
    out_b = n(ks[7], (depth + 1, 1), jnp.float32) * 0.1
    return (ftr_w, ftr_b, fw_w, fw_b, code_w, code_b, out_w, out_b)


def sinr2_reference(x, a, params, *, depth):
    """Pure-JAX reference mirroring the PyTorch forward."""
    (ftr_w, ftr_b, fw_w, fw_b, code_w, code_b, out_w, out_b) = params
    theta, phi = x[..., 0:1], x[..., 1:2]

    def ftr(l):
        return (jnp.sin(theta * ftr_w[l, 0] + ftr_b[l, 0])
                * jnp.sin(jnp.cos(phi) * ftr_w[l, 1] + ftr_b[l, 1])
                * jnp.sin(jnp.sin(phi) * ftr_w[l, 2] + ftr_b[l, 2]))

    def out_lin(l, z):
        return jnp.sum(z * out_w[l], axis=-1, keepdims=True) + out_b[l]

    z = ftr(0)
    out = out_lin(0, z)
    for i in range(depth):
        z = (z @ fw_w[i] + fw_b[i]) + (a @ code_w[i] + code_b[i])
        z = z * ftr(i + 1)
        out = out + out_lin(i + 1, z)
    return out[..., 0], x


if __name__ == "__main__":
    # Small shapes consistent with the module's forward.
    B, N = 2, 64
    depth, hidden_dim, code_dim = 3, 32, 64

    key = jax.random.PRNGKey(0)
    kx, ka, kp = jax.random.split(key, 3)
    x = jax.random.uniform(kx, (B, N, 2), jnp.float32) * 3.14159
    a = jax.random.normal(ka, (B, N, code_dim), jnp.float32)

    params = init_params(kp, depth, hidden_dim, code_dim)

    out, x_out = sinr2_forward(x, a, params, depth=depth)
    jax.block_until_ready(out)

    # Sanity-check against the plain-JAX reference.
    ref_out, _ = sinr2_reference(x, a, params, depth=depth)
    assert out.shape == (B, N)
    assert jnp.allclose(out, ref_out, atol=1e-4, rtol=1e-4), "mismatch vs reference"

    print("KERNEL_OK")
</pallas_src>

<mosaic_0001>
module attributes {stable_mosaic.version = 11 : i64} {
  func.func @sinr2_kernel(%arg0: i32, %arg1: memref<128x3xf32, #tpu.memory_space<vmem>>, %arg2: memref<128x64xf32, #tpu.memory_space<vmem>>, %arg3: memref<3x128xf32, #tpu.memory_space<vmem>>, %arg4: memref<3x128xf32, #tpu.memory_space<vmem>>, %arg5: memref<3x32x32xf32, #tpu.memory_space<vmem>>, %arg6: memref<3x32xf32, #tpu.memory_space<vmem>>, %arg7: memref<64x96xf32, #tpu.memory_space<vmem>>, %arg8: memref<1x96xf32, #tpu.memory_space<vmem>>, %arg9: memref<4x32xf32, #tpu.memory_space<vmem>>, %arg10: memref<1x1xf32, #tpu.memory_space<vmem>>, %arg11: memref<128x1xf32, #tpu.memory_space<vmem>>) attributes {dimension_semantics = [#tpu.dimension_semantics<parallel>], iteration_bounds = array<i64: 1>, scalar_prefetch = 0 : i64, scratch_operands = 0 : i64, tpu.core_type = #tpu.core_type<tc>, window_params = [{transform_indices = @transform_0, window_bounds = array<i64: 128, 3>}, {transform_indices = @transform_1, window_bounds = array<i64: 128, 64>}, {pipeline_mode = #tpu.pipeline_mode<synchronous>, transform_indices = @transform_2, window_bounds = array<i64: 3, 128>}, {pipeline_mode = #tpu.pipeline_mode<synchronous>, transform_indices = @transform_3, window_bounds = array<i64: 3, 128>}, {pipeline_mode = #tpu.pipeline_mode<synchronous>, transform_indices = @transform_4, window_bounds = array<i64: 3, 32, 32>}, {pipeline_mode = #tpu.pipeline_mode<synchronous>, transform_indices = @transform_5, window_bounds = array<i64: 3, 32>}, {pipeline_mode = #tpu.pipeline_mode<synchronous>, transform_indices = @transform_6, window_bounds = array<i64: 64, 96>}, {pipeline_mode = #tpu.pipeline_mode<synchronous>, transform_indices = @transform_7, window_bounds = array<i64: 1, 96>}, {pipeline_mode = #tpu.pipeline_mode<synchronous>, transform_indices = @transform_8, window_bounds = array<i64: 4, 32>}, {pipeline_mode = #tpu.pipeline_mode<synchronous>, transform_indices = @transform_9, window_bounds = array<i64: 1, 1>}, {transform_indices = @transform_10, window_bounds = array<i64: 128, 1>}]} {
    %c0 = arith.constant 0 : index
    %c0_0 = arith.constant 0 : index
    %0 = vector.load %arg1[%c0, %c0_0] : memref<128x3xf32, #tpu.memory_space<vmem>>, vector<128x3xf32>
    %c0_1 = arith.constant 0 : index
    %c0_2 = arith.constant 0 : index
    %1 = vector.load %arg2[%c0_1, %c0_2] : memref<128x64xf32, #tpu.memory_space<vmem>>, vector<128x64xf32>
    %2 = vector.extract_strided_slice %0 {offsets = [0, 0], sizes = [128, 1], strides = [1, 1]} : vector<128x3xf32> to vector<128x1xf32>
    %3 = vector.extract_strided_slice %0 {offsets = [0, 1], sizes = [128, 1], strides = [1, 1]} : vector<128x3xf32> to vector<128x1xf32>
    %4 = vector.extract_strided_slice %0 {offsets = [0, 2], sizes = [128, 1], strides = [1, 1]} : vector<128x3xf32> to vector<128x1xf32>
    %c0_3 = arith.constant 0 : index
    %c0_4 = arith.constant 0 : index
    %5 = vector.load %arg3[%c0_3, %c0_4] : memref<3x128xf32, #tpu.memory_space<vmem>>, vector<3x128xf32>
    %c0_5 = arith.constant 0 : index
    %c0_6 = arith.constant 0 : index
    %6 = vector.load %arg4[%c0_5, %c0_6] : memref<3x128xf32, #tpu.memory_space<vmem>>, vector<3x128xf32>
    %7 = vector.extract_strided_slice %5 {offsets = [0, 0], sizes = [1, 128], strides = [1, 1]} : vector<3x128xf32> to vector<1x128xf32>
    %8 = vector.broadcast %2 : vector<128x1xf32> to vector<128x128xf32>
    %9 = vector.broadcast %7 : vector<1x128xf32> to vector<128x128xf32>
    %10 = arith.mulf %8, %9 : vector<128x128xf32>
    %11 = vector.extract_strided_slice %6 {offsets = [0, 0], sizes = [1, 128], strides = [1, 1]} : vector<3x128xf32> to vector<1x128xf32>
    %12 = vector.broadcast %11 : vector<1x128xf32> to vector<128x128xf32>
    %13 = arith.addf %10, %12 : vector<128x128xf32>
    %14 = math.sin %13 : vector<128x128xf32>
    %15 = vector.extract_strided_slice %5 {offsets = [1, 0], sizes = [1, 128], strides = [1, 1]} : vector<3x128xf32> to vector<1x128xf32>
    %16 = vector.broadcast %3 : vector<128x1xf32> to vector<128x128xf32>
    %17 = vector.broadcast %15 : vector<1x128xf32> to vector<128x128xf32>
    %18 = arith.mulf %16, %17 : vector<128x128xf32>
    %19 = vector.extract_strided_slice %6 {offsets = [1, 0], sizes = [1, 128], strides = [1, 1]} : vector<3x128xf32> to vector<1x128xf32>
    %20 = vector.broadcast %19 : vector<1x128xf32> to vector<128x128xf32>
    %21 = arith.addf %18, %20 : vector<128x128xf32>
    %22 = math.sin %21 : vector<128x128xf32>
    %23 = arith.mulf %14, %22 : vector<128x128xf32>
    %24 = vector.extract_strided_slice %5 {offsets = [2, 0], sizes = [1, 128], strides = [1, 1]} : vector<3x128xf32> to vector<1x128xf32>
    %25 = vector.broadcast %4 : vector<128x1xf32> to vector<128x128xf32>
    %26 = vector.broadcast %24 : vector<1x128xf32> to vector<128x128xf32>
    %27 = arith.mulf %25, %26 : vector<128x128xf32>
    %28 = vector.extract_strided_slice %6 {offsets = [2, 0], sizes = [1, 128], strides = [1, 1]} : vector<3x128xf32> to vector<1x128xf32>
    %29 = vector.broadcast %28 : vector<1x128xf32> to vector<128x128xf32>
    %30 = arith.addf %27, %29 : vector<128x128xf32>
    %31 = math.sin %30 : vector<128x128xf32>
    %32 = arith.mulf %23, %31 : vector<128x128xf32>
    %c0_7 = arith.constant 0 : index
    %c0_8 = arith.constant 0 : index
    %33 = vector.load %arg7[%c0_7, %c0_8] : memref<64x96xf32, #tpu.memory_space<vmem>>, vector<64x96xf32>
    %cst = arith.constant dense<0.000000e+00> : vector<128x96xf32>
    %34 = tpu.matmul %1, %33, %cst {dimension_numbers = #tpu.dot_dimension_numbers<[1], [0], [0], [1], [0, 0, 1, 1], [], []>} : vector<128x64xf32>, vector<64x96xf32>, vector<128x96xf32> -> vector<128x96xf32>
    %c0_9 = arith.constant 0 : index
    %c0_10 = arith.constant 0 : index
    %35 = vector.load %arg8[%c0_9, %c0_10] : memref<1x96xf32, #tpu.memory_space<vmem>>, vector<1x96xf32>
    %36 = vector.broadcast %35 : vector<1x96xf32> to vector<128x96xf32>
    %37 = arith.addf %34, %36 : vector<128x96xf32>
    %38 = vector.extract_strided_slice %32 {offsets = [0, 0], sizes = [128, 32], strides = [1, 1]} : vector<128x128xf32> to vector<128x32xf32>
    %c0_11 = arith.constant 0 : index
    %c0_12 = arith.constant 0 : index
    %39 = vector.load %arg9[%c0_11, %c0_12] : memref<4x32xf32, #tpu.memory_space<vmem>>, vector<1x32xf32>
    %40 = vector.shape_cast %39 : vector<1x32xf32> to vector<32xf32>
    %41 = vector.shape_cast %40 : vector<32xf32> to vector<1x32xf32>
    %42 = vector.broadcast %41 : vector<1x32xf32> to vector<128x32xf32>
    %43 = arith.mulf %38, %42 : vector<128x32xf32>
    %c0_13 = arith.constant 0 : index
    %c0_14 = arith.constant 0 : index
    %c0_15 = arith.constant 0 : index
    %44 = vector.load %arg5[%c0_13, %c0_14, %c0_15] : memref<3x32x32xf32, #tpu.memory_space<vmem>>, vector<1x32x32xf32>
    %45 = vector.shape_cast %44 : vector<1x32x32xf32> to vector<32x32xf32>
    %cst_16 = arith.constant dense<0.000000e+00> : vector<128x32xf32>
    %46 = tpu.matmul %38, %45, %cst_16 {dimension_numbers = #tpu.dot_dimension_numbers<[1], [0], [0], [1], [0, 0, 1, 1], [], []>} : vector<128x32xf32>, vector<32x32xf32>, vector<128x32xf32> -> vector<128x32xf32>
    %c0_17 = arith.constant 0 : index
    %c0_18 = arith.constant 0 : index
    %47 = vector.load %arg6[%c0_17, %c0_18] : memref<3x32xf32, #tpu.memory_space<vmem>>, vector<1x32xf32>
    %48 = vector.shape_cast %47 : vector<1x32xf32> to vector<32xf32>
    %49 = vector.shape_cast %48 : vector<32xf32> to vector<1x32xf32>
    %50 = vector.broadcast %49 : vector<1x32xf32> to vector<128x32xf32>
    %51 = arith.addf %46, %50 : vector<128x32xf32>
    %52 = vector.extract_strided_slice %37 {offsets = [0, 0], sizes = [128, 32], strides = [1, 1]} : vector<128x96xf32> to vector<128x32xf32>
    %53 = arith.addf %51, %52 : vector<128x32xf32>
    %54 = vector.extract_strided_slice %32 {offsets = [0, 32], sizes = [128, 32], strides = [1, 1]} : vector<128x128xf32> to vector<128x32xf32>
    %55 = arith.mulf %53, %54 : vector<128x32xf32>
    %c1 = arith.constant 1 : index
    %c0_19 = arith.constant 0 : index
    %56 = vector.load %arg9[%c1, %c0_19] : memref<4x32xf32, #tpu.memory_space<vmem>>, vector<1x32xf32>
    %57 = vector.shape_cast %56 : vector<1x32xf32> to vector<32xf32>
    %58 = vector.shape_cast %57 : vector<32xf32> to vector<1x32xf32>
    %59 = vector.broadcast %58 : vector<1x32xf32> to vector<128x32xf32>
    %60 = arith.mulf %55, %59 : vector<128x32xf32>
    %61 = arith.addf %43, %60 : vector<128x32xf32>
    %c1_20 = arith.constant 1 : index
    %c0_21 = arith.constant 0 : index
    %c0_22 = arith.constant 0 : index
    %62 = vector.load %arg5[%c1_20, %c0_21, %c0_22] : memref<3x32x32xf32, #tpu.memory_space<vmem>>, vector<1x32x32xf32>
    %63 = vector.shape_cast %62 : vector<1x32x32xf32> to vector<32x32xf32>
    %cst_23 = arith.constant dense<0.000000e+00> : vector<128x32xf32>
    %64 = tpu.matmul %55, %63, %cst_23 {dimension_numbers = #tpu.dot_dimension_numbers<[1], [0], [0], [1], [0, 0, 1, 1], [], []>} : vector<128x32xf32>, vector<32x32xf32>, vector<128x32xf32> -> vector<128x32xf32>
    %c1_24 = arith.constant 1 : index
    %c0_25 = arith.constant 0 : index
    %65 = vector.load %arg6[%c1_24, %c0_25] : memref<3x32xf32, #tpu.memory_space<vmem>>, vector<1x32xf32>
    %66 = vector.shape_cast %65 : vector<1x32xf32> to vector<32xf32>
    %67 = vector.shape_cast %66 : vector<32xf32> to vector<1x32xf32>
    %68 = vector.broadcast %67 : vector<1x32xf32> to vector<128x32xf32>
    %69 = arith.addf %64, %68 : vector<128x32xf32>
    %70 = vector.extract_strided_slice %37 {offsets = [0, 32], sizes = [128, 32], strides = [1, 1]} : vector<128x96xf32> to vector<128x32xf32>
    %71 = arith.addf %69, %70 : vector<128x32xf32>
    %72 = vector.extract_strided_slice %32 {offsets = [0, 64], sizes = [128, 32], strides = [1, 1]} : vector<128x128xf32> to vector<128x32xf32>
    %73 = arith.mulf %71, %72 : vector<128x32xf32>
    %c2 = arith.constant 2 : index
    %c0_26 = arith.constant 0 : index
    %74 = vector.load %arg9[%c2, %c0_26] : memref<4x32xf32, #tpu.memory_space<vmem>>, vector<1x32xf32>
    %75 = vector.shape_cast %74 : vector<1x32xf32> to vector<32xf32>
    %76 = vector.shape_cast %75 : vector<32xf32> to vector<1x32xf32>
    %77 = vector.broadcast %76 : vector<1x32xf32> to vector<128x32xf32>
    %78 = arith.mulf %73, %77 : vector<128x32xf32>
    %79 = arith.addf %61, %78 : vector<128x32xf32>
    %c2_27 = arith.constant 2 : index
    %c0_28 = arith.constant 0 : index
    %c0_29 = arith.constant 0 : index
    %80 = vector.load %arg5[%c2_27, %c0_28, %c0_29] : memref<3x32x32xf32, #tpu.memory_space<vmem>>, vector<1x32x32xf32>
    %81 = vector.shape_cast %80 : vector<1x32x32xf32> to vector<32x32xf32>
    %cst_30 = arith.constant dense<0.000000e+00> : vector<128x32xf32>
    %82 = tpu.matmul %73, %81, %cst_30 {dimension_numbers = #tpu.dot_dimension_numbers<[1], [0], [0], [1], [0, 0, 1, 1], [], []>} : vector<128x32xf32>, vector<32x32xf32>, vector<128x32xf32> -> vector<128x32xf32>
    %c2_31 = arith.constant 2 : index
    %c0_32 = arith.constant 0 : index
    %83 = vector.load %arg6[%c2_31, %c0_32] : memref<3x32xf32, #tpu.memory_space<vmem>>, vector<1x32xf32>
    %84 = vector.shape_cast %83 : vector<1x32xf32> to vector<32xf32>
    %85 = vector.shape_cast %84 : vector<32xf32> to vector<1x32xf32>
    %86 = vector.broadcast %85 : vector<1x32xf32> to vector<128x32xf32>
    %87 = arith.addf %82, %86 : vector<128x32xf32>
    %88 = vector.extract_strided_slice %37 {offsets = [0, 64], sizes = [128, 32], strides = [1, 1]} : vector<128x96xf32> to vector<128x32xf32>
    %89 = arith.addf %87, %88 : vector<128x32xf32>
    %90 = vector.extract_strided_slice %32 {offsets = [0, 96], sizes = [128, 32], strides = [1, 1]} : vector<128x128xf32> to vector<128x32xf32>
    %91 = arith.mulf %89, %90 : vector<128x32xf32>
    %c3 = arith.constant 3 : index
    %c0_33 = arith.constant 0 : index
    %92 = vector.load %arg9[%c3, %c0_33] : memref<4x32xf32, #tpu.memory_space<vmem>>, vector<1x32xf32>
    %93 = vector.shape_cast %92 : vector<1x32xf32> to vector<32xf32>
    %94 = vector.shape_cast %93 : vector<32xf32> to vector<1x32xf32>
    %95 = vector.broadcast %94 : vector<1x32xf32> to vector<128x32xf32>
    %96 = arith.mulf %91, %95 : vector<128x32xf32>
    %97 = arith.addf %79, %96 : vector<128x32xf32>
    %cst_34 = arith.constant dense<0.000000e+00> : vector<128xf32>
    %98 = vector.multi_reduction <add>, %97, %cst_34 [1] : vector<128x32xf32> to vector<128xf32>
    %99 = vector.shape_cast %98 : vector<128xf32> to vector<128x1xf32>
    %c0_35 = arith.constant 0 : index
    %c0_36 = arith.constant 0 : index
    %100 = vector.load %arg10[%c0_35, %c0_36] : memref<1x1xf32, #tpu.memory_space<vmem>>, vector<1x1xf32>
    %101 = vector.broadcast %100 : vector<1x1xf32> to vector<128x1xf32>
    %102 = arith.addf %99, %101 : vector<128x1xf32>
    %c0_37 = arith.constant 0 : index
    %c0_38 = arith.constant 0 : index
    %103 = vector.load %arg11[%c0_37, %c0_38] : memref<128x1xf32, #tpu.memory_space<vmem>>, vector<128x1xf32>
    tpu.vector_store %arg11[%c0_37, %c0_38], %102 {strides = array<i32>} : memref<128x1xf32, #tpu.memory_space<vmem>>, vector<128x1xf32>,
    return
  }
  func.func @transform_0(%arg0: i32) -> (i32, i32) {
    %c0_i32 = arith.constant 0 : i32
    %c0_i32_0 = arith.constant 0 : i32
    return %arg0, %c0_i32 : i32, i32
  }
  func.func @transform_1(%arg0: i32) -> (i32, i32) {
    %c0_i32 = arith.constant 0 : i32
    %c0_i32_0 = arith.constant 0 : i32
    return %arg0, %c0_i32 : i32, i32
  }
  func.func @transform_2(%arg0: i32) -> (i32, i32) {
    %c0_i32 = arith.constant 0 : i32
    %c0_i32_0 = arith.constant 0 : i32
    %c0_i32_1 = arith.constant 0 : i32
    return %c0_i32, %c0_i32_0 : i32, i32
  }
  func.func @transform_3(%arg0: i32) -> (i32, i32) {
    %c0_i32 = arith.constant 0 : i32
    %c0_i32_0 = arith.constant 0 : i32
    %c0_i32_1 = arith.constant 0 : i32
    return %c0_i32, %c0_i32_0 : i32, i32
  }
  func.func @transform_4(%arg0: i32) -> (i32, i32, i32) {
    %c0_i32 = arith.constant 0 : i32
    %c0_i32_0 = arith.constant 0 : i32
    %c0_i32_1 = arith.constant 0 : i32
    %c0_i32_2 = arith.constant 0 : i32
    return %c0_i32, %c0_i32_0, %c0_i32_1 : i32, i32, i32
  }
  func.func @transform_5(%arg0: i32) -> (i32, i32) {
    %c0_i32 = arith.constant 0 : i32
    %c0_i32_0 = arith.constant 0 : i32
    %c0_i32_1 = arith.constant 0 : i32
    return %c0_i32, %c0_i32_0 : i32, i32
  }
  func.func @transform_6(%arg0: i32) -> (i32, i32) {
    %c0_i32 = arith.constant 0 : i32
    %c0_i32_0 = arith.constant 0 : i32
    %c0_i32_1 = arith.constant 0 : i32
    return %c0_i32, %c0_i32_0 : i32, i32
  }
  func.func @transform_7(%arg0: i32) -> (i32, i32) {
    %c0_i32 = arith.constant 0 : i32
    %c0_i32_0 = arith.constant 0 : i32
    %c0_i32_1 = arith.constant 0 : i32
    return %c0_i32, %c0_i32_0 : i32, i32
  }
  func.func @transform_8(%arg0: i32) -> (i32, i32) {
    %c0_i32 = arith.constant 0 : i32
    %c0_i32_0 = arith.constant 0 : i32
    %c0_i32_1 = arith.constant 0 : i32
    return %c0_i32, %c0_i32_0 : i32, i32
  }
  func.func @transform_9(%arg0: i32) -> (i32, i32) {
    %c0_i32 = arith.constant 0 : i32
    %c0_i32_0 = arith.constant 0 : i32
    %c0_i32_1 = arith.constant 0 : i32
    return %c0_i32, %c0_i32_0 : i32, i32
  }
  func.func @transform_10(%arg0: i32) -> (i32, i32) {
    %c0_i32 = arith.constant 0 : i32
    %c0_i32_0 = arith.constant 0 : i32
    return %arg0, %c0_i32 : i32, i32
  }
}

</mosaic_0001>

<bundles_post_ra>
// kernel: tpu_custom_call.1
= control target key start
LH: loop header
LB: loop body
LE: loop exit
PB: predicated region body
PF: predicated region fallthrough
CT: control target
= control target key end

     0   :  { %v7741_v0 = vmov 1   ;;  %v7742_v1 = vmov 0   ;;  %v7743_v5 = vmov 2   ;;  %v151_v18 = vlaneseq  ;;  %s7751_s24 = smov 64   ;;  %s7752_s25 = smov 32   ;;  %s14343_s0 = inlined_call_operand.vmem [shape: f32[128,3], index: 0, kind: input, shape index: {}]   ;;  %s14344_s2 = inlined_call_operand.vmem [shape: f32[3,128], index: 2, kind: input, shape index: {}]   ;;  %s14345_s3 = inlined_call_operand.vmem [shape: f32[3,128], index: 3, kind: input, shape index: {}]   ;;  %s14346_s6 = inlined_call_operand.vmem [shape: f32[64,96], index: 6, kind: input, shape index: {}]   ;;  %s14347_s1 = inlined_call_operand.vmem [shape: f32[128,64], index: 1, kind: input, shape index: {}]   ;;  %s14348_s4 = inlined_call_operand.vmem [shape: f32[3,32,32], index: 4, kind: input, shape index: {}]   ;;  %s14349_s7 = inlined_call_operand.vmem [shape: f32[1,96], index: 7, kind: input, shape index: {}]   ;;  %s14350_s5 = inlined_call_operand.vmem [shape: f32[3,32], index: 5, kind: input, shape index: {}]   ;;  %s14351_s8 = inlined_call_operand.vmem [shape: f32[4,32], index: 8, kind: input, shape index: {}]   ;;  %s14352_s9 = inlined_call_operand.<no memory space> [shape: f32[1,1], index: 9, kind: input, shape index: {}]   ;;  %s14353_s10 = inlined_call_operand.vmem [shape: f32[128,1], index: 10, kind: output, shape index: {}]  }
   0x1   :  { %7522 = vset.pattern.permute.xlu0 %v7741_v0  ;;  %7524 = vset.pattern.permute.xlu1 %v7742_v1  ;;  %v38_v2 = vld [vmem:[%s14343_s0 + $0x8] sm:$0xff]  ;;  %v37_v3 = vld [vmem:[%s14343_s0] sm:$0xff]  ;;  %v40_v4 = vld [vmem:[%s14343_s0 + $0x18] sm:$0xff]  ;;  %v14369_v54 = vmov 683565275  }
   0x2   :  { %78 = vperm.xlu1 %7524, %v38_v2   ;;  %1856 = vperm.xlu0 %7522, %v37_v3   ;;  %v42_v6 = vld [vmem:[%s14343_s0 + $0x28] sm:$0xff]  ;;  %v39_v7 = vld [vmem:[%s14343_s0 + $0x10] sm:$0xff]  ;;  %v44_v8 = vld [vmem:[%s14343_s0 + $0x38] sm:$0xff]  ;;  %v7879_v19 = vshrl.u32 %v151_v18, 7  ;;  %v14358_v56 = vmov 2475754826  }
   0x3   :  { %v46_v9 = vld [vmem:[%s14343_s0 + $0x48] sm:$0xff]  ;;  %v48_v10 = vld [vmem:[%s14343_s0 + $0x58] sm:$0xff]  ;;  %v41_v13 = vld [vmem:[%s14343_s0 + $0x20] sm:$0xff]  ;;  %v14356_v60 = vmov 2131351028  }
   0x4   :  { %v50_v11 = vld [vmem:[%s14343_s0 + $0x68] sm:$0xff]  ;;  %v7846_v12 = vld [vmem:[%s14343_s0 + $0x78] sm:$0xff]  ;;  %v43_v14 = vld [vmem:[%s14343_s0 + $0x30] sm:$0xff]  ;;  %v153_v20 = vsub.s32 0, %v7879_v19  ;;  %v1921_v21 = vsub.s32 1, %v7879_v19 }
   0x5   :  { %v45_v15 = vld [vmem:[%s14343_s0 + $0x40] sm:$0xff]  ;;  %v47_v16 = vld [vmem:[%s14343_s0 + $0x50] sm:$0xff]  ;;  %v14362_v63 = vmov 2102212464  }
   0x6   :  { %7525 = vset.pattern.permute.xlu1 %v7741_v0  ;;  %7523 = vset.pattern.permute.xlu0 %v7742_v1  ;;  %v49_v17 = vld [vmem:[%s14343_s0 + $0x60] sm:$0xff]  ;;  %v51_v34 = vld [vmem:[%s14343_s0 + $0x70] sm:$0xff] }
   0x7   :  { %1860 = vperm.xlu1 %7525, %v38_v2   ;;  %73 = vperm.xlu0 %7523, %v37_v3   ;;  %v7887_v22 = vld [vmem:[%s14344_s2] sm:$0x7] }
   0x8   :  { %v7892_v23 = vld [vmem:[%s14345_s3] sm:$0x7]  ;;  %v7895_v24 = vrot.slane %v7887_v22, %v153_v20  ;;  %v7898_v25 = vrot.slane %v7887_v22, %v1921_v21 }
   0x9   :  { %v7901_v26 = vrot.slane %v7892_v23, %v153_v20  ;;  %v7904_v27 = vrot.slane %v7892_v23, %v1921_v21 }
   0xa   :  { %14626 = vst [vmem:[#allocation3_spill] sm:$0xff] %v7895_v24  ;;  %14627 = vst [vmem:[#allocation4_spill] sm:$0xff] %v7898_v25 }
   0xb   :  { %7526 = vset.pattern.permute.xlu1 %v7743_v5  ;;  %88 = vperm.xlu0 %7523, %v40_v4   ;;  %14628 = vst [vmem:[#allocation5_spill] sm:$0xff] %v7901_v26  ;;  %14629 = vst [vmem:[#allocation6_spill] sm:$0xff] %v7904_v27 }
   0xc   :  { %3640 = vperm.xlu1 %7526, %v37_v3  }
   0xf   :  { %98 = vperm.xlu0 %7523, %v42_v6  }
  0x10   :  { %7527 = vset.pattern.permute.xlu1 %v7742_v1 }
  0x11   :  { %83 = vperm.xlu1 %7527, %v39_v7  }
  0x13   :  { %108 = vperm.xlu0 %7523, %v44_v8  }
  0x15   :  { %7528 = vset.pattern.permute.xlu1 %v7741_v0 }
  0x16   :  { %1864 = vperm.xlu1 %7528, %v39_v7  }
  0x17   :  { %118 = vperm.xlu0 %7523, %v46_v9  }
  0x1a   :  { %1868 = vperm.xlu1 %7528, %v40_v4  }
  0x1b   :  { %128 = vperm.xlu0 %7523, %v48_v10  }
  0x1e   :  { %7529 = vset.pattern.permute.xlu1 %v7743_v5 }
  0x1f   :  { %3648 = vperm.xlu1 %7529, %v39_v7   ;;  %138 = vperm.xlu0 %7523, %v50_v11  }
  0x23   :  { %7530 = vset.pattern.permute.xlu1 %v7742_v1  ;;  %148 = vperm.xlu0 %7523, %v7846_v12  }
  0x24   :  { %93 = vperm.xlu1 %7530, %v41_v13  }
  0x27   :  { %7547 = vset.pattern.permute.xlu0 %v7743_v5 }
  0x28   :  { %7531 = vset.pattern.permute.xlu1 %v7741_v0  ;;  %3644 = vperm.xlu0 %7547, %v38_v2   ;;  %v14364_v2 = vmov 920167782  }
  0x29   :  { %1872 = vperm.xlu1 %7531, %v41_v13  }
  0x2c   :  { %3652 = vperm.xlu0 %7547, %v40_v4  }
  0x2d   :  { %1876 = vperm.xlu1 %7531, %v42_v6  }
  0x30   :  { %3660 = vperm.xlu0 %7547, %v42_v6   ;;  %v14360_v6 = vmov 1326507024  }
  0x31   :  { %7532 = vset.pattern.permute.xlu1 %v7743_v5 }
  0x32   :  { %3656 = vperm.xlu1 %7532, %v41_v13  }
  0x34   :  { %3668 = vperm.xlu0 %7547, %v44_v8  }
  0x36   :  { %7533 = vset.pattern.permute.xlu1 %v7742_v1 }
  0x37   :  { %103 = vperm.xlu1 %7533, %v43_v14  }
  0x38   :  { %3676 = vperm.xlu0 %7547, %v46_v9  }
  0x3b   :  { %7534 = vset.pattern.permute.xlu1 %v7741_v0 }
  0x3c   :  { %1880 = vperm.xlu1 %7534, %v43_v14   ;;  %3684 = vperm.xlu0 %7547, %v48_v10  }
  0x40   :  { %1884 = vperm.xlu1 %7534, %v44_v8   ;;  %3692 = vperm.xlu0 %7547, %v50_v11  }
  0x44   :  { %7535 = vset.pattern.permute.xlu1 %v7743_v5  ;;  %3700 = vperm.xlu0 %7547, %v7846_v12  }
  0x45   :  { %3664 = vperm.xlu1 %7535, %v43_v14  }
  0x49   :  { %7536 = vset.pattern.permute.xlu1 %v7742_v1 }
  0x4a   :  { %113 = vperm.xlu1 %7536, %v45_v15  }
  0x4e   :  { %7537 = vset.pattern.permute.xlu1 %v7741_v0 }
  0x4f   :  { %1888 = vperm.xlu1 %7537, %v45_v15  }
  0x53   :  { %1892 = vperm.xlu1 %7537, %v46_v9  }
  0x57   :  { %7538 = vset.pattern.permute.xlu1 %v7743_v5 }
  0x58   :  { %3672 = vperm.xlu1 %7538, %v45_v15  }
  0x5c   :  { %7539 = vset.pattern.permute.xlu1 %v7742_v1 }
  0x5d   :  { %123 = vperm.xlu1 %7539, %v47_v16  }
  0x61   :  { %7540 = vset.pattern.permute.xlu1 %v7741_v0 }
  0x62   :  { %1896 = vperm.xlu1 %7540, %v47_v16  }
  0x66   :  { %1900 = vperm.xlu1 %7540, %v48_v10  }
  0x6a   :  { %7541 = vset.pattern.permute.xlu1 %v7743_v5 }
  0x6b   :  { %3680 = vperm.xlu1 %7541, %v47_v16  }
  0x6f   :  { %7542 = vset.pattern.permute.xlu1 %v7742_v1 }
  0x70   :  { %133 = vperm.xlu1 %7542, %v49_v17  }
  0x74   :  { %7543 = vset.pattern.permute.xlu1 %v7741_v0 }
  0x75   :  { %1904 = vperm.xlu1 %7543, %v49_v17  }
  0x79   :  { %1908 = vperm.xlu1 %7543, %v50_v11  }
  0x7d   :  { %v79_v28 = vpop.permute.xlu1 %78  ;;  %7544 = vset.pattern.permute.xlu1 %v7743_v5  ;;  %v1857_v29 = vpop.permute.xlu0 %1856 }
  0x7e   :  { %v156_v30 = vmul.f32 %v7895_v24, %v79_v28  ;;  %v1923_v31 = vmul.f32 %v7898_v25, %v1857_v29  ;;  %3688 = vperm.xlu1 %7544, %v49_v17  }
  0x80   :  { %v7910_v32 = vadd.f32 %v7901_v26, %v156_v30  ;;  %v7913_v33 = vadd.f32 %v7904_v27, %v1923_v31 }
  0x82   :  { %14630 = vst [vmem:[#allocation7_spill] sm:$0xff] %v7910_v32  ;;  %14631 = vst [vmem:[#allocation8_spill] sm:$0xff] %v7913_v33  ;;  %v298_v35 = vand.u32 2139095040, %v7910_v32  ;;  %7545 = vset.pattern.permute.xlu1 %v7742_v1  ;;  %v1962_v36 = vand.u32 2139095040, %v7913_v33  ;;  %v1861_v37 = vpop.permute.xlu1 %1860  ;;  %v295_v40 = vand.u32 2147483647, %v7910_v32 }
  0x83   :  { %143 = vperm.xlu1 %7545, %v51_v34   ;;  %v1924_v42 = vmul.f32 %v7898_v25, %v1861_v37 }
  0x84   :  { %v299_v38 = vshrl.u32 %v298_v35, 23  ;;  %v1963_v39 = vshrl.u32 %v1962_v36, 23  ;;  %v302_v46 = vand.u32 8388607, %v295_v40  ;;  %v1959_v35 = vand.u32 2147483647, %v7913_v33 }
  0x85   :  { %v7927_v47 = vadd.f32 %v7904_v27, %v1924_v42 }
  0x86   :  { %v6821_v41 = vadd.s32 4294967169, %v299_v38  ;;  %v6881_v43 = vadd.s32 4294967169, %v1963_v39  ;;  %v303_v50 = vor.u32 8388608, %v302_v46 }
  0x87   :  { %7546 = vset.pattern.permute.xlu1 %v7741_v0  ;;  %14632 = vst [vmem:[#allocation9_spill] sm:$0xff] %v7927_v47  ;;  %v2066_v52 = vand.u32 2139095040, %v7927_v47 }
  0x88   :  { %v305_v44 = vadd.s32 1, %v6821_v41  ;;  %1912 = vperm.xlu1 %7546, %v51_v34   ;;  %v1969_v45 = vadd.s32 1, %v6881_v43  ;;  %v343_v18 = vshll.u32 %v303_v50, 8 }
  0x89   :  { %v2067_v15 = vshrl.u32 %v2066_v52, 23 }
  0x8a   :  { %vm306_vm0 = vcmp.gt.s32.totalorder %v305_v44, 0  ;;  %vm1970_vm1 = vcmp.gt.s32.totalorder %v1969_v45, 0 }
  0x8b   :  { %v307_v48 = vsel %vm306_vm0, %v305_v44, 0  ;;  %v1971_v58 = vsel %vm1970_vm1, %v1969_v45, 0  ;;  %v6885_v36 = vadd.s32 4294967169, %v2067_v15 }
  0x8c   :  { %v309_v49 = vand.u32 31, %v307_v48  ;;  %1916 = vperm.xlu1 %7546, %v7846_v12   ;;  %v7931_v53 = vshrl.u32 %v307_v48, 5  ;;  %v1973_v11 = vand.u32 31, %v1971_v58  ;;  %v7974_v39 = vshrl.u32 %v1971_v58, 5 }
  0x8e   :  { %v310_v51 = vsub.s32 32, %v309_v49  ;;  %v312_v55 = vshll.u32 %v14369_v54, %v309_v49  ;;  %v315_v57 = vshll.u32 %v14358_v56, %v309_v49  ;;  %v318_v62 = vshll.u32 %v14356_v60, %v309_v49 }
  0x8f   :  { %v321_v1 = vshll.u32 %v14362_v63, %v309_v49  ;;  %v324_v4 = vshll.u32 %v14364_v2, %v309_v49  ;;  %vm327_vm2 = vcmp.lt.s32.totalorder %v7931_v53, 1  ;;  %vm330_vm3 = vcmp.lt.s32.totalorder %v7931_v53, 4 }
  0x90   :  { %v313_v59 = vshrl.u32 %v14358_v56, %v310_v51  ;;  %v316_v61 = vshrl.u32 %v14356_v60, %v310_v51  ;;  %v319_v0 = vshrl.u32 %v14362_v63, %v310_v51  ;;  %7548 = vset.pattern.permute.xlu1 %v7743_v5  ;;  %v322_v3 = vshrl.u32 %v14364_v2, %v310_v51 }
  0x91   :  { %v325_v7 = vshrl.u32 %v14360_v6, %v310_v51  ;;  %3696 = vperm.xlu1 %7548, %v51_v34   ;;  %vm329_vm4 = vcmp.lt.s32.totalorder %v7931_v53, 3  ;;  %vm328_vm5 = vcmp.lt.s32.totalorder %v7931_v53, 2  ;;  %v7960_v28 = vsub.s32 32, %v1973_v11 }
  0x92   :  { %v314_v8 = vor.u32 %v313_v59, %v312_v55  ;;  %v317_v9 = vor.u32 %v316_v61, %v315_v57  ;;  %v320_v10 = vor.u32 %v319_v0, %v318_v62  ;;  %v323_v12 = vor.u32 %v322_v3, %v321_v1 }
  0x93   :  { %v326_v13 = vor.u32 %v325_v7, %v324_v4  ;;  %v1976_v41 = vshll.u32 %v14369_v54, %v1973_v11  ;;  %v1977_v42 = vshrl.u32 %v14358_v56, %v7960_v28  ;;  %v1979_v43 = vshll.u32 %v14358_v56, %v1973_v11 }
  0x94   :  { %v335_v5 = vsel %vm327_vm2, %v314_v8, %v317_v9  ;;  %v339_v14 = vsel %vm327_vm2, %v317_v9, %v320_v10  ;;  %v336_v16 = vsel %vm330_vm3, %v323_v12, 920167782  ;;  %v1985_v44 = vshll.u32 %v14362_v63, %v1973_v11 }
  0x95   :  { %v340_v17 = vsel %vm330_vm3, %v326_v13, 1326507024  ;;  %v337_v20 = vsel %vm329_vm4, %v320_v10, %v336_v16  ;;  %v1986_v45 = vshrl.u32 %v14364_v2, %v7960_v28  ;;  %v332_v46 = vsel %vm330_vm3, %v320_v10, 2102212464 }
  0x96   :  { %v341_v21 = vsel %vm329_vm4, %v323_v12, %v340_v17  ;;  %v338_v29 = vsel %vm328_vm5, %v335_v5, %v337_v20  ;;  %v1980_v48 = vshrl.u32 %v14356_v60, %v7960_v28  ;;  %v1982_v49 = vshll.u32 %v14356_v60, %v1973_v11 }
  0x97   :  { %v342_v30 = vsel %vm328_vm5, %v339_v14, %v341_v21  ;;  %v7966_v31 = vmul.u32.u64.low %v343_v18, %v338_v29  ;;  %v7967_v34 = vmul.u32.u64.high %v343_v18, %v338_v29, %v7966_v31  ;;  %v1983_v50 = vshrl.u32 %v14362_v63, %v7960_v28 }
  0x98   :  { %v7971_v37 = vmul.u32.u64.low %v343_v18, %v342_v30  ;;  %v7972_v38 = vmul.u32.u64.high %v343_v18, %v342_v30, %v7971_v37  ;;  %v311_v52 = vshrl.u32 %v14369_v54, %v310_v51  ;;  %v1987_v55 = vor.u32 %v1986_v45, %v1985_v44 }
  0x99   :  { %v1988_v57 = vshll.u32 %v14364_v2, %v1973_v11  ;;  %v1989_v58 = vshrl.u32 %v14360_v6, %v7960_v28  ;;  %v1966_v59 = vand.u32 8388607, %v1959_v35  ;;  %vm1994_vm6 = vcmp.lt.s32.totalorder %v7974_v39, 4  ;;  %v74_v11 = vpop.permute.xlu0 %73 }
  0x9a   :  { %v331_v61 = vsel %vm327_vm2, %v311_v52, %v314_v8  ;;  %v333_v62 = vsel %vm329_vm4, %v317_v9, %v332_v46  ;;  %v8001_v0 = vor.u32 %v1977_v42, %v1976_v41  ;;  %v8003_v51 = vor.u32 %v1980_v48, %v1979_v43 }
  0x9b   :  { %v1984_v1 = vor.u32 %v1983_v50, %v1982_v49  ;;  %vm1991_vm7 = vcmp.lt.s32.totalorder %v7974_v39, 1  ;;  %vm1993_vm8 = vcmp.lt.s32.totalorder %v7974_v39, 3  ;;  %v353_v3 = vadd.s32 1, %v7967_v34 }
  0x9c   :  { %v1990_v4 = vor.u32 %v1989_v58, %v1988_v57  ;;  %v2000_v7 = vsel %vm1994_vm6, %v1987_v55, 920167782  ;;  %v2073_v10 = vadd.s32 1, %v6885_v36  ;;  %vm352_vm9 = vc.u32 %v7972_v38, %v7966_v31 }
  0x9d   :  { %v1967_v8 = vor.u32 8388608, %v1966_v59  ;;  %v334_v9 = vsel %vm328_vm5, %v331_v61, %v333_v62  ;;  %vm1992_vm11 = vcmp.lt.s32.totalorder %v7974_v39, 2  ;;  %v1999_v12 = vsel %vm1991_vm7, %v8001_v0, %v8003_v51 }
  0x9e   :  { %vm2074_vm10 = vcmp.gt.s32.totalorder %v2073_v10, 0  ;;  %v2001_v13 = vsel %vm1993_vm8, %v1984_v1, %v2000_v7  ;;  %v354_v14 = vsel %vm352_vm9, %v353_v3, %v7967_v34  ;;  %v2004_v15 = vsel %vm1994_vm6, %v1990_v4, 1326507024 }
  0x9f   :  { %v2075_v5 = vsel %vm2074_vm10, %v2073_v10, 0  ;;  %v350_v16 = vmul.u32 %v343_v18, %v334_v9  ;;  %v8024_v17 = vshll.u32 %v1967_v8, 8  ;;  %v14355_v20 = vand.u32 2147483647, %v7927_v47 }
  0xa0   :  { %v2077_v53 = vand.u32 31, %v2075_v5  ;;  %v155_v21 = vmul.f32 %v7895_v24, %v74_v11  ;;  %v2002_v29 = vsel %vm1992_vm11, %v1999_v12, %v2001_v13  ;;  %v2003_v34 = vsel %vm1991_vm7, %v8003_v51, %v1984_v1 }
  0xa1   :  { %v355_v36 = vadd.s32 %v354_v14, %v350_v16  ;;  %v2005_v37 = vsel %vm1993_vm8, %v1987_v55, %v2004_v15  ;;  %v8038_v18 = vmul.u32.u64.low %v8024_v17, %v2002_v29  ;;  %v8039_v41 = vmul.u32.u64.high %v8024_v17, %v2002_v29, %v8038_v18 }
  0xa2   :  { %v8030_v30 = vsub.s32 32, %v2077_v53  ;;  %v2070_v42 = vand.u32 8388607, %v14355_v20  ;;  %v8045_v43 = vadd.f32 %v7901_v26, %v155_v21  ;;  %v2006_v44 = vsel %vm1992_vm11, %v2003_v34, %v2005_v37 }
  0xa3   :  { %v356_v49 = vadd.s32 536870912, %v355_v36  ;;  %v8055_v50 = vshrl.u32 %v2075_v5, 5  ;;  %v2089_v52 = vshll.u32 %v14362_v63, %v2077_v53  ;;  %v2080_v57 = vshll.u32 %v14369_v54, %v2077_v53 }
  0xa4   :  { %14633 = vst [vmem:[#allocation10_spill] sm:$0xff] %v8045_v43  ;;  %v2081_v45 = vshrl.u32 %v14358_v56, %v8030_v30  ;;  %v2084_v46 = vshrl.u32 %v14356_v60, %v8030_v30  ;;  %v2087_v48 = vshrl.u32 %v14362_v63, %v8030_v30  ;;  %v2090_v55 = vshrl.u32 %v14364_v2, %v8030_v30 }
  0xa5   :  { %v2083_v58 = vshll.u32 %v14358_v56, %v2077_v53  ;;  %v2086_v59 = vshll.u32 %v14356_v60, %v2077_v53  ;;  %v2093_v61 = vshrl.u32 %v14360_v6, %v8030_v30  ;;  %v1975_v62 = vshrl.u32 %v14369_v54, %v7960_v28 }
  0xa6   :  { %v8068_v3 = vmul.u32.u64.low %v8024_v17, %v2006_v44  ;;  %v8069_v4 = vmul.u32.u64.high %v8024_v17, %v2006_v44, %v8068_v3  ;;  %v2091_v7 = vor.u32 %v2090_v55, %v2089_v52  ;;  %v2082_v10 = vor.u32 %v2081_v45, %v2080_v57 }
  0xa7   :  { %v2085_v8 = vor.u32 %v2084_v46, %v2083_v58  ;;  %v2088_v9 = vor.u32 %v2087_v48, %v2086_v59  ;;  %v2092_v11 = vshll.u32 %v14364_v2, %v2077_v53  ;;  %v8072_v12 = vshrl.u32 %v356_v49, 30 }
  0xa8   :  { %v1996_v13 = vsel %vm1994_vm6, %v1984_v1, 2102212464  ;;  %vm2098_vm12 = vcmp.lt.s32.totalorder %v8055_v50, 4  ;;  %v2071_v14 = vor.u32 8388608, %v2070_v42  ;;  %vm2095_vm13 = vcmp.lt.s32.totalorder %v8055_v50, 1 }
  0xa9   :  { %v2094_v5 = vor.u32 %v2093_v61, %v2092_v11  ;;  %v2104_v28 = vsel %vm2098_vm12, %v2091_v7, 920167782  ;;  %vm2097_vm14 = vcmp.lt.s32.totalorder %v8055_v50, 3  ;;  %v194_v15 = vand.u32 2139095040, %v8045_v43 }
  0xaa   :  { %v1995_v53 = vsel %vm1991_vm7, %v1975_v62, %v8001_v0  ;;  %v1997_v1 = vsel %vm1993_vm8, %v8003_v51, %v1996_v13  ;;  %v2103_v16 = vsel %vm2095_vm13, %v2082_v10, %v2085_v8  ;;  %v2105_v21 = vsel %vm2097_vm14, %v2088_v9, %v2104_v28 }
  0xab   :  { %v358_v29 = vshll.u32 %v8072_v12, 30  ;;  %vm2096_vm15 = vcmp.lt.s32.totalorder %v8055_v50, 2  ;;  %v2107_v34 = vsel %vm2095_vm13, %v2085_v8, %v2088_v9  ;;  %v2108_v0 = vsel %vm2098_vm12, %v2094_v5, 1326507024  ;;  %v89_v5 = vpop.permute.xlu0 %88 }
  0xac   :  { %v1998_v37 = vsel %vm1992_vm11, %v1995_v53, %v1997_v1  ;;  %v2017_v51 = vadd.s32 1, %v8039_v41  ;;  %v2106_v42 = vsel %vm2096_vm15, %v2103_v16, %v2105_v21  ;;  %v2109_v44 = vsel %vm2097_vm14, %v2091_v7, %v2108_v0 }
  0xad   :  { %vm2016_vm0 = vc.u32 %v8069_v4, %v8038_v18  ;;  %v2110_v45 = vsel %vm2096_vm15, %v2107_v34, %v2109_v44  ;;  %v2111_v46 = vshll.u32 %v2071_v14, 8  ;;  %v195_v48 = vshrl.u32 %v194_v15, 23 }
  0xae   :  { %v8109_v49 = vsub.s32 %v355_v36, %v358_v29  ;;  %v2014_v39 = vmul.u32 %v8024_v17, %v1998_v37  ;;  %v2018_v57 = vsel %vm2016_vm0, %v2017_v51, %v8039_v41  ;;  %v2100_v7 = vsel %vm2098_vm12, %v2088_v9, 2102212464 }
  0xaf   :  { %v8112_v52 = vmul.u32.u64.low %v2111_v46, %v2106_v42  ;;  %v8113_v55 = vmul.u32.u64.high %v2111_v46, %v2106_v42, %v8112_v52  ;;  %v8117_v58 = vmul.u32.u64.low %v2111_v46, %v2110_v45  ;;  %v8118_v59 = vmul.u32.u64.high %v2111_v46, %v2110_v45, %v8117_v58 }
  0xb0   :  { %v6817_v61 = vadd.s32 4294967169, %v195_v48  ;;  %v361_v62 = vsub.s32 0, %v8109_v49  ;;  %v2019_v3 = vadd.s32 %v2018_v57, %v2014_v39  ;;  %v2079_v36 = vshrl.u32 %v14369_v54, %v8030_v30 }
  0xb1   :  { %v2101_v41 = vsel %vm2097_vm14, %v2085_v8, %v2100_v7  ;;  %v2121_v14 = vadd.s32 1, %v8113_v55  ;;  %vm2120_vm1 = vc.u32 %v8118_v59, %v8112_v52  ;;  %v158_v30 = vmul.f32 %v7895_v24, %v89_v5 }
  0xb2   :  { %v201_v17 = vadd.s32 1, %v6817_v61  ;;  %v6822_v11 = vmin.u32 %v361_v62, %v8109_v49  ;;  %v2099_v13 = vsel %vm2095_vm13, %v2079_v36, %v2082_v10  ;;  %v2020_v28 = vadd.s32 536870912, %v2019_v3 }
  0xb3   :  { %v2102_v9 = vsel %vm2096_vm15, %v2099_v13, %v2101_v41  ;;  %v2122_v10 = vsel %vm2120_vm1, %v2121_v14, %v8113_v55  ;;  %v8140_v16 = vadd.f32 %v7901_v26, %v158_v30  ;;  %v3705_v21 = vsub.s32 2, %v7879_v19  ;;  %v3641_v19 = vpop.permute.xlu1 %3640 }
  0xb4   :  { %vm202_vm2 = vcmp.gt.s32.totalorder %v201_v17, 0  ;;  %v363_v15 = vclz %v6822_v11  ;;  %v8136_v53 = vshrl.u32 %v2020_v28, 30  ;;  %v2118_v1 = vmul.u32 %v2111_v46, %v2102_v9 }
  0xb5   :  { %v203_v8 = vsel %vm202_vm2, %v201_v17, 0  ;;  %14634 = vst [vmem:[#allocation11_spill] sm:$0xff] %v8140_v16  ;;  %v14354_v50 = vand.u32 2147483647, %v8045_v43  ;;  %v506_v51 = vand.u32 2139095040, %v8140_v16  ;;  %v8147_v42 = vrot.slane %v7887_v22, %v3705_v21 }
  0xb6   :  { %v6823_v29 = vadd.s32 4294967294, %v363_v15  ;;  %v2123_v34 = vadd.s32 %v2122_v10, %v2118_v1  ;;  %v2022_v0 = vshll.u32 %v8136_v53, 30  ;;  %v205_v37 = vand.u32 31, %v203_v8 }
  0xb7   :  { %14635 = vst [vmem:[#allocation12_spill] sm:$0xff] %v8147_v42  ;;  %v381_v44 = vsub.s32 4, %v8072_v12  ;;  %v8152_v46 = vand.u32 8388607, %v14354_v50  ;;  %vm8160_vm4 = vcmp.le.f32.partialorder %v295_v40, 0.7853982  ;;  %v8166_v22 = vrot.slane %v7892_v23, %v3705_v21 }
  0xb8   :  { %vm6824_vm3 = vcmp.lt.s32.totalorder %v6823_v29, 0  ;;  %v2124_v45 = vadd.s32 536870912, %v2123_v34  ;;  %v8154_v48 = vsub.s32 %v2019_v3, %v2022_v0  ;;  %v8156_v39 = vsub.s32 32, %v205_v37 }
  0xb9   :  { %vm297_vm5 = vcmp.lt.s32.totalorder %v7910_v32, 0  ;;  %14638 = vst [vmem:[#allocation13_spill] sm:$0xff] %v8166_v22  ;;  %v351_v57 = vadd.s32 %v7966_v31, %v7972_v38  ;;  %v8170_v58 = vsel %vm6824_vm3, 0, %v6823_v29  ;;  %v507_v61 = vshrl.u32 %v506_v51, 23 }
  0xba   :  { %v3707_v62 = vmul.f32 %v8147_v42, %v3641_v19  ;;  %v8176_v40 = vsel %vm297_vm5, %v381_v44, %v8072_v12  ;;  %v8180_v3 = vadd.s32 %v8038_v18, %v8069_v4  ;;  %v8182_v7 = vshrl.u32 %v2124_v45, 30 }
  0xbb   :  { %v199_v23 = vor.u32 8388608, %v8152_v46  ;;  %v2025_v31 = vsub.s32 0, %v8154_v48  ;;  %v217_v38 = vshll.u32 %v14362_v63, %v205_v37  ;;  %v218_v36 = vshrl.u32 %v14364_v2, %v8156_v39 }
  0xbc   :  { %v6829_v17 = vadd.s32 4294967169, %v507_v61  ;;  %v367_v11 = vsub.s32 32, %v8170_v58  ;;  %v8190_v12 = vshrl.u32 %v203_v8, 5  ;;  %v220_v13 = vshll.u32 %v14364_v2, %v205_v37 }
  0xbd   :  { %v221_v18 = vshrl.u32 %v14360_v6, %v8156_v39  ;;  %v208_v4 = vshll.u32 %v14369_v54, %v205_v37  ;;  %v211_v41 = vshll.u32 %v14358_v56, %v205_v37  ;;  %v214_v5 = vshll.u32 %v14356_v60, %v205_v37  ;;  %v5430_v37 = vld [vmem:[%s14346_s6 + $0x38] sm:$0xff] }
  0xbe   :  { %v513_v28 = vadd.s32 1, %v6829_v17  ;;  %v2126_v14 = vshll.u32 %v8182_v7, 30  ;;  %v209_v9 = vshrl.u32 %v14358_v56, %v8156_v39  ;;  %v212_v30 = vshrl.u32 %v14356_v60, %v8156_v39  ;;  %7174 = vmatprep.subr.mxu0 %v5430_v37 }
  0xbf   :  { %v215_v15 = vshrl.u32 %v14362_v63, %v8156_v39  ;;  %v371_v10 = vsub.s32 4294967266, %v8170_v58  ;;  %v384_v1 = vsel %vm8160_vm4, 0, %v8176_v40  ;;  %v219_v8 = vor.u32 %v218_v36, %v217_v38  ;;  %7175 = vmatpush3.msra.mxu0 %v5430_v37 }
  0xc0   :  { %vm514_vm6 = vcmp.gt.s32.totalorder %v513_v28, 0  ;;  %v6882_v21 = vmin.u32 %v2025_v31, %v8154_v48  ;;  %v222_v29 = vor.u32 %v221_v18, %v220_v13  ;;  %vm226_vm7 = vcmp.lt.s32.totalorder %v8190_v12, 4 }
  0xc1   :  { %v515_v0 = vsel %vm514_vm6, %v513_v28, 0  ;;  %v8214_v51 = vshrl.u32 %v351_v57, %v367_v11  ;;  %v14367_v44 = vand.u32 2147483647, %v8140_v16  ;;  %v8218_v19 = vadd.f32 %v8166_v22, %v3707_v62 }
  0xc2   :  { %v517_v45 = vand.u32 31, %v515_v0  ;;  %v8220_v61 = vsub.s32 %v2123_v34, %v2126_v14  ;;  %v8222_v31 = vor.u32 %v209_v9, %v208_v4  ;;  %v8224_v38 = vor.u32 %v212_v30, %v211_v41 }
  0xc3   :  { %14639 = vst [vmem:[#allocation14_spill] sm:$0xff] %v8218_v19  ;;  %v216_v36 = vor.u32 %v215_v15, %v214_v5  ;;  %vm223_vm8 = vcmp.lt.s32.totalorder %v8190_v12, 1  ;;  %vm225_vm9 = vcmp.lt.s32.totalorder %v8190_v12, 3  ;;  %v232_v57 = vsel %vm226_vm7, %v219_v8, 920167782 }
  0xc4   :  { %v8230_v17 = vsub.s32 32, %v517_v45  ;;  %v236_v62 = vsel %vm226_vm7, %v222_v29, 1326507024  ;;  %v8234_v34 = vshrl.u32 %v515_v0, 5  ;;  %v520_v11 = vshll.u32 %v14369_v54, %v517_v45 }
  0xc5   :  { %v529_v13 = vshll.u32 %v14362_v63, %v517_v45  ;;  %v523_v4 = vshll.u32 %v14358_v56, %v517_v45  ;;  %v526_v41 = vshll.u32 %v14356_v60, %v517_v45  ;;  %v532_v5 = vshll.u32 %v14364_v2, %v517_v45 }
  0xc6   :  { %v521_v18 = vshrl.u32 %v14358_v56, %v8230_v17  ;;  %v524_v28 = vshrl.u32 %v14356_v60, %v8230_v17  ;;  %v527_v14 = vshrl.u32 %v14362_v63, %v8230_v17  ;;  %v530_v9 = vshrl.u32 %v14364_v2, %v8230_v17 }
  0xc7   :  { %v533_v30 = vshrl.u32 %v14360_v6, %v8230_v17  ;;  %v372_v15 = vadd.s32 127, %v371_v10  ;;  %v2027_v29 = vclz %v6882_v21  ;;  %v2129_v0 = vsub.s32 0, %v8220_v61 }
  0xc8   :  { %vm224_vm10 = vcmp.lt.s32.totalorder %v8190_v12, 2  ;;  %v231_v37 = vsel %vm223_vm8, %v8222_v31, %v8224_v38  ;;  %v510_v45 = vand.u32 8388607, %v14367_v44  ;;  %v531_v50 = vor.u32 %v530_v9, %v529_v13  ;;  %v5429_v12 = vld [vmem:[%s14346_s6 + $0x30] sm:$0xff] }
  0xc9   :  { %v3746_v20 = vand.u32 2139095040, %v8218_v19  ;;  %v233_v60 = vsel %vm225_vm9, %v216_v36, %v232_v57  ;;  %v235_v10 = vsel %vm223_vm8, %v8224_v38, %v216_v36  ;;  %v237_v21 = vsel %vm225_vm9, %v219_v8, %v236_v62  ;;  %7176 = vmatprep.subr.mxu0 %v5429_v12 }
  0xca   :  { %v8267_v56 = vor.u32 %v521_v18, %v520_v11  ;;  %v8269_v6 = vor.u32 %v524_v28, %v523_v4  ;;  %v528_v63 = vor.u32 %v527_v14, %v526_v41  ;;  %v534_v2 = vor.u32 %v533_v30, %v532_v5  ;;  %7177 = vmatpush3.msra.mxu0 %v5429_v12 }
  0xcb   :  { %vm538_vm11 = vcmp.lt.s32.totalorder %v8234_v34, 4  ;;  %v373_v13 = vshll.u32 %v372_v15, 23  ;;  %v8274_v9 = vshll.u32 %v199_v23, 8  ;;  %vm535_vm12 = vcmp.lt.s32.totalorder %v8234_v34, 1 }
  0xcc   :  { %vm537_vm13 = vcmp.lt.s32.totalorder %v8234_v34, 3  ;;  %v234_v8 = vsel %vm224_vm10, %v231_v37, %v233_v60  ;;  %v511_v57 = vor.u32 8388608, %v510_v45  ;;  %v544_v62 = vsel %vm538_vm11, %v531_v50, 920167782 }
  0xcd   :  { %v3747_v11 = vshrl.u32 %v3746_v20, 23  ;;  %vm1961_vm14 = vcmp.lt.s32.totalorder %v7913_v33, 0  ;;  %v6883_v18 = vadd.s32 4294967294, %v2027_v29  ;;  %v6886_v4 = vmin.u32 %v2129_v0, %v8220_v61 }
  0xce   :  { %v207_v46 = vshrl.u32 %v14369_v54, %v8156_v39  ;;  %v238_v23 = vsel %vm224_vm10, %v235_v10, %v237_v21  ;;  %vm536_vm15 = vcmp.lt.s32.totalorder %v8234_v34, 2  ;;  %v543_v60 = vsel %vm535_vm12, %v8267_v56, %v8269_v6 }
  0xcf   :  { %v545_v20 = vsel %vm537_vm13, %v528_v63, %v544_v62  ;;  %v548_v41 = vsel %vm538_vm11, %v534_v2, 1326507024  ;;  %v8298_v5 = vmul.u32.u64.low %v8274_v9, %v234_v8  ;;  %v8299_v28 = vmul.u32.u64.high %v8274_v9, %v234_v8, %v8298_v5 }
  0xd0   :  { %v547_v39 = vsel %vm535_vm12, %v8269_v6, %v528_v63  ;;  %v549_v14 = vsel %vm537_vm13, %v531_v50, %v548_v41  ;;  %vm8309_vm0 = vcmp.le.f32.partialorder %v1959_v35, 0.7853982  ;;  %v8317_v29 = vshll.u32 %v511_v57, 8 }
  0xd1   :  { %v8314_v2 = vmul.u32.u64.low %v8274_v9, %v238_v23  ;;  %v8315_v15 = vmul.u32.u64.high %v8274_v9, %v238_v23, %v8314_v2  ;;  %v6945_v0 = vadd.s32 4294967169, %v3747_v11  ;;  %v368_v37 = vshll.u32 %v8109_v49, %v8170_v58 }
  0xd2   :  { %v2045_v45 = vsub.s32 4, %v8136_v53  ;;  %v228_v50 = vsel %vm226_vm7, %v216_v36, 2102212464  ;;  %v546_v35 = vsel %vm536_vm15, %v543_v60, %v545_v20  ;;  %vm6884_vm1 = vcmp.lt.s32.totalorder %v6883_v18, 0 }
  0xd3   :  { %v2131_v10 = vclz %v6886_v4  ;;  %v550_v21 = vsel %vm536_vm15, %v547_v39, %v549_v14  ;;  %v3753_v8 = vadd.s32 1, %v6945_v0  ;;  %v370_v57 = vor.u32 %v8214_v51, %v368_v37 }
  0xd4   :  { %v374_v62 = vor.u32 4788187, %v373_v13  ;;  %v388_v49 = vadd.s32 3, %v384_v1  ;;  %v227_v58 = vsel %vm223_vm8, %v207_v46, %v8222_v31  ;;  %v229_v36 = vsel %vm225_vm9, %v8224_v38, %v228_v50 }
  0xd5   :  { %v8340_v11 = vmul.u32.u64.low %v8317_v29, %v546_v35  ;;  %v8341_v4 = vmul.u32.u64.high %v8317_v29, %v546_v35, %v8340_v11  ;;  %vm3754_vm2 = vcmp.gt.s32.totalorder %v3753_v8, 0  ;;  %v8344_v51 = vsel %vm6884_vm1, 0, %v6883_v18 }
  0xd6   :  { %v8347_v13 = vmul.u32.u64.low %v8317_v29, %v550_v21  ;;  %v8348_v40 = vmul.u32.u64.high %v8317_v29, %v550_v21, %v8347_v13  ;;  %v3755_v1 = vsel %vm3754_vm2, %v3753_v8, 0  ;;  %v2046_v31 = vsel %vm1961_vm14, %v2045_v45, %v8136_v53 }
  0xd7   :  { %v6887_v46 = vadd.s32 4294967294, %v2131_v10  ;;  %v519_v38 = vshrl.u32 %v14369_v54, %v8230_v17  ;;  %v3757_v23 = vand.u32 31, %v3755_v1  ;;  %v375_v60 = vand.u32 2147483647, %v374_v62  ;;  %v99_v17 = vpop.permute.xlu0 %98 }
  0xd8   :  { %v230_v20 = vsel %vm224_vm10, %v227_v58, %v229_v36  ;;  %v249_v18 = vadd.s32 1, %v8299_v28  ;;  %v540_v41 = vsel %vm538_vm11, %v528_v63, 2102212464  ;;  %v2031_v39 = vsub.s32 32, %v8344_v51 }
  0xd9   :  { %v2035_v14 = vsub.s32 4294967266, %v8344_v51  ;;  %vm248_vm3 = vc.u32 %v8315_v15, %v8298_v5  ;;  %v8364_v53 = vsub.s32 32, %v3757_v23  ;;  %v377_v2 = vcvt.s32.f32 %v370_v57 }
  0xda   :  { %v8369_v0 = vand.u32 3, %v388_v49  ;;  %v2048_v63 = vsel %vm8309_vm0, 0, %v2046_v31  ;;  %vm6888_vm6 = vcmp.lt.s32.totalorder %v6887_v46, 0  ;;  %v246_v37 = vmul.u32 %v8274_v9, %v230_v20 }
  0xdb   :  { %v539_v45 = vsel %vm535_vm12, %v519_v38, %v8267_v56  ;;  %v541_v50 = vsel %vm537_vm13, %v8269_v6, %v540_v41  ;;  %v378_v35 = vmul.f32 %v377_v2, %v375_v60  ;;  %v2032_v10 = vshll.u32 %v8154_v48, %v8344_v51 }
  0xdc   :  { %14642 = vst [vmem:[#allocation15_spill] sm:$0xff] %v8369_v0  ;;  %v250_v21 = vsel %vm248_vm3, %v249_v18, %v8299_v28  ;;  %v160_v9 = vmul.f32 %v7895_v24, %v99_v17  ;;  %v2033_v8 = vshrl.u32 %v8180_v3, %v2031_v39  ;;  %v2036_v57 = vadd.s32 127, %v2035_v14 }
  0xdd   :  { %v561_v56 = vadd.s32 1, %v8341_v4  ;;  %v14643_v62 = vmov 920167782   ;;  %v8391_v49 = vsel %vm6888_vm6, 0, %v6887_v46  ;;  %v542_v48 = vsel %vm536_vm15, %v539_v45, %v541_v50 }
  0xde   :  { %v3770_v6 = vshrl.u32 %v14643_v62, %v8364_v53  ;;  %vm560_vm7 = vc.u32 %v8348_v40, %v8340_v11  ;;  %v14366_v28 = vand.u32 2147483647, %v8218_v19  ;;  %v8398_v58 = vadd.s32 %v250_v21, %v246_v37 }
  0xdf   :  { %v8400_v36 = vshrl.u32 %v3755_v1, 5  ;;  %v14644_v3 = vmov 2102212464   ;;  %v14645_v13 = vmov 1326507024   ;;  %v3772_v18 = vshll.u32 %v14643_v62, %v3757_v23 }
  0xe0   :  { %v3769_v51 = vshll.u32 %v14644_v3, %v3757_v23  ;;  %v3773_v31 = vshrl.u32 %v14645_v13, %v8364_v53  ;;  %v14646_v46 = vmov 2475754826   ;;  %v14647_v34 = vmov 2131351028  }
  0xe1   :  { %v3761_v38 = vshrl.u32 %v14646_v46, %v8364_v53  ;;  %v3764_v60 = vshrl.u32 %v14647_v34, %v8364_v53  ;;  %v3767_v20 = vshrl.u32 %v14644_v3, %v8364_v53  ;;  %v2037_v41 = vshll.u32 %v2036_v57, 23 }
  0xe2   :  { %v558_v1 = vmul.u32 %v8317_v29, %v542_v48  ;;  %v562_v39 = vsel %vm560_vm7, %v561_v56, %v8341_v4  ;;  %v3771_v14 = vor.u32 %v3770_v6, %v3769_v51  ;;  %vm2065_vm8 = vcmp.lt.s32.totalorder %v7927_v47, 0 }
  0xe3   :  { %v3760_v17 = vshll.u32 %v14369_v54, %v3757_v23  ;;  %v3763_v12 = vshll.u32 %v14646_v46, %v3757_v23  ;;  %v3766_v2 = vshll.u32 %v14647_v34, %v3757_v23  ;;  %v3774_v37 = vor.u32 %v3773_v31, %v3772_v18 }
  0xe4   :  { %v8418_v45 = vadd.s32 3, %v2048_v63  ;;  %v2139_v50 = vsub.s32 4294967266, %v8391_v49  ;;  %v252_v21 = vadd.s32 536870912, %v8398_v58  ;;  %v3750_v29 = vand.u32 8388607, %v14366_v28 }
  0xe5   :  { %v3762_v4 = vor.u32 %v3761_v38, %v3760_v17  ;;  %v3765_v57 = vor.u32 %v3764_v60, %v3763_v12  ;;  %v3768_v56 = vor.u32 %v3767_v20, %v3766_v2  ;;  %vm3778_vm9 = vcmp.lt.s32.totalorder %v8400_v36, 4  ;;  %v84_v2 = vpop.permute.xlu1 %83 }
  0xe6   :  { %v14648_v6 = vand.u32 2147483647, %v7927_v47  ;;  %v2119_v23 = vadd.s32 %v8112_v52, %v8118_v59  ;;  %v8433_v63 = vadd.s32 %v562_v39, %v558_v1  ;;  %v3784_v51 = vsel %vm3778_vm9, %v3771_v14, 920167782 }
  0xe7   :  { %v8438_v31 = vadd.f32 %v7901_v26, %v160_v9  ;;  %v379_v38 = vxor.u32 2147483648, %v378_v35  ;;  %v2034_v60 = vor.u32 %v2033_v8, %v2032_v10  ;;  %v2038_v20 = vor.u32 4788187, %v2037_v41 }
  0xe8   :  { %vm8427_vm10 = vcmp.le.f32.partialorder %v14648_v6, 0.7853982  ;;  %v3788_v18 = vsel %vm3778_vm9, %v3774_v37, 1326507024  ;;  %v2140_v17 = vadd.s32 127, %v2139_v50  ;;  %v2149_v12 = vsub.s32 4, %v8182_v7 }
  0xe9   :  { %14651 = vst [vmem:[#allocation16_spill] sm:$0xff] %v8438_v31  ;;  %vm3775_vm11 = vcmp.lt.s32.totalorder %v8400_v36, 1  ;;  %vm3777_vm12 = vcmp.lt.s32.totalorder %v8400_v36, 3  ;;  %v8445_v52 = vshrl.u32 %v252_v21, 30  ;;  %v3751_v59 = vor.u32 8388608, %v3750_v29 }
  0xea   :  { %v3783_v9 = vsel %vm3775_vm11, %v3762_v4, %v3765_v57  ;;  %v3785_v10 = vsel %vm3777_vm12, %v3768_v56, %v3784_v51  ;;  %v564_v8 = vadd.s32 536870912, %v8433_v63  ;;  %v3787_v41 = vsel %vm3775_vm11, %v3765_v57, %v3768_v56 }
  0xeb   :  { %v3789_v1 = vsel %vm3777_vm12, %v3771_v14, %v3788_v18  ;;  %v714_v39 = vand.u32 2139095040, %v8438_v31  ;;  %v380_v37 = vsel %vm297_vm5, %v379_v38, %v378_v35  ;;  %v2039_v50 = vand.u32 2147483647, %v2038_v20 }
  0xec   :  { %v2041_v21 = vcvt.s32.f32 %v2034_v60  ;;  %vm3776_vm13 = vcmp.lt.s32.totalorder %v8400_v36, 2  ;;  %v2135_v29 = vsub.s32 32, %v8391_v49  ;;  %v2150_v6 = vsel %vm2065_vm8, %v2149_v12, %v8182_v7 }
  0xed   :  { %v3786_v51 = vsel %vm3776_vm13, %v3783_v9, %v3785_v10  ;;  %v715_v14 = vshrl.u32 %v714_v39, 23  ;;  %v2141_v18 = vshll.u32 %v2140_v17, 23  ;;  %v3790_v28 = vsel %vm3776_vm13, %v3787_v41, %v3789_v1  ;;  %v5428_v1 = vld [vmem:[%s14346_s6 + $0x28] sm:$0xff] }
  0xee   :  { %v8468_v44 = vshll.u32 %v3751_v59, 8  ;;  %v157_v35 = vmul.f32 %v7895_v24, %v84_v2  ;;  %v8474_v38 = vsel %vm8160_vm4, %v7910_v32, %v380_v37  ;;  %v254_v60 = vshll.u32 %v8445_v52, 30  ;;  %7178 = vmatprep.subr.mxu0 %v5428_v1 }
  0xef   :  { %v8477_v7 = vshrl.u32 %v564_v8, 30  ;;  %v6837_v20 = vadd.s32 4294967169, %v715_v14  ;;  %v8479_v12 = vmul.f32 %v2041_v21, %v2039_v50  ;;  %v2152_v17 = vsel %vm8427_vm10, 0, %v2150_v6  ;;  %7179 = vmatpush3.msra.mxu0 %v5428_v1 }
  0xf0   :  { %v8484_v59 = vmul.u32.u64.low %v8468_v44, %v3786_v51  ;;  %v8485_v9 = vmul.u32.u64.high %v8468_v44, %v3786_v51, %v8484_v59  ;;  %v3780_v55 = vsel %vm3778_vm9, %v3768_v56, 2102212464  ;;  %v2137_v39 = vshrl.u32 %v2119_v23, %v2135_v29  ;;  %v5427_v23 = vld [vmem:[%s14346_s6 + $0x20] sm:$0xff] }
  0xf1   :  { %v8491_v10 = vmul.u32.u64.low %v8468_v44, %v3790_v28  ;;  %v8492_v41 = vmul.u32.u64.high %v8468_v44, %v3790_v28, %v8491_v10  ;;  %v721_v8 = vadd.s32 1, %v6837_v20  ;;  %v2142_v2 = vor.u32 4788187, %v2141_v18  ;;  %7180 = vmatprep.subr.mxu0 %v5427_v23 }
  0xf2   :  { %v3759_v37 = vshrl.u32 %v14369_v54, %v8364_v53  ;;  %v8500_v50 = vadd.f32 %v7901_v26, %v157_v35  ;;  %v2136_v56 = vshll.u32 %v8220_v61, %v8391_v49  ;;  %v8505_v28 = vsub.s32 %v8398_v58, %v254_v60  ;;  %7181 = vmatpush3.msra.mxu0 %v5427_v23 }
  0xf3   :  { %v566_v21 = vshll.u32 %v8477_v7, 30  ;;  %vm722_vm4 = vcmp.gt.s32.totalorder %v721_v8, 0  ;;  %v3781_v29 = vsel %vm3777_vm12, %v3765_v57, %v3780_v55  ;;  %v14368_v6 = vand.u32 2147483647, %v8438_v31 }
  0xf4   :  { %14652 = vst [vmem:[#allocation17_spill] sm:$0xff] %v8500_v50  ;;  %v3779_v53 = vsel %vm3775_vm11, %v3759_v37, %v3762_v4  ;;  %v723_v61 = vsel %vm722_vm4, %v721_v8, 0  ;;  %7549 = vcosq.f32 %v8474_v38  ;;  %v8518_v49 = vand.u32 3, %v8418_v45 }
  0xf5   :  { %v8520_v58 = vadd.s32 3, %v2152_v17  ;;  %v725_v51 = vand.u32 31, %v723_v61  ;;  %v2043_v14 = vxor.u32 2147483648, %v8479_v12  ;;  %v2138_v18 = vor.u32 %v2137_v39, %v2136_v56 }
  0xf6   :  { %14653 = vst [vmem:[#allocation18_spill] sm:$0xff] %v8518_v49  ;;  %v2143_v4 = vand.u32 2147483647, %v2142_v2  ;;  %v402_v35 = vand.u32 2139095040, %v8500_v50  ;;  %v257_v57 = vsub.s32 0, %v8505_v28  ;;  %v8526_v60 = vsub.s32 %v8433_v63, %v566_v21 }
  0xf7   :  { %v3782_v20 = vsel %vm3776_vm13, %v3779_v53, %v3781_v29  ;;  %v726_v45 = vsub.s32 32, %v725_v51  ;;  %v3801_v17 = vadd.s32 1, %v8485_v9  ;;  %v718_v55 = vand.u32 8388607, %v14368_v6 }
  0xf8   :  { %v728_v10 = vshll.u32 %v14369_v54, %v725_v51  ;;  %v731_v8 = vshll.u32 %v14646_v46, %v725_v51  ;;  %vm3800_vm5 = vc.u32 %v8492_v41, %v8484_v59  ;;  %v734_v63 = vshll.u32 %v14647_v34, %v725_v51 }
  0xf9   :  { %v729_v1 = vshrl.u32 %v14646_v46, %v726_v45  ;;  %v737_v36 = vshll.u32 %v14644_v3, %v725_v51  ;;  %v8540_v39 = vshrl.u32 %v723_v61, 5  ;;  %v732_v2 = vshrl.u32 %v14647_v34, %v726_v45 }
  0xfa   :  { %v735_v37 = vshrl.u32 %v14644_v3, %v726_v45  ;;  %v403_v56 = vshrl.u32 %v402_v35, 23  ;;  %v2145_v21 = vcvt.s32.f32 %v2138_v18  ;;  %v6818_v23 = vmin.u32 %v257_v57, %v8505_v28 }
  0xfb   :  { %v569_v53 = vsub.s32 0, %v8526_v60  ;;  %v738_v29 = vshrl.u32 %v14643_v62, %v726_v45  ;;  %v3802_v6 = vsel %vm3800_vm5, %v3801_v17, %v8485_v9  ;;  %v730_v54 = vor.u32 %v729_v1, %v728_v10  ;;  %v109_v9 = vpop.permute.xlu0 %108 }
  0xfc   :  { %v733_v32 = vor.u32 %v732_v2, %v731_v8  ;;  %v740_v0 = vshll.u32 %v14643_v62, %v725_v51  ;;  %v3798_v61 = vmul.u32 %v8468_v44, %v3782_v20  ;;  %v719_v49 = vor.u32 8388608, %v718_v55 }
  0xfd   :  { %v736_v22 = vor.u32 %v735_v37, %v734_v63  ;;  %v739_v42 = vor.u32 %v738_v29, %v737_v36  ;;  %v2146_v31 = vmul.f32 %v2145_v21, %v2143_v4  ;;  %v741_v18 = vshrl.u32 %v14645_v13, %v726_v45 }
  0xfe   :  { %vm743_vm15 = vcmp.lt.s32.totalorder %v8540_v39, 1  ;;  %v6825_v35 = vadd.s32 4294967169, %v403_v56  ;;  %v259_v57 = vclz %v6818_v23  ;;  %v8552_v19 = vadd.s32 %v3802_v6, %v3798_v61 }
  0xff   :  { %vm745_vm1 = vcmp.lt.s32.totalorder %v8540_v39, 3  ;;  %vm746_vm2 = vcmp.lt.s32.totalorder %v8540_v39, 4  ;;  %v6830_v51 = vmin.u32 %v569_v53, %v8526_v60  ;;  %v742_v44 = vor.u32 %v741_v18, %v740_v0 }
 0x100   :  { %vm744_vm3 = vcmp.lt.s32.totalorder %v8540_v39, 2  ;;  %v751_v4 = vsel %vm743_vm15, %v730_v54, %v733_v32  ;;  %v2044_v20 = vsel %vm1961_vm14, %v2043_v14, %v8479_v12  ;;  %v752_v6 = vsel %vm746_vm2, %v739_v42, 920167782 }
 0x101   :  { %v755_v17 = vsel %vm743_vm15, %v733_v32, %v736_v22  ;;  %v8567_v55 = vshll.u32 %v719_v49, 8  ;;  %v8569_v10 = vpop.eup %7549  ;;  %v753_v0 = vsel %vm745_vm1, %v736_v22, %v752_v6  ;;  %v756_v8 = vsel %vm746_vm2, %v742_v44, 1326507024 }
 0x102   :  { %14654 = vst [vmem:[#allocation19_spill] sm:$0xff] %v8569_v10  ;;  %v409_v1 = vadd.s32 1, %v6825_v35  ;;  %v162_v63 = vmul.f32 %v7895_v24, %v109_v9  ;;  %v6819_v12 = vadd.s32 4294967294, %v259_v57  ;;  %v3804_v14 = vadd.s32 536870912, %v8552_v19 }
 0x103   :  { %v754_v36 = vsel %vm744_vm3, %v751_v4, %v753_v0  ;;  %v757_v49 = vsel %vm745_vm1, %v739_v42, %v756_v8  ;;  %v2147_v2 = vxor.u32 2147483648, %v2146_v31  ;;  %v571_v37 = vclz %v6830_v51 }
 0x104   :  { %v14655_v56 = vmov 683565275   ;;  %v758_v23 = vsel %vm744_vm3, %v755_v17, %v757_v49  ;;  %v748_v53 = vsel %vm746_vm2, %v736_v22, 2102212464  ;;  %vm410_vm14 = vcmp.gt.s32.totalorder %v409_v1, 0 }
 0x105   :  { %v727_v21 = vshrl.u32 %v14655_v56, %v726_v45  ;;  %v8587_v29 = vmul.u32.u64.low %v8567_v55, %v754_v36  ;;  %v8588_v61 = vmul.u32.u64.high %v8567_v55, %v754_v36, %v8587_v29  ;;  %v14383_v42 = vand.u32 2147483647, %v8500_v50 }
 0x106   :  { %v8592_v18 = vmul.u32.u64.low %v8567_v55, %v758_v23  ;;  %v8593_v35 = vmul.u32.u64.high %v8567_v55, %v758_v23, %v8592_v18  ;;  %v411_v57 = vsel %vm410_vm14, %v409_v1, 0  ;;  %vm6820_vm6 = vcmp.lt.s32.totalorder %v6819_v12, 0 }
 0x107   :  { %v8596_v45 = vshrl.u32 %v3804_v14, 30  ;;  %v413_v9 = vand.u32 31, %v411_v57  ;;  %v8599_v51 = vadd.f32 %v7901_v26, %v162_v63  ;;  %7551 = vsinq.f32 %v8474_v38 }
 0x108   :  { %v8603_v22 = vand.u32 3, %v8520_v58  ;;  %v747_v44 = vsel %vm743_vm15, %v727_v21, %v730_v54  ;;  %v749_v4 = vsel %vm745_vm1, %v733_v32, %v748_v53  ;;  %v8612_v6 = vsel %vm8309_vm0, %v7913_v33, %v2044_v20 }
 0x109   :  { %14656 = vst [vmem:[#allocation20_spill] sm:$0xff] %v8599_v51  ;;  %v247_v17 = vadd.s32 %v8298_v5, %v8315_v15  ;;  %v277_v0 = vsub.s32 4, %v8445_v52  ;;  %v8617_v38 = vsub.s32 32, %v413_v9  ;;  %v2148_v58 = vsel %vm2065_vm8, %v2147_v2, %v2146_v31 }
 0x10a   :  { %14657 = vst [vmem:[#allocation21_spill] sm:$0xff] %v8603_v22  ;;  %v8621_v8 = vsel %vm6820_vm6, 0, %v6819_v12  ;;  %v6831_v54 = vadd.s32 4294967294, %v571_v37  ;;  %v406_v32 = vand.u32 8388607, %v14383_v42  ;;  %v3806_v30 = vshll.u32 %v8596_v45, 30  ;;  %v1865_v42 = vpop.permute.xlu1 %1864 }
 0x10b   :  { %v750_v20 = vsel %vm744_vm3, %v747_v44, %v749_v4  ;;  %v416_v5 = vshll.u32 %v14655_v56, %v413_v9  ;;  %v922_v15 = vand.u32 2139095040, %v8599_v51  ;;  %v417_v1 = vshrl.u32 %v14646_v46, %v8617_v38 }
 0x10c   :  { %v419_v31 = vshll.u32 %v14646_v46, %v413_v9  ;;  %v420_v63 = vshrl.u32 %v14647_v34, %v8617_v38  ;;  %v423_v12 = vshrl.u32 %v14644_v3, %v8617_v38  ;;  %v769_v14 = vadd.s32 1, %v8588_v61 }
 0x10d   :  { %v8638_v36 = vshrl.u32 %v411_v57, 5  ;;  %v425_v39 = vshll.u32 %v14644_v3, %v413_v9  ;;  %v426_v49 = vshrl.u32 %v14643_v62, %v8617_v38  ;;  %vm768_vm0 = vc.u32 %v8593_v35, %v8587_v29 }
 0x10e   :  { %v8645_v2 = vor.u32 %v417_v1, %v416_v5  ;;  %v8647_v37 = vor.u32 %v420_v63, %v419_v31  ;;  %v422_v21 = vshll.u32 %v14647_v34, %v413_v9  ;;  %v8651_v23 = vsub.s32 %v8552_v19, %v3806_v30 }
 0x10f   :  { %v427_v53 = vor.u32 %v426_v49, %v425_v39  ;;  %v428_v18 = vshll.u32 %v14643_v62, %v413_v9  ;;  %v429_v57 = vshrl.u32 %v14645_v13, %v8617_v38  ;;  %v263_v44 = vsub.s32 32, %v8621_v8 }
 0x110   :  { %vm6832_vm7 = vcmp.lt.s32.totalorder %v6831_v54, 0  ;;  %v766_v4 = vmul.u32 %v8567_v55, %v750_v20  ;;  %v424_v5 = vor.u32 %v423_v12, %v422_v21  ;;  %vm193_vm8 = vcmp.lt.s32.totalorder %v8045_v43, 0 }
 0x111   :  { %v770_v1 = vsel %vm768_vm0, %v769_v14, %v8588_v61  ;;  %v430_v31 = vor.u32 %v429_v57, %v428_v18  ;;  %vm431_vm9 = vcmp.lt.s32.totalorder %v8638_v36, 1  ;;  %v923_v19 = vshrl.u32 %v922_v15, 23 }
 0x112   :  { %v267_v30 = vsub.s32 4294967266, %v8621_v8  ;;  %v407_v9 = vor.u32 8388608, %v406_v32  ;;  %vm434_vm11 = vcmp.lt.s32.totalorder %v8638_v36, 4  ;;  %v439_v63 = vsel %vm431_vm9, %v8645_v2, %v8647_v37 }
 0x113   :  { %v8667_v55 = vsel %vm6832_vm7, 0, %v6831_v54  ;;  %v3809_v20 = vsub.s32 0, %v8651_v23  ;;  %vm433_vm12 = vcmp.lt.s32.totalorder %v8638_v36, 3  ;;  %v440_v61 = vsel %vm434_vm11, %v427_v53, 920167782 }
 0x114   :  { %v14658_v15 = vand.u32 2147483647, %v8045_v43  ;;  %v8679_v12 = vadd.s32 %v770_v1, %v766_v4  ;;  %vm432_vm4 = vcmp.lt.s32.totalorder %v8638_v36, 2  ;;  %v441_v54 = vsel %vm433_vm12, %v424_v5, %v440_v61  ;;  %v8687_v39 = vpop.eup %7551 }
 0x115   :  { %v443_v14 = vsel %vm431_vm9, %v8647_v37, %v424_v5  ;;  %14661 = vst [vmem:[#allocation22_spill] sm:$0xff] %v8687_v39  ;;  %v264_v49 = vshll.u32 %v8505_v28, %v8621_v8  ;;  %v442_v21 = vsel %vm432_vm4, %v439_v63, %v441_v54  ;;  %v444_v18 = vsel %vm434_vm11, %v430_v31, 1326507024 }
 0x116   :  { %vm8675_vm13 = vcmp.le.f32.partialorder %v14658_v15, 0.7853982  ;;  %v6845_v57 = vadd.s32 4294967169, %v923_v19  ;;  %v265_v4 = vshrl.u32 %v247_v17, %v263_v44  ;;  %v268_v1 = vadd.s32 127, %v267_v30 }
 0x117   :  { %v445_v61 = vsel %vm433_vm12, %v427_v53, %v444_v18  ;;  %v8697_v15 = vshll.u32 %v407_v9, 8  ;;  %7553 = vcosq.f32 %v8612_v6  ;;  %v8703_v28 = vsel %vm8427_vm10, %v7927_v47, %v2148_v58 }
 0x118   :  { %v579_v8 = vsub.s32 4294967266, %v8667_v55  ;;  %v446_v31 = vsel %vm432_vm4, %v443_v14, %v445_v61  ;;  %v6946_v17 = vmin.u32 %v3809_v20, %v8651_v23  ;;  %v772_v44 = vadd.s32 536870912, %v8679_v12 }
 0x119   :  { %v8711_v53 = vmul.u32.u64.low %v8697_v15, %v442_v21  ;;  %v8712_v19 = vmul.u32.u64.high %v8697_v15, %v442_v21, %v8711_v53  ;;  %v8716_v30 = vmul.u32.u64.low %v8697_v15, %v446_v31  ;;  %v8717_v9 = vmul.u32.u64.high %v8697_v15, %v446_v31, %v8716_v30 }
 0x11a   :  { %v929_v48 = vadd.s32 1, %v6845_v57  ;;  %v1925_v58 = vmul.f32 %v7898_v25, %v1865_v42  ;;  %7555 = vsinq.f32 %v8612_v6  ;;  %v8721_v63 = vor.u32 %v265_v4, %v264_v49 }
 0x11b   :  { %v269_v54 = vshll.u32 %v268_v1, 23  ;;  %v8728_v20 = vsel %vm193_vm8, %v277_v0, %v8445_v52  ;;  %v559_v14 = vadd.s32 %v8340_v11, %v8348_v40  ;;  %v575_v21 = vsub.s32 32, %v8667_v55 }
 0x11c   :  { %v580_v18 = vadd.s32 127, %v579_v8  ;;  %vm930_vm10 = vcmp.gt.s32.totalorder %v929_v48, 0  ;;  %7557 = vcosq.f32 %v8703_v28  ;;  %v3811_v42 = vclz %v6946_v17 }
 0x11d   :  { %v8734_v6 = vshrl.u32 %v772_v44, 30  ;;  %v931_v49 = vsel %vm930_vm10, %v929_v48, 0  ;;  %v436_v52 = vsel %vm434_vm11, %v424_v5, 2102212464  ;;  %v8742_v11 = vadd.f32 %v7904_v27, %v1925_v58 }
 0x11e   :  { %v933_v0 = vand.u32 31, %v931_v49  ;;  %v8744_v40 = vor.u32 4788187, %v269_v54  ;;  %v576_v1 = vshll.u32 %v8526_v60, %v8667_v55  ;;  %v415_v61 = vshrl.u32 %v14655_v56, %v8617_v38  ;;  %v5426_v38 = vld [vmem:[%s14346_s6 + $0x18] sm:$0xff] }
 0x11f   :  { %14662 = vst [vmem:[#allocation23_spill] sm:$0xff] %v8742_v11  ;;  %v577_v8 = vshrl.u32 %v559_v14, %v575_v21  ;;  %v581_v31 = vshll.u32 %v580_v18, 23  ;;  %v6947_v5 = vadd.s32 4294967294, %v3811_v42  ;;  %v774_v30 = vshll.u32 %v8734_v6, 30  ;;  %7182 = vmatprep.subr.mxu0 %v5426_v38  ;;  %v5425_v18 = vld [vmem:[%s14346_s6 + $0x10] sm:$0xff] }
 0x120   :  { %v8752_v44 = vsub.s32 32, %v933_v0  ;;  %v435_v48 = vsel %vm431_vm9, %v415_v61, %v8645_v2  ;;  %v437_v60 = vsel %vm433_vm12, %v8647_v37, %v436_v52  ;;  %vm456_vm5 = vc.u32 %v8717_v9, %v8711_v53  ;;  %7183 = vmatpush3.msra.mxu0 %v5426_v38 }
 0x121   :  { %v457_v55 = vadd.s32 1, %v8712_v19  ;;  %v8767_v58 = vshrl.u32 %v931_v49, 5  ;;  %v2170_v54 = vand.u32 2139095040, %v8742_v11  ;;  %v936_v2 = vshll.u32 %v14655_v56, %v933_v0  ;;  %7184 = vmatprep.subr.mxu0 %v5425_v18 }
 0x122   :  { %v937_v14 = vshrl.u32 %v14646_v46, %v8752_v44  ;;  %v939_v37 = vshll.u32 %v14646_v46, %v933_v0  ;;  %v940_v21 = vshrl.u32 %v14647_v34, %v8752_v44  ;;  %v942_v42 = vshll.u32 %v14647_v34, %v933_v0  ;;  %7185 = vmatpush3.msra.mxu0 %v5425_v18 }
 0x123   :  { %v943_v49 = vshrl.u32 %v14644_v3, %v8752_v44  ;;  %v945_v52 = vshll.u32 %v14644_v3, %v933_v0  ;;  %v946_v61 = vshrl.u32 %v14643_v62, %v8752_v44  ;;  %v578_v4 = vor.u32 %v577_v8, %v576_v1 }
 0x124   :  { %v8785_v57 = vpop.eup %7553  ;;  %v582_v17 = vor.u32 4788187, %v581_v31  ;;  %vm6948_vm15 = vcmp.lt.s32.totalorder %v6947_v5, 0  ;;  %v14664_v38 = vand.u32 2147483647, %v8599_v51  ;;  %v8790_v22 = vsub.s32 %v8679_v12, %v774_v30 }
 0x125   :  { %14663 = vst [vmem:[#allocation24_spill] sm:$0xff] %v8785_v57  ;;  %v438_v10 = vsel %vm432_vm4, %v435_v48, %v437_v60  ;;  %v948_v39 = vshll.u32 %v14643_v62, %v933_v0  ;;  %v949_v33 = vshrl.u32 %v14645_v13, %v8752_v44  ;;  %v458_v1 = vsel %vm456_vm5, %v457_v55, %v8712_v19 }
 0x126   :  { %v926_v47 = vand.u32 8388607, %v14664_v38  ;;  %v938_v8 = vor.u32 %v937_v14, %v936_v2  ;;  %v941_v31 = vor.u32 %v940_v21, %v939_v37  ;;  %v2171_v38 = vshrl.u32 %v2170_v54, 23 }
 0x127   :  { %v8801_v18 = vpop.eup %7555  ;;  %v944_v12 = vor.u32 %v943_v49, %v942_v42  ;;  %v947_v30 = vor.u32 %v946_v61, %v945_v52  ;;  %v950_v57 = vor.u32 %v949_v33, %v948_v39  ;;  %vm951_vm1 = vcmp.lt.s32.totalorder %v8767_v58, 1 }
 0x128   :  { %14665 = vst [vmem:[#allocation25_spill] sm:$0xff] %v8801_v18  ;;  %v271_v36 = vand.u32 2147483647, %v8744_v40  ;;  %v585_v0 = vcvt.s32.f32 %v578_v4  ;;  %v454_v48 = vmul.u32 %v8697_v15, %v438_v10  ;;  %v927_v60 = vor.u32 8388608, %v926_v47  ;;  %v119_v10 = vpop.permute.xlu0 %118 }
 0x129   :  { %v8806_v51 = vpop.eup %7557  ;;  %vm505_vm2 = vcmp.lt.s32.totalorder %v8140_v16, 0  ;;  %v583_v19 = vand.u32 2147483647, %v582_v17  ;;  %v8810_v55 = vsel %vm6948_vm15, 0, %v6947_v5  ;;  %vm953_vm3 = vcmp.lt.s32.totalorder %v8767_v58, 3 }
 0x12a   :  { %14666 = vst [vmem:[#allocation26_spill] sm:$0xff] %v8806_v51  ;;  %vm954_vm14 = vcmp.lt.s32.totalorder %v8767_v58, 4  ;;  %v777_v33 = vsub.s32 0, %v8790_v22  ;;  %v8815_v39 = vadd.s32 %v458_v1, %v454_v48  ;;  %vm952_vm6 = vcmp.lt.s32.totalorder %v8767_v58, 2 }
 0x12b   :  { %v959_v47 = vsel %vm951_vm1, %v938_v8, %v941_v31  ;;  %v960_v15 = vsel %vm954_vm14, %v947_v30, 920167782  ;;  %v963_v40 = vsel %vm951_vm1, %v941_v31, %v944_v12  ;;  %v964_v4 = vsel %vm954_vm14, %v950_v57, 1326507024 }
 0x12c   :  { %v6889_v17 = vadd.s32 4294967169, %v2171_v38  ;;  %7559 = vsinq.f32 %v8703_v28  ;;  %v3819_v5 = vsub.s32 4294967266, %v8810_v55  ;;  %v961_v54 = vsel %vm953_vm3, %v944_v12, %v960_v15 }
 0x12d   :  { %v8830_v2 = vshll.u32 %v927_v60, 8  ;;  %v589_v14 = vsub.s32 4, %v8477_v7  ;;  %v965_v37 = vsel %vm953_vm3, %v947_v30, %v964_v4  ;;  %v164_v42 = vmul.f32 %v7895_v24, %v119_v10 }
 0x12e   :  { %v2177_v21 = vadd.s32 1, %v6889_v17  ;;  %v6838_v57 = vmin.u32 %v777_v33, %v8790_v22  ;;  %v460_v49 = vadd.s32 536870912, %v8815_v39  ;;  %v962_v28 = vsel %vm952_vm6, %v959_v47, %v961_v54 }
 0x12f   :  { %v966_v52 = vsel %vm952_vm6, %v963_v40, %v965_v37  ;;  %v14667_v61 = vcvt.s32.f32 %v8721_v63  ;;  %v8846_v38 = vmul.f32 %v585_v0, %v583_v19  ;;  %v935_v30 = vshrl.u32 %v14655_v56, %v8752_v44 }
 0x130   :  { %vm2178_vm0 = vcmp.gt.s32.totalorder %v2177_v21, 0  ;;  %v3820_v48 = vadd.s32 127, %v3819_v5  ;;  %v956_v60 = vsel %vm954_vm14, %v944_v12, 2102212464  ;;  %v14394_v63 = vand.u32 2147483647, %v8742_v11 }
 0x131   :  { %v8844_v1 = vmul.f32 %v14667_v61, %v271_v36  ;;  %v8853_v33 = vmul.u32.u64.low %v8830_v2, %v966_v52  ;;  %v8854_v47 = vmul.u32.u64.high %v8830_v2, %v966_v52, %v8853_v33  ;;  %v2179_v36 = vsel %vm2178_vm0, %v2177_v21, 0 }
 0x132   :  { %v8857_v10 = vmul.u32.u64.low %v8830_v2, %v962_v28  ;;  %v8858_v15 = vmul.u32.u64.high %v8830_v2, %v962_v28, %v8857_v10  ;;  %v14668_v44 = vsel %vm8675_vm13, 0, %v8728_v20  ;;  %v8869_v12 = vsel %vm505_vm2, %v589_v14, %v8477_v7 }
 0x133   :  { %v284_v0 = vadd.s32 3, %v14668_v44  ;;  %v779_v19 = vclz %v6838_v57  ;;  %v8871_v40 = vshrl.u32 %v460_v49, 30  ;;  %v955_v17 = vsel %vm951_vm1, %v935_v30, %v938_v8 }
 0x134   :  { %v957_v5 = vsel %vm953_vm3, %v941_v31, %v956_v60  ;;  %v2181_v54 = vand.u32 31, %v2179_v36  ;;  %v3799_v37 = vadd.s32 %v8484_v59, %v8492_v41  ;;  %v3829_v7 = vsub.s32 4, %v8596_v45 }
 0x135   :  { %v8883_v14 = vadd.f32 %v7901_v26, %v164_v42  ;;  %v3815_v21 = vsub.s32 32, %v8810_v55  ;;  %v3821_v57 = vshll.u32 %v3820_v48, 23  ;;  %v2174_v8 = vand.u32 8388607, %v14394_v63  ;;  %v1869_v42 = vpop.permute.xlu1 %1868 }
 0x136   :  { %v8888_v49 = vsub.s32 32, %v2181_v54  ;;  %v6839_v31 = vadd.s32 4294967294, %v779_v19  ;;  %v462_v28 = vshll.u32 %v8871_v40, 30  ;;  %v958_v52 = vsel %vm952_vm6, %v955_v17, %v957_v5  ;;  %v14674_v17 = vld [vmem:[#allocation14_spill] sm:$0xff] }
 0x137   :  { %14669 = vst [vmem:[#allocation27_spill] sm:$0xff] %v8883_v14  ;;  %v8893_v59 = vshrl.u32 %v2179_v36, 5  ;;  %v14670_v41 = vand.u32 2147483647, %v8140_v16  ;;  %v2184_v61 = vshll.u32 %v14655_v56, %v2181_v54  ;;  %v2187_v48 = vshll.u32 %v14646_v46, %v2181_v54 }
 0x138   :  { %v2185_v30 = vshrl.u32 %v14646_v46, %v8888_v49  ;;  %v2188_v60 = vshrl.u32 %v14647_v34, %v8888_v49  ;;  %v2190_v58 = vshll.u32 %v14647_v34, %v2181_v54  ;;  %v2191_v33 = vshrl.u32 %v14644_v3, %v8888_v49 }
 0x139   :  { %vm8897_vm7 = vcmp.le.f32.partialorder %v14670_v41, 0.7853982  ;;  %v2193_v36 = vshll.u32 %v14644_v3, %v2181_v54  ;;  %v2194_v44 = vshrl.u32 %v14643_v62, %v8888_v49  ;;  %v8913_v19 = vpop.eup %7559  ;;  %vm3745_vm9 = vcmp.lt.s32.totalorder %v14674_v17, 0 }
 0x13a   :  { %14673 = vst [vmem:[#allocation28_spill] sm:$0xff] %v8913_v19  ;;  %vm976_vm11 = vc.u32 %v8854_v47, %v8857_v10  ;;  %v977_v5 = vadd.s32 1, %v8858_v15  ;;  %v8919_v41 = vor.u32 %v2185_v30, %v2184_v61  ;;  %v8921_v63 = vor.u32 %v2188_v60, %v2187_v48 }
 0x13b   :  { %v2192_v20 = vor.u32 %v2191_v33, %v2190_v58  ;;  %v2195_v4 = vor.u32 %v2194_v44, %v2193_v36  ;;  %v2196_v51 = vshll.u32 %v14643_v62, %v2181_v54  ;;  %v2197_v18 = vshrl.u32 %v14645_v13, %v8888_v49 }
 0x13c   :  { %v3816_v19 = vshll.u32 %v8651_v23, %v8810_v55  ;;  %v3817_v11 = vshrl.u32 %v3799_v37, %v3815_v21  ;;  %v8929_v26 = vsub.s32 %v8815_v39, %v462_v28  ;;  %v1130_v24 = vand.u32 2139095040, %v8883_v14 }
 0x13d   :  { %v3822_v61 = vor.u32 4788187, %v3821_v57  ;;  %vm6840_vm12 = vcmp.lt.s32.totalorder %v6839_v31, 0  ;;  %v2175_v30 = vor.u32 8388608, %v2174_v8  ;;  %v2198_v48 = vor.u32 %v2197_v18, %v2196_v51 }
 0x13e   :  { %v14675_v60 = vand.u32 2147483647, %v14674_v17  ;;  %v974_v58 = vmul.u32 %v8830_v2, %v958_v52  ;;  %v978_v23 = vsel %vm976_vm11, %v977_v5, %v8858_v15  ;;  %vm2199_vm10 = vcmp.lt.s32.totalorder %v8893_v59, 1 }
 0x13f   :  { %vm2202_vm5 = vcmp.lt.s32.totalorder %v8893_v59, 4  ;;  %vm2201_vm15 = vcmp.lt.s32.totalorder %v8893_v59, 3  ;;  %v2207_v51 = vsel %vm2199_vm10, %v8919_v41, %v8921_v63  ;;  %v2211_v55 = vsel %vm2199_vm10, %v8921_v63, %v2192_v20 }
 0x140   :  { %vm8934_vm4 = vcmp.le.f32.partialorder %v14675_v60, 0.7853982  ;;  %v2208_v18 = vsel %vm2202_vm5, %v2195_v4, 920167782  ;;  %v465_v39 = vsub.s32 0, %v8929_v26  ;;  %v1131_v37 = vshrl.u32 %v1130_v24, 23 }
 0x141   :  { %v2209_v2 = vsel %vm2201_vm15, %v2192_v20, %v2208_v18  ;;  %v2212_v15 = vsel %vm2202_vm5, %v2198_v48, 1326507024  ;;  %v8960_v21 = vand.u32 3, %v284_v0  ;;  %v592_v57 = vsel %vm8897_vm7, 0, %v8869_v12 }
 0x142   :  { %vm2200_vm1 = vcmp.lt.s32.totalorder %v8893_v59, 2  ;;  %v2213_v8 = vsel %vm2201_vm15, %v2195_v4, %v2212_v15  ;;  %v3818_v28 = vor.u32 %v3817_v11, %v3816_v19  ;;  %v8968_v52 = vadd.s32 %v978_v23, %v974_v58 }
 0x143   :  { %14678 = vst [vmem:[#allocation29_spill] sm:$0xff] %v8960_v21  ;;  %v2210_v33 = vsel %vm2200_vm1, %v2207_v51, %v2209_v2  ;;  %v2214_v24 = vsel %vm2200_vm1, %v2211_v55, %v2213_v8  ;;  %v14679_v0 = vxor.u32 2147483648, %v8844_v1  ;;  %v3830_v36 = vsel %vm3745_vm9, %v3829_v7, %v8596_v45 }
 0x144   :  { %v782_v11 = vsel %vm6840_vm12, 0, %v6839_v31  ;;  %v8983_v4 = vshll.u32 %v2175_v30, 8  ;;  %v14680_v44 = vxor.u32 2147483648, %v8846_v38  ;;  %v3823_v5 = vand.u32 2147483647, %v3822_v61 }
 0x145   :  { %v276_v12 = vsel %vm193_vm8, %v14679_v0, %v8844_v1  ;;  %v6826_v48 = vmin.u32 %v465_v39, %v8929_v26  ;;  %v6853_v60 = vadd.s32 4294967169, %v1131_v37  ;;  %v3825_v31 = vcvt.s32.f32 %v3818_v28 }
 0x146   :  { %v588_v19 = vsel %vm505_vm2, %v14680_v44, %v8846_v38  ;;  %v8992_v1 = vmul.u32.u64.low %v8983_v4, %v2214_v24  ;;  %v8993_v58 = vmul.u32.u64.high %v8983_v4, %v2214_v24, %v8992_v1  ;;  %v787_v30 = vsub.s32 4294967266, %v782_v11 }
 0x147   :  { %v8996_v45 = vmul.u32.u64.low %v8983_v4, %v2210_v33  ;;  %v8997_v7 = vmul.u32.u64.high %v8983_v4, %v2210_v33, %v8996_v45  ;;  %v980_v23 = vadd.s32 536870912, %v8968_v52  ;;  %v1137_v51 = vadd.s32 1, %v6853_v60  ;;  %v5423_v1 = vld [vmem:[%s14346_s6] sm:$0xff] }
 0x148   :  { %v279_v38 = vsel %vm8675_vm13, %v8045_v43, %v276_v12  ;;  %v591_v61 = vsel %vm8897_vm7, %v8140_v16, %v588_v19  ;;  %v596_v18 = vadd.s32 3, %v592_v57  ;;  %v3832_v55 = vsel %vm8934_vm4, 0, %v3830_v36  ;;  %v5424_v36 = vld [vmem:[%s14346_s6 + $0x8] sm:$0xff] }
 0x149   :  { %v3826_v39 = vmul.f32 %v3825_v31, %v3823_v5  ;;  %v767_v2 = vadd.s32 %v8587_v29, %v8593_v35  ;;  %v2204_v15 = vsel %vm2202_vm5, %v2192_v20, 2102212464  ;;  %vm1138_vm8 = vcmp.gt.s32.totalorder %v1137_v51, 0  ;;  %7186 = vmatprep.subr.mxu0 %v5424_v36  ;;  %v14683_v31 = vld [vmem:[#allocation16_spill] sm:$0xff] }
 0x14a   :  { %v783_v37 = vsub.s32 32, %v782_v11  ;;  %v467_v8 = vclz %v6826_v48  ;;  %v2183_v32 = vshrl.u32 %v14655_v56, %v8888_v49  ;;  %v1139_v28 = vsel %vm1138_vm8, %v1137_v51, 0  ;;  %7187 = vmatpush3.msra.mxu0 %v5424_v36 }
 0x14b   :  { %7561 = vcosq.f32 %v279_v38  ;;  %v788_v57 = vadd.s32 127, %v787_v30  ;;  %v9015_v33 = vshrl.u32 %v980_v23, 30  ;;  %v1141_v24 = vand.u32 31, %v1139_v28  ;;  %7188 = vmatprep.subr.mxu0 %v5423_v1 }
 0x14c   :  { %7563 = vsinq.f32 %v279_v38  ;;  %v3836_v0 = vadd.s32 3, %v3832_v55  ;;  %v2203_v29 = vsel %vm2199_vm10, %v2183_v32, %v8919_v41  ;;  %v2205_v35 = vsel %vm2201_vm15, %v8921_v63, %v2204_v15  ;;  %7189 = vmatpush3.msra.mxu0 %v5423_v1 }
 0x14d   :  { %7565 = vcosq.f32 %v591_v61  ;;  %v3827_v20 = vxor.u32 2147483648, %v3826_v39  ;;  %v2225_v49 = vadd.s32 1, %v8997_v7  ;;  %v1926_v12 = vmul.f32 %v7898_v25, %v1869_v42 }
 0x14e   :  { %v784_v44 = vshll.u32 %v8790_v22, %v782_v11  ;;  %v785_v19 = vshrl.u32 %v767_v2, %v783_v37  ;;  %v6827_v5 = vadd.s32 4294967294, %v467_v8  ;;  %vm2224_vm13 = vc.u32 %v8993_v58, %v8996_v45 }
 0x14f   :  { %v789_v41 = vshll.u32 %v788_v57, 23  ;;  %v982_v63 = vshll.u32 %v9015_v33, 30  ;;  %v2206_v48 = vsel %vm2200_vm1, %v2203_v29, %v2205_v35  ;;  %v9034_v60 = vsub.s32 32, %v1141_v24 }
 0x150   :  { %7567 = vsinq.f32 %v591_v61  ;;  %v9039_v22 = vand.u32 3, %v596_v18  ;;  %v9041_v11 = vand.u32 3, %v3836_v0  ;;  %vm713_vm2 = vcmp.lt.s32.totalorder %v14683_v31, 0 }
 0x151   :  { %v3828_v30 = vsel %vm3745_vm9, %v3827_v20, %v3826_v39  ;;  %v797_v59 = vsub.s32 4, %v8734_v6  ;;  %v2226_v23 = vsel %vm2224_vm13, %v2225_v49, %v8997_v7  ;;  %v9049_v51 = vadd.f32 %v7904_v27, %v1926_v12 }
 0x152   :  { %14681 = vst [vmem:[#allocation30_spill] sm:$0xff] %v9039_v22  ;;  %14682 = vst [vmem:[#allocation31_spill] sm:$0xff] %v9041_v11  ;;  %v786_v38 = vor.u32 %v785_v19, %v784_v44  ;;  %vm6828_vm3 = vcmp.lt.s32.totalorder %v6827_v5, 0  ;;  %v2222_v61 = vmul.u32 %v8983_v4, %v2206_v48  ;;  %v14405_v18 = vand.u32 2147483647, %v8883_v14 }
 0x153   :  { %14684 = vst [vmem:[#allocation32_spill] sm:$0xff] %v9049_v51  ;;  %v14685_v55 = vand.u32 2147483647, %v14683_v31  ;;  %v790_v39 = vor.u32 4788187, %v789_v41  ;;  %v9060_v15 = vsub.s32 %v8968_v52, %v982_v63  ;;  %v1153_v7 = vshll.u32 %v14644_v3, %v1141_v24 }
 0x154   :  { %v1154_v37 = vshrl.u32 %v14643_v62, %v9034_v60  ;;  %vm401_vm6 = vcmp.lt.s32.totalorder %v8500_v50, 0  ;;  %v9066_v4 = vadd.s32 %v2226_v23, %v2222_v61  ;;  %v9068_v8 = vshrl.u32 %v1139_v28, 5 }
 0x155   :  { %vm9055_vm14 = vcmp.le.f32.partialorder %v14685_v55, 0.7853982  ;;  %v1156_v32 = vshll.u32 %v14643_v62, %v1141_v24  ;;  %v1157_v42 = vshrl.u32 %v14645_v13, %v9034_v60  ;;  %v9073_v57 = vsel %vm6828_vm3, 0, %v6827_v5 }
 0x156   :  { %v1144_v52 = vshll.u32 %v14655_v56, %v1141_v24  ;;  %v1147_v0 = vshll.u32 %v14646_v46, %v1141_v24  ;;  %v2274_v29 = vand.u32 2139095040, %v9049_v51  ;;  %v1145_v35 = vshrl.u32 %v14646_v46, %v9034_v60 }
 0x157   :  { %v1148_v28 = vshrl.u32 %v14647_v34, %v9034_v60  ;;  %v1150_v20 = vshll.u32 %v14647_v34, %v1141_v24  ;;  %v1151_v49 = vshrl.u32 %v14644_v3, %v9034_v60  ;;  %v9088_v12 = vsel %vm8934_vm4, %v14674_v17, %v3828_v30 }
 0x158   :  { %v798_v36 = vsel %vm713_vm2, %v797_v59, %v8734_v6  ;;  %v985_v44 = vsub.s32 0, %v9060_v15  ;;  %v1155_v19 = vor.u32 %v1154_v37, %v1153_v7  ;;  %v9094_v5 = vpop.eup %7561  ;;  %v14689_v41 = vand.u32 2147483647, %v8500_v50 }
 0x159   :  { %14688 = vst [vmem:[#allocation33_spill] sm:$0xff] %v9094_v5  ;;  %v2228_v63 = vadd.s32 536870912, %v9066_v4  ;;  %v1134_v54 = vand.u32 8388607, %v14405_v18  ;;  %v1158_v48 = vor.u32 %v1157_v42, %v1156_v32  ;;  %vm1162_vm7 = vcmp.lt.s32.totalorder %v9068_v8, 4  ;;  %v9106_v6 = vpop.eup %7563  ;;  %v14695_v18 = vld [vmem:[#allocation3_spill] sm:$0xff] }
 0x15a   :  { %vm9098_vm0 = vcmp.le.f32.partialorder %v14689_v41, 0.7853982  ;;  %14692 = vst [vmem:[#allocation34_spill] sm:$0xff] %v9106_v6  ;;  %v791_v1 = vand.u32 2147483647, %v790_v39  ;;  %v793_v30 = vcvt.s32.f32 %v786_v38  ;;  %v475_v59 = vsub.s32 4294967266, %v9073_v57  ;;  %v9110_v61 = vpop.eup %7565 }
 0x15b   :  { %v485_v23 = vsub.s32 4, %v8871_v40  ;;  %14693 = vst [vmem:[#allocation35_spill] sm:$0xff] %v9110_v61  ;;  %v1146_v55 = vor.u32 %v1145_v35, %v1144_v52  ;;  %v1149_v7 = vor.u32 %v1148_v28, %v1147_v0  ;;  %v1152_v37 = vor.u32 %v1151_v49, %v1150_v20 }
 0x15c   :  { %v2275_v41 = vshrl.u32 %v2274_v29, 23  ;;  %v6846_v16 = vmin.u32 %v985_v44, %v9060_v15  ;;  %vm1159_vm9 = vcmp.lt.s32.totalorder %v9068_v8, 1  ;;  %vm1161_vm11 = vcmp.lt.s32.totalorder %v9068_v8, 3 }
 0x15d   :  { %v1168_v39 = vsel %vm1162_vm7, %v1155_v19, 920167782  ;;  %v800_v38 = vsel %vm9055_vm14, 0, %v798_v36  ;;  %v9119_v32 = vshrl.u32 %v2228_v63, 30  ;;  %v1135_v42 = vor.u32 8388608, %v1134_v54  ;;  %v9123_v0 = vpop.eup %7567 }
 0x15e   :  { %v1172_v52 = vsel %vm1162_vm7, %v1158_v48, 1326507024  ;;  %14694 = vst [vmem:[#allocation36_spill] sm:$0xff] %v9123_v0  ;;  %7569 = vcosq.f32 %v9088_v12  ;;  %v794_v29 = vmul.f32 %v793_v30, %v791_v1  ;;  %v476_v35 = vadd.s32 127, %v475_v59 }
 0x15f   :  { %v9129_v28 = vsel %vm401_vm6, %v485_v23, %v8871_v40  ;;  %vm1160_vm12 = vcmp.lt.s32.totalorder %v9068_v8, 2  ;;  %v1167_v20 = vsel %vm1159_vm9, %v1146_v55, %v1149_v7  ;;  %v1169_v49 = vsel %vm1161_vm11, %v1152_v37, %v1168_v39  ;;  %v129_v23 = vpop.permute.xlu0 %128 }
 0x160   :  { %v6893_v36 = vadd.s32 4294967169, %v2275_v41  ;;  %v9136_v44 = vadd.s32 3, %v800_v38  ;;  %v987_v63 = vclz %v6846_v16  ;;  %v1171_v54 = vsel %vm1159_vm9, %v1149_v7, %v1152_v37 }
 0x161   :  { %v1173_v48 = vsel %vm1161_vm11, %v1155_v19, %v1172_v52  ;;  %v455_v40 = vadd.s32 %v8711_v53, %v8717_v9  ;;  %v2230_v1 = vshll.u32 %v9119_v32, 30  ;;  %v9145_v30 = vshll.u32 %v1135_v42, 8 }
 0x162   :  { %v2281_v59 = vadd.s32 1, %v6893_v36  ;;  %v795_v39 = vxor.u32 2147483648, %v794_v29  ;;  %v471_v41 = vsub.s32 32, %v9073_v57  ;;  %v1170_v38 = vsel %vm1160_vm12, %v1167_v20, %v1169_v49 }
 0x163   :  { %v477_v19 = vshll.u32 %v476_v35, 23  ;;  %v1143_v53 = vshrl.u32 %v14655_v56, %v9034_v60  ;;  %v1174_v9 = vsel %vm1160_vm12, %v1171_v54, %v1173_v48  ;;  %v6847_v42 = vadd.s32 4294967294, %v987_v63 }
 0x164   :  { %vm2282_vm4 = vcmp.gt.s32.totalorder %v2281_v59, 0  ;;  %v1164_v52 = vsel %vm1162_vm7, %v1152_v37, 2102212464  ;;  %v166_v22 = vmul.f32 %v14695_v18, %v129_v23  ;;  %v9161_v16 = vsub.s32 %v9066_v4, %v2230_v1 }
 0x165   :  { %v2283_v36 = vsel %vm2282_vm4, %v2281_v59, 0  ;;  %v9164_v20 = vmul.u32.u64.low %v9145_v30, %v1170_v38  ;;  %v9165_v35 = vmul.u32.u64.high %v9145_v30, %v1170_v38, %v9164_v20  ;;  %v9170_v49 = vsel %vm713_vm2, %v795_v39, %v794_v29 }
 0x166   :  { %v2285_v60 = vand.u32 31, %v2283_v36  ;;  %v472_v63 = vshll.u32 %v8929_v26, %v9073_v57  ;;  %v9175_v37 = vmul.u32.u64.low %v9145_v30, %v1174_v9  ;;  %v9176_v54 = vmul.u32.u64.high %v9145_v30, %v1174_v9, %v9175_v37  ;;  %v14696_v26 = vld [vmem:[#allocation5_spill] sm:$0xff] }
 0x167   :  { %v1163_v4 = vsel %vm1159_vm9, %v1143_v53, %v1146_v55  ;;  %v1165_v48 = vsel %vm1161_vm11, %v1149_v7, %v1164_v52  ;;  %v14410_v1 = vand.u32 2147483647, %v9049_v51  ;;  %v473_v23 = vshrl.u32 %v455_v40, %v471_v41 }
 0x168   :  { %v9183_v59 = vsub.s32 32, %v2285_v60  ;;  %v478_v29 = vor.u32 4788187, %v477_v19  ;;  %v975_v39 = vadd.s32 %v8857_v10, %v8854_v47  ;;  %v9188_v57 = vadd.f32 %v14696_v26, %v166_v22 }
 0x169   :  { %vm6848_vm10 = vcmp.lt.s32.totalorder %v6847_v42, 0  ;;  %v2233_v38 = vsub.s32 0, %v9161_v16  ;;  %v1166_v53 = vsel %vm1160_vm12, %v1163_v4, %v1165_v48  ;;  %v2297_v47 = vshll.u32 %v14644_v3, %v2285_v60 }
 0x16a   :  { %14697 = vst [vmem:[#allocation37_spill] sm:$0xff] %v9188_v57  ;;  %v2289_v55 = vshrl.u32 %v14646_v46, %v9183_v59  ;;  %v2292_v7 = vshrl.u32 %v14647_v34, %v9183_v59  ;;  %v2295_v40 = vshrl.u32 %v14644_v3, %v9183_v59  ;;  %v2298_v10 = vshrl.u32 %v14643_v62, %v9183_v59 }
 0x16b   :  { %v9202_v22 = vpop.eup %7569  ;;  %v2278_v41 = vand.u32 8388607, %v14410_v1  ;;  %v9206_v19 = vshrl.u32 %v2283_v36, 5  ;;  %v2288_v9 = vshll.u32 %v14655_v56, %v2285_v60  ;;  %v2291_v8 = vshll.u32 %v14646_v46, %v2285_v60 }
 0x16c   :  { %14698 = vst [vmem:[#allocation38_spill] sm:$0xff] %v9202_v22  ;;  %v2294_v52 = vshll.u32 %v14647_v34, %v2285_v60  ;;  %v2299_v37 = vor.u32 %v2298_v10, %v2297_v47  ;;  %v2301_v4 = vshrl.u32 %v14645_v13, %v9183_v59  ;;  %v1338_v48 = vand.u32 2139095040, %v9188_v57 }
 0x16d   :  { %v1185_v61 = vadd.s32 1, %v9165_v35  ;;  %v9215_v0 = vor.u32 %v2289_v55, %v2288_v9  ;;  %v9217_v17 = vor.u32 %v2292_v7, %v2291_v8  ;;  %v2300_v36 = vshll.u32 %v14643_v62, %v2285_v60 }
 0x16e   :  { %v474_v1 = vor.u32 %v473_v23, %v472_v63  ;;  %v479_v22 = vand.u32 2147483647, %v478_v29  ;;  %vm1184_vm5 = vc.u32 %v9176_v54, %v9164_v20  ;;  %v2296_v11 = vor.u32 %v2295_v40, %v2294_v52  ;;  %v3649_v63 = vpop.permute.xlu1 %3648 }
 0x16f   :  { %v990_v47 = vsel %vm6848_vm10, 0, %v6847_v42  ;;  %v6890_v10 = vmin.u32 %v2233_v38, %v9161_v16  ;;  %v2302_v5 = vor.u32 %v2301_v4, %v2300_v36  ;;  %vm2306_vm15 = vcmp.lt.s32.totalorder %v9206_v19, 4  ;;  %v14699_v38 = vld [vmem:[#allocation20_spill] sm:$0xff] }
 0x170   :  { %v1182_v55 = vmul.u32 %v9145_v30, %v1166_v53  ;;  %v2279_v9 = vor.u32 8388608, %v2278_v41  ;;  %vm2303_vm1 = vcmp.lt.s32.totalorder %v9206_v19, 1  ;;  %v2312_v60 = vsel %vm2306_vm15, %v2299_v37, 920167782  ;;  %v14700_v41 = vld [vmem:[#allocation12_spill] sm:$0xff] }
 0x171   :  { %v1186_v23 = vsel %vm1184_vm5, %v1185_v61, %v9165_v35  ;;  %vm2305_vm8 = vcmp.lt.s32.totalorder %v9206_v19, 3  ;;  %v2311_v42 = vsel %vm2303_vm1, %v9215_v0, %v9217_v17  ;;  %v1339_v29 = vshrl.u32 %v1338_v48, 23 }
 0x172   :  { %vm921_vm13 = vcmp.lt.s32.totalorder %v14699_v38, 0  ;;  %v991_v30 = vsub.s32 32, %v990_v47  ;;  %v995_v7 = vsub.s32 4294967266, %v990_v47  ;;  %v2313_v53 = vsel %vm2305_vm8, %v2296_v11, %v2312_v60 }
 0x173   :  { %v2315_v40 = vsel %vm2303_vm1, %v9217_v17, %v2296_v11  ;;  %v481_v61 = vcvt.s32.f32 %v474_v1  ;;  %vm2304_vm2 = vcmp.lt.s32.totalorder %v9206_v19, 2  ;;  %v2316_v35 = vsel %vm2306_vm15, %v2302_v5, 1326507024 }
 0x174   :  { %v3709_v8 = vmul.f32 %v14700_v41, %v3649_v63  ;;  %v2235_v52 = vclz %v6890_v10  ;;  %v9245_v4 = vadd.s32 %v1186_v23, %v1182_v55  ;;  %v2314_v48 = vsel %vm2304_vm2, %v2311_v42, %v2313_v53 }
 0x175   :  { %v2317_v36 = vsel %vm2305_vm8, %v2299_v37, %v2316_v35  ;;  %v9255_v1 = vsel %vm9055_vm14, %v14683_v31, %v9170_v49  ;;  %v9259_v60 = vshll.u32 %v2279_v9, 8  ;;  %v6861_v10 = vadd.s32 4294967169, %v1339_v29  ;;  %v14701_v49 = vld [vmem:[#allocation13_spill] sm:$0xff] }
 0x176   :  { %v2318_v5 = vsel %vm2304_vm2, %v2315_v40, %v2317_v36  ;;  %v9261_v55 = vmul.f32 %v481_v61, %v479_v22  ;;  %v992_v63 = vshll.u32 %v9060_v15, %v990_v47  ;;  %v993_v23 = vshrl.u32 %v975_v39, %v991_v30 }
 0x177   :  { %v996_v42 = vadd.s32 127, %v995_v7  ;;  %v9265_v37 = vmul.u32.u64.low %v9259_v60, %v2314_v48  ;;  %v9266_v53 = vmul.u32.u64.high %v9259_v60, %v2314_v48, %v9265_v37  ;;  %v1345_v2 = vadd.s32 1, %v6861_v10 }
 0x178   :  { %v9270_v35 = vadd.f32 %v14701_v49, %v3709_v8  ;;  %v6891_v31 = vadd.s32 4294967294, %v2235_v52  ;;  %v1188_v9 = vadd.s32 536870912, %v9245_v4  ;;  %7571 = vsinq.f32 %v9088_v12 }
 0x179   :  { %v9274_v29 = vmul.u32.u64.low %v9259_v60, %v2318_v5  ;;  %v9275_v22 = vmul.u32.u64.high %v9259_v60, %v2318_v5, %v9274_v29  ;;  %v9279_v15 = vand.u32 3, %v9136_v44  ;;  %v1005_v39 = vsub.s32 4, %v9015_v33 }
 0x17a   :  { %14702 = vst [vmem:[#allocation12_spill] sm:$0xff] %v9270_v35  ;;  %vm1346_vm3 = vcmp.gt.s32.totalorder %v1345_v2, 0  ;;  %v9282_v47 = vor.u32 %v993_v23, %v992_v63  ;;  %v997_v30 = vshll.u32 %v996_v42, 23  ;;  %v2308_v7 = vsel %vm2306_vm15, %v2296_v11, 2102212464 }
 0x17b   :  { %14703 = vst [vmem:[#allocation39_spill] sm:$0xff] %v9279_v15  ;;  %v1347_v40 = vsel %vm1346_vm3, %v1345_v2, 0  ;;  %7573 = vcosq.f32 %v9255_v1  ;;  %v14704_v61 = vsel %vm9098_vm0, 0, %v9129_v28  ;;  %v2287_v44 = vshrl.u32 %v14655_v56, %v9183_v59 }
 0x17c   :  { %v9291_v12 = vadd.s32 3, %v14704_v61  ;;  %v3954_v8 = vand.u32 2139095040, %v9270_v35  ;;  %v483_v52 = vxor.u32 2147483648, %v9261_v55  ;;  %vm6892_vm14 = vcmp.lt.s32.totalorder %v6891_v31, 0 }
 0x17d   :  { %v9297_v48 = vshrl.u32 %v1188_v9, 30  ;;  %v1349_v11 = vand.u32 31, %v1347_v40  ;;  %v9302_v36 = vsel %vm921_vm13, %v1005_v39, %v9015_v33  ;;  %v2223_v28 = vadd.s32 %v8996_v45, %v8993_v58 }
 0x17e   :  { %v2307_v59 = vsel %vm2303_vm1, %v2287_v44, %v9215_v0  ;;  %v2309_v5 = vsel %vm2305_vm8, %v9217_v17, %v2308_v7  ;;  %v14705_v10 = vand.u32 2147483647, %v14699_v38  ;;  %v998_v23 = vor.u32 4788187, %v997_v30 }
 0x17f   :  { %v1001_v33 = vcvt.s32.f32 %v9282_v47  ;;  %v9320_v58 = vsub.s32 32, %v1349_v11  ;;  %v9322_v45 = vsel %vm6892_vm14, 0, %v6891_v31  ;;  %v2329_v0 = vadd.s32 1, %v9266_v53 }
 0x180   :  { %vm9314_vm7 = vcmp.le.f32.partialorder %v14705_v10, 0.7853982  ;;  %v1361_v2 = vshll.u32 %v14644_v3, %v1349_v11  ;;  %v3955_v17 = vshrl.u32 %v3954_v8, 23  ;;  %v1190_v9 = vshll.u32 %v9297_v48, 30 }
 0x181   :  { %v2310_v29 = vsel %vm2304_vm2, %v2307_v59, %v2309_v5  ;;  %vm2328_vm9 = vc.u32 %v9275_v22, %v9265_v37  ;;  %v9331_v39 = vshrl.u32 %v1347_v40, 5  ;;  %v1352_v47 = vshll.u32 %v14655_v56, %v1349_v11 }
 0x182   :  { %v1355_v31 = vshll.u32 %v14646_v46, %v1349_v11  ;;  %v1362_v30 = vshrl.u32 %v14643_v62, %v9320_v58  ;;  %v1364_v7 = vshll.u32 %v14643_v62, %v1349_v11  ;;  %v1353_v61 = vshrl.u32 %v14646_v46, %v9320_v58 }
 0x183   :  { %v1356_v19 = vshrl.u32 %v14647_v34, %v9320_v58  ;;  %v1358_v44 = vshll.u32 %v14647_v34, %v1349_v11  ;;  %v1359_v40 = vshrl.u32 %v14644_v3, %v9320_v58  ;;  %v2330_v8 = vsel %vm2328_vm9, %v2329_v0, %v9266_v53 }
 0x184   :  { %v1363_v59 = vor.u32 %v1362_v30, %v1361_v2  ;;  %v1365_v5 = vshrl.u32 %v14645_v13, %v9320_v58  ;;  %v6953_v10 = vadd.s32 4294967169, %v3955_v17  ;;  %v2243_v42 = vsub.s32 4294967266, %v9322_v45 }
 0x185   :  { %v2326_v15 = vmul.u32 %v9259_v60, %v2310_v29  ;;  %v14708_v43 = vand.u32 2147483647, %v9188_v57  ;;  %vm1370_vm11 = vcmp.lt.s32.totalorder %v9331_v39, 4  ;;  %v999_v11 = vand.u32 2147483647, %v998_v23  ;;  %v9357_v0 = vpop.eup %7571 }
 0x186   :  { %v2239_v6 = vsub.s32 32, %v9322_v45  ;;  %v9355_v27 = vsub.s32 %v9245_v4, %v1190_v9  ;;  %v1366_v53 = vor.u32 %v1365_v5, %v1364_v7  ;;  %14709 = vst [vmem:[#allocation40_spill] sm:$0xff] %v9357_v0  ;;  %v1354_v17 = vor.u32 %v1353_v61, %v1352_v47 }
 0x187   :  { %v1342_v21 = vand.u32 8388607, %v14708_v43  ;;  %v9359_v2 = vadd.s32 %v2330_v8, %v2326_v15  ;;  %v1357_v30 = vor.u32 %v1356_v19, %v1355_v31  ;;  %v1360_v25 = vor.u32 %v1359_v40, %v1358_v44  ;;  %v53_v44 = vld [vmem:[%s14347_s1] sm:$0xff] }
 0x188   :  { %vm1367_vm12 = vcmp.lt.s32.totalorder %v9331_v39, 1  ;;  %vm1369_vm4 = vcmp.lt.s32.totalorder %v9331_v39, 3  ;;  %v1376_v43 = vsel %vm1370_vm11, %v1363_v59, 920167782  ;;  %v3961_v60 = vadd.s32 1, %v6953_v10  ;;  %v9365_v23 = vpop.eup %7573 }
 0x189   :  { %14710 = vst [vmem:[#allocation41_spill] sm:$0xff] %v9365_v23  ;;  %7575 = vsinq.f32 %v9255_v1  ;;  %v484_v4 = vsel %vm401_vm6, %v483_v52, %v9261_v55  ;;  %v2244_v15 = vadd.s32 127, %v2243_v42  ;;  %v1343_v9 = vor.u32 8388608, %v1342_v21 }
 0x18a   :  { %v9371_v29 = vmul.f32 %v1001_v33, %v999_v11  ;;  %v2241_v31 = vshrl.u32 %v2223_v28, %v2239_v6  ;;  %v1380_v7 = vsel %vm1370_vm11, %v1366_v53, 1326507024  ;;  %v1193_v61 = vsub.s32 0, %v9355_v27 }
 0x18b   :  { %vm1368_vm10 = vcmp.lt.s32.totalorder %v9331_v39, 2  ;;  %v1375_v1 = vsel %vm1367_vm12, %v1354_v17, %v1357_v30  ;;  %v1377_v21 = vsel %vm1369_vm4, %v1360_v25, %v1376_v43  ;;  %v2332_v55 = vadd.s32 536870912, %v9359_v2 }
 0x18c   :  { %v1379_v52 = vsel %vm1367_vm12, %v1357_v30, %v1360_v25  ;;  %v1381_v6 = vsel %vm1369_vm4, %v1363_v59, %v1380_v7  ;;  %vm3962_vm6 = vcmp.gt.s32.totalorder %v3961_v60, 0  ;;  %v2240_v28 = vshll.u32 %v9161_v16, %v9322_v45  ;;  %v54_v16 = vld [vmem:[%s14347_s1 + $0x8] sm:$0xff] }
 0x18d   :  { %v2245_v33 = vshll.u32 %v2244_v15, 23  ;;  %v9391_v42 = vshll.u32 %v1343_v9, 8  ;;  %v3963_v19 = vsel %vm3962_vm6, %v3961_v60, 0  ;;  %v9399_v40 = vsel %vm9098_vm0, %v8500_v50, %v484_v4 }
 0x18e   :  { %v1378_v59 = vsel %vm1368_vm10, %v1375_v1, %v1377_v21  ;;  %v3965_v5 = vand.u32 31, %v3963_v19  ;;  %v9407_v45 = vor.u32 %v2241_v31, %v2240_v28  ;;  %v6854_v10 = vmin.u32 %v1193_v61, %v9355_v27 }
 0x18f   :  { %v1382_v11 = vsel %vm1368_vm10, %v1379_v52, %v1381_v6  ;;  %vm5438_vm5 = vcmask 523264   ;;  %v9413_v53 = vshrl.u32 %v2332_v55, 30  ;;  %v14424_v43 = vand.u32 2147483647, %v9270_v35 }
 0x190   :  { %v9416_v60 = vsub.s32 32, %v3965_v5  ;;  %7190 = vmatprep.mubr.msk.f32.mxu0 %vm5438_vm5, %v53_v44  ;;  %v2246_v4 = vor.u32 4788187, %v2245_v33  ;;  %v1351_v15 = vshrl.u32 %v14655_v56, %v9320_v58  ;;  %v1372_v7 = vsel %vm1370_vm11, %v1360_v25, 2102212464 }
 0x191   :  { %v9422_v9 = vmul.u32.u64.low %v9391_v42, %v1378_v59  ;;  %v9423_v31 = vmul.u32.u64.high %v9391_v42, %v1378_v59, %v9422_v9  ;;  %7191 = vmatmul.mubr.msk.f32.vlgmr.msra.gmra.mxu0 %vm5438_vm5, %v54_v16  ;;  %v9430_v61 = vmul.u32.u64.low %v9391_v42, %v1382_v11  ;;  %v9431_v1 = vmul.u32.u64.high %v9391_v42, %v1382_v11, %v9430_v61  ;;  %v139_v11 = vpop.permute.xlu0 %138 }
 0x192   :  { %v3969_v21 = vshrl.u32 %v14646_v46, %v9416_v60  ;;  %v2249_v55 = vcvt.s32.f32 %v9407_v45  ;;  %v1195_v58 = vclz %v6854_v10  ;;  %v3968_v52 = vshll.u32 %v14655_v56, %v3965_v5 }
 0x193   :  { %v3972_v6 = vshrl.u32 %v14647_v34, %v9416_v60  ;;  %v2334_v28 = vshll.u32 %v9413_v53, 30  ;;  %v3958_v25 = vand.u32 8388607, %v14424_v43  ;;  %v3971_v33 = vshll.u32 %v14646_v46, %v3965_v5 }
 0x194   :  { %v3975_v44 = vshrl.u32 %v14644_v3, %v9416_v60  ;;  %v1371_v59 = vsel %vm1367_vm12, %v1351_v15, %v1354_v17  ;;  %v1373_v16 = vsel %vm1369_vm4, %v1357_v30, %v1372_v7  ;;  %v9449_v45 = vshrl.u32 %v3963_v19, 5  ;;  %v14712_v15 = vld [vmem:[#allocation23_spill] sm:$0xff] }
 0x195   :  { %v9451_v10 = vor.u32 %v3969_v21, %v3968_v52  ;;  %vm1129_vm0 = vcmp.lt.s32.totalorder %v8883_v14, 0  ;;  %v9456_v43 = vor.u32 %v3972_v6, %v3971_v33  ;;  %v3974_v24 = vshll.u32 %v14647_v34, %v3965_v5 }
 0x196   :  { %v9453_v61 = vpop.eup %7575  ;;  %v3977_v8 = vshll.u32 %v14644_v3, %v3965_v5  ;;  %v3978_v17 = vshrl.u32 %v14643_v62, %v9416_v60  ;;  %vm2169_vm15 = vcmp.lt.s32.totalorder %v14712_v15, 0  ;;  %v2247_v30 = vand.u32 2147483647, %v2246_v4 }
 0x197   :  { %14711 = vst [vmem:[#allocation42_spill] sm:$0xff] %v9453_v61  ;;  %v6855_v19 = vadd.s32 4294967294, %v1195_v58  ;;  %v3980_v7 = vshll.u32 %v14643_v62, %v3965_v5  ;;  %v3981_v21 = vshrl.u32 %v14645_v13, %v9416_v60  ;;  %v3959_v52 = vor.u32 8388608, %v3958_v25 }
 0x198   :  { %v3976_v47 = vor.u32 %v3975_v44, %v3974_v24  ;;  %v3979_v6 = vor.u32 %v3978_v17, %v3977_v8  ;;  %v168_v33 = vmul.f32 %v14695_v18, %v139_v11  ;;  %v1374_v23 = vsel %vm1368_vm10, %v1371_v59, %v1373_v16 }
 0x199   :  { %v1393_v61 = vadd.s32 1, %v9423_v31  ;;  %v3982_v50 = vor.u32 %v3981_v21, %v3980_v7  ;;  %vm3983_vm1 = vcmp.lt.s32.totalorder %v9449_v45, 1  ;;  %v14713_v4 = vand.u32 2147483647, %v8883_v14 }
 0x19a   :  { %v9478_v58 = vsub.s32 %v9359_v2, %v2334_v28  ;;  %vm1392_vm2 = vc.u32 %v9431_v1, %v9422_v9  ;;  %vm3986_vm3 = vcmp.lt.s32.totalorder %v9449_v45, 4  ;;  %v3991_v39 = vsel %vm3983_vm1, %v9451_v10, %v9456_v43 }
 0x19b   :  { %vm9473_vm8 = vcmp.le.f32.partialorder %v14713_v4, 0.7853982  ;;  %vm6856_vm14 = vcmp.lt.s32.totalorder %v6855_v19, 0  ;;  %v1213_v8 = vsub.s32 4, %v9297_v48  ;;  %vm3985_vm9 = vcmp.lt.s32.totalorder %v9449_v45, 3 }
 0x19c   :  { %v3992_v24 = vsel %vm3986_vm3, %v3979_v6, 920167782  ;;  %v14716_v2 = vand.u32 2147483647, %v14712_v15  ;;  %v1390_v25 = vmul.u32 %v9391_v42, %v1374_v23  ;;  %vm3984_vm12 = vcmp.lt.s32.totalorder %v9449_v45, 2 }
 0x19d   :  { %v3993_v44 = vsel %vm3985_vm9, %v3976_v47, %v3992_v24  ;;  %v3995_v59 = vsel %vm3983_vm1, %v9456_v43, %v3976_v47  ;;  %v2250_v16 = vmul.f32 %v2249_v55, %v2247_v30  ;;  %v1394_v11 = vsel %vm1392_vm2, %v1393_v61, %v9423_v31 }
 0x19e   :  { %vm9493_vm11 = vcmp.le.f32.partialorder %v14716_v2, 0.7853982  ;;  %v3994_v17 = vsel %vm3984_vm12, %v3991_v39, %v3993_v44  ;;  %v3996_v7 = vsel %vm3986_vm3, %v3982_v50, 1326507024  ;;  %v2337_v23 = vsub.s32 0, %v9478_v58 }
 0x19f   :  { %v3997_v42 = vsel %vm3985_vm9, %v3979_v6, %v3996_v7  ;;  %v9512_v21 = vshll.u32 %v3959_v52, 8  ;;  %v9515_v4 = vadd.f32 %v14696_v26, %v168_v33  ;;  %7577 = vcosq.f32 %v9399_v40 }
 0x1a0   :  { %v14720_v31 = vsel %vm9314_vm7, 0, %v9302_v36  ;;  %v1198_v61 = vsel %vm6856_vm14, 0, %v6855_v19  ;;  %v3998_v50 = vsel %vm3984_vm12, %v3995_v59, %v3997_v42  ;;  %v14721_v30 = vsub.s32 4, %v9119_v32 }
 0x1a1   :  { %14719 = vst [vmem:[#allocation43_spill] sm:$0xff] %v9515_v4  ;;  %v1012_v55 = vadd.s32 3, %v14720_v31  ;;  %v9530_v6 = vadd.s32 %v1394_v11, %v1390_v25  ;;  %v9533_v33 = vmul.u32.u64.low %v9512_v21, %v3994_v17  ;;  %v9534_v39 = vmul.u32.u64.high %v9512_v21, %v3994_v17, %v9533_v33 }
 0x1a2   :  { %v2254_v52 = vsel %vm2169_vm15, %v14721_v30, %v9119_v32  ;;  %v14722_v36 = vxor.u32 2147483648, %v9371_v29  ;;  %v1214_v24 = vsel %vm1129_vm0, %v1213_v8, %v9297_v48  ;;  %v2251_v25 = vxor.u32 2147483648, %v2250_v16 }
 0x1a3   :  { %v9546_v2 = vmul.u32.u64.low %v9512_v21, %v3998_v50  ;;  %v9547_v32 = vmul.u32.u64.high %v9512_v21, %v3998_v50, %v9546_v2  ;;  %v1203_v44 = vsub.s32 4294967266, %v1198_v61  ;;  %v6894_v59 = vmin.u32 %v2337_v23, %v9478_v58 }
 0x1a4   :  { %v1004_v19 = vsel %vm921_vm13, %v14722_v36, %v9371_v29  ;;  %v1546_v11 = vand.u32 2139095040, %v9515_v4  ;;  %7579 = vsinq.f32 %v9399_v40  ;;  %v9553_v17 = vand.u32 3, %v9291_v12 }
 0x1a5   :  { %v1183_v29 = vadd.s32 %v9164_v20, %v9176_v54  ;;  %v1199_v7 = vsub.s32 32, %v1198_v61  ;;  %v9557_v48 = vand.u32 3, %v1012_v55  ;;  %v1396_v8 = vadd.s32 536870912, %v9530_v6  ;;  %v149_v54 = vpop.permute.xlu0 %148 }
 0x1a6   :  { %14723 = vst [vmem:[#allocation44_spill] sm:$0xff] %v9553_v17  ;;  %v3988_v42 = vsel %vm3986_vm3, %v3976_v47, 2102212464  ;;  %v1547_v31 = vshrl.u32 %v1546_v11, 23  ;;  %v1007_v23 = vsel %vm9314_vm7, %v14699_v38, %v1004_v19  ;;  %v2256_v12 = vsel %vm9493_vm11, 0, %v2254_v52 }
 0x1a7   :  { %14724 = vst [vmem:[#allocation45_spill] sm:$0xff] %v9557_v48  ;;  %v1216_v40 = vsel %vm9473_vm8, 0, %v1214_v24  ;;  %v3967_v20 = vshrl.u32 %v14655_v56, %v9416_v60  ;;  %v2252_v55 = vsel %vm2169_vm15, %v2251_v25, %v2250_v16  ;;  %v1204_v50 = vadd.s32 127, %v1203_v44 }
 0x1a8   :  { %v2339_v47 = vclz %v6894_v59  ;;  %v6869_v30 = vadd.s32 4294967169, %v1547_v31  ;;  %v1200_v36 = vshll.u32 %v9355_v27, %v1198_v61  ;;  %v1201_v63 = vshrl.u32 %v1183_v29, %v1199_v7  ;;  %v55_v27 = vld [vmem:[%s14347_s1 + $0x10] sm:$0xff] }
 0x1a9   :  { %v3987_v52 = vsel %vm3983_vm1, %v3967_v20, %v9451_v10  ;;  %v3989_v19 = vsel %vm3985_vm9, %v9456_v43, %v3988_v42  ;;  %v9580_v24 = vshrl.u32 %v1396_v8, 30  ;;  %v4009_v60 = vadd.s32 1, %v9534_v39  ;;  %7193 = vmatprep.mubr.msk.f32.mxu0 %vm5438_vm5, %v55_v27 }
 0x1aa   :  { %v1553_v2 = vadd.s32 1, %v6869_v30  ;;  %v170_v16 = vmul.f32 %v14695_v18, %v149_v54  ;;  %7581 = vcosq.f32 %v1007_v23  ;;  %v2260_v61 = vadd.s32 3, %v2256_v12 }
 0x1ab   :  { %v1220_v25 = vadd.s32 3, %v1216_v40  ;;  %vm4008_vm13 = vc.u32 %v9547_v32, %v9533_v33  ;;  %v1205_v43 = vshll.u32 %v1204_v50, 23  ;;  %v6895_v10 = vadd.s32 4294967294, %v2339_v47 }
 0x1ac   :  { %v3990_v44 = vsel %vm3984_vm12, %v3987_v52, %v3989_v19  ;;  %vm1554_vm7 = vcmp.gt.s32.totalorder %v1553_v2, 0  ;;  %v9595_v59 = vsel %vm9493_vm11, %v14712_v15, %v2252_v55  ;;  %v1202_v11 = vor.u32 %v1201_v63, %v1200_v36  ;;  %v9598_v8 = vpop.eup %7577 }
 0x1ad   :  { %v14429_v29 = vand.u32 2147483647, %v9515_v4  ;;  %v1555_v7 = vsel %vm1554_vm7, %v1553_v2, 0  ;;  %14725 = vst [vmem:[#allocation46_spill] sm:$0xff] %v9598_v8  ;;  %v1398_v42 = vshll.u32 %v9580_v24, 30  ;;  %v4010_v31 = vsel %vm4008_vm13, %v4009_v60, %v9534_v39 }
 0x1ae   :  { %v1557_v12 = vand.u32 31, %v1555_v7  ;;  %v9603_v45 = vadd.f32 %v14696_v26, %v170_v16  ;;  %7583 = vsinq.f32 %v1007_v23  ;;  %v9605_v40 = vand.u32 3, %v2260_v61 }
 0x1af   :  { %v9607_v28 = vand.u32 3, %v1220_v25  ;;  %v4006_v20 = vmul.u32 %v9512_v21, %v3990_v44  ;;  %7585 = vcosq.f32 %v9595_v59  ;;  %v1206_v54 = vor.u32 4788187, %v1205_v43 }
 0x1b0   :  { %14726 = vst [vmem:[#allocation47_spill] sm:$0xff] %v9603_v45  ;;  %14727 = vst [vmem:[#allocation48_spill] sm:$0xff] %v9605_v40  ;;  %vm6896_vm4 = vcmp.lt.s32.totalorder %v6895_v10, 0  ;;  %v1558_v55 = vsub.s32 32, %v1557_v12  ;;  %v1550_v39 = vand.u32 8388607, %v14429_v29  ;;  %v1560_v47 = vshll.u32 %v14655_v56, %v1557_v12 }
 0x1b1   :  { %14728 = vst [vmem:[#allocation49_spill] sm:$0xff] %v9607_v28  ;;  %v9611_v50 = vadd.s32 %v4010_v31, %v4006_v20  ;;  %v1563_v23 = vshll.u32 %v14646_v46, %v1557_v12  ;;  %v9617_v30 = vpop.eup %7579  ;;  %v1209_v36 = vcvt.s32.f32 %v1202_v11  ;;  %vm2273_vm10 = vcmp.lt.s32.totalorder %v9049_v51, 0 }
 0x1b2   :  { %14729 = vst [vmem:[#allocation50_spill] sm:$0xff] %v9617_v30  ;;  %v9621_v21 = vsub.s32 %v9530_v6, %v1398_v42  ;;  %v1561_v63 = vshrl.u32 %v14646_v46, %v1558_v55  ;;  %v1754_v52 = vand.u32 2139095040, %v9603_v45  ;;  %v9625_v19 = vshrl.u32 %v1555_v7, 5 }
 0x1b3   :  { %v1564_v60 = vshrl.u32 %v14647_v34, %v1558_v55  ;;  %v1566_v2 = vshll.u32 %v14647_v34, %v1557_v12  ;;  %v1567_v16 = vshrl.u32 %v14644_v3, %v1558_v55  ;;  %v1207_v27 = vand.u32 2147483647, %v1206_v54 }
 0x1b4   :  { %v9631_v61 = vsel %vm6896_vm4, 0, %v6895_v10  ;;  %v1569_v25 = vshll.u32 %v14644_v3, %v1557_v12  ;;  %v1570_v6 = vshrl.u32 %v14643_v62, %v1558_v55  ;;  %v4012_v43 = vadd.s32 536870912, %v9611_v50 }
 0x1b5   :  { %v1551_v44 = vor.u32 8388608, %v1550_v39  ;;  %v1562_v11 = vor.u32 %v1561_v63, %v1560_v47  ;;  %v1565_v7 = vor.u32 %v1564_v60, %v1563_v23  ;;  %v1572_v31 = vshll.u32 %v14643_v62, %v1557_v12 }
 0x1b6   :  { %v1571_v42 = vor.u32 %v1570_v6, %v1569_v25  ;;  %v1573_v20 = vshrl.u32 %v14645_v13, %v1558_v55  ;;  %v1755_v29 = vshrl.u32 %v1754_v52, 23  ;;  %v2357_v54 = vsub.s32 4, %v9413_v53 }
 0x1b7   :  { %v1401_v10 = vsub.s32 0, %v9621_v21  ;;  %v1568_v28 = vor.u32 %v1567_v16, %v1566_v2  ;;  %vm1575_vm6 = vcmp.lt.s32.totalorder %v9625_v19, 1  ;;  %v9641_v38 = vpop.eup %7581  ;;  %v14731_v48 = vand.u32 2147483647, %v9049_v51 }
 0x1b8   :  { %14730 = vst [vmem:[#allocation51_spill] sm:$0xff] %v9641_v38  ;;  %v2327_v12 = vadd.s32 %v9265_v37, %v9275_v22  ;;  %v1574_v47 = vor.u32 %v1573_v20, %v1572_v31  ;;  %vm1577_vm1 = vcmp.lt.s32.totalorder %v9625_v19, 3  ;;  %vm1578_vm2 = vcmp.lt.s32.totalorder %v9625_v19, 4 }
 0x1b9   :  { %vm9645_vm15 = vcmp.le.f32.partialorder %v14731_v48, 0.7853982  ;;  %v2347_v23 = vsub.s32 4294967266, %v9631_v61  ;;  %v9654_v63 = vshrl.u32 %v4012_v43, 30  ;;  %vm1576_vm3 = vcmp.lt.s32.totalorder %v9625_v19, 2 }
 0x1ba   :  { %v1583_v48 = vsel %vm1575_vm6, %v1562_v11, %v1565_v7  ;;  %v9659_v52 = vmul.f32 %v1209_v36, %v1207_v27  ;;  %v1584_v60 = vsel %vm1578_vm2, %v1571_v42, 920167782  ;;  %v9663_v37 = vshll.u32 %v1551_v44, 8  ;;  %v94_v44 = vpop.permute.xlu1 %93 }
 0x1bb   :  { %v6877_v22 = vadd.s32 4294967169, %v1755_v29  ;;  %v9668_v2 = vsel %vm2273_vm10, %v2357_v54, %v9413_v53  ;;  %v6862_v16 = vmin.u32 %v1401_v10, %v9621_v21  ;;  %v1585_v25 = vsel %vm1577_vm1, %v1568_v28, %v1584_v60  ;;  %v9675_v27 = vpop.eup %7583 }
 0x1bc   :  { %v1587_v36 = vsel %vm1575_vm6, %v1565_v7, %v1568_v28  ;;  %14734 = vst [vmem:[#allocation52_spill] sm:$0xff] %v9675_v27  ;;  %v2343_v6 = vsub.s32 32, %v9631_v61  ;;  %v1559_v43 = vshrl.u32 %v14655_v56, %v1558_v55  ;;  %v1586_v29 = vsel %vm1576_vm3, %v1583_v48, %v1585_v25  ;;  %v9683_v31 = vpop.eup %7585 }
 0x1bd   :  { %v1588_v53 = vsel %vm1578_vm2, %v1574_v47, 1326507024  ;;  %14735 = vst [vmem:[#allocation53_spill] sm:$0xff] %v9683_v31  ;;  %v2348_v20 = vadd.s32 127, %v2347_v23  ;;  %v4014_v54 = vshll.u32 %v9654_v63, 30  ;;  %v1761_v47 = vadd.s32 1, %v6877_v22 }
 0x1be   :  { %v1580_v10 = vsel %vm1578_vm2, %v1568_v28, 2102212464  ;;  %v1589_v60 = vsel %vm1577_vm1, %v1571_v42, %v1588_v53  ;;  %v9693_v48 = vmul.u32.u64.low %v9663_v37, %v1586_v29  ;;  %v9694_v25 = vmul.u32.u64.high %v9663_v37, %v1586_v29, %v9693_v48 }
 0x1bf   :  { %v1590_v55 = vsel %vm1576_vm3, %v1587_v36, %v1589_v60  ;;  %v1403_v38 = vclz %v6862_v16  ;;  %v159_v15 = vmul.f32 %v14695_v18, %v94_v44  ;;  %v1211_v28 = vxor.u32 2147483648, %v9659_v52 }
 0x1c0   :  { %v9698_v23 = vmul.u32.u64.low %v9663_v37, %v1590_v55  ;;  %v9699_v27 = vmul.u32.u64.high %v9663_v37, %v1590_v55, %v9698_v23  ;;  %v1579_v42 = vsel %vm1575_vm6, %v1559_v43, %v1562_v11  ;;  %v1581_v36 = vsel %vm1577_vm1, %v1565_v7, %v1580_v10 }
 0x1c1   :  { %vm1762_vm14 = vcmp.gt.s32.totalorder %v1761_v47, 0  ;;  %v2360_v22 = vsel %vm9645_vm15, 0, %v9668_v2  ;;  %v9711_v16 = vsub.s32 %v9611_v50, %v4014_v54  ;;  %v14436_v29 = vand.u32 2147483647, %v9603_v45  ;;  %v56_v50 = vld [vmem:[%s14347_s1 + $0x18] sm:$0xff] }
 0x1c2   :  { %v1763_v53 = vsel %vm1762_vm14, %v1761_v47, 0  ;;  %v2344_v44 = vshll.u32 %v9478_v58, %v9631_v61  ;;  %v2345_v60 = vshrl.u32 %v2327_v12, %v2343_v6  ;;  %v2349_v55 = vshll.u32 %v2348_v20, 23  ;;  %7194 = vmatmul.mubr.msk.f32.gmra.mxu0 %vm5438_vm5, %v56_v50 }
 0x1c3   :  { %v1765_v11 = vand.u32 31, %v1763_v53  ;;  %v6863_v43 = vadd.s32 4294967294, %v1403_v38  ;;  %v1582_v7 = vsel %vm1576_vm3, %v1579_v42, %v1581_v36  ;;  %v1601_v10 = vadd.s32 1, %v9694_v25 }
 0x1c4   :  { %v9720_v2 = vadd.f32 %v14696_v26, %v159_v15  ;;  %vm1600_vm9 = vc.u32 %v9699_v27, %v9693_v48  ;;  %v4017_v19 = vsub.s32 0, %v9711_v16  ;;  %v1758_v15 = vand.u32 8388607, %v14436_v29 }
 0x1c5   :  { %v1766_v58 = vsub.s32 32, %v1765_v11  ;;  %v1768_v61 = vshll.u32 %v14655_v56, %v1765_v11  ;;  %v1771_v38 = vshll.u32 %v14646_v46, %v1765_v11  ;;  %v9733_v12 = vshrl.u32 %v1763_v53, 5 }
 0x1c6   :  { %14736 = vst [vmem:[#allocation54_spill] sm:$0xff] %v9720_v2  ;;  %v1777_v6 = vshll.u32 %v14644_v3, %v1765_v11  ;;  %v1774_v47 = vshll.u32 %v14647_v34, %v1765_v11  ;;  %vm6864_vm11 = vcmp.lt.s32.totalorder %v6863_v43, 0  ;;  %v1598_v42 = vmul.u32 %v9663_v37, %v1582_v7 }
 0x1c7   :  { %v1769_v20 = vshrl.u32 %v14646_v46, %v1766_v58  ;;  %v1772_v54 = vshrl.u32 %v14647_v34, %v1766_v58  ;;  %v1775_v23 = vshrl.u32 %v14644_v3, %v1766_v58  ;;  %v1602_v36 = vsel %vm1600_vm9, %v1601_v10, %v9694_v25 }
 0x1c8   :  { %v1778_v50 = vshrl.u32 %v14643_v62, %v1766_v58  ;;  %v1780_v31 = vshll.u32 %v14643_v62, %v1765_v11  ;;  %v1781_v40 = vshrl.u32 %v14645_v13, %v1766_v58  ;;  %v6954_v17 = vmin.u32 %v4017_v19, %v9711_v16 }
 0x1c9   :  { %v9743_v29 = vor.u32 %v1769_v20, %v1768_v61  ;;  %v9745_v53 = vor.u32 %v1772_v54, %v1771_v38  ;;  %vm1783_vm12 = vcmp.lt.s32.totalorder %v9733_v12, 1  ;;  %v610_v30 = vand.u32 2139095040, %v9720_v2 }
 0x1ca   :  { %v1779_v8 = vor.u32 %v1778_v50, %v1777_v6  ;;  %v9752_v37 = vsel %vm6864_vm11, 0, %v6863_v43  ;;  %v1759_v25 = vor.u32 8388608, %v1758_v15  ;;  %v1776_v7 = vor.u32 %v1775_v23, %v1774_v47 }
 0x1cb   :  { %vm1786_vm13 = vcmp.lt.s32.totalorder %v9733_v12, 4  ;;  %v2346_v10 = vor.u32 %v2345_v60, %v2344_v44  ;;  %v2350_v61 = vor.u32 4788187, %v2349_v55  ;;  %vm1337_vm7 = vcmp.lt.s32.totalorder %v9188_v57, 0 }
 0x1cc   :  { %v9756_v11 = vadd.s32 %v1602_v36, %v1598_v42  ;;  %vm1785_vm4 = vcmp.lt.s32.totalorder %v9733_v12, 3  ;;  %v1782_v38 = vor.u32 %v1781_v40, %v1780_v31  ;;  %vm1784_vm6 = vcmp.lt.s32.totalorder %v9733_v12, 2 }
 0x1cd   :  { %v1791_v43 = vsel %vm1783_vm12, %v9743_v29, %v9745_v53  ;;  %v1792_v19 = vsel %vm1786_vm13, %v1779_v8, 920167782  ;;  %v2364_v15 = vadd.s32 3, %v2360_v22  ;;  %v1411_v44 = vsub.s32 4294967266, %v9752_v37 }
 0x1ce   :  { %v4019_v60 = vclz %v6954_v17  ;;  %v611_v55 = vshrl.u32 %v610_v30, 23  ;;  %v1212_v6 = vsel %vm1129_vm0, %v1211_v28, %v9659_v52  ;;  %v14737_v40 = vand.u32 2147483647, %v9188_v57 }
 0x1cf   :  { %v1391_v20 = vadd.s32 %v9422_v9, %v9431_v1  ;;  %v1793_v22 = vsel %vm1785_vm4, %v1776_v7, %v1792_v19  ;;  %v9780_v54 = vshll.u32 %v1759_v25, 8  ;;  %v2353_v17 = vcvt.s32.f32 %v2346_v10 }
 0x1d0   :  { %vm9772_vm1 = vcmp.le.f32.partialorder %v14737_v40, 0.7853982  ;;  %v1604_v30 = vadd.s32 536870912, %v9756_v11  ;;  %v1794_v52 = vsel %vm1784_vm6, %v1791_v43, %v1793_v22  ;;  %v1795_v28 = vsel %vm1783_vm12, %v9745_v53, %v1776_v7  ;;  %v3645_v22 = vpop.permute.xlu0 %3644 }
 0x1d1   :  { %v2351_v47 = vand.u32 2147483647, %v2350_v61  ;;  %v1407_v23 = vsub.s32 32, %v9752_v37  ;;  %v1421_v9 = vsub.s32 4, %v9580_v24  ;;  %v1796_v1 = vsel %vm1786_vm13, %v1782_v38, 1326507024 }
 0x1d2   :  { %v1412_v42 = vadd.s32 127, %v1411_v44  ;;  %v6955_v36 = vadd.s32 4294967294, %v4019_v60  ;;  %v1797_v50 = vsel %vm1785_vm4, %v1779_v8, %v1796_v1  ;;  %v6833_v25 = vadd.s32 4294967169, %v611_v55 }
 0x1d3   :  { %v1767_v10 = vshrl.u32 %v14655_v56, %v1766_v58  ;;  %v1798_v43 = vsel %vm1784_vm6, %v1795_v28, %v1797_v50  ;;  %v9798_v61 = vmul.u32.u64.low %v9780_v54, %v1794_v52  ;;  %v9799_v19 = vmul.u32.u64.high %v9780_v54, %v1794_v52, %v9798_v61 }
 0x1d4   :  { %v9802_v40 = vshrl.u32 %v1604_v30, 30  ;;  %v9805_v38 = vmul.u32.u64.low %v9780_v54, %v1798_v43  ;;  %v9806_v44 = vmul.u32.u64.high %v9780_v54, %v1798_v43, %v9805_v38  ;;  %v617_v60 = vadd.s32 1, %v6833_v25 }
 0x1d5   :  { %7587 = vsinq.f32 %v9595_v59  ;;  %v1215_v8 = vsel %vm9473_vm8, %v8883_v14, %v1212_v6  ;;  %v2354_v58 = vmul.f32 %v2353_v17, %v2351_v47  ;;  %v1788_v55 = vsel %vm1786_vm13, %v1776_v7, 2102212464 }
 0x1d6   :  { %v1408_v30 = vshll.u32 %v9621_v21, %v9752_v37  ;;  %v1409_v52 = vshrl.u32 %v1391_v20, %v1407_v23  ;;  %vm6956_vm0 = vcmp.lt.s32.totalorder %v6955_v36, 0  ;;  %vm618_vm2 = vcmp.gt.s32.totalorder %v617_v60, 0 }
 0x1d7   :  { %v9816_v28 = vand.u32 3, %v2364_v15  ;;  %v9821_v59 = vsel %vm1337_vm7, %v1421_v9, %v9580_v24  ;;  %v619_v1 = vsel %vm618_vm2, %v617_v60, 0  ;;  %v3708_v5 = vmul.f32 %v14700_v41, %v3645_v22 }
 0x1d8   :  { %v1413_v6 = vshll.u32 %v1412_v42, 23  ;;  %v1606_v17 = vshll.u32 %v9802_v40, 30  ;;  %v1787_v21 = vsel %vm1783_vm12, %v1767_v10, %v9743_v29  ;;  %v1789_v37 = vsel %vm1785_vm4, %v9745_v53, %v1788_v55 }
 0x1d9   :  { %14740 = vst [vmem:[#allocation55_spill] sm:$0xff] %v9816_v28  ;;  %7589 = vcosq.f32 %v1215_v8  ;;  %v9831_v7 = vsel %vm6956_vm0, 0, %v6955_v36  ;;  %v14442_v24 = vand.u32 2147483647, %v9720_v2  ;;  %v621_v15 = vand.u32 31, %v619_v1 }
 0x1da   :  { %7591 = vsinq.f32 %v1215_v8  ;;  %v2355_v20 = vxor.u32 2147483648, %v2354_v58  ;;  %v9834_v47 = vor.u32 %v1409_v52, %v1408_v30  ;;  %v1790_v29 = vsel %vm1784_vm6, %v1787_v21, %v1789_v37 }
 0x1db   :  { %v1809_v9 = vadd.s32 1, %v9799_v19  ;;  %v622_v53 = vsub.s32 32, %v621_v15  ;;  %v9843_v42 = vadd.f32 %v14701_v49, %v3708_v5  ;;  %v9845_v36 = vor.u32 4788187, %v1413_v6 }
 0x1dc   :  { %v4023_v50 = vsub.s32 32, %v9831_v7  ;;  %v9849_v25 = vsub.s32 %v9756_v11, %v1606_v17  ;;  %vm1808_vm8 = vc.u32 %v9806_v44, %v9798_v61  ;;  %v4027_v10 = vsub.s32 4294967266, %v9831_v7 }
 0x1dd   :  { %14741 = vst [vmem:[#allocation56_spill] sm:$0xff] %v9843_v42  ;;  %v614_v12 = vand.u32 8388607, %v14442_v24  ;;  %v625_v43 = vshrl.u32 %v14646_v46, %v622_v53  ;;  %v628_v38 = vshrl.u32 %v14647_v34, %v622_v53  ;;  %v1806_v60 = vmul.u32 %v9780_v54, %v1790_v29 }
 0x1de   :  { %v624_v22 = vshll.u32 %v14655_v56, %v621_v15  ;;  %v631_v8 = vshrl.u32 %v14644_v3, %v622_v53  ;;  %v634_v11 = vshrl.u32 %v14643_v62, %v622_v53  ;;  %v1810_v55 = vsel %vm1808_vm8, %v1809_v9, %v9799_v19 }
 0x1df   :  { %v627_v30 = vshll.u32 %v14646_v46, %v621_v15  ;;  %v633_v52 = vshll.u32 %v14644_v3, %v621_v15  ;;  %v3850_v5 = vand.u32 2139095040, %v9843_v42  ;;  %v1609_v6 = vsub.s32 0, %v9849_v25 }
 0x1e0   :  { %v9867_v17 = vshrl.u32 %v619_v1, 5  ;;  %v626_v21 = vor.u32 %v625_v43, %v624_v22  ;;  %v630_v54 = vshll.u32 %v14647_v34, %v621_v15  ;;  %v636_v24 = vshll.u32 %v14643_v62, %v621_v15 }
 0x1e1   :  { %v629_v37 = vor.u32 %v628_v38, %v627_v30  ;;  %v635_v29 = vor.u32 %v634_v11, %v633_v52  ;;  %v637_v23 = vshrl.u32 %v14645_v13, %v622_v53  ;;  %v2356_v9 = vsel %vm2273_vm10, %v2355_v20, %v2354_v58  ;;  %v1873_v52 = vpop.permute.xlu1 %1872 }
 0x1e2   :  { %v9872_v19 = vpop.eup %7587  ;;  %v9876_v14 = vadd.s32 %v1810_v55, %v1806_v60  ;;  %v615_v28 = vor.u32 8388608, %v614_v12  ;;  %v632_v0 = vor.u32 %v631_v8, %v630_v54  ;;  %v1417_v1 = vcvt.s32.f32 %v9834_v47 }
 0x1e3   :  { %14742 = vst [vmem:[#allocation57_spill] sm:$0xff] %v9872_v19  ;;  %v4007_v43 = vadd.s32 %v9533_v33, %v9547_v32  ;;  %v638_v38 = vor.u32 %v637_v23, %v636_v24  ;;  %v3851_v22 = vshrl.u32 %v3850_v5, 23  ;;  %v1415_v15 = vand.u32 2147483647, %v9845_v36 }
 0x1e4   :  { %v6870_v11 = vmin.u32 %v1609_v6, %v9849_v25  ;;  %vm639_vm3 = vcmp.lt.s32.totalorder %v9867_v17, 1  ;;  %vm642_vm14 = vcmp.lt.s32.totalorder %v9867_v17, 4  ;;  %v4028_v20 = vadd.s32 127, %v4027_v10 }
 0x1e5   :  { %v4025_v58 = vshrl.u32 %v4007_v43, %v4023_v50  ;;  %v647_v12 = vsel %vm639_vm3, %v626_v21, %v629_v37  ;;  %v648_v47 = vsel %vm642_vm14, %v635_v29, 920167782  ;;  %v1812_v33 = vadd.s32 536870912, %v9876_v14 }
 0x1e6   :  { %v9889_v60 = vpop.eup %7589  ;;  %vm641_vm10 = vcmp.lt.s32.totalorder %v9867_v17, 3  ;;  %v651_v32 = vsel %vm639_vm3, %v629_v37, %v632_v0  ;;  %v655_v24 = vshll.u32 %v615_v28, 8  ;;  %vm3953_vm9 = vcmp.lt.s32.totalorder %v9270_v35, 0 }
 0x1e7   :  { %14743 = vst [vmem:[#allocation58_spill] sm:$0xff] %v9889_v60  ;;  %v9895_v23 = vpop.eup %7591  ;;  %vm640_vm11 = vcmp.lt.s32.totalorder %v9867_v17, 2  ;;  %v649_v36 = vsel %vm641_vm10, %v632_v0, %v648_v47  ;;  %v652_v50 = vsel %vm642_vm14, %v638_v38, 1326507024  ;;  %v6949_v10 = vadd.s32 4294967169, %v3851_v22  ;;  %v14745_v47 = vld [vmem:[#allocation4_spill] sm:$0xff] }
 0x1e8   :  { %14744 = vst [vmem:[#allocation59_spill] sm:$0xff] %v9895_v23  ;;  %v1611_v8 = vclz %v6870_v11  ;;  %v644_v55 = vsel %vm642_vm14, %v632_v0, 2102212464  ;;  %v650_v28 = vsel %vm640_vm11, %v647_v12, %v649_v36  ;;  %v653_v30 = vsel %vm641_vm10, %v635_v29, %v652_v50 }
 0x1e9   :  { %v623_v5 = vshrl.u32 %v14655_v56, %v622_v53  ;;  %v654_v6 = vsel %vm640_vm11, %v651_v32, %v653_v30  ;;  %v9912_v54 = vmul.u32.u64.low %v655_v24, %v650_v28  ;;  %v9913_v43 = vmul.u32.u64.high %v655_v24, %v650_v28, %v9912_v54 }
 0x1ea   :  { %v4029_v38 = vshll.u32 %v4028_v20, 23  ;;  %v9916_v22 = vshrl.u32 %v1812_v33, 30  ;;  %v9918_v0 = vmul.u32.u64.low %v655_v24, %v654_v6  ;;  %v9919_v11 = vmul.u32.u64.high %v655_v24, %v654_v6, %v9918_v0 }
 0x1eb   :  { %v643_v12 = vsel %vm639_vm3, %v623_v5, %v626_v21  ;;  %v645_v29 = vsel %vm641_vm10, %v629_v37, %v644_v55  ;;  %v3857_v53 = vadd.s32 1, %v6949_v10  ;;  %v1927_v36 = vmul.f32 %v14745_v47, %v1873_v52 }
 0x1ec   :  { %v9929_v32 = vsel %vm9645_vm15, %v9049_v51, %v2356_v9  ;;  %v14746_v20 = vsel %vm9772_vm1, 0, %v9821_v59  ;;  %v4024_v50 = vshll.u32 %v9711_v16, %v9831_v7  ;;  %v4037_v21 = vsub.s32 4, %v9654_v63  ;;  %v14747_v7 = vld [vmem:[#allocation6_spill] sm:$0xff] }
 0x1ed   :  { %v1428_v33 = vadd.s32 3, %v14746_v20  ;;  %v1418_v28 = vmul.f32 %v1417_v1, %v1415_v15  ;;  %v6871_v37 = vadd.s32 4294967294, %v1611_v8  ;;  %v665_v10 = vadd.s32 1, %v9913_v43 }
 0x1ee   :  { %vm3858_vm12 = vcmp.gt.s32.totalorder %v3857_v53, 0  ;;  %v4026_v55 = vor.u32 %v4025_v58, %v4024_v50  ;;  %v4030_v30 = vor.u32 4788187, %v4029_v38  ;;  %v1814_v39 = vshll.u32 %v9916_v22, 30 }
 0x1ef   :  { %v646_v9 = vsel %vm640_vm11, %v643_v12, %v645_v29  ;;  %vm664_vm15 = vc.u32 %v9919_v11, %v9912_v54  ;;  %v14447_v59 = vand.u32 2147483647, %v9843_v42  ;;  %v3859_v16 = vsel %vm3858_vm12, %v3857_v53, 0 }
 0x1f0   :  { %v9946_v52 = vadd.f32 %v14747_v7, %v1927_v36  ;;  %7593 = vcosq.f32 %v9929_v32  ;;  %v9949_v1 = vand.u32 3, %v1428_v33  ;;  %v9954_v15 = vsel %vm3953_vm9, %v4037_v21, %v9654_v63 }
 0x1f1   :  { %v666_v17 = vsel %vm664_vm15, %v665_v10, %v9913_v43  ;;  %v1419_v58 = vxor.u32 2147483648, %v1418_v28  ;;  %v14750_v8 = vand.u32 2147483647, %v9270_v35  ;;  %vm6872_vm4 = vcmp.lt.s32.totalorder %v6871_v37, 0 }
 0x1f2   :  { %14748 = vst [vmem:[#allocation60_spill] sm:$0xff] %v9946_v52  ;;  %14749 = vst [vmem:[#allocation61_spill] sm:$0xff] %v9949_v1  ;;  %v662_v6 = vmul.u32 %v655_v24, %v646_v9  ;;  %v3861_v38 = vand.u32 31, %v3859_v16  ;;  %v4031_v0 = vand.u32 2147483647, %v4030_v30  ;;  %v4033_v12 = vcvt.s32.f32 %v4026_v55 }
 0x1f3   :  { %vm9959_vm13 = vcmp.le.f32.partialorder %v14750_v8, 0.7853982  ;;  %v1599_v29 = vadd.s32 %v9693_v48, %v9699_v27  ;;  %v9966_v63 = vsub.s32 %v9876_v14, %v1814_v39  ;;  %v3854_v43 = vand.u32 8388607, %v14447_v59 }
 0x1f4   :  { %v9968_v53 = vadd.s32 %v666_v17, %v662_v6  ;;  %v3862_v36 = vsub.s32 32, %v3861_v38  ;;  %v2378_v20 = vand.u32 2139095040, %v9946_v52  ;;  %v9973_v33 = vsel %vm6872_vm4, 0, %v6871_v37 }
 0x1f5   :  { %v3864_v24 = vshll.u32 %v14655_v56, %v3861_v38  ;;  %v3867_v50 = vshll.u32 %v14646_v46, %v3861_v38  ;;  %v3873_v21 = vshll.u32 %v14644_v3, %v3861_v38  ;;  %v9978_v27 = vshrl.u32 %v3859_v16, 5 }
 0x1f6   :  { %v3865_v14 = vshrl.u32 %v14646_v46, %v3862_v36  ;;  %v3868_v48 = vshrl.u32 %v14647_v34, %v3862_v36  ;;  %v3870_v10 = vshll.u32 %v14647_v34, %v3861_v38  ;;  %v1817_v55 = vsub.s32 0, %v9966_v63 }
 0x1f7   :  { %v3871_v30 = vshrl.u32 %v14644_v3, %v3862_v36  ;;  %v3874_v37 = vshrl.u32 %v14643_v62, %v3862_v36  ;;  %v3876_v39 = vshll.u32 %v14643_v62, %v3861_v38  ;;  %v1615_v9 = vsub.s32 32, %v9973_v33 }
 0x1f8   :  { %v668_v17 = vadd.s32 536870912, %v9968_v53  ;;  %v3855_v16 = vor.u32 8388608, %v3854_v43  ;;  %v2379_v8 = vshrl.u32 %v2378_v20, 23  ;;  %v3866_v6 = vor.u32 %v3865_v14, %v3864_v24 }
 0x1f9   :  { %v3869_v59 = vor.u32 %v3868_v48, %v3867_v50  ;;  %v3875_v1 = vor.u32 %v3874_v37, %v3873_v21  ;;  %v3877_v60 = vshrl.u32 %v14645_v13, %v3862_v36  ;;  %v1619_v23 = vsub.s32 4294967266, %v9973_v33 }
 0x1fa   :  { %v3872_v51 = vor.u32 %v3871_v30, %v3870_v10  ;;  %vm3879_vm6 = vcmp.lt.s32.totalorder %v9978_v27, 1  ;;  %vm3882_vm0 = vcmp.lt.s32.totalorder %v9978_v27, 4  ;;  %v1420_v38 = vsel %vm1337_vm7, %v1419_v58, %v1418_v28 }
 0x1fb   :  { %v4040_v43 = vsel %vm9959_vm13, 0, %v9954_v15  ;;  %v6878_v20 = vmin.u32 %v1817_v55, %v9966_v63  ;;  %v3878_v24 = vor.u32 %v3877_v60, %v3876_v39  ;;  %v4034_v50 = vmul.f32 %v4033_v12, %v4031_v0 }
 0x1fc   :  { %v9999_v21 = vshrl.u32 %v668_v17, 30  ;;  %vm3881_vm2 = vcmp.lt.s32.totalorder %v9978_v27, 3  ;;  %v10002_v14 = vshll.u32 %v3855_v16, 8  ;;  %vm3880_vm8 = vcmp.lt.s32.totalorder %v9978_v27, 2 }
 0x1fd   :  { %v3887_v48 = vsel %vm3879_vm6, %v3866_v6, %v3869_v59  ;;  %v3888_v28 = vsel %vm3882_vm0, %v3875_v1, 920167782  ;;  %v6897_v58 = vadd.s32 4294967169, %v2379_v8  ;;  %v10009_v15 = vpop.eup %7593  ;;  %v1616_v60 = vshll.u32 %v9849_v25, %v9973_v33 }
 0x1fe   :  { %14753 = vst [vmem:[#allocation62_spill] sm:$0xff] %v10009_v15  ;;  %v1617_v0 = vshrl.u32 %v1599_v29, %v1615_v9  ;;  %v1620_v12 = vadd.s32 127, %v1619_v23  ;;  %v3891_v10 = vsel %vm3879_vm6, %v3869_v59, %v3872_v51  ;;  %v1819_v55 = vclz %v6878_v20 }
 0x1ff   :  { %v3863_v30 = vshrl.u32 %v14655_v56, %v3862_v36  ;;  %v3889_v37 = vsel %vm3881_vm2, %v3872_v51, %v3888_v28  ;;  %v3892_v39 = vsel %vm3882_vm0, %v3878_v24, 1326507024  ;;  %v670_v17 = vshll.u32 %v9999_v21, 30 }
 0x200   :  { %v3884_v16 = vsel %vm3882_vm0, %v3872_v51, 2102212464  ;;  %v3890_v25 = vsel %vm3880_vm8, %v3887_v48, %v3889_v37  ;;  %v3893_v23 = vsel %vm3881_vm2, %v3875_v1, %v3892_v39  ;;  %v2385_v9 = vadd.s32 1, %v6897_v58 }
 0x201   :  { %v3894_v29 = vsel %vm3880_vm8, %v3891_v10, %v3893_v23  ;;  %v10030_v36 = vmul.u32.u64.low %v10002_v14, %v3890_v25  ;;  %v10031_v33 = vmul.u32.u64.high %v10002_v14, %v3890_v25, %v10030_v36  ;;  %v1423_v8 = vsel %vm9772_vm1, %v9188_v57, %v1420_v38  ;;  %v3653_v10 = vpop.permute.xlu0 %3652 }
 0x202   :  { %v4035_v51 = vxor.u32 2147483648, %v4034_v50  ;;  %v10038_v20 = vmul.u32.u64.low %v10002_v14, %v3894_v29  ;;  %v10039_v24 = vmul.u32.u64.high %v10002_v14, %v3894_v29, %v10038_v20  ;;  %vm1545_vm7 = vcmp.lt.s32.totalorder %v9515_v4, 0 }
 0x203   :  { %v1621_v1 = vshll.u32 %v1620_v12, 23  ;;  %v3883_v48 = vsel %vm3879_vm6, %v3863_v30, %v3866_v6  ;;  %v3885_v28 = vsel %vm3881_vm2, %v3869_v59, %v3884_v16  ;;  %vm2386_vm3 = vcmp.gt.s32.totalorder %v2385_v9, 0 }
 0x204   :  { %7595 = vsinq.f32 %v9929_v32  ;;  %v1618_v58 = vor.u32 %v1617_v0, %v1616_v60  ;;  %v6879_v31 = vadd.s32 4294967294, %v1819_v55  ;;  %v2387_v38 = vsel %vm2386_vm3, %v2385_v9, 0 }
 0x205   :  { %7597 = vcosq.f32 %v1423_v8  ;;  %v10047_v37 = vadd.s32 3, %v4040_v43  ;;  %v10050_v39 = vsub.s32 %v9968_v53, %v670_v17  ;;  %v2389_v12 = vand.u32 31, %v2387_v38 }
 0x206   :  { %7599 = vsinq.f32 %v1423_v8  ;;  %v4036_v6 = vsel %vm3953_vm9, %v4035_v51, %v4034_v50  ;;  %v1629_v59 = vsub.s32 4, %v9802_v40  ;;  %v3886_v32 = vsel %vm3880_vm8, %v3883_v48, %v3885_v28 }
 0x207   :  { %v14754_v60 = vand.u32 2147483647, %v9515_v4  ;;  %v1622_v43 = vor.u32 4788187, %v1621_v1  ;;  %v3905_v53 = vadd.s32 1, %v10031_v33  ;;  %v10064_v55 = vsub.s32 32, %v2389_v12 }
 0x208   :  { %v3710_v30 = vmul.f32 %v14700_v41, %v3653_v10  ;;  %v1625_v17 = vcvt.s32.f32 %v1618_v58  ;;  %vm6880_vm14 = vcmp.lt.s32.totalorder %v6879_v31, 0  ;;  %vm3904_vm10 = vc.u32 %v10039_v24, %v10030_v36 }
 0x209   :  { %vm10059_vm1 = vcmp.le.f32.partialorder %v14754_v60, 0.7853982  ;;  %v14454_v27 = vand.u32 2147483647, %v9946_v52  ;;  %v673_v50 = vsub.s32 0, %v10050_v39  ;;  %v3902_v16 = vmul.u32 %v10002_v14, %v3886_v32 }
 0x20a   :  { %v2393_v25 = vshrl.u32 %v14646_v46, %v10064_v55  ;;  %v2396_v23 = vshrl.u32 %v14647_v34, %v10064_v55  ;;  %v10076_v29 = vshrl.u32 %v2387_v38, 5  ;;  %v2392_v9 = vshll.u32 %v14655_v56, %v2389_v12 }
 0x20b   :  { %v2395_v8 = vshll.u32 %v14646_v46, %v2389_v12  ;;  %v2399_v51 = vshrl.u32 %v14644_v3, %v10064_v55  ;;  %v3906_v20 = vsel %vm3904_vm10, %v3905_v53, %v10031_v33  ;;  %v2398_v1 = vshll.u32 %v14647_v34, %v2389_v12 }
 0x20c   :  { %v2401_v14 = vshll.u32 %v14644_v3, %v2389_v12  ;;  %v2402_v48 = vshrl.u32 %v14643_v62, %v10064_v55  ;;  %v1623_v28 = vand.u32 2147483647, %v1622_v43  ;;  %v2382_v58 = vand.u32 8388607, %v14454_v27 }
 0x20d   :  { %v10089_v38 = vor.u32 %v2393_v25, %v2392_v9  ;;  %v10091_v10 = vor.u32 %v2396_v23, %v2395_v8  ;;  %v2400_v32 = vor.u32 %v2399_v51, %v2398_v1  ;;  %v2404_v57 = vshll.u32 %v14643_v62, %v2389_v12 }
 0x20e   :  { %v2403_v60 = vor.u32 %v2402_v48, %v2401_v14  ;;  %v2405_v33 = vshrl.u32 %v14645_v13, %v10064_v55  ;;  %v1630_v53 = vsel %vm1545_vm7, %v1629_v59, %v9802_v40  ;;  %vm1753_vm9 = vcmp.lt.s32.totalorder %v9603_v45, 0 }
 0x20f   :  { %v10101_v43 = vsel %vm6880_vm14, 0, %v6879_v31  ;;  %v6834_v25 = vmin.u32 %v673_v50, %v10050_v39  ;;  %v10104_v23 = vadd.s32 %v3906_v20, %v3902_v16  ;;  %vm2407_vm11 = vcmp.lt.s32.totalorder %v10076_v29, 1 }
 0x210   :  { %v2406_v9 = vor.u32 %v2405_v33, %v2404_v57  ;;  %vm2410_vm12 = vcmp.lt.s32.totalorder %v10076_v29, 4  ;;  %v10109_v12 = vadd.f32 %v14701_v49, %v3710_v30  ;;  %v2383_v8 = vor.u32 8388608, %v2382_v58 }
 0x211   :  { %vm2409_vm15 = vcmp.lt.s32.totalorder %v10076_v29, 3  ;;  %v2415_v40 = vsel %vm2407_vm11, %v10089_v38, %v10091_v10  ;;  %v2416_v31 = vsel %vm2410_vm12, %v2403_v60, 920167782  ;;  %v10118_v59 = vpop.eup %7595  ;;  %v4039_v57 = vsel %vm9959_vm13, %v9270_v35, %v4036_v6 }
 0x212   :  { %14757 = vst [vmem:[#allocation63_spill] sm:$0xff] %v10109_v12  ;;  %14758 = vst [vmem:[#allocation64_spill] sm:$0xff] %v10118_v59  ;;  %v1626_v50 = vmul.f32 %v1625_v17, %v1623_v28  ;;  %v14759_v30 = vand.u32 2147483647, %v9603_v45  ;;  %v1827_v51 = vsub.s32 4294967266, %v10101_v43  ;;  %v2417_v20 = vsel %vm2409_vm15, %v2400_v32, %v2416_v31  ;;  %v10132_v1 = vpop.eup %7597 }
 0x213   :  { %14762 = vst [vmem:[#allocation65_spill] sm:$0xff] %v10132_v1  ;;  %v1632_v14 = vsel %vm10059_vm1, 0, %v1630_v53  ;;  %v675_v48 = vclz %v6834_v25  ;;  %v3908_v5 = vadd.s32 536870912, %v10104_v23  ;;  %vm2408_vm13 = vcmp.lt.s32.totalorder %v10076_v29, 2  ;;  %v10138_v6 = vpop.eup %7599  ;;  %v1877_v53 = vpop.permute.xlu1 %1876 }
 0x214   :  { %vm10125_vm4 = vcmp.le.f32.partialorder %v14759_v30, 0.7853982  ;;  %14763 = vst [vmem:[#allocation66_spill] sm:$0xff] %v10138_v6  ;;  %v2418_v17 = vsel %vm2408_vm13, %v2415_v40, %v2417_v20  ;;  %v2419_v28 = vsel %vm2407_vm11, %v10091_v10, %v2400_v32  ;;  %v2420_v58 = vsel %vm2410_vm12, %v2406_v9, 1326507024 }
 0x215   :  { %v4058_v33 = vand.u32 2139095040, %v10109_v12  ;;  %v1807_v25 = vadd.s32 %v9798_v61, %v9806_v44  ;;  %v1823_v31 = vsub.s32 32, %v10101_v43  ;;  %v2421_v30 = vsel %vm2409_vm15, %v2403_v60, %v2420_v58 }
 0x216   :  { %v10153_v27 = vshll.u32 %v2383_v8, 8  ;;  %v1627_v40 = vxor.u32 2147483648, %v1626_v50  ;;  %v1828_v20 = vadd.s32 127, %v1827_v51  ;;  %v1837_v1 = vsub.s32 4, %v9916_v22 }
 0x217   :  { %v2422_v9 = vsel %vm2408_vm13, %v2419_v28, %v2421_v30  ;;  %v10158_v6 = vshrl.u32 %v3908_v5, 30  ;;  %v1928_v61 = vmul.f32 %v14745_v47, %v1877_v53  ;;  %v6835_v44 = vadd.s32 4294967294, %v675_v48 }
 0x218   :  { %v10161_v15 = vmul.u32.u64.low %v10153_v27, %v2418_v17  ;;  %v10162_v59 = vmul.u32.u64.high %v10153_v27, %v2418_v17, %v10161_v15  ;;  %v10167_v60 = vmul.u32.u64.low %v10153_v27, %v2422_v9  ;;  %v10168_v8 = vmul.u32.u64.high %v10153_v27, %v2422_v9, %v10167_v60 }
 0x219   :  { %v4059_v51 = vshrl.u32 %v4058_v33, 23  ;;  %7601 = vcosq.f32 %v4039_v57  ;;  %v1636_v58 = vadd.s32 3, %v1632_v14  ;;  %v1824_v28 = vshll.u32 %v9966_v63, %v10101_v43 }
 0x21a   :  { %v1825_v5 = vshrl.u32 %v1807_v25, %v1823_v31  ;;  %v1628_v30 = vsel %vm1545_vm7, %v1627_v40, %v1626_v50  ;;  %v1829_v17 = vshll.u32 %v1828_v20, 23  ;;  %v1838_v53 = vsel %vm1753_vm9, %v1837_v1, %v9916_v22 }
 0x21b   :  { %v6957_v48 = vadd.s32 4294967169, %v4059_v51  ;;  %7603 = vsinq.f32 %v4039_v57  ;;  %v10178_v9 = vand.u32 3, %v10047_v37  ;;  %v3910_v33 = vshll.u32 %v10158_v6, 30 }
 0x21c   :  { %v2412_v14 = vsel %vm2410_vm12, %v2400_v32, 2102212464  ;;  %vm6836_vm6 = vcmp.lt.s32.totalorder %v6835_v44, 0  ;;  %v2391_v63 = vshrl.u32 %v14655_v56, %v10064_v55  ;;  %v10186_v50 = vadd.f32 %v14747_v7, %v1928_v61 }
 0x21d   :  { %14764 = vst [vmem:[#allocation67_spill] sm:$0xff] %v10178_v9  ;;  %v4065_v43 = vadd.s32 1, %v6957_v48  ;;  %v10191_v22 = vsel %vm10059_vm1, %v9515_v4, %v1628_v30  ;;  %v10193_v37 = vand.u32 3, %v1636_v58  ;;  %v1826_v57 = vor.u32 %v1825_v5, %v1824_v28 }
 0x21e   :  { %14765 = vst [vmem:[#allocation68_spill] sm:$0xff] %v10186_v50  ;;  %v1840_v1 = vsel %vm10125_vm4, 0, %v1838_v53  ;;  %v1830_v32 = vor.u32 4788187, %v1829_v17  ;;  %v2411_v55 = vsel %vm2407_vm11, %v2391_v63, %v10089_v38  ;;  %v2413_v25 = vsel %vm2409_vm15, %v10091_v10, %v2412_v14 }
 0x21f   :  { %14766 = vst [vmem:[#allocation69_spill] sm:$0xff] %v10193_v37  ;;  %vm4066_vm0 = vcmp.gt.s32.totalorder %v4065_v43, 0  ;;  %v10203_v31 = vsel %vm6836_vm6, 0, %v6835_v44  ;;  %v10206_v0 = vsub.s32 %v10104_v23, %v3910_v33  ;;  %v2433_v40 = vadd.s32 1, %v10162_v59 }
 0x220   :  { %v4067_v20 = vsel %vm4066_vm0, %v4065_v43, 0  ;;  %vm2432_vm2 = vc.u32 %v10168_v8, %v10161_v15  ;;  %v14459_v61 = vand.u32 2147483647, %v10109_v12  ;;  %v2482_v38 = vand.u32 2139095040, %v10186_v50 }
 0x221   :  { %v4069_v60 = vand.u32 31, %v4067_v20  ;;  %7605 = vcosq.f32 %v10191_v22  ;;  %v10214_v10 = vadd.s32 3, %v1840_v1  ;;  %v663_v44 = vadd.s32 %v9912_v54, %v9919_v11 }
 0x222   :  { %v2414_v23 = vsel %vm2408_vm13, %v2411_v55, %v2413_v25  ;;  %v1831_v51 = vand.u32 2147483647, %v1830_v32  ;;  %v1833_v58 = vcvt.s32.f32 %v1826_v57  ;;  %v683_v28 = vsub.s32 4294967266, %v10203_v31 }
 0x223   :  { %v4070_v5 = vsub.s32 32, %v4069_v60  ;;  %v3913_v30 = vsub.s32 0, %v10206_v0  ;;  %v2434_v17 = vsel %vm2432_vm2, %v2433_v40, %v10162_v59  ;;  %v4072_v53 = vshll.u32 %v14655_v56, %v4069_v60 }
 0x224   :  { %v4075_v48 = vshll.u32 %v14646_v46, %v4069_v60  ;;  %v2430_v33 = vmul.u32 %v10153_v27, %v2414_v23  ;;  %v4062_v54 = vand.u32 8388607, %v14459_v61  ;;  %v2483_v29 = vshrl.u32 %v2482_v38, 23 }
 0x225   :  { %v4073_v11 = vshrl.u32 %v14646_v46, %v4070_v5  ;;  %v10229_v14 = vshrl.u32 %v4067_v20, 5  ;;  %v4076_v63 = vshrl.u32 %v14647_v34, %v4070_v5  ;;  %v4078_v43 = vshll.u32 %v14647_v34, %v4069_v60 }
 0x226   :  { %v4079_v59 = vshrl.u32 %v14644_v3, %v4070_v5  ;;  %v10234_v57 = vpop.eup %7601  ;;  %v1834_v1 = vmul.f32 %v1833_v58, %v1831_v51  ;;  %v679_v32 = vsub.s32 32, %v10203_v31  ;;  %v10237_v27 = vadd.s32 %v2434_v17, %v2430_v33 }
 0x227   :  { %14767 = vst [vmem:[#allocation70_spill] sm:$0xff] %v10234_v57  ;;  %v4081_v55 = vshll.u32 %v14644_v3, %v4069_v60  ;;  %v684_v25 = vadd.s32 127, %v683_v28  ;;  %v6950_v40 = vmin.u32 %v3913_v30, %v10206_v0  ;;  %v4074_v20 = vor.u32 %v4073_v11, %v4072_v53 }
 0x228   :  { %v4077_v38 = vor.u32 %v4076_v63, %v4075_v48  ;;  %v10241_v23 = vpop.eup %7603  ;;  %v4063_v61 = vor.u32 8388608, %v4062_v54  ;;  %v4082_v4 = vshrl.u32 %v14643_v62, %v4070_v5  ;;  %v4084_v37 = vshll.u32 %v14643_v62, %v4069_v60 }
 0x229   :  { %14768 = vst [vmem:[#allocation71_spill] sm:$0xff] %v10241_v23  ;;  %v4085_v51 = vshrl.u32 %v14645_v13, %v4070_v5  ;;  %v680_v58 = vshll.u32 %v10050_v39, %v10203_v31  ;;  %v4080_v17 = vor.u32 %v4079_v59, %v4078_v43  ;;  %vm4087_vm8 = vcmp.lt.s32.totalorder %v10229_v14, 1 }
 0x22a   :  { %v6901_v28 = vadd.s32 4294967169, %v2483_v29  ;;  %vm609_vm7 = vcmp.lt.s32.totalorder %v9720_v2, 0  ;;  %v2436_v30 = vadd.s32 536870912, %v10237_v27  ;;  %v4083_v53 = vor.u32 %v4082_v4, %v4081_v55 }
 0x22b   :  { %v4086_v48 = vor.u32 %v4085_v51, %v4084_v37  ;;  %vm4089_vm3 = vcmp.lt.s32.totalorder %v10229_v14, 3  ;;  %v3915_v33 = vclz %v6950_v40  ;;  %vm4088_vm1 = vcmp.lt.s32.totalorder %v10229_v14, 2 }
 0x22c   :  { %vm4090_vm14 = vcmp.lt.s32.totalorder %v10229_v14, 4  ;;  %v4095_v39 = vsel %vm4087_vm8, %v4074_v20, %v4077_v38  ;;  %v681_v31 = vshrl.u32 %v663_v44, %v679_v32  ;;  %v685_v60 = vshll.u32 %v684_v25, 23 }
 0x22d   :  { %v4096_v54 = vsel %vm4090_vm14, %v4083_v53, 920167782  ;;  %v10256_v11 = vshll.u32 %v4063_v61, 8  ;;  %v4071_v29 = vshrl.u32 %v14655_v56, %v4070_v5  ;;  %v4099_v37 = vsel %vm4087_vm8, %v4077_v38, %v4080_v17 }
 0x22e   :  { %v4097_v4 = vsel %vm4089_vm3, %v4080_v17, %v4096_v54  ;;  %v2489_v63 = vadd.s32 1, %v6901_v28  ;;  %v10263_v43 = vpop.eup %7605  ;;  %v10265_v59 = vshrl.u32 %v2436_v30, 30  ;;  %v4092_v55 = vsel %vm4090_vm14, %v4080_v17, 2102212464 }
 0x22f   :  { %14769 = vst [vmem:[#allocation72_spill] sm:$0xff] %v10263_v43  ;;  %v4098_v44 = vsel %vm4088_vm1, %v4095_v39, %v4097_v4  ;;  %v4100_v32 = vsel %vm4090_vm14, %v4086_v48, 1326507024  ;;  %v1835_v61 = vxor.u32 2147483648, %v1834_v1  ;;  %v693_v25 = vsub.s32 4, %v9999_v21 }
 0x230   :  { %v6951_v5 = vadd.s32 4294967294, %v3915_v33  ;;  %v4101_v40 = vsel %vm4089_vm3, %v4083_v53, %v4100_v32  ;;  %v682_v51 = vor.u32 %v681_v31, %v680_v58  ;;  %v686_v17 = vor.u32 4788187, %v685_v60  ;;  %v3661_v33 = vpop.permute.xlu0 %3660 }
 0x231   :  { %v4102_v28 = vsel %vm4088_vm1, %v4099_v37, %v4101_v40  ;;  %v10275_v54 = vmul.u32.u64.low %v10256_v11, %v4098_v44  ;;  %v10276_v30 = vmul.u32.u64.high %v10256_v11, %v4098_v44, %v10275_v54  ;;  %v4091_v48 = vsel %vm4087_vm8, %v4071_v29, %v4074_v20 }
 0x232   :  { %v4093_v39 = vsel %vm4089_vm3, %v4077_v38, %v4092_v55  ;;  %vm2490_vm10 = vcmp.gt.s32.totalorder %v2489_v63, 0  ;;  %v2438_v53 = vshll.u32 %v10265_v59, 30  ;;  %v10291_v37 = vsel %vm609_vm7, %v693_v25, %v9999_v21 }
 0x233   :  { %v10285_v58 = vmul.u32.u64.low %v10256_v11, %v4102_v28  ;;  %v10286_v31 = vmul.u32.u64.high %v10256_v11, %v4102_v28, %v10285_v58  ;;  %v2491_v4 = vsel %vm2490_vm10, %v2489_v63, 0  ;;  %vm3849_vm11 = vcmp.lt.s32.totalorder %v9843_v42, 0 }
 0x234   :  { %vm6952_vm12 = vcmp.lt.s32.totalorder %v6951_v5, 0  ;;  %v14463_v20 = vand.u32 2147483647, %v10186_v50  ;;  %v2493_v38 = vand.u32 31, %v2491_v4  ;;  %v10297_v60 = vsel %vm1753_vm9, %v1835_v61, %v1834_v1 }
 0x235   :  { %v10301_v29 = vadd.s32 %v10030_v36, %v10039_v24  ;;  %v4094_v63 = vsel %vm4088_vm1, %v4091_v48, %v4093_v39  ;;  %v3712_v21 = vmul.f32 %v14700_v41, %v3661_v33  ;;  %v687_v55 = vand.u32 2147483647, %v686_v17 }
 0x236   :  { %v689_v44 = vcvt.s32.f32 %v682_v51  ;;  %v4113_v32 = vadd.s32 1, %v10276_v30  ;;  %v2494_v25 = vsub.s32 32, %v2493_v38  ;;  %v10307_v40 = vsel %vm6952_vm12, 0, %v6951_v5 }
 0x237   :  { %v3933_v28 = vsub.s32 4, %v10158_v6  ;;  %v10311_v1 = vsub.s32 %v10237_v27, %v2438_v53  ;;  %vm4112_vm9 = vc.u32 %v10286_v31, %v10275_v54  ;;  %v4110_v36 = vmul.u32 %v10256_v11, %v4094_v63 }
 0x238   :  { %v2486_v24 = vand.u32 8388607, %v14463_v20  ;;  %v2492_v14 = vshrl.u32 %v2491_v4, 5  ;;  %v2496_v61 = vshll.u32 %v14655_v56, %v2493_v38  ;;  %v2497_v51 = vshrl.u32 %v14646_v46, %v2494_v25 }
 0x239   :  { %v2499_v5 = vshll.u32 %v14646_v46, %v2493_v38  ;;  %v2500_v17 = vshrl.u32 %v14647_v34, %v2494_v25  ;;  %v2503_v27 = vshrl.u32 %v14644_v3, %v2494_v25  ;;  %v4114_v48 = vsel %vm4112_vm9, %v4113_v32, %v10276_v30 }
 0x23a   :  { %v2502_v39 = vshll.u32 %v14647_v34, %v2493_v38  ;;  %v2505_v11 = vshll.u32 %v14644_v3, %v2493_v38  ;;  %v2506_v33 = vshrl.u32 %v14643_v62, %v2494_v25  ;;  %v3923_v53 = vsub.s32 4294967266, %v10307_v40 }
 0x23b   :  { %v2441_v58 = vsub.s32 0, %v10311_v1  ;;  %v2498_v4 = vor.u32 %v2497_v51, %v2496_v61  ;;  %v2501_v63 = vor.u32 %v2500_v17, %v2499_v5  ;;  %v2508_v35 = vshll.u32 %v14643_v62, %v2493_v38 }
 0x23c   :  { %v2504_v20 = vor.u32 %v2503_v27, %v2502_v39  ;;  %v2507_v43 = vor.u32 %v2506_v33, %v2505_v11  ;;  %v2509_v57 = vshrl.u32 %v14645_v13, %v2494_v25  ;;  %v690_v9 = vmul.f32 %v689_v44, %v687_v55 }
 0x23d   :  { %v10334_v30 = vsel %vm3849_vm11, %v3933_v28, %v10158_v6  ;;  %v10336_v32 = vadd.s32 %v4114_v48, %v4110_v36  ;;  %v10339_v23 = vadd.f32 %v14701_v49, %v3712_v21  ;;  %v14771_v61 = vand.u32 2147483647, %v9720_v2 }
 0x23e   :  { %v3919_v38 = vsub.s32 32, %v10307_v40  ;;  %v2487_v5 = vor.u32 8388608, %v2486_v24  ;;  %v2510_v55 = vor.u32 %v2509_v57, %v2508_v35  ;;  %vm2511_vm13 = vcmp.lt.s32.totalorder %v2492_v14, 1 }
 0x23f   :  { %14770 = vst [vmem:[#allocation73_spill] sm:$0xff] %v10339_v23  ;;  %vm10343_vm15 = vcmp.le.f32.partialorder %v14771_v61, 0.7853982  ;;  %v14774_v44 = vand.u32 2147483647, %v9843_v42  ;;  %v3924_v28 = vadd.s32 127, %v3923_v53  ;;  %v6898_v21 = vmin.u32 %v2441_v58, %v10311_v1 }
 0x240   :  { %vm2514_vm0 = vcmp.lt.s32.totalorder %v2492_v14, 4  ;;  %v2519_v36 = vsel %vm2511_vm13, %v2498_v4, %v2501_v63  ;;  %v2495_v17 = vshrl.u32 %v14655_v56, %v2494_v25  ;;  %vm2513_vm2 = vcmp.lt.s32.totalorder %v2492_v14, 3 }
 0x241   :  { %vm10350_vm6 = vcmp.le.f32.partialorder %v14774_v44, 0.7853982  ;;  %v2516_v27 = vsel %vm2514_vm0, %v2504_v20, 2102212464  ;;  %v2520_v48 = vsel %vm2514_vm0, %v2507_v43, 920167782  ;;  %v2523_v24 = vsel %vm2511_vm13, %v2501_v63, %v2504_v20 }
 0x242   :  { %v4116_v35 = vadd.s32 536870912, %v10336_v32  ;;  %vm2512_vm8 = vcmp.lt.s32.totalorder %v2492_v14, 2  ;;  %v2521_v57 = vsel %vm2513_vm2, %v2504_v20, %v2520_v48  ;;  %v2524_v11 = vsel %vm2514_vm0, %v2510_v55, 1326507024  ;;  %v3657_v14 = vpop.permute.xlu1 %3656 }
 0x243   :  { %v2522_v39 = vsel %vm2512_vm8, %v2519_v36, %v2521_v57  ;;  %v2527_v33 = vshll.u32 %v2487_v5, 8  ;;  %v4266_v53 = vand.u32 2139095040, %v10339_v23  ;;  %v2443_v58 = vclz %v6898_v21 }
 0x244   :  { %v2515_v61 = vsel %vm2511_vm13, %v2495_v17, %v2498_v4  ;;  %v2517_v44 = vsel %vm2513_vm2, %v2501_v63, %v2516_v27  ;;  %v2525_v25 = vsel %vm2513_vm2, %v2507_v43, %v2524_v11  ;;  %v691_v19 = vxor.u32 2147483648, %v690_v9 }
 0x245   :  { %v2526_v7 = vsel %vm2512_vm8, %v2523_v24, %v2525_v25  ;;  %v10363_v47 = vmul.u32.u64.low %v2527_v33, %v2522_v39  ;;  %v10364_v50 = vmul.u32.u64.high %v2527_v33, %v2522_v39, %v10363_v47  ;;  %v3920_v20 = vshll.u32 %v10206_v0, %v10307_v40 }
 0x246   :  { %v10369_v36 = vshrl.u32 %v4116_v35, 30  ;;  %v10371_v5 = vmul.u32.u64.low %v2527_v33, %v2526_v7  ;;  %v10372_v55 = vmul.u32.u64.high %v2527_v33, %v2526_v7, %v10371_v5  ;;  %v3921_v21 = vshrl.u32 %v10301_v29, %v3919_v38 }
 0x247   :  { %v3925_v4 = vshll.u32 %v3924_v28, 23  ;;  %v2518_v43 = vsel %vm2512_vm8, %v2515_v61, %v2517_v44  ;;  %v4267_v63 = vshrl.u32 %v4266_v53, 23  ;;  %7607 = vsinq.f32 %v10191_v22 }
 0x248   :  { %v10378_v17 = vand.u32 3, %v10214_v10  ;;  %v696_v0 = vsel %vm10343_vm15, 0, %v10291_v37  ;;  %v6899_v40 = vadd.s32 4294967294, %v2443_v58  ;;  %v1839_v7 = vsel %vm10125_vm4, %v9603_v45, %v10297_v60 }
 0x249   :  { %v3936_v29 = vsel %vm10350_vm6, 0, %v10334_v30  ;;  %vm2377_vm3 = vcmp.lt.s32.totalorder %v9946_v52, 0  ;;  %v2537_v22 = vadd.s32 1, %v10364_v50  ;;  %v6965_v10 = vadd.s32 4294967169, %v4267_v63 }
 0x24a   :  { %14777 = vst [vmem:[#allocation74_spill] sm:$0xff] %v10378_v17  ;;  %v692_v38 = vsel %vm609_vm7, %v691_v19, %v690_v9  ;;  %v4118_v37 = vshll.u32 %v10369_v36, 30  ;;  %v2534_v28 = vmul.u32 %v2527_v33, %v2518_v43  ;;  %vm2536_vm1 = vc.u32 %v10372_v55, %v10363_v47 }
 0x24b   :  { %v3922_v16 = vor.u32 %v3921_v21, %v3920_v20  ;;  %v3926_v60 = vor.u32 4788187, %v3925_v4  ;;  %v2538_v27 = vsel %vm2536_vm1, %v2537_v22, %v10364_v50  ;;  %v4273_v30 = vadd.s32 1, %v6965_v10 }
 0x24c   :  { %v700_v48 = vadd.s32 3, %v696_v0  ;;  %vm6900_vm4 = vcmp.lt.s32.totalorder %v6899_v40, 0  ;;  %v2539_v35 = vadd.s32 %v2538_v27, %v2534_v28  ;;  %v3711_v57 = vmul.f32 %v14700_v41, %v3657_v14 }
 0x24d   :  { %7609 = vcosq.f32 %v1839_v7  ;;  %v10402_v19 = vsel %vm10343_vm15, %v9720_v2, %v692_v38  ;;  %v3940_v9 = vadd.s32 3, %v3936_v29  ;;  %vm4274_vm7 = vcmp.gt.s32.totalorder %v4273_v30, 0 }
 0x24e   :  { %v2461_v24 = vsub.s32 4, %v10265_v59  ;;  %v10406_v39 = vsub.s32 %v10336_v32, %v4118_v37  ;;  %v2540_v50 = vadd.s32 536870912, %v2539_v35  ;;  %v14474_v11 = vand.u32 2147483647, %v10339_v23 }
 0x24f   :  { %v3927_v33 = vand.u32 2147483647, %v3926_v60  ;;  %v3929_v53 = vcvt.s32.f32 %v3922_v16  ;;  %v10409_v58 = vsel %vm6900_vm4, 0, %v6899_v40  ;;  %v4275_v61 = vsel %vm4274_vm7, %v4273_v30, 0 }
 0x250   :  { %7611 = vsinq.f32 %v1839_v7  ;;  %v10411_v44 = vand.u32 3, %v700_v48  ;;  %v10413_v51 = vshrl.u32 %v2540_v50, 30  ;;  %v10416_v25 = vadd.f32 %v14701_v49, %v3711_v57 }
 0x251   :  { %7613 = vcosq.f32 %v10402_v19  ;;  %v10419_v32 = vand.u32 3, %v3940_v9  ;;  %v2431_v20 = vadd.s32 %v10161_v15, %v10168_v8  ;;  %v4277_v5 = vand.u32 31, %v4275_v61 }
 0x252   :  { %14778 = vst [vmem:[#allocation75_spill] sm:$0xff] %v10411_v44  ;;  %14779 = vst [vmem:[#allocation76_spill] sm:$0xff] %v10416_v25  ;;  %v2451_v21 = vsub.s32 4294967266, %v10409_v58  ;;  %v10427_v4 = vsel %vm2377_vm3, %v2461_v24, %v10265_v59  ;;  %v4121_v43 = vsub.s32 0, %v10406_v39  ;;  %v4270_v63 = vand.u32 8388607, %v14474_v11 }
 0x253   :  { %14780 = vst [vmem:[#allocation77_spill] sm:$0xff] %v10419_v32  ;;  %v10432_v0 = vmul.f32 %v3929_v53, %v3927_v33  ;;  %v4278_v40 = vsub.s32 32, %v4277_v5  ;;  %v4280_v7 = vshll.u32 %v14655_v56, %v4277_v5  ;;  %v4283_v15 = vshll.u32 %v14646_v46, %v4277_v5 }
 0x254   :  { %v2447_v8 = vsub.s32 32, %v10409_v58  ;;  %v2542_v29 = vshll.u32 %v10413_v51, 30  ;;  %v4286_v22 = vshll.u32 %v14647_v34, %v4277_v5  ;;  %v4162_v59 = vand.u32 2139095040, %v10416_v25  ;;  %v10440_v10 = vpop.eup %7607 }
 0x255   :  { %14781 = vst [vmem:[#allocation78_spill] sm:$0xff] %v10440_v10  ;;  %v2448_v14 = vshll.u32 %v10311_v1, %v10409_v58  ;;  %v4276_v38 = vshrl.u32 %v4275_v61, 5  ;;  %v4281_v37 = vshrl.u32 %v14646_v46, %v4278_v40  ;;  %v4284_v28 = vshrl.u32 %v14647_v34, %v4278_v40 }
 0x256   :  { %v14782_v16 = vand.u32 2147483647, %v9946_v52  ;;  %v2452_v27 = vadd.s32 127, %v2451_v21  ;;  %v6958_v30 = vmin.u32 %v4121_v43, %v10406_v39  ;;  %v4271_v48 = vor.u32 8388608, %v4270_v63 }
 0x257   :  { %v4287_v57 = vshrl.u32 %v14644_v3, %v4278_v40  ;;  %v4282_v9 = vor.u32 %v4281_v37, %v4280_v7  ;;  %v4285_v24 = vor.u32 %v4284_v28, %v4283_v15  ;;  %v4289_v1 = vshll.u32 %v14644_v3, %v4277_v5 }
 0x258   :  { %vm10448_vm14 = vcmp.le.f32.partialorder %v14782_v16, 0.7853982  ;;  %v4290_v50 = vshrl.u32 %v14643_v62, %v4278_v40  ;;  %v10456_v33 = vsub.s32 %v2539_v35, %v2542_v29  ;;  %v4279_v53 = vshrl.u32 %v14655_v56, %v4278_v40 }
 0x259   :  { %v4288_v58 = vor.u32 %v4287_v57, %v4286_v22  ;;  %v4163_v61 = vshrl.u32 %v4162_v59, 23  ;;  %v4292_v21 = vshll.u32 %v14643_v62, %v4277_v5  ;;  %v4293_v43 = vshrl.u32 %v14645_v13, %v4278_v40 }
 0x25a   :  { %v4291_v16 = vor.u32 %v4290_v50, %v4289_v1  ;;  %vm4295_vm10 = vcmp.lt.s32.totalorder %v4276_v38, 1  ;;  %v10461_v63 = vpop.eup %7609  ;;  %v2449_v7 = vshrl.u32 %v2431_v20, %v2447_v8  ;;  %v2453_v15 = vshll.u32 %v2452_v27, 23 }
 0x25b   :  { %14785 = vst [vmem:[#allocation79_spill] sm:$0xff] %v10461_v63  ;;  %v4123_v37 = vclz %v6958_v30  ;;  %vm4297_vm12 = vcmp.lt.s32.totalorder %v4276_v38, 3  ;;  %v4294_v28 = vor.u32 %v4293_v43, %v4292_v21  ;;  %vm4296_vm9 = vcmp.lt.s32.totalorder %v4276_v38, 2 }
 0x25c   :  { %vm4298_vm15 = vcmp.lt.s32.totalorder %v4276_v38, 4  ;;  %v4303_v35 = vsel %vm4295_vm10, %v4282_v9, %v4285_v24  ;;  %v2545_v29 = vsub.s32 0, %v10456_v33  ;;  %v4311_v59 = vshll.u32 %v4271_v48, 8 }
 0x25d   :  { %v4300_v22 = vsel %vm4298_vm15, %v4288_v58, 2102212464  ;;  %v4304_v5 = vsel %vm4298_vm15, %v4291_v16, 920167782  ;;  %v10467_v40 = vpop.eup %7611  ;;  %v4299_v57 = vsel %vm4295_vm10, %v4279_v53, %v4282_v9  ;;  %v6961_v27 = vadd.s32 4294967169, %v4163_v61 }
 0x25e   :  { %14786 = vst [vmem:[#allocation80_spill] sm:$0xff] %v10467_v40  ;;  %v4301_v20 = vsel %vm4297_vm12, %v4285_v24, %v4300_v22  ;;  %v4305_v8 = vsel %vm4297_vm12, %v4288_v58, %v4304_v5  ;;  %v10472_v30 = vpop.eup %7613  ;;  %v2454_v1 = vor.u32 4788187, %v2453_v15  ;;  %v6959_v50 = vadd.s32 4294967294, %v4123_v37 }
 0x25f   :  { %14787 = vst [vmem:[#allocation81_spill] sm:$0xff] %v10472_v30  ;;  %v4306_v21 = vsel %vm4296_vm9, %v4303_v35, %v4305_v8  ;;  %v4307_v43 = vsel %vm4295_vm10, %v4285_v24, %v4288_v58  ;;  %7615 = vsinq.f32 %v10402_v19  ;;  %v3931_v48 = vxor.u32 2147483648, %v10432_v0  ;;  %v3669_v35 = vpop.permute.xlu0 %3668 }
 0x260   :  { %v2464_v9 = vsel %vm10448_vm14, 0, %v10427_v4  ;;  %v4308_v53 = vsel %vm4298_vm15, %v4294_v28, 1326507024  ;;  %v2450_v22 = vor.u32 %v2449_v7, %v2448_v14  ;;  %v6902_v61 = vmin.u32 %v2545_v29, %v10456_v33 }
 0x261   :  { %v4302_v15 = vsel %vm4296_vm9, %v4299_v57, %v4301_v20  ;;  %v4309_v37 = vsel %vm4297_vm12, %v4291_v16, %v4308_v53  ;;  %v10486_v58 = vmul.u32.u64.low %v4311_v59, %v4306_v21  ;;  %v10487_v19 = vmul.u32.u64.high %v4311_v59, %v4306_v21, %v10486_v58 }
 0x262   :  { %v4310_v24 = vsel %vm4296_vm9, %v4307_v43, %v4309_v37  ;;  %v4169_v5 = vadd.s32 1, %v6961_v27  ;;  %v2455_v8 = vand.u32 2147483647, %v2454_v1  ;;  %vm6960_vm13 = vcmp.lt.s32.totalorder %v6959_v50, 0 }
 0x263   :  { %v10490_v4 = vmul.u32.u64.low %v4311_v59, %v4310_v24  ;;  %v10491_v11 = vmul.u32.u64.high %v4311_v59, %v4310_v24, %v10490_v4  ;;  %v3932_v14 = vsel %vm3849_vm11, %v3931_v48, %v10432_v0  ;;  %v14475_v7 = vand.u32 2147483647, %v10416_v25 }
 0x264   :  { %vm4170_vm0 = vcmp.gt.s32.totalorder %v4169_v5, 0  ;;  %v3714_v38 = vmul.f32 %v14700_v41, %v3669_v35  ;;  %v2457_v16 = vcvt.s32.f32 %v2450_v22  ;;  %v2547_v28 = vclz %v6902_v61 }
 0x265   :  { %v4318_v29 = vmul.u32 %v4311_v59, %v4302_v15  ;;  %v4171_v57 = vsel %vm4170_vm0, %v4169_v5, 0  ;;  %v10498_v20 = vadd.s32 3, %v2464_v9  ;;  %v10500_v27 = vsel %vm6960_vm13, 0, %v6959_v50 }
 0x266   :  { %v4321_v1 = vadd.s32 1, %v10487_v19  ;;  %v4173_v21 = vand.u32 31, %v4171_v57  ;;  %v10506_v0 = vsel %vm10350_vm6, %v9843_v42, %v3932_v14  ;;  %v2458_v43 = vmul.f32 %v2457_v16, %v2455_v8  ;;  %v14795_v42 = vld [vmem:[#allocation68_spill] sm:$0xff] }
 0x267   :  { %v4111_v48 = vadd.s32 %v10275_v54, %v10286_v31  ;;  %vm4320_vm11 = vc.u32 %v10491_v11, %v10486_v58  ;;  %v4166_v50 = vand.u32 8388607, %v14475_v7  ;;  %v10516_v53 = vadd.f32 %v14701_v49, %v3714_v38 }
 0x268   :  { %v4322_v59 = vsel %vm4320_vm11, %v4321_v1, %v10487_v19  ;;  %v4174_v9 = vsub.s32 32, %v4173_v21  ;;  %v4131_v6 = vsub.s32 4294967266, %v10500_v27  ;;  %v6903_v22 = vadd.s32 4294967294, %v2547_v28 }
 0x269   :  { %14788 = vst [vmem:[#allocation82_spill] sm:$0xff] %v10516_v53  ;;  %v4323_v61 = vadd.s32 %v4322_v59, %v4318_v29  ;;  %v4176_v15 = vshll.u32 %v14655_v56, %v4173_v21  ;;  %v4179_v31 = vshll.u32 %v14646_v46, %v4173_v21  ;;  %v4172_v19 = vshrl.u32 %v4171_v57, 5 }
 0x26a   :  { %v4177_v54 = vshrl.u32 %v14646_v46, %v4174_v9  ;;  %v4180_v37 = vshrl.u32 %v14647_v34, %v4174_v9  ;;  %v4183_v35 = vshrl.u32 %v14644_v3, %v4174_v9  ;;  %v4185_v5 = vshll.u32 %v14644_v3, %v4173_v21 }
 0x26b   :  { %v4324_v24 = vadd.s32 536870912, %v4323_v61  ;;  %v4186_v8 = vshrl.u32 %v14643_v62, %v4174_v9  ;;  %v4182_v38 = vshll.u32 %v14647_v34, %v4173_v21  ;;  %v4189_v16 = vshrl.u32 %v14645_v13, %v4174_v9 }
 0x26c   :  { %v4178_v4 = vor.u32 %v4177_v54, %v4176_v15  ;;  %v4181_v14 = vor.u32 %v4180_v37, %v4179_v31  ;;  %v10528_v28 = vpop.eup %7615  ;;  %v4127_v29 = vsub.s32 32, %v10500_v27  ;;  %v4167_v1 = vor.u32 8388608, %v4166_v50 }
 0x26d   :  { %14789 = vst [vmem:[#allocation83_spill] sm:$0xff] %v10528_v28  ;;  %v4187_v59 = vor.u32 %v4186_v8, %v4185_v5  ;;  %v4474_v7 = vand.u32 2139095040, %v10516_v53  ;;  %v2459_v45 = vxor.u32 2147483648, %v2458_v43  ;;  %v4128_v57 = vshll.u32 %v10406_v39, %v10500_v27 }
 0x26e   :  { %v4184_v63 = vor.u32 %v4183_v35, %v4182_v38  ;;  %v4188_v15 = vshll.u32 %v14643_v62, %v4173_v21  ;;  %vm6904_vm6 = vcmp.lt.s32.totalorder %v6903_v22, 0  ;;  %v10535_v54 = vshrl.u32 %v4324_v24, 30  ;;  %v104_v24 = vpop.permute.xlu1 %103 }
 0x26f   :  { %vm4191_vm2 = vcmp.lt.s32.totalorder %v4172_v19, 1  ;;  %vm4194_vm8 = vcmp.lt.s32.totalorder %v4172_v19, 4  ;;  %v4132_v31 = vadd.s32 127, %v4131_v6  ;;  %v4129_v5 = vshrl.u32 %v4111_v48, %v4127_v29 }
 0x270   :  { %v4190_v37 = vor.u32 %v4189_v16, %v4188_v15  ;;  %v4199_v17 = vsel %vm4191_vm2, %v4178_v4, %v4181_v14  ;;  %v4200_v50 = vsel %vm4194_vm8, %v4187_v59, 920167782  ;;  %vm4193_vm1 = vcmp.lt.s32.totalorder %v4172_v19, 3 }
 0x271   :  { %v4207_v8 = vshll.u32 %v4167_v1, 8  ;;  %v4475_v40 = vshrl.u32 %v4474_v7, 23  ;;  %v10539_v10 = vsel %vm6904_vm6, 0, %v6903_v22  ;;  %vm4192_vm4 = vcmp.lt.s32.totalorder %v4172_v19, 2 }
 0x272   :  { %v4196_v39 = vsel %vm4194_vm8, %v4184_v63, 2102212464  ;;  %v4201_v27 = vsel %vm4193_vm1, %v4184_v63, %v4200_v50  ;;  %vm4057_vm7 = vcmp.lt.s32.totalorder %v10109_v12, 0  ;;  %v4326_v21 = vshll.u32 %v10535_v54, 30 }
 0x273   :  { %v4175_v6 = vshrl.u32 %v14655_v56, %v4174_v9  ;;  %v4202_v35 = vsel %vm4192_vm4, %v4199_v17, %v4201_v27  ;;  %v4203_v48 = vsel %vm4191_vm2, %v4181_v14, %v4184_v63  ;;  %v4133_v38 = vshll.u32 %v4132_v31, 23 }
 0x274   :  { %v4204_v7 = vsel %vm4194_vm8, %v4190_v37, 1326507024  ;;  %v10549_v22 = vmul.u32.u64.low %v4207_v8, %v4202_v35  ;;  %v10550_v16 = vmul.u32.u64.high %v4207_v8, %v4202_v35, %v10549_v22  ;;  %v4197_v1 = vsel %vm4193_vm1, %v4181_v14, %v4196_v39 }
 0x275   :  { %v4195_v29 = vsel %vm4191_vm2, %v4175_v6, %v4178_v4  ;;  %v4205_v15 = vsel %vm4193_vm1, %v4187_v59, %v4204_v7  ;;  %v6973_v50 = vadd.s32 4294967169, %v4475_v40  ;;  %v2460_v17 = vsel %vm2377_vm3, %v2459_v45, %v2458_v43 }
 0x276   :  { %v2555_v63 = vsub.s32 4294967266, %v10539_v10  ;;  %v4206_v9 = vsel %vm4192_vm4, %v4203_v48, %v4205_v15  ;;  %v161_v31 = vmul.f32 %v14695_v18, %v104_v24  ;;  %v10561_v37 = vsub.s32 %v4323_v61, %v4326_v21 }
 0x277   :  { %v10563_v27 = vmul.u32.u64.low %v4207_v8, %v4206_v9  ;;  %v10564_v35 = vmul.u32.u64.high %v4207_v8, %v4206_v9, %v10563_v27  ;;  %v4481_v4 = vadd.s32 1, %v6973_v50  ;;  %7617 = vcosq.f32 %v10506_v0 }
 0x278   :  { %v4141_v14 = vsub.s32 4, %v10369_v36  ;;  %v4198_v40 = vsel %vm4192_vm4, %v4195_v29, %v4197_v1  ;;  %v4217_v45 = vadd.s32 1, %v10550_v16  ;;  %v10573_v43 = vsel %vm10448_vm14, %v9946_v52, %v2460_v17 }
 0x279   :  { %v4130_v59 = vor.u32 %v4129_v5, %v4128_v57  ;;  %v4134_v61 = vor.u32 4788187, %v4133_v38  ;;  %vm4482_vm3 = vcmp.gt.s32.totalorder %v4481_v4, 0  ;;  %v2551_v39 = vsub.s32 32, %v10539_v10 }
 0x27a   :  { %v2556_v21 = vadd.s32 127, %v2555_v63  ;;  %v14481_v6 = vand.u32 2147483647, %v10516_v53  ;;  %v4483_v48 = vsel %vm4482_vm3, %v4481_v4, 0  ;;  %v4329_v24 = vsub.s32 0, %v10561_v37 }
 0x27b   :  { %v4214_v19 = vmul.u32 %v4207_v8, %v4198_v40  ;;  %vm4216_vm10 = vc.u32 %v10564_v35, %v10549_v22  ;;  %v10581_v7 = vadd.f32 %v14696_v26, %v161_v31  ;;  %v10586_v60 = vsel %vm4057_vm7, %v4141_v14, %v10369_v36 }
 0x27c   :  { %v2535_v57 = vadd.s32 %v10363_v47, %v10372_v55  ;;  %v4218_v5 = vsel %vm4216_vm10, %v4217_v45, %v10550_v16  ;;  %v4485_v38 = vand.u32 31, %v4483_v48  ;;  %v4135_v29 = vand.u32 2147483647, %v4134_v61  ;;  %v3677_v16 = vpop.permute.xlu0 %3676 }
 0x27d   :  { %14790 = vst [vmem:[#allocation84_spill] sm:$0xff] %v10581_v7  ;;  %v4137_v1 = vcvt.s32.f32 %v4130_v59  ;;  %v2552_v8 = vshll.u32 %v10456_v33, %v10539_v10  ;;  %v4219_v15 = vadd.s32 %v4218_v5, %v4214_v19  ;;  %v2557_v17 = vshll.u32 %v2556_v21, 23 }
 0x27e   :  { %v2553_v50 = vshrl.u32 %v2535_v57, %v2551_v39  ;;  %v4478_v63 = vand.u32 8388607, %v14481_v6  ;;  %v4486_v9 = vsub.s32 32, %v4485_v38  ;;  %v6966_v36 = vmin.u32 %v4329_v24, %v10561_v37 }
 0x27f   :  { %v4220_v31 = vadd.s32 536870912, %v4219_v15  ;;  %v4488_v47 = vshll.u32 %v14655_v56, %v4485_v38  ;;  %v818_v55 = vand.u32 2139095040, %v10581_v7  ;;  %v4491_v4 = vshll.u32 %v14646_v46, %v4485_v38 }
 0x280   :  { %v4489_v27 = vshrl.u32 %v14646_v46, %v4486_v9  ;;  %v4492_v10 = vshrl.u32 %v14647_v34, %v4486_v9  ;;  %v4497_v33 = vshll.u32 %v14644_v3, %v4485_v38  ;;  %v4484_v14 = vshrl.u32 %v4483_v48, 5 }
 0x281   :  { %v4494_v40 = vshll.u32 %v14647_v34, %v4485_v38  ;;  %v4495_v45 = vshrl.u32 %v14644_v3, %v4486_v9  ;;  %v4498_v59 = vshrl.u32 %v14643_v62, %v4486_v9  ;;  %v14791_v61 = vand.u32 2147483647, %v10109_v12 }
 0x282   :  { %v4138_v21 = vmul.f32 %v4137_v1, %v4135_v29  ;;  %v2565_v24 = vsub.s32 4, %v10413_v51  ;;  %v4500_v19 = vshll.u32 %v14643_v62, %v4485_v38  ;;  %v3716_v57 = vmul.f32 %v14700_v41, %v3677_v16 }
 0x283   :  { %vm10607_vm14 = vcmp.le.f32.partialorder %v14791_v61, 0.7853982  ;;  %v2554_v48 = vor.u32 %v2553_v50, %v2552_v8  ;;  %v2558_v5 = vor.u32 4788187, %v2557_v17  ;;  %v10614_v6 = vshrl.u32 %v4220_v31, 30 }
 0x284   :  { %v4479_v52 = vor.u32 8388608, %v4478_v63  ;;  %v4490_v2 = vor.u32 %v4489_v27, %v4488_v47  ;;  %v4493_v44 = vor.u32 %v4492_v10, %v4491_v4  ;;  %v4499_v30 = vor.u32 %v4498_v59, %v4497_v33  ;;  %v10617_v28 = vpop.eup %7617 }
 0x285   :  { %v4501_v61 = vshrl.u32 %v14645_v13, %v4486_v9  ;;  %14794 = vst [vmem:[#allocation85_spill] sm:$0xff] %v10617_v28  ;;  %vm2481_vm12 = vcmp.lt.s32.totalorder %v14795_v42, 0  ;;  %v4331_v29 = vclz %v6966_v36  ;;  %v4496_v1 = vor.u32 %v4495_v45, %v4494_v40 }
 0x286   :  { %vm4503_vm9 = vcmp.lt.s32.totalorder %v4484_v14, 1  ;;  %v819_v38 = vshrl.u32 %v818_v55, 23  ;;  %v4139_v32 = vxor.u32 2147483648, %v4138_v21  ;;  %v4487_v8 = vshrl.u32 %v14655_v56, %v4486_v9 }
 0x287   :  { %v4502_v50 = vor.u32 %v4501_v61, %v4500_v19  ;;  %vm4506_vm15 = vcmp.lt.s32.totalorder %v4484_v14, 4  ;;  %v2559_v17 = vand.u32 2147483647, %v2558_v5  ;;  %v4222_v63 = vshll.u32 %v10614_v6, 30 }
 0x288   :  { %vm4505_vm13 = vcmp.lt.s32.totalorder %v4484_v14, 3  ;;  %v4508_v31 = vsel %vm4506_vm15, %v4496_v1, 2102212464  ;;  %v14796_v47 = vand.u32 2147483647, %v14795_v42  ;;  %vm4504_vm11 = vcmp.lt.s32.totalorder %v4484_v14, 2 }
 0x289   :  { %v4511_v36 = vsel %vm4503_vm9, %v4490_v2, %v4493_v44  ;;  %v4512_v55 = vsel %vm4506_vm15, %v4499_v30, 920167782  ;;  %v4519_v9 = vshll.u32 %v4479_v52, 8  ;;  %v2561_v27 = vcvt.s32.f32 %v2554_v48 }
 0x28a   :  { %vm10625_vm0 = vcmp.le.f32.partialorder %v14796_v47, 0.7853982  ;;  %v6967_v4 = vadd.s32 4294967294, %v4331_v29  ;;  %v4515_v10 = vsel %vm4503_vm9, %v4493_v44, %v4496_v1  ;;  %v6841_v33 = vadd.s32 4294967169, %v819_v38 }
 0x28b   :  { %v4507_v40 = vsel %vm4503_vm9, %v4487_v8, %v4490_v2  ;;  %v4509_v45 = vsel %vm4505_vm13, %v4493_v44, %v4508_v31  ;;  %v4513_v59 = vsel %vm4505_vm13, %v4496_v1, %v4512_v55  ;;  %v4516_v19 = vsel %vm4506_vm15, %v4502_v50, 1326507024 }
 0x28c   :  { %v4144_v5 = vsel %vm10607_vm14, 0, %v10586_v60  ;;  %v10639_v61 = vsub.s32 %v4219_v15, %v4222_v63  ;;  %v4514_v52 = vsel %vm4504_vm11, %v4511_v36, %v4513_v59  ;;  %v4517_v48 = vsel %vm4505_vm13, %v4499_v30, %v4516_v19 }
 0x28d   :  { %v2562_v29 = vmul.f32 %v2561_v27, %v2559_v17  ;;  %v4518_v38 = vsel %vm4504_vm11, %v4515_v10, %v4517_v48  ;;  %v10644_v2 = vmul.u32.u64.low %v4519_v9, %v4514_v52  ;;  %v10645_v8 = vmul.u32.u64.high %v4519_v9, %v4514_v52, %v10644_v2 }
 0x28e   :  { %vm6968_vm6 = vcmp.lt.s32.totalorder %v6967_v4, 0  ;;  %v4510_v44 = vsel %vm4504_vm11, %v4507_v40, %v4509_v45  ;;  %v10649_v1 = vmul.u32.u64.low %v4519_v9, %v4518_v38  ;;  %v10650_v50 = vmul.u32.u64.high %v4519_v9, %v4518_v38, %v10649_v1 }
 0x28f   :  { %v4140_v60 = vsel %vm4057_vm7, %v4139_v32, %v4138_v21  ;;  %v2566_v30 = vsel %vm2481_vm12, %v2565_v24, %v10413_v51  ;;  %v825_v15 = vadd.s32 1, %v6841_v33  ;;  %v10658_v17 = vadd.f32 %v14701_v49, %v3716_v57 }
 0x290   :  { %7619 = vsinq.f32 %v10506_v0  ;;  %v10662_v63 = vand.u32 3, %v10498_v20  ;;  %v4148_v14 = vadd.s32 3, %v4144_v5  ;;  %v4225_v31 = vsub.s32 0, %v10639_v61 }
 0x291   :  { %14799 = vst [vmem:[#allocation86_spill] sm:$0xff] %v10658_v17  ;;  %v10665_v47 = vsel %vm6968_vm6, 0, %v6967_v4  ;;  %v4526_v36 = vmul.u32 %v4519_v9, %v4510_v44  ;;  %v4529_v32 = vadd.s32 1, %v10645_v8  ;;  %vm826_vm2 = vcmp.gt.s32.totalorder %v825_v15, 0 }
 0x292   :  { %14800 = vst [vmem:[#allocation87_spill] sm:$0xff] %v10662_v63  ;;  %7621 = vcosq.f32 %v10573_v43  ;;  %v10672_v51 = vsel %vm10607_vm14, %v10109_v12, %v4140_v60  ;;  %v2563_v0 = vxor.u32 2147483648, %v2562_v29  ;;  %v2568_v20 = vsel %vm10625_vm0, 0, %v2566_v30 }
 0x293   :  { %vm4528_vm8 = vc.u32 %v10650_v50, %v10644_v2  ;;  %v14490_v21 = vand.u32 2147483647, %v10581_v7  ;;  %v827_v24 = vsel %vm826_vm2, %v825_v15, 0  ;;  %v4682_v57 = vand.u32 2139095040, %v10658_v17 }
 0x294   :  { %7623 = vsinq.f32 %v10573_v43  ;;  %vm4265_vm1 = vcmp.lt.s32.totalorder %v10339_v23, 0  ;;  %v4339_v39 = vsub.s32 4294967266, %v10665_v47  ;;  %v6962_v55 = vmin.u32 %v4225_v31, %v10639_v61 }
 0x295   :  { %v4530_v9 = vsel %vm4528_vm8, %v4529_v32, %v10645_v8  ;;  %v10685_v27 = vand.u32 3, %v4148_v14  ;;  %v10687_v4 = vadd.s32 3, %v2568_v20  ;;  %v829_v33 = vand.u32 31, %v827_v24 }
 0x296   :  { %v4531_v10 = vadd.s32 %v4530_v9, %v4526_v36  ;;  %7625 = vcosq.f32 %v10672_v51  ;;  %v2564_v40 = vsel %vm2481_vm12, %v2563_v0, %v2562_v29  ;;  %v4319_v43 = vadd.s32 %v10486_v58, %v10491_v11 }
 0x297   :  { %14801 = vst [vmem:[#allocation88_spill] sm:$0xff] %v10685_v27  ;;  %v4349_v45 = vsub.s32 4, %v10535_v54  ;;  %v822_v19 = vand.u32 8388607, %v14490_v21  ;;  %v830_v5 = vsub.s32 32, %v829_v33  ;;  %v4683_v52 = vshrl.u32 %v4682_v57, 23 }
 0x298   :  { %v4532_v59 = vadd.s32 536870912, %v4531_v10  ;;  %v4335_v48 = vsub.s32 32, %v10665_v47  ;;  %v10698_v38 = vadd.s32 127, %v4339_v39  ;;  %v4227_v8 = vclz %v6962_v55 }
 0x299   :  { %v832_v44 = vshll.u32 %v14655_v56, %v829_v33  ;;  %v833_v29 = vshrl.u32 %v14646_v46, %v830_v5  ;;  %v835_v1 = vshll.u32 %v14646_v46, %v829_v33  ;;  %v836_v11 = vshrl.u32 %v14647_v34, %v830_v5 }
 0x29a   :  { %v838_v58 = vshll.u32 %v14647_v34, %v829_v33  ;;  %v10705_v60 = vshrl.u32 %v4532_v59, 30  ;;  %v839_v30 = vshrl.u32 %v14644_v3, %v830_v5  ;;  %v841_v15 = vshll.u32 %v14644_v3, %v829_v33 }
 0x29b   :  { %v842_v14 = vshrl.u32 %v14643_v62, %v830_v5  ;;  %v828_v31 = vshrl.u32 %v827_v24, 5  ;;  %v834_v36 = vor.u32 %v833_v29, %v832_v44  ;;  %v844_v32 = vshll.u32 %v14643_v62, %v829_v33 }
 0x29c   :  { %v6981_v0 = vadd.s32 4294967169, %v4683_v52  ;;  %v837_v20 = vor.u32 %v836_v11, %v835_v1  ;;  %v840_v57 = vor.u32 %v839_v30, %v838_v58  ;;  %v845_v55 = vshrl.u32 %v14645_v13, %v830_v5 }
 0x29d   :  { %v843_v39 = vor.u32 %v842_v14, %v841_v15  ;;  %v10712_v9 = vpop.eup %7619  ;;  %v10717_v59 = vsel %vm10625_vm0, %v14795_v42, %v2564_v40  ;;  %v10722_v24 = vsel %vm4265_vm1, %v4349_v45, %v10535_v54  ;;  %v823_v44 = vor.u32 8388608, %v822_v19 }
 0x29e   :  { %14802 = vst [vmem:[#allocation89_spill] sm:$0xff] %v10712_v9  ;;  %v4336_v52 = vshll.u32 %v10561_v37, %v10665_v47  ;;  %v4337_v29 = vshrl.u32 %v4319_v43, %v4335_v48  ;;  %v4534_v1 = vshll.u32 %v10705_v60, 30  ;;  %v846_v11 = vor.u32 %v845_v55, %v844_v32 }
 0x29f   :  { %v10728_v58 = vpop.eup %7621  ;;  %v14804_v16 = vand.u32 2147483647, %v10339_v23  ;;  %v4341_v54 = vshll.u32 %v10698_v38, 23  ;;  %v6963_v45 = vadd.s32 4294967294, %v4227_v8  ;;  %vm847_vm7 = vcmp.lt.s32.totalorder %v828_v31, 1 }
 0x2a0   :  { %14803 = vst [vmem:[#allocation90_spill] sm:$0xff] %v10728_v58  ;;  %vm850_vm3 = vcmp.lt.s32.totalorder %v828_v31, 4  ;;  %v855_v37 = vsel %vm847_vm7, %v834_v36, %v837_v20  ;;  %v4689_v43 = vadd.s32 1, %v6981_v0  ;;  %v831_v30 = vshrl.u32 %v14655_v56, %v830_v5  ;;  %v1881_v58 = vpop.permute.xlu1 %1880 }
 0x2a1   :  { %vm10732_vm4 = vcmp.le.f32.partialorder %v14804_v16, 0.7853982  ;;  %v852_v19 = vsel %vm850_vm3, %v840_v57, 2102212464  ;;  %v856_v47 = vsel %vm850_vm3, %v843_v39, 920167782  ;;  %v10738_v48 = vpop.eup %7623  ;;  %v859_v15 = vsel %vm847_vm7, %v837_v20, %v840_v57 }
 0x2a2   :  { %14807 = vst [vmem:[#allocation91_spill] sm:$0xff] %v10738_v48  ;;  %vm849_vm10 = vcmp.lt.s32.totalorder %v828_v31, 3  ;;  %v863_v14 = vshll.u32 %v823_v44, 8  ;;  %v10742_v32 = vsub.s32 %v4531_v10, %v4534_v1  ;;  %vm848_vm14 = vcmp.lt.s32.totalorder %v828_v31, 2 }
 0x2a3   :  { %v857_v38 = vsel %vm849_vm10, %v840_v57, %v856_v47  ;;  %v860_v8 = vsel %vm850_vm3, %v846_v11, 1326507024  ;;  %v10744_v55 = vpop.eup %7625  ;;  %v851_v16 = vsel %vm847_vm7, %v831_v30, %v834_v36  ;;  %v853_v21 = vsel %vm849_vm10, %v837_v20, %v852_v19  ;;  %v14809_v20 = vld [vmem:[#allocation4_spill] sm:$0xff] }
 0x2a4   :  { %14808 = vst [vmem:[#allocation92_spill] sm:$0xff] %v10744_v55  ;;  %v858_v0 = vsel %vm848_vm14, %v855_v37, %v857_v38  ;;  %v861_v33 = vsel %vm849_vm10, %v843_v39, %v860_v8  ;;  %vm4690_vm12 = vcmp.gt.s32.totalorder %v4689_v43, 0  ;;  %v10753_v10 = vor.u32 %v4337_v29, %v4336_v52 }
 0x2a5   :  { %v862_v5 = vsel %vm848_vm14, %v859_v15, %v861_v33  ;;  %v10749_v63 = vmul.u32.u64.low %v863_v14, %v858_v0  ;;  %v10750_v48 = vmul.u32.u64.high %v863_v14, %v858_v0, %v10749_v63  ;;  %v4691_v1 = vsel %vm4690_vm12, %v4689_v43, 0 }
 0x2a6   :  { %v10755_v57 = vmul.u32.u64.low %v863_v14, %v862_v5  ;;  %v10756_v44 = vmul.u32.u64.high %v863_v14, %v862_v5, %v10755_v57  ;;  %7627 = vsinq.f32 %v10672_v51  ;;  %vm6964_vm9 = vcmp.lt.s32.totalorder %v6963_v45, 0 }
 0x2a7   :  { %v4693_v36 = vand.u32 31, %v4691_v1  ;;  %v1929_v39 = vmul.f32 %v14809_v20, %v1881_v58  ;;  %7629 = vcosq.f32 %v10717_v59  ;;  %v10762_v33 = vand.u32 3, %v10687_v4 }
 0x2a8   :  { %v4537_v11 = vsub.s32 0, %v10742_v32  ;;  %v854_v52 = vsel %vm848_vm14, %v851_v16, %v853_v21  ;;  %v4342_v29 = vor.u32 4788187, %v4341_v54  ;;  %v873_v51 = vadd.s32 1, %v10750_v48  ;;  %v57_v16 = vld [vmem:[%s14347_s1 + $0x20] sm:$0xff] }
 0x2a9   :  { %14810 = vst [vmem:[#allocation4_spill] sm:$0xff] %v10762_v33  ;;  %v4694_v37 = vsub.s32 32, %v4693_v36  ;;  %v4345_v47 = vcvt.s32.f32 %v10753_v10  ;;  %v10771_v58 = vsel %vm6964_vm9, 0, %v6963_v45  ;;  %v14811_v43 = vand.u32 2147483647, %v10658_v17  ;;  %7196 = vmatprep.mubr.msk.f32.mxu0 %vm5438_vm5, %v57_v16 }
 0x2aa   :  { %v4696_v30 = vshll.u32 %v14655_v56, %v4693_v36  ;;  %vm4161_vm15 = vcmp.lt.s32.totalorder %v10416_v25, 0  ;;  %v870_v21 = vmul.u32 %v863_v14, %v854_v52  ;;  %vm872_vm13 = vc.u32 %v10756_v44, %v10749_v63 }
 0x2ab   :  { %v4686_v4 = vand.u32 8388607, %v14811_v43  ;;  %v4697_v31 = vshrl.u32 %v14646_v46, %v4694_v37  ;;  %v4699_v54 = vshll.u32 %v14646_v46, %v4693_v36  ;;  %v6974_v15 = vmin.u32 %v4537_v11, %v10742_v32 }
 0x2ac   :  { %v874_v45 = vsel %vm872_vm13, %v873_v51, %v10750_v48  ;;  %v4692_v38 = vshrl.u32 %v4691_v1, 5  ;;  %v4700_v8 = vshrl.u32 %v14647_v34, %v4694_v37  ;;  %v4235_v14 = vsub.s32 4294967266, %v10771_v58  ;;  %v58_v48 = vld [vmem:[%s14347_s1 + $0x28] sm:$0xff] }
 0x2ad   :  { %v10788_v0 = vadd.s32 %v874_v45, %v870_v21  ;;  %v4702_v5 = vshll.u32 %v14647_v34, %v4693_v36  ;;  %v4703_v10 = vshrl.u32 %v14644_v3, %v4694_v37  ;;  %v4343_v57 = vand.u32 2147483647, %v4342_v29  ;;  %7197 = vmatmul.mubr.msk.f32.gmra.mxu0 %vm5438_vm5, %v58_v48 }
 0x2ae   :  { %v4245_v1 = vsub.s32 4, %v10614_v6  ;;  %v4698_v11 = vor.u32 %v4697_v31, %v4696_v30  ;;  %v4705_v52 = vshll.u32 %v14644_v3, %v4693_v36  ;;  %v4701_v43 = vor.u32 %v4700_v8, %v4699_v54  ;;  %v14812_v30 = vld [vmem:[#allocation6_spill] sm:$0xff] }
 0x2af   :  { %v876_v51 = vadd.s32 536870912, %v10788_v0  ;;  %v4706_v21 = vshrl.u32 %v14643_v62, %v4694_v37  ;;  %v4708_v45 = vshll.u32 %v14643_v62, %v4693_v36  ;;  %v4539_v16 = vclz %v6974_v15 }
 0x2b0   :  { %v4687_v19 = vor.u32 8388608, %v4686_v4  ;;  %v4709_v42 = vshrl.u32 %v14645_v13, %v4694_v37  ;;  %vm4711_vm0 = vcmp.lt.s32.totalorder %v4692_v38, 1  ;;  %v4236_v29 = vadd.s32 127, %v4235_v14 }
 0x2b1   :  { %v4704_v33 = vor.u32 %v4703_v10, %v4702_v5  ;;  %v4707_v12 = vor.u32 %v4706_v21, %v4705_v52  ;;  %v10804_v31 = vadd.f32 %v14812_v30, %v1929_v39  ;;  %v14814_v48 = vand.u32 2147483647, %v10416_v25 }
 0x2b2   :  { %v4695_v54 = vshrl.u32 %v14655_v56, %v4694_v37  ;;  %v4710_v36 = vor.u32 %v4709_v42, %v4708_v45  ;;  %vm4713_vm6 = vcmp.lt.s32.totalorder %v4692_v38, 3  ;;  %vm4714_vm2 = vcmp.lt.s32.totalorder %v4692_v38, 4 }
 0x2b3   :  { %14813 = vst [vmem:[#allocation6_spill] sm:$0xff] %v10804_v31  ;;  %vm10808_vm11 = vcmp.le.f32.partialorder %v14814_v48, 0.7853982  ;;  %v10813_v4 = vshrl.u32 %v876_v51, 30  ;;  %vm4712_vm8 = vcmp.lt.s32.totalorder %v4692_v38, 2  ;;  %v4719_v8 = vsel %vm4711_vm0, %v4698_v11, %v4701_v43  ;;  %v10817_v39 = vpop.eup %7627 }
 0x2b4   :  { %v4716_v15 = vsel %vm4714_vm2, %v4704_v33, 2102212464  ;;  %14817 = vst [vmem:[#allocation93_spill] sm:$0xff] %v10817_v39  ;;  %v4246_v14 = vsel %vm4161_vm15, %v4245_v1, %v10614_v6  ;;  %v6975_v5 = vadd.s32 4294967294, %v4539_v16  ;;  %v4720_v10 = vsel %vm4714_vm2, %v4707_v12, 920167782  ;;  %v10823_v42 = vpop.eup %7629 }
 0x2b5   :  { %v4727_v37 = vshll.u32 %v4687_v19, 8  ;;  %14818 = vst [vmem:[#allocation94_spill] sm:$0xff] %v10823_v42  ;;  %v4346_v52 = vmul.f32 %v4345_v47, %v4343_v57  ;;  %v4721_v51 = vsel %vm4713_vm6, %v4704_v33, %v4720_v10  ;;  %v4723_v21 = vsel %vm4711_vm0, %v4701_v43, %v4704_v33  ;;  %v3685_v57 = vpop.permute.xlu0 %3684 }
 0x2b6   :  { %v2586_v45 = vand.u32 2139095040, %v10804_v31  ;;  %v4715_v48 = vsel %vm4711_vm0, %v4695_v54, %v4698_v11  ;;  %v4717_v27 = vsel %vm4713_vm6, %v4701_v43, %v4716_v15  ;;  %v4722_v39 = vsel %vm4712_vm8, %v4719_v8, %v4721_v51 }
 0x2b7   :  { %v4724_v6 = vsel %vm4714_vm2, %v4710_v36, 1326507024  ;;  %v4231_v1 = vsub.s32 32, %v10771_v58  ;;  %v4237_v19 = vshll.u32 %v4236_v29, 23  ;;  %v878_v16 = vshll.u32 %v10813_v4, 30 }
 0x2b8   :  { %v4725_v47 = vsel %vm4713_vm6, %v4707_v12, %v4724_v6  ;;  %vm6976_vm7 = vcmp.lt.s32.totalorder %v6975_v5, 0  ;;  %v10836_v10 = vmul.u32.u64.low %v4727_v37, %v4722_v39  ;;  %v10837_v42 = vmul.u32.u64.high %v4727_v37, %v4722_v39, %v10836_v10 }
 0x2b9   :  { %v4726_v33 = vsel %vm4712_vm8, %v4723_v21, %v4725_v47  ;;  %v4347_v11 = vxor.u32 2147483648, %v4346_v52  ;;  %v14819_v43 = vsel %vm10732_vm4, 0, %v10722_v24  ;;  %v4215_v29 = vadd.s32 %v10549_v22, %v10564_v35 }
 0x2ba   :  { %v4356_v54 = vadd.s32 3, %v14819_v43  ;;  %v4718_v36 = vsel %vm4712_vm8, %v4715_v48, %v4717_v27  ;;  %v10847_v12 = vmul.u32.u64.low %v4727_v37, %v4726_v33  ;;  %v10848_v15 = vmul.u32.u64.high %v4727_v37, %v4726_v33, %v10847_v12 }
 0x2bb   :  { %v2587_v8 = vshrl.u32 %v2586_v45, 23  ;;  %v3718_v51 = vmul.f32 %v14700_v41, %v3685_v57  ;;  %v4233_v39 = vshrl.u32 %v4215_v29, %v4231_v1  ;;  %v4248_v21 = vsel %vm10808_vm11, 0, %v4246_v14 }
 0x2bc   :  { %v10853_v6 = vsel %vm6976_vm7, 0, %v6975_v5  ;;  %v10856_v24 = vsub.s32 %v10788_v0, %v878_v16  ;;  %v4238_v47 = vor.u32 4788187, %v4237_v19  ;;  %v4734_v43 = vmul.u32 %v4727_v37, %v4718_v36 }
 0x2bd   :  { %v4737_v22 = vadd.s32 1, %v10837_v42  ;;  %v6905_v35 = vadd.s32 4294967169, %v2587_v8  ;;  %7631 = vsinq.f32 %v10717_v59  ;;  %v4348_v27 = vsel %vm4265_vm1, %v4347_v11, %v4346_v52  ;;  %v59_v11 = vld [vmem:[%s14347_s1 + $0x30] sm:$0xff] }
 0x2be   :  { %v10862_v38 = vand.u32 3, %v4356_v54  ;;  %v4232_v14 = vshll.u32 %v10639_v61, %v10771_v58  ;;  %vm4473_vm3 = vcmp.lt.s32.totalorder %v10516_v53, 0  ;;  %v4547_v0 = vsub.s32 4294967266, %v10853_v6  ;;  %7199 = vmatprep.mubr.msk.f32.mxu0 %vm5438_vm5, %v59_v11 }
 0x2bf   :  { %vm4736_vm10 = vc.u32 %v10848_v15, %v10836_v10  ;;  %v2593_v5 = vadd.s32 1, %v6905_v35  ;;  %v10871_v37 = vadd.f32 %v14701_v49, %v3718_v51  ;;  %v4252_v45 = vadd.s32 3, %v4248_v21 }
 0x2c0   :  { %14820 = vst [vmem:[#allocation95_spill] sm:$0xff] %v10862_v38  ;;  %v4234_v59 = vor.u32 %v4233_v39, %v4232_v14  ;;  %v881_v52 = vsub.s32 0, %v10856_v24  ;;  %v4738_v48 = vsel %vm4736_vm10, %v4737_v22, %v10837_v42  ;;  %v4351_v61 = vsel %vm10732_vm4, %v10339_v23, %v4348_v27 }
 0x2c1   :  { %14821 = vst [vmem:[#allocation96_spill] sm:$0xff] %v10871_v37  ;;  %v4239_v58 = vand.u32 2147483647, %v4238_v47  ;;  %v4739_v1 = vadd.s32 %v4738_v48, %v4734_v43  ;;  %vm2594_vm1 = vcmp.gt.s32.totalorder %v2593_v5, 0  ;;  %v4527_v19 = vadd.s32 %v10644_v2, %v10650_v50  ;;  %v60_v2 = vld [vmem:[%s14347_s1 + $0x38] sm:$0xff] }
 0x2c2   :  { %v4543_v16 = vsub.s32 32, %v10853_v6  ;;  %v14502_v57 = vand.u32 2147483647, %v10804_v31  ;;  %v2595_v33 = vsel %vm2594_vm1, %v2593_v5, 0  ;;  %v4548_v42 = vadd.s32 127, %v4547_v0  ;;  %7200 = vmatmul.mubr.msk.f32.gmra.mxu0 %vm5438_vm5, %v60_v2 }
 0x2c3   :  { %v4740_v54 = vadd.s32 536870912, %v4739_v1  ;;  %v2597_v29 = vand.u32 31, %v2595_v33  ;;  %v4890_v40 = vand.u32 2139095040, %v10871_v37  ;;  %7633 = vcosq.f32 %v4351_v61 }
 0x2c4   :  { %v4241_v50 = vcvt.s32.f32 %v4234_v59  ;;  %v10890_v36 = vand.u32 3, %v4252_v45  ;;  %v6842_v12 = vmin.u32 %v881_v52, %v10856_v24  ;;  %7635 = vsinq.f32 %v4351_v61 }
 0x2c5   :  { %v4557_v8 = vsub.s32 4, %v10705_v60  ;;  %v10895_v51 = vshrl.u32 %v4740_v54, 30  ;;  %v2598_v39 = vsub.s32 32, %v2597_v29  ;;  %v4544_v47 = vshll.u32 %v10742_v32, %v10853_v6 }
 0x2c6   :  { %14822 = vst [vmem:[#allocation97_spill] sm:$0xff] %v10890_v36  ;;  %v10897_v21 = vmul.f32 %v4241_v50, %v4239_v58  ;;  %v4545_v43 = vshrl.u32 %v4527_v19, %v4543_v16  ;;  %v2590_v22 = vand.u32 8388607, %v14502_v57  ;;  %v4549_v35 = vshll.u32 %v4548_v42, 23 }
 0x2c7   :  { %v4742_v27 = vshll.u32 %v10895_v51, 30  ;;  %v2601_v14 = vshrl.u32 %v14646_v46, %v2598_v39  ;;  %v4891_v0 = vshrl.u32 %v4890_v40, 23  ;;  %v883_v5 = vclz %v6842_v12 }
 0x2c8   :  { %v2600_v59 = vshll.u32 %v14655_v56, %v2597_v29  ;;  %v2604_v45 = vshrl.u32 %v14647_v34, %v2598_v39  ;;  %v2607_v52 = vshrl.u32 %v14644_v3, %v2598_v39  ;;  %v2603_v32 = vshll.u32 %v14646_v46, %v2597_v29 }
 0x2c9   :  { %v10908_v48 = vsub.s32 %v4739_v1, %v4742_v27  ;;  %v2609_v6 = vshll.u32 %v14644_v3, %v2597_v29  ;;  %v2610_v61 = vshrl.u32 %v14643_v62, %v2598_v39  ;;  %v10916_v58 = vsel %vm4473_vm3, %v4557_v8, %v10705_v60 }
 0x2ca   :  { %v2591_v19 = vor.u32 8388608, %v2590_v22  ;;  %v10918_v16 = vshrl.u32 %v2595_v33, 5  ;;  %v2606_v11 = vshll.u32 %v14647_v34, %v2597_v29  ;;  %v10921_v42 = vpop.eup %7631  ;;  %v2602_v1 = vor.u32 %v2601_v14, %v2600_v59 }
 0x2cb   :  { %14823 = vst [vmem:[#allocation98_spill] sm:$0xff] %v10921_v42  ;;  %v2605_v54 = vor.u32 %v2604_v45, %v2603_v32  ;;  %v2611_v40 = vor.u32 %v2610_v61, %v2609_v6  ;;  %v6989_v2 = vadd.s32 4294967169, %v4891_v0  ;;  %v4745_v50 = vsub.s32 0, %v10908_v48 }
 0x2cc   :  { %v2608_v12 = vor.u32 %v2607_v52, %v2606_v11  ;;  %v2612_v27 = vshll.u32 %v14643_v62, %v2597_v29  ;;  %v2613_v57 = vshrl.u32 %v14645_v13, %v2598_v39  ;;  %v4243_v60 = vxor.u32 2147483648, %v10897_v21 }
 0x2cd   :  { %v4546_v8 = vor.u32 %v4545_v43, %v4544_v47  ;;  %v4550_v33 = vor.u32 4788187, %v4549_v35  ;;  %v6843_v22 = vadd.s32 4294967294, %v883_v5  ;;  %vm2615_vm4 = vcmp.lt.s32.totalorder %v10918_v16, 1 }
 0x2ce   :  { %v2614_v36 = vor.u32 %v2613_v57, %v2612_v27  ;;  %vm2618_vm14 = vcmp.lt.s32.totalorder %v10918_v16, 4  ;;  %v10929_v14 = vshll.u32 %v2591_v19, 8  ;;  %vm2617_vm12 = vcmp.lt.s32.totalorder %v10918_v16, 3 }
 0x2cf   :  { %v2623_v0 = vsel %vm2615_vm4, %v2602_v1, %v2605_v54  ;;  %v2624_v29 = vsel %vm2618_vm14, %v2611_v40, 920167782  ;;  %v4897_v59 = vadd.s32 1, %v6989_v2  ;;  %vm817_vm9 = vcmp.lt.s32.totalorder %v10581_v7, 0 }
 0x2d0   :  { %v6982_v47 = vmin.u32 %v4745_v50, %v10908_v48  ;;  %vm2616_vm13 = vcmp.lt.s32.totalorder %v10918_v16, 2  ;;  %v2625_v57 = vsel %vm2617_vm12, %v2608_v12, %v2624_v29  ;;  %v2627_v43 = vsel %vm2615_vm4, %v2605_v54, %v2608_v12  ;;  %v10943_v35 = vpop.eup %7633 }
 0x2d1   :  { %14824 = vst [vmem:[#allocation99_spill] sm:$0xff] %v10943_v35  ;;  %v4553_v5 = vcvt.s32.f32 %v4546_v8  ;;  %v2626_v45 = vsel %vm2616_vm13, %v2623_v0, %v2625_v57  ;;  %v2628_v52 = vsel %vm2618_vm14, %v2614_v36, 1326507024  ;;  %v14504_v32 = vand.u32 2147483647, %v10871_v37  ;;  %v10950_v6 = vpop.eup %7635 }
 0x2d2   :  { %14825 = vst [vmem:[#allocation100_spill] sm:$0xff] %v10950_v6  ;;  %vm6844_vm0 = vcmp.lt.s32.totalorder %v6843_v22, 0  ;;  %v2629_v61 = vsel %vm2617_vm12, %v2611_v40, %v2628_v52  ;;  %v10955_v19 = vmul.u32.u64.low %v10929_v14, %v2626_v45  ;;  %v10956_v11 = vmul.u32.u64.high %v10929_v14, %v2626_v45, %v10955_v19  ;;  %v1885_v40 = vpop.permute.xlu1 %1884 }
 0x2d3   :  { %v4551_v2 = vand.u32 2147483647, %v4550_v33  ;;  %v2599_v50 = vshrl.u32 %v14655_v56, %v2598_v39  ;;  %v2620_v27 = vsel %vm2618_vm14, %v2608_v12, 2102212464  ;;  %v2630_v36 = vsel %vm2616_vm13, %v2627_v43, %v2629_v61 }
 0x2d4   :  { %v4747_v8 = vclz %v6982_v47  ;;  %v10965_v0 = vmul.u32.u64.low %v10929_v14, %v2630_v36  ;;  %v10966_v29 = vmul.u32.u64.high %v10929_v14, %v2630_v36, %v10965_v0  ;;  %vm4898_vm6 = vcmp.gt.s32.totalorder %v4897_v59, 0 }
 0x2d5   :  { %v10971_v57 = vsel %vm4161_vm15, %v4243_v60, %v10897_v21  ;;  %v10973_v33 = vsel %vm6844_vm0, 0, %v6843_v22  ;;  %v901_v39 = vsub.s32 4, %v10813_v4  ;;  %v4899_v12 = vsel %vm4898_vm6, %v4897_v59, 0 }
 0x2d6   :  { %v2619_v43 = vsel %vm2615_vm4, %v2599_v50, %v2602_v1  ;;  %v2621_v47 = vsel %vm2617_vm12, %v2605_v54, %v2620_v27  ;;  %v4894_v45 = vand.u32 8388607, %v14504_v32  ;;  %v4901_v52 = vand.u32 31, %v4899_v12  ;;  %v61_v1 = vld [vmem:[%s14347_s1 + $0x40] sm:$0xff] }
 0x2d7   :  { %v10982_v61 = vmul.f32 %v4553_v5, %v4551_v2  ;;  %v871_v21 = vadd.s32 %v10749_v63, %v10756_v44  ;;  %v2641_v60 = vadd.s32 1, %v10956_v11  ;;  %v1930_v22 = vmul.f32 %v14809_v20, %v1885_v40  ;;  %7202 = vmatprep.mubr.msk.f32.mxu0 %vm5438_vm5, %v61_v1  ;;  %v62_v63 = vld [vmem:[%s14347_s1 + $0x48] sm:$0xff] }
 0x2d8   :  { %v891_v59 = vsub.s32 4294967266, %v10973_v33  ;;  %v6983_v54 = vadd.s32 4294967294, %v4747_v8  ;;  %vm2640_vm15 = vc.u32 %v10966_v29, %v10955_v19  ;;  %v4902_v50 = vsub.s32 32, %v4901_v52  ;;  %7203 = vmatmul.mubr.msk.f32.gmra.mxu0 %vm5438_vm5, %v62_v63 }
 0x2d9   :  { %v11001_v44 = vsel %vm817_vm9, %v901_v39, %v10813_v4  ;;  %v2622_v5 = vsel %vm2616_vm13, %v2619_v43, %v2621_v47  ;;  %v4904_v2 = vshll.u32 %v14655_v56, %v4901_v52  ;;  %v4907_v27 = vshll.u32 %v14646_v46, %v4901_v52 }
 0x2da   :  { %v4895_v36 = vor.u32 8388608, %v4894_v45  ;;  %v4900_v8 = vshrl.u32 %v4899_v12, 5  ;;  %v4905_v0 = vshrl.u32 %v14646_v46, %v4902_v50  ;;  %v4908_v40 = vshrl.u32 %v14647_v34, %v4902_v50  ;;  %v64_v45 = vld [vmem:[%s14347_s1 + $0x58] sm:$0xff] }
 0x2db   :  { %v887_v1 = vsub.s32 32, %v10973_v33  ;;  %v2642_v4 = vsel %vm2640_vm15, %v2641_v60, %v10956_v11  ;;  %v4910_v39 = vshll.u32 %v14647_v34, %v4901_v52  ;;  %v4911_v16 = vshrl.u32 %v14644_v3, %v4902_v50 }
 0x2dc   :  { %v892_v43 = vadd.s32 127, %v891_v59  ;;  %vm6984_vm2 = vcmp.lt.s32.totalorder %v6983_v54, 0  ;;  %v2638_v47 = vmul.u32 %v10929_v14, %v2622_v5  ;;  %v4913_v63 = vshll.u32 %v14644_v3, %v4901_v52 }
 0x2dd   :  { %v14826_v12 = vand.u32 2147483647, %v10516_v53  ;;  %v4906_v32 = vor.u32 %v4905_v0, %v4904_v2  ;;  %v4909_v35 = vor.u32 %v4908_v40, %v4907_v27  ;;  %v4914_v11 = vshrl.u32 %v14643_v62, %v4902_v50 }
 0x2de   :  { %v4916_v60 = vshll.u32 %v14643_v62, %v4901_v52  ;;  %v11024_v6 = vadd.s32 %v2642_v4, %v2638_v47  ;;  %v4912_v59 = vor.u32 %v4911_v16, %v4910_v39  ;;  %v4917_v23 = vshrl.u32 %v14645_v13, %v4902_v50 }
 0x2df   :  { %vm11018_vm8 = vcmp.le.f32.partialorder %v14826_v12, 0.7853982  ;;  %vm4919_vm7 = vcmp.lt.s32.totalorder %v4900_v8, 1  ;;  %v4915_v14 = vor.u32 %v4914_v11, %v4913_v63  ;;  %vm4921_vm10 = vcmp.lt.s32.totalorder %v4900_v8, 3 }
 0x2e0   :  { %vm4922_vm1 = vcmp.lt.s32.totalorder %v4900_v8, 4  ;;  %v11028_v5 = vadd.f32 %v14812_v30, %v1930_v22  ;;  %v14829_v12 = vand.u32 2147483647, %v10581_v7  ;;  %v11037_v52 = vsel %vm6984_vm2, 0, %v6983_v54 }
 0x2e1   :  { %v4903_v27 = vshrl.u32 %v14655_v56, %v4902_v50  ;;  %vm4920_vm14 = vcmp.lt.s32.totalorder %v4900_v8, 2  ;;  %v4935_v0 = vshll.u32 %v4895_v36, 8  ;;  %v4918_v40 = vor.u32 %v4917_v23, %v4916_v60 }
 0x2e2   :  { %vm11032_vm4 = vcmp.le.f32.partialorder %v14829_v12, 0.7853982  ;;  %v4924_v4 = vsel %vm4922_vm1, %v4912_v59, 2102212464  ;;  %v4927_v39 = vsel %vm4919_vm7, %v4906_v32, %v4909_v35  ;;  %v4928_v22 = vsel %vm4922_vm1, %v4915_v14, 920167782 }
 0x2e3   :  { %v4555_v16 = vxor.u32 2147483648, %v10982_v61  ;;  %v893_v47 = vshll.u32 %v892_v43, 23  ;;  %v2644_v63 = vadd.s32 536870912, %v11024_v6  ;;  %v4929_v11 = vsel %vm4921_vm10, %v4912_v59, %v4928_v22 }
 0x2e4   :  { %v4735_v54 = vadd.s32 %v10836_v10, %v10848_v15  ;;  %v4755_v50 = vsub.s32 4294967266, %v11037_v52  ;;  %v4930_v23 = vsel %vm4920_vm14, %v4927_v39, %v4929_v11  ;;  %v2690_v36 = vand.u32 2139095040, %v11028_v5 }
 0x2e5   :  { %v889_v60 = vshrl.u32 %v871_v21, %v887_v1  ;;  %v4923_v12 = vsel %vm4919_vm7, %v4903_v27, %v4906_v32  ;;  %v4925_v38 = vsel %vm4921_vm10, %v4909_v35, %v4924_v4  ;;  %v4931_v43 = vsel %vm4919_vm7, %v4909_v35, %v4912_v59 }
 0x2e6   :  { %v888_v42 = vshll.u32 %v10856_v24, %v10973_v33  ;;  %vm4681_vm12 = vcmp.lt.s32.totalorder %v10658_v17, 0  ;;  %v4932_v10 = vsel %vm4922_vm1, %v4918_v40, 1326507024  ;;  %v894_v39 = vor.u32 4788187, %v893_v47  ;;  %v66_v47 = vld [vmem:[%s14347_s1 + $0x68] sm:$0xff] }
 0x2e7   :  { %v11058_v15 = vmul.u32.u64.low %v4935_v0, %v4930_v23  ;;  %v11059_v22 = vmul.u32.u64.high %v4935_v0, %v4930_v23, %v11058_v15  ;;  %v4751_v21 = vsub.s32 32, %v11037_v52  ;;  %v11063_v1 = vshrl.u32 %v2644_v63, 30 }
 0x2e8   :  { %v4933_v32 = vsel %vm4921_vm10, %v4915_v14, %v4932_v10  ;;  %v4756_v27 = vadd.s32 127, %v4755_v50  ;;  %v4926_v35 = vsel %vm4920_vm14, %v4923_v12, %v4925_v38  ;;  %v2691_v33 = vshrl.u32 %v2690_v36, 23 }
 0x2e9   :  { %v4934_v24 = vsel %vm4920_vm14, %v4931_v43, %v4933_v32  ;;  %v4560_v59 = vsel %vm11018_vm8, 0, %v10916_v58  ;;  %v890_v40 = vor.u32 %v889_v60, %v888_v42  ;;  %v14832_v4 = vand.u32 2147483647, %v10658_v17 }
 0x2ea   :  { %v11077_v63 = vmul.u32.u64.low %v4935_v0, %v4934_v24  ;;  %v11078_v11 = vmul.u32.u64.high %v4935_v0, %v4934_v24, %v11077_v63  ;;  %v4247_v38 = vsel %vm10808_vm11, %v10416_v25, %v10971_v57  ;;  %v904_v8 = vsel %vm11032_vm4, 0, %v11001_v44 }
 0x2eb   :  { %vm11073_vm13 = vcmp.le.f32.partialorder %v14832_v4, 0.7853982  ;;  %v4945_v58 = vadd.s32 1, %v11059_v22  ;;  %v6909_v42 = vadd.s32 4294967169, %v2691_v33  ;;  %v4556_v14 = vsel %vm4473_vm3, %v4555_v16, %v10982_v61  ;;  %v3693_v16 = vpop.permute.xlu0 %3692 }
 0x2ec   :  { %v895_v50 = vand.u32 2147483647, %v894_v39  ;;  %v2646_v23 = vshll.u32 %v11063_v1, 30  ;;  %v4942_v36 = vmul.u32 %v4935_v0, %v4926_v35  ;;  %v4752_v60 = vshll.u32 %v10908_v48, %v11037_v52  ;;  %v63_v39 = vld [vmem:[%s14347_s1 + $0x50] sm:$0xff] }
 0x2ed   :  { %v4753_v55 = vshrl.u32 %v4735_v54, %v4751_v21  ;;  %v4757_v57 = vshll.u32 %v4756_v27, 23  ;;  %v2697_v12 = vadd.s32 1, %v6909_v42  ;;  %v4564_v43 = vadd.s32 3, %v4560_v59  ;;  %7205 = vmatprep.mubr.msk.f32.mxu0 %vm5438_vm5, %v63_v39 }
 0x2ee   :  { %v897_v10 = vcvt.s32.f32 %v890_v40  ;;  %v4765_v44 = vsub.s32 4, %v10895_v51  ;;  %vm4944_vm11 = vc.u32 %v11078_v11, %v11058_v15  ;;  %7637 = vcosq.f32 %v4247_v38  ;;  %7206 = vmatmul.mubr.msk.f32.gmra.mxu0 %vm5438_vm5, %v64_v45 }
 0x2ef   :  { %v908_v32 = vadd.s32 3, %v904_v8  ;;  %v4946_v61 = vsel %vm4944_vm11, %v4945_v58, %v11059_v22  ;;  %vm2698_vm3 = vcmp.gt.s32.totalorder %v2697_v12, 0  ;;  %v4559_v48 = vsel %vm11018_vm8, %v10516_v53, %v4556_v14 }
 0x2f0   :  { %v898_v52 = vmul.f32 %v897_v10, %v895_v50  ;;  %v11102_v0 = vsub.s32 %v11024_v6, %v2646_v23  ;;  %v4947_v54 = vadd.s32 %v4946_v61, %v4942_v36  ;;  %7639 = vsinq.f32 %v4247_v38 }
 0x2f1   :  { %v4754_v21 = vor.u32 %v4753_v55, %v4752_v60  ;;  %v4758_v27 = vor.u32 4788187, %v4757_v57  ;;  %v2699_v35 = vsel %vm2698_vm3, %v2697_v12, 0  ;;  %v4766_v6 = vsel %vm4681_vm12, %v4765_v44, %v10895_v51  ;;  %v65_v51 = vld [vmem:[%s14347_s1 + $0x60] sm:$0xff] }
 0x2f2   :  { %v4948_v22 = vadd.s32 536870912, %v4947_v54  ;;  %v14511_v24 = vand.u32 2147483647, %v11028_v5  ;;  %v3720_v33 = vmul.f32 %v14700_v41, %v3693_v16  ;;  %7641 = vcosq.f32 %v4559_v48  ;;  %7208 = vmatprep.mubr.msk.f32.mxu0 %vm5438_vm5, %v65_v51 }
 0x2f3   :  { %v11117_v59 = vand.u32 3, %v4564_v43  ;;  %v11119_v40 = vand.u32 3, %v908_v32  ;;  %v2701_v4 = vand.u32 31, %v2699_v35  ;;  %7643 = vsinq.f32 %v4559_v48  ;;  %7209 = vmatmul.mubr.msk.f32.gmra.mxu0 %vm5438_vm5, %v66_v47 }
 0x2f4   :  { %v899_v63 = vxor.u32 2147483648, %v898_v52  ;;  %v2649_v38 = vsub.s32 0, %v11102_v0  ;;  %v11122_v8 = vshrl.u32 %v4948_v22, 30  ;;  %v4759_v58 = vand.u32 2147483647, %v4758_v27 }
 0x2f5   :  { %14835 = vst [vmem:[#allocation101_spill] sm:$0xff] %v11117_v59  ;;  %14836 = vst [vmem:[#allocation102_spill] sm:$0xff] %v11119_v40  ;;  %v4761_v42 = vcvt.s32.f32 %v4754_v21  ;;  %v4768_v14 = vsel %vm11073_vm13, 0, %v4766_v6  ;;  %v2702_v50 = vsub.s32 32, %v2701_v4  ;;  %v2694_v23 = vand.u32 8388607, %v14511_v24 }
 0x2f6   :  { %v2704_v36 = vshll.u32 %v14655_v56, %v2701_v4  ;;  %v2707_v60 = vshll.u32 %v14646_v46, %v2701_v4  ;;  %v11135_v55 = vadd.f32 %v14701_v49, %v3720_v33  ;;  %v4950_v57 = vshll.u32 %v11122_v8, 30 }
 0x2f7   :  { %v2705_v12 = vshrl.u32 %v14646_v46, %v2702_v50  ;;  %v2708_v43 = vshrl.u32 %v14647_v34, %v2702_v50  ;;  %v2711_v10 = vshrl.u32 %v14644_v3, %v2702_v50  ;;  %v900_v44 = vsel %vm817_vm9, %v899_v63, %v898_v52 }
 0x2f8   :  { %14837 = vst [vmem:[#allocation103_spill] sm:$0xff] %v11135_v55  ;;  %v11143_v32 = vadd.s32 3, %v4768_v14  ;;  %v6906_v61 = vmin.u32 %v2649_v38, %v11102_v0  ;;  %v2700_v16 = vshrl.u32 %v2699_v35, 5  ;;  %v4762_v48 = vmul.f32 %v4761_v42, %v4759_v58 }
 0x2f9   :  { %vm2585_vm0 = vcmp.lt.s32.totalorder %v10804_v31, 0  ;;  %v2706_v39 = vor.u32 %v2705_v12, %v2704_v36  ;;  %v2709_v21 = vor.u32 %v2708_v43, %v2707_v60  ;;  %v2710_v27 = vshll.u32 %v14647_v34, %v2701_v4 }
 0x2fa   :  { %v2695_v45 = vor.u32 8388608, %v2694_v23  ;;  %v2713_v6 = vshll.u32 %v14644_v3, %v2701_v4  ;;  %v2714_v22 = vshrl.u32 %v14643_v62, %v2702_v50  ;;  %v5098_v33 = vand.u32 2139095040, %v11135_v55 }
 0x2fb   :  { %v11151_v52 = vsub.s32 %v4947_v54, %v4950_v57  ;;  %v2712_v63 = vor.u32 %v2711_v10, %v2710_v27  ;;  %v2716_v38 = vshll.u32 %v14643_v62, %v2701_v4  ;;  %v2717_v35 = vshrl.u32 %v14645_v13, %v2702_v50  ;;  %v11155_v51 = vpop.eup %7637 }
 0x2fc   :  { %14838 = vst [vmem:[#allocation104_spill] sm:$0xff] %v11155_v51  ;;  %v903_v58 = vsel %vm11032_vm4, %v10581_v7, %v900_v44  ;;  %v14839_v42 = vand.u32 2147483647, %v10804_v31  ;;  %v2651_v23 = vclz %v6906_v61  ;;  %v2715_v54 = vor.u32 %v2714_v22, %v2713_v6 }
 0x2fd   :  { %vm2719_vm6 = vcmp.lt.s32.totalorder %v2700_v16, 1  ;;  %v2669_v36 = vsub.s32 4, %v11063_v1  ;;  %v2718_v4 = vor.u32 %v2717_v35, %v2716_v38  ;;  %vm2722_vm15 = vcmp.lt.s32.totalorder %v2700_v16, 4  ;;  %v11168_v57 = vpop.eup %7639 }
 0x2fe   :  { %vm11162_vm9 = vcmp.le.f32.partialorder %v14839_v42, 0.7853982  ;;  %v2727_v60 = vsel %vm2719_vm6, %v2706_v39, %v2709_v21  ;;  %14842 = vst [vmem:[#allocation105_spill] sm:$0xff] %v11168_v57  ;;  %v4763_v12 = vxor.u32 2147483648, %v4762_v48  ;;  %vm2721_vm2 = vcmp.lt.s32.totalorder %v2700_v16, 3 }
 0x2ff   :  { %v2728_v2 = vsel %vm2722_vm15, %v2715_v54, 920167782  ;;  %v5099_v43 = vshrl.u32 %v5098_v33, 23  ;;  %v4953_v10 = vsub.s32 0, %v11151_v52  ;;  %vm2720_vm8 = vcmp.lt.s32.totalorder %v2700_v16, 2  ;;  %v11173_v27 = vpop.eup %7641 }
 0x300   :  { %v2729_v44 = vsel %vm2721_vm2, %v2712_v63, %v2728_v2  ;;  %v2735_v61 = vshll.u32 %v2695_v45, 8  ;;  %14843 = vst [vmem:[#allocation106_spill] sm:$0xff] %v11173_v27  ;;  %v6907_v6 = vadd.s32 4294967294, %v2651_v23  ;;  %v2724_v22 = vsel %vm2722_vm15, %v2712_v63, 2102212464  ;;  %v11178_v42 = vpop.eup %7643  ;;  %v3701_v2 = vpop.permute.xlu0 %3700 }
 0x301   :  { %v2730_v38 = vsel %vm2720_vm8, %v2727_v60, %v2729_v44  ;;  %v2731_v35 = vsel %vm2719_vm6, %v2709_v21, %v2712_v63  ;;  %14844 = vst [vmem:[#allocation107_spill] sm:$0xff] %v11178_v42  ;;  %v2703_v24 = vshrl.u32 %v14655_v56, %v2702_v50  ;;  %v2732_v33 = vsel %vm2722_vm15, %v2718_v4, 1326507024 }
 0x302   :  { %v11182_v7 = vmul.u32.u64.low %v2735_v61, %v2730_v38  ;;  %v11183_v40 = vmul.u32.u64.high %v2735_v61, %v2730_v38, %v11182_v7  ;;  %7645 = vcosq.f32 %v903_v58  ;;  %v2670_v45 = vsel %vm2585_vm0, %v2669_v36, %v11063_v1 }
 0x303   :  { %v2733_v23 = vsel %vm2721_vm2, %v2715_v54, %v2732_v33  ;;  %v6997_v60 = vadd.s32 4294967169, %v5099_v43  ;;  %v6990_v63 = vmin.u32 %v4953_v10, %v11151_v52  ;;  %v2723_v44 = vsel %vm2719_vm6, %v2703_v24, %v2706_v39  ;;  %v3665_v10 = vpop.permute.xlu1 %3664 }
 0x304   :  { %v2725_v50 = vsel %vm2721_vm2, %v2709_v21, %v2724_v22  ;;  %v2734_v4 = vsel %vm2720_vm8, %v2731_v35, %v2733_v23  ;;  %7647 = vsinq.f32 %v903_v58  ;;  %v4764_v38 = vsel %vm4681_vm12, %v4763_v12, %v4762_v48 }
 0x305   :  { %vm6908_vm7 = vcmp.lt.s32.totalorder %v6907_v6, 0  ;;  %v5105_v27 = vadd.s32 1, %v6997_v60  ;;  %v2672_v1 = vsel %vm11162_vm9, 0, %v2670_v45  ;;  %v3722_v43 = vmul.f32 %v14700_v41, %v3701_v2 }
 0x306   :  { %v11198_v54 = vmul.u32.u64.low %v2735_v61, %v2734_v4  ;;  %v11199_v36 = vmul.u32.u64.high %v2735_v61, %v2734_v4, %v11198_v54  ;;  %v2726_v24 = vsel %vm2720_vm8, %v2723_v44, %v2725_v50  ;;  %v2745_v39 = vadd.s32 1, %v11183_v40 }
 0x307   :  { %v14516_v21 = vand.u32 2147483647, %v11135_v55  ;;  %vm5106_vm10 = vcmp.gt.s32.totalorder %v5105_v27, 0  ;;  %v2639_v48 = vadd.s32 %v10955_v19, %v10966_v29  ;;  %v11207_v58 = vsel %vm6908_vm7, 0, %v6907_v6 }
 0x308   :  { %v4955_v12 = vclz %v6990_v63  ;;  %v5107_v22 = vsel %vm5106_vm10, %v5105_v27, 0  ;;  %v11212_v35 = vsel %vm11073_vm13, %v10658_v17, %v4764_v38  ;;  %v11214_v33 = vadd.s32 3, %v2672_v1 }
 0x309   :  { %v5109_v16 = vand.u32 31, %v5107_v22  ;;  %v11217_v45 = vmul.f32 %v14700_v41, %v3665_v10  ;;  %v11221_v23 = vadd.s32 %v11058_v15, %v11078_v11  ;;  %v2742_v19 = vmul.u32 %v2735_v61, %v2726_v24  ;;  %v68_v24 = vld [vmem:[%s14347_s1 + $0x78] sm:$0xff] }
 0x30a   :  { %vm2744_vm1 = vc.u32 %v11199_v36, %v11182_v7  ;;  %v11226_v29 = vadd.f32 %v14701_v49, %v3722_v43  ;;  %v2655_v27 = vsub.s32 32, %v11207_v58  ;;  %v5102_v60 = vand.u32 8388607, %v14516_v21 }
 0x30b   :  { %v2746_v6 = vsel %vm2744_vm1, %v2745_v39, %v11183_v40  ;;  %v5110_v15 = vsub.s32 32, %v5109_v16  ;;  %v6991_v11 = vadd.s32 4294967294, %v4955_v12  ;;  %v5112_v2 = vshll.u32 %v14655_v56, %v5109_v16  ;;  %v67_v40 = vld [vmem:[%s14347_s1 + $0x70] sm:$0xff]  ;;  %s7750_s1 = smov 96  }
 0x30c   :  { %14845 = vst [vmem:[#allocation108_spill] sm:$0xff] %v11226_v29  ;;  %v2747_v61 = vadd.s32 %v2746_v6, %v2742_v19  ;;  %v5115_v63 = vshll.u32 %v14646_v46, %v5109_v16  ;;  %v5108_v44 = vshrl.u32 %v5107_v22, 5  ;;  %v5118_v38 = vshll.u32 %v14647_v34, %v5109_v16  ;;  %7211 = vmatprep.mubr.msk.f32.mxu0 %vm5438_vm5, %v67_v40 }
 0x30d   :  { %v5113_v50 = vshrl.u32 %v14646_v46, %v5110_v15  ;;  %v5116_v4 = vshrl.u32 %v14647_v34, %v5110_v15  ;;  %v5119_v54 = vshrl.u32 %v14644_v3, %v5110_v15  ;;  %v5121_v43 = vshll.u32 %v14644_v3, %v5109_v16  ;;  %7212 = vmatmul.mubr.msk.f32.gmra.mxu0 %vm5438_vm5, %v68_v24 }
 0x30e   :  { %v2748_v1 = vadd.s32 536870912, %v2747_v61  ;;  %v5122_v10 = vshrl.u32 %v14643_v62, %v5110_v15  ;;  %v2656_v39 = vshll.u32 %v11102_v0, %v11207_v58  ;;  %v2659_v12 = vsub.s32 4294967266, %v11207_v58 }
 0x30f   :  { %v5124_v22 = vshll.u32 %v14643_v62, %v5109_v16  ;;  %v5306_v19 = vand.u32 2139095040, %v11226_v29  ;;  %v11257_v47 = vpop.eup %7645  ;;  %v5114_v40 = vor.u32 %v5113_v50, %v5112_v2  ;;  %v5117_v21 = vor.u32 %v5116_v4, %v5115_v63 }
 0x310   :  { %14846 = vst [vmem:[#allocation109_spill] sm:$0xff] %v11257_v47  ;;  %v11259_v6 = vshrl.u32 %v2748_v1, 30  ;;  %v5125_v17 = vshrl.u32 %v14645_v13, %v5110_v15  ;;  %v5103_v53 = vor.u32 8388608, %v5102_v60  ;;  %v5120_v59 = vor.u32 %v5119_v54, %v5118_v38 }
 0x311   :  { %v5123_v42 = vor.u32 %v5122_v10, %v5121_v43  ;;  %vm5127_vm4 = vcmp.lt.s32.totalorder %v5108_v44, 1  ;;  %v11262_v0 = vpop.eup %7647  ;;  %vm6992_vm14 = vcmp.lt.s32.totalorder %v6991_v11, 0  ;;  %v5111_v16 = vshrl.u32 %v14655_v56, %v5110_v15 }
 0x312   :  { %14847 = vst [vmem:[#allocation110_spill] sm:$0xff] %v11262_v0  ;;  %v2750_v58 = vshll.u32 %v11259_v6, 30  ;;  %vm5130_vm5 = vcmp.lt.s32.totalorder %v5108_v44, 4  ;;  %v2660_v24 = vadd.s32 127, %v2659_v12  ;;  %v5126_v47 = vor.u32 %v5125_v17, %v5124_v22 }
 0x313   :  { %vm5129_vm12 = vcmp.lt.s32.totalorder %v5108_v44, 3  ;;  %v5132_v2 = vsel %vm5130_vm5, %v5120_v59, 2102212464  ;;  %vm5128_vm13 = vcmp.lt.s32.totalorder %v5108_v44, 2  ;;  %v5135_v60 = vsel %vm5127_vm4, %v5114_v40, %v5117_v21 }
 0x314   :  { %v11267_v63 = vsub.s32 %v2747_v61, %v2750_v58  ;;  %v5307_v50 = vshrl.u32 %v5306_v19, 23  ;;  %v2657_v4 = vshrl.u32 %v2639_v48, %v2655_v27  ;;  %v4958_v38 = vsel %vm6992_vm14, 0, %v6991_v11 }
 0x315   :  { %v5136_v1 = vsel %vm5130_vm5, %v5123_v42, 920167782  ;;  %v5143_v54 = vshll.u32 %v5103_v53, 8  ;;  %v5131_v15 = vsel %vm5127_vm4, %v5111_v16, %v5114_v40  ;;  %v5133_v17 = vsel %vm5129_vm12, %v5117_v21, %v5132_v2 }
 0x316   :  { %v2753_v43 = vsub.s32 0, %v11267_v63  ;;  %v5137_v10 = vsel %vm5129_vm12, %v5120_v59, %v5136_v1  ;;  %v2661_v12 = vshll.u32 %v2660_v24, 23  ;;  %v5139_v22 = vsel %vm5127_vm4, %v5117_v21, %v5120_v59 }
 0x317   :  { %v5138_v61 = vsel %vm5128_vm13, %v5135_v60, %v5137_v10  ;;  %v5140_v19 = vsel %vm5130_vm5, %v5126_v47, 1326507024  ;;  %v4959_v48 = vsub.s32 32, %v4958_v38  ;;  %v4963_v27 = vsub.s32 4294967266, %v4958_v38 }
 0x318   :  { %v5141_v11 = vsel %vm5129_vm12, %v5123_v42, %v5140_v19  ;;  %v7005_v53 = vadd.s32 4294967169, %v5307_v50  ;;  %v5134_v58 = vsel %vm5128_vm13, %v5131_v15, %v5133_v17  ;;  %v6910_v24 = vmin.u32 %v2753_v43, %v11267_v63  ;;  %v114_v17 = vpop.permute.xlu1 %113 }
 0x319   :  { %v5142_v40 = vsel %vm5128_vm13, %v5139_v22, %v5141_v11  ;;  %v11281_v16 = vmul.u32.u64.low %v5143_v54, %v5138_v61  ;;  %v11282_v2 = vmul.u32.u64.high %v5143_v54, %v5138_v61, %v11281_v16  ;;  %7649 = vcosq.f32 %v11212_v35 }
 0x31a   :  { %v11286_v60 = vmul.u32.u64.low %v5143_v54, %v5142_v40  ;;  %v11287_v1 = vmul.u32.u64.high %v5143_v54, %v5142_v40, %v11286_v60  ;;  %v5313_v59 = vadd.s32 1, %v7005_v53  ;;  %v2658_v21 = vor.u32 %v2657_v4, %v2656_v39 }
 0x31b   :  { %v2662_v47 = vor.u32 4788187, %v2661_v12  ;;  %v14524_v42 = vand.u32 2147483647, %v11226_v29  ;;  %v4960_v50 = vshll.u32 %v11151_v52, %v4958_v38  ;;  %v4961_v44 = vshrl.u32 %v11221_v23, %v4959_v48 }
 0x31c   :  { %v5150_v15 = vmul.u32 %v5143_v54, %v5134_v58  ;;  %vm5314_vm11 = vcmp.gt.s32.totalorder %v5313_v59, 0  ;;  %v4964_v10 = vadd.s32 127, %v4963_v27  ;;  %v5153_v43 = vadd.s32 1, %v11282_v2 }
 0x31d   :  { %v5315_v61 = vsel %vm5314_vm11, %v5313_v59, 0  ;;  %v11296_v22 = vadd.f32 %v14701_v49, %v11217_v45  ;;  %7651 = vsinq.f32 %v11212_v35  ;;  %v11300_v39 = vand.u32 3, %v11143_v32 }
 0x31e   :  { %v2755_v4 = vclz %v6910_v24  ;;  %vm5152_vm3 = vc.u32 %v11287_v1, %v11281_v16  ;;  %v11305_v52 = vand.u32 3, %v11214_v33  ;;  %v5317_v38 = vand.u32 31, %v5315_v61 }
 0x31f   :  { %14848 = vst [vmem:[#allocation111_spill] sm:$0xff] %v11296_v22  ;;  %14849 = vst [vmem:[#allocation112_spill] sm:$0xff] %v11300_v39  ;;  %v5154_v23 = vsel %vm5152_vm3, %v5153_v43, %v11282_v2  ;;  %v11309_v54 = vmul.f32 %v14695_v18, %v114_v17  ;;  %v2663_v45 = vand.u32 2147483647, %v2662_v47  ;;  %v2665_v12 = vcvt.s32.f32 %v2658_v21 }
 0x320   :  { %14850 = vst [vmem:[#allocation113_spill] sm:$0xff] %v11305_v52  ;;  %v5155_v19 = vadd.s32 %v5154_v23, %v5150_v15  ;;  %v5310_v32 = vand.u32 8388607, %v14524_v42  ;;  %v11313_v35 = vor.u32 %v4961_v44, %v4960_v50  ;;  %v4965_v48 = vshll.u32 %v4964_v10, 23 }
 0x321   :  { %v5318_v27 = vsub.s32 32, %v5317_v38  ;;  %v4370_v11 = vand.u32 2139095040, %v11296_v22  ;;  %v6911_v33 = vadd.s32 4294967294, %v2755_v4  ;;  %v5316_v58 = vshrl.u32 %v5315_v61, 5 }
 0x322   :  { %v5156_v53 = vadd.s32 536870912, %v5155_v19  ;;  %v5320_v40 = vshll.u32 %v14655_v56, %v5317_v38  ;;  %v5323_v24 = vshll.u32 %v14646_v46, %v5317_v38  ;;  %v5329_v59 = vshll.u32 %v14644_v3, %v5317_v38 }
 0x323   :  { %v5321_v2 = vshrl.u32 %v14646_v46, %v5318_v27  ;;  %v5324_v60 = vshrl.u32 %v14647_v34, %v5318_v27  ;;  %v5326_v47 = vshll.u32 %v14647_v34, %v5317_v38  ;;  %v5327_v50 = vshrl.u32 %v14644_v3, %v5318_v27 }
 0x324   :  { %v11321_v21 = vshrl.u32 %v5156_v53, 30  ;;  %v5330_v44 = vshrl.u32 %v14643_v62, %v5318_v27  ;;  %v11326_v15 = vmul.f32 %v2665_v12, %v2663_v45  ;;  %v4973_v17 = vsub.s32 4, %v11122_v8 }
 0x325   :  { %v5311_v10 = vor.u32 8388608, %v5310_v32  ;;  %v5332_v43 = vshll.u32 %v14643_v62, %v5317_v38  ;;  %vm4889_vm6 = vcmp.lt.s32.totalorder %v10871_v37, 0  ;;  %v4966_v61 = vor.u32 4788187, %v4965_v48 }
 0x326   :  { %v4969_v4 = vcvt.s32.f32 %v11313_v35  ;;  %vm6912_vm15 = vcmp.lt.s32.totalorder %v6911_v33, 0  ;;  %v5158_v23 = vshll.u32 %v11321_v21, 30  ;;  %v5322_v53 = vor.u32 %v5321_v2, %v5320_v40  ;;  %v11334_v45 = vpop.eup %7649 }
 0x327   :  { %v5325_v42 = vor.u32 %v5324_v60, %v5323_v24  ;;  %v5331_v39 = vor.u32 %v5330_v44, %v5329_v59  ;;  %v5333_v52 = vshrl.u32 %v14645_v13, %v5318_v27  ;;  %14851 = vst [vmem:[#allocation114_spill] sm:$0xff] %v11334_v45  ;;  %v5328_v32 = vor.u32 %v5327_v50, %v5326_v47 }
 0x328   :  { %v11336_v12 = vsub.s32 %v5155_v19, %v5158_v23  ;;  %vm5335_vm2 = vcmp.lt.s32.totalorder %v5316_v58, 1  ;;  %v4371_v38 = vshrl.u32 %v4370_v11, 23  ;;  %v14852_v0 = vand.u32 2147483647, %v10871_v37 }
 0x329   :  { %v2758_v35 = vsel %vm6912_vm15, 0, %v6911_v33  ;;  %v5319_v40 = vshrl.u32 %v14655_v56, %v5318_v27  ;;  %v5334_v2 = vor.u32 %v5333_v52, %v5332_v43  ;;  %vm5338_vm7 = vcmp.lt.s32.totalorder %v5316_v58, 4 }
 0x32a   :  { %vm11340_vm8 = vcmp.le.f32.partialorder %v14852_v0, 0.7853982  ;;  %v4967_v24 = vand.u32 2147483647, %v4966_v61  ;;  %v5161_v60 = vsub.s32 0, %v11336_v12  ;;  %vm5337_vm10 = vcmp.lt.s32.totalorder %v5316_v58, 3  ;;  %v11347_v59 = vpop.eup %7651 }
 0x32b   :  { %v5340_v19 = vsel %vm5338_vm7, %v5328_v32, 2102212464  ;;  %14855 = vst [vmem:[#allocation115_spill] sm:$0xff] %v11347_v59  ;;  %vm5336_vm1 = vcmp.lt.s32.totalorder %v5316_v58, 2  ;;  %v5343_v11 = vsel %vm5335_vm2, %v5322_v53, %v5325_v42  ;;  %v5344_v0 = vsel %vm5338_vm7, %v5331_v39, 920167782 }
 0x32c   :  { %v5351_v47 = vshll.u32 %v5311_v10, 8  ;;  %v2763_v50 = vsub.s32 4294967266, %v2758_v35  ;;  %v6998_v33 = vmin.u32 %v5161_v60, %v11336_v12  ;;  %v5347_v52 = vsel %vm5335_vm2, %v5325_v42, %v5328_v32 }
 0x32d   :  { %v6969_v27 = vadd.s32 4294967169, %v4371_v38  ;;  %v5339_v44 = vsel %vm5335_vm2, %v5319_v40, %v5322_v53  ;;  %v5341_v43 = vsel %vm5337_vm10, %v5325_v42, %v5340_v19  ;;  %v5345_v61 = vsel %vm5337_vm10, %v5328_v32, %v5344_v0  ;;  %v1889_v42 = vpop.permute.xlu1 %1888 }
 0x32e   :  { %v5348_v23 = vsel %vm5338_vm7, %v5334_v2, 1326507024  ;;  %v2743_v45 = vadd.s32 %v11182_v7, %v11199_v36  ;;  %v2759_v59 = vsub.s32 32, %v2758_v35  ;;  %v5346_v10 = vsel %vm5336_vm1, %v5343_v11, %v5345_v61 }
 0x32f   :  { %v5349_v51 = vsel %vm5337_vm10, %v5331_v39, %v5348_v23  ;;  %vm2689_vm4 = vcmp.lt.s32.totalorder %v11028_v5, 0  ;;  %v5163_v60 = vclz %v6998_v33  ;;  %v4970_v32 = vmul.f32 %v4969_v4, %v4967_v24 }
 0x330   :  { %v5350_v38 = vsel %vm5336_vm1, %v5347_v52, %v5349_v51  ;;  %v11363_v53 = vmul.u32.u64.low %v5351_v47, %v5346_v10  ;;  %v11364_v40 = vmul.u32.u64.high %v5351_v47, %v5346_v10, %v11363_v53  ;;  %v5342_v2 = vsel %vm5336_vm1, %v5339_v44, %v5341_v43 }
 0x331   :  { %v11368_v19 = vmul.u32.u64.low %v5351_v47, %v5350_v38  ;;  %v11369_v7 = vmul.u32.u64.high %v5351_v47, %v5350_v38, %v11368_v19  ;;  %v2667_v36 = vxor.u32 2147483648, %v11326_v15  ;;  %v4974_v39 = vsel %vm4889_vm6, %v4973_v17, %v11122_v8 }
 0x332   :  { %v2764_v11 = vadd.s32 127, %v2763_v50  ;;  %v4377_v0 = vadd.s32 1, %v6969_v27  ;;  %v2761_v51 = vshrl.u32 %v2743_v45, %v2759_v59  ;;  %v14531_v33 = vand.u32 2147483647, %v11296_v22 }
 0x333   :  { %v11378_v52 = vadd.f32 %v14696_v26, %v11309_v54  ;;  %v1931_v58 = vmul.f32 %v14809_v20, %v1889_v42  ;;  %v6999_v4 = vadd.s32 4294967294, %v5163_v60  ;;  %v5358_v24 = vmul.u32 %v5351_v47, %v5342_v2 }
 0x334   :  { %v5361_v44 = vadd.s32 1, %v11364_v40  ;;  %vm4378_vm14 = vcmp.gt.s32.totalorder %v4377_v0, 0  ;;  %v4971_v43 = vxor.u32 2147483648, %v4970_v32  ;;  %v4976_v8 = vsel %vm11340_vm8, 0, %v4974_v39 }
 0x335   :  { %14856 = vst [vmem:[#allocation116_spill] sm:$0xff] %v11378_v52  ;;  %v2760_v17 = vshll.u32 %v11267_v63, %v2758_v35  ;;  %v2773_v45 = vsub.s32 4, %v11259_v6  ;;  %v2668_v54 = vsel %vm2585_vm0, %v2667_v36, %v11326_v15  ;;  %v2765_v59 = vshll.u32 %v2764_v11, 23 }
 0x336   :  { %vm5360_vm5 = vc.u32 %v11369_v7, %v11363_v53  ;;  %v4379_v47 = vsel %vm4378_vm14, %v4377_v0, 0  ;;  %v4374_v61 = vand.u32 8388607, %v14531_v33  ;;  %v1026_v63 = vand.u32 2139095040, %v11378_v52 }
 0x337   :  { %v11391_v50 = vor.u32 %v2761_v51, %v2760_v17  ;;  %v5362_v27 = vsel %vm5360_vm5, %v5361_v44, %v11364_v40  ;;  %v11397_v35 = vadd.s32 3, %v4976_v8  ;;  %vm7000_vm12 = vcmp.lt.s32.totalorder %v6999_v4, 0 }
 0x338   :  { %v5363_v23 = vadd.s32 %v5362_v27, %v5358_v24  ;;  %v4381_v10 = vand.u32 31, %v4379_v47  ;;  %v11402_v15 = vsel %vm11162_vm9, %v10804_v31, %v2668_v54  ;;  %v11406_v60 = vsel %vm4889_vm6, %v4971_v43, %v4970_v32 }
 0x339   :  { %v11411_v38 = vsel %vm2689_vm4, %v2773_v45, %v11259_v6  ;;  %v11414_v40 = vadd.f32 %v14812_v30, %v1931_v58  ;;  %v11416_v42 = vor.u32 4788187, %v2765_v59  ;;  %v11420_v2 = vadd.s32 %v11281_v16, %v11287_v1 }
 0x33a   :  { %v5364_v14 = vadd.s32 536870912, %v5363_v23  ;;  %v4382_v19 = vsub.s32 32, %v4381_v10  ;;  %v11423_v32 = vsel %vm7000_vm12, 0, %v6999_v4  ;;  %v4375_v39 = vor.u32 8388608, %v4374_v61 }
 0x33b   :  { %14857 = vst [vmem:[#allocation117_spill] sm:$0xff] %v11414_v40  ;;  %v1027_v11 = vshrl.u32 %v1026_v63, 23  ;;  %v4384_v6 = vshll.u32 %v14655_v56, %v4381_v10  ;;  %v4387_v24 = vshll.u32 %v14646_v46, %v4381_v10  ;;  %v4393_v1 = vshll.u32 %v14644_v3, %v4381_v10 }
 0x33c   :  { %v11425_v0 = vshrl.u32 %v5364_v14, 30  ;;  %v4385_v51 = vshrl.u32 %v14646_v46, %v4382_v19  ;;  %v4388_v58 = vshrl.u32 %v14647_v34, %v4382_v19  ;;  %v4391_v16 = vshrl.u32 %v14644_v3, %v4382_v19 }
 0x33d   :  { %v4394_v44 = vshrl.u32 %v14643_v62, %v4382_v19  ;;  %v4380_v43 = vshrl.u32 %v4379_v47, 5  ;;  %v4390_v8 = vshll.u32 %v14647_v34, %v4381_v10  ;;  %v4396_v17 = vshll.u32 %v14643_v62, %v4381_v10 }
 0x33e   :  { %v5366_v4 = vshll.u32 %v11425_v0, 30  ;;  %vm5097_vm0 = vcmp.lt.s32.totalorder %v11135_v55, 0  ;;  %v4386_v45 = vor.u32 %v4385_v51, %v4384_v6  ;;  %v4389_v54 = vor.u32 %v4388_v58, %v4387_v24 }
 0x33f   :  { %v4395_v59 = vor.u32 %v4394_v44, %v4393_v1  ;;  %v4397_v27 = vshrl.u32 %v14645_v13, %v4382_v19  ;;  %v14858_v61 = vand.u32 2147483647, %v11028_v5  ;;  %v2767_v14 = vand.u32 2147483647, %v11416_v42 }
 0x340   :  { %v5181_v47 = vsub.s32 4, %v11321_v21  ;;  %v11447_v33 = vsub.s32 %v5363_v23, %v5366_v4  ;;  %v4392_v10 = vor.u32 %v4391_v16, %v4390_v8  ;;  %v5171_v36 = vsub.s32 4294967266, %v11423_v32 }
 0x341   :  { %vm11441_vm9 = vcmp.le.f32.partialorder %v14858_v61, 0.7853982  ;;  %v4398_v6 = vor.u32 %v4397_v27, %v4396_v17  ;;  %v4415_v51 = vshll.u32 %v4375_v39, 8  ;;  %v5167_v24 = vsub.s32 32, %v11423_v32 }
 0x342   :  { %v5369_v1 = vsub.s32 0, %v11447_v33  ;;  %vm4399_vm13 = vcmp.lt.s32.totalorder %v4380_v43, 1  ;;  %vm4402_vm11 = vcmp.lt.s32.totalorder %v4380_v43, 4  ;;  %v4383_v44 = vshrl.u32 %v14655_v56, %v4382_v19 }
 0x343   :  { %v4407_v42 = vsel %vm4399_vm13, %v4386_v45, %v4389_v54  ;;  %v4408_v61 = vsel %vm4402_vm11, %v4395_v59, 920167782  ;;  %v6849_v23 = vadd.s32 4294967169, %v1027_v11  ;;  %v14861_v16 = vand.u32 2147483647, %v11135_v55 }
 0x344   :  { %v7006_v39 = vmin.u32 %v5369_v1, %v11447_v33  ;;  %vm4401_vm6 = vcmp.lt.s32.totalorder %v4380_v43, 3  ;;  %v4404_v8 = vsel %vm4402_vm11, %v4392_v10, 2102212464  ;;  %v4411_v17 = vsel %vm4399_vm13, %v4389_v54, %v4392_v10 }
 0x345   :  { %vm11457_vm3 = vcmp.le.f32.partialorder %v14861_v16, 0.7853982  ;;  %v5172_v27 = vadd.s32 127, %v5171_v36  ;;  %vm4400_vm15 = vcmp.lt.s32.totalorder %v4380_v43, 2  ;;  %v4409_v58 = vsel %vm4401_vm6, %v4392_v10, %v4408_v61  ;;  %v1893_v43 = vpop.permute.xlu1 %1892 }
 0x346   :  { %v4412_v19 = vsel %vm4402_vm11, %v4398_v6, 1326507024  ;;  %v5371_v31 = vclz %v7006_v39  ;;  %v4403_v25 = vsel %vm4399_vm13, %v4383_v44, %v4386_v45  ;;  %v4410_v11 = vsel %vm4400_vm15, %v4407_v42, %v4409_v58 }
 0x347   :  { %v4413_v57 = vsel %vm4401_vm6, %v4395_v59, %v4412_v19  ;;  %v4405_v16 = vsel %vm4401_vm6, %v4389_v54, %v4404_v8  ;;  %v11466_v9 = vmul.u32.u64.low %v4415_v51, %v4410_v11  ;;  %v11467_v26 = vmul.u32.u64.high %v4415_v51, %v4410_v11, %v11466_v9 }
 0x348   :  { %v4414_v28 = vsel %vm4400_vm15, %v4411_v17, %v4413_v57  ;;  %v7007_v1 = vadd.s32 4294967294, %v5371_v31  ;;  %v1033_v36 = vadd.s32 1, %v6849_v23  ;;  %7653 = vcosq.f32 %v11402_v15 }
 0x349   :  { %v11470_v18 = vmul.u32.u64.low %v4415_v51, %v4414_v28  ;;  %v11471_v49 = vmul.u32.u64.high %v4415_v51, %v4414_v28, %v11470_v18  ;;  %v11478_v45 = vsel %vm11340_vm8, %v10871_v37, %v11406_v60  ;;  %v11481_v54 = vand.u32 3, %v11397_v35 }
 0x34a   :  { %v2776_v57 = vsel %vm11441_vm9, 0, %v11411_v38  ;;  %v14865_v31 = vcvt.s32.f32 %v11391_v50  ;;  %v11493_v18 = vsel %vm5097_vm0, %v5181_v47, %v11321_v21  ;;  %v4406_v48 = vsel %vm4400_vm15, %v4403_v25, %v4405_v16 }
 0x34b   :  { %14864 = vst [vmem:[#allocation118_spill] sm:$0xff] %v11481_v54  ;;  %vm1034_vm2 = vcmp.gt.s32.totalorder %v1033_v36, 0  ;;  %v5168_v35 = vshll.u32 %v11336_v12, %v11423_v32  ;;  %vm7008_vm8 = vcmp.lt.s32.totalorder %v7007_v1, 0  ;;  %v4425_v60 = vadd.s32 1, %v11467_v26 }
 0x34c   :  { %v11488_v28 = vmul.f32 %v14865_v31, %v2767_v14  ;;  %v1035_v59 = vsel %vm1034_vm2, %v1033_v36, 0  ;;  %v5169_v38 = vshrl.u32 %v11420_v2, %v5167_v24  ;;  %v5173_v50 = vshll.u32 %v5172_v27, 23 }
 0x34d   :  { %v14866_v14 = vand.u32 2147483647, %v11378_v52  ;;  %v2794_v6 = vand.u32 2139095040, %v11414_v40  ;;  %7655 = vsinq.f32 %v11402_v15  ;;  %v4422_v21 = vmul.u32 %v4415_v51, %v4406_v48 }
 0x34e   :  { %vm4424_vm7 = vc.u32 %v11471_v49, %v11466_v9  ;;  %v1037_v25 = vand.u32 31, %v1035_v59  ;;  %7657 = vcosq.f32 %v11478_v45  ;;  %v11507_v12 = vadd.s32 3, %v2776_v57 }
 0x34f   :  { %v1030_v10 = vand.u32 8388607, %v14866_v14  ;;  %v11509_v32 = vsel %vm7008_vm8, 0, %v7007_v1  ;;  %v4426_v2 = vsel %vm4424_vm7, %v4425_v60, %v11467_v26  ;;  %v5170_v58 = vor.u32 %v5169_v38, %v5168_v35 }
 0x350   :  { %v4427_v15 = vadd.s32 %v4426_v2, %v4422_v21  ;;  %v1038_v51 = vsub.s32 32, %v1037_v25  ;;  %v5174_v24 = vor.u32 4788187, %v5173_v50  ;;  %v2795_v42 = vshrl.u32 %v2794_v6, 23 }
 0x351   :  { %v1031_v44 = vor.u32 8388608, %v1030_v10  ;;  %v5379_v61 = vsub.s32 4294967266, %v11509_v32  ;;  %v1040_v26 = vshll.u32 %v14655_v56, %v1037_v25  ;;  %v1043_v17 = vshll.u32 %v14646_v46, %v1037_v25 }
 0x352   :  { %v4428_v23 = vadd.s32 536870912, %v4427_v15  ;;  %v1041_v39 = vshrl.u32 %v14646_v46, %v1038_v51  ;;  %v1044_v8 = vshrl.u32 %v14647_v34, %v1038_v51  ;;  %v1047_v27 = vshrl.u32 %v14644_v3, %v1038_v51 }
 0x353   :  { %v1050_v19 = vshrl.u32 %v14643_v62, %v1038_v51  ;;  %v1036_v16 = vshrl.u32 %v1035_v59, 5  ;;  %v1046_v1 = vshll.u32 %v14647_v34, %v1037_v25  ;;  %v1049_v36 = vshll.u32 %v14644_v3, %v1037_v25 }
 0x354   :  { %v11523_v11 = vshrl.u32 %v4428_v23, 30  ;;  %v1042_v57 = vor.u32 %v1041_v39, %v1040_v26  ;;  %v1045_v31 = vor.u32 %v1044_v8, %v1043_v17  ;;  %v1052_v48 = vshll.u32 %v14643_v62, %v1037_v25 }
 0x355   :  { %v1053_v35 = vshrl.u32 %v14645_v13, %v1038_v51  ;;  %v5359_v60 = vadd.s32 %v11363_v53, %v11369_v7  ;;  %v1048_v50 = vor.u32 %v1047_v27, %v1046_v1  ;;  %v1051_v14 = vor.u32 %v1050_v19, %v1049_v36  ;;  %v11532_v10 = vpop.eup %7653 }
 0x356   :  { %v4430_v38 = vshll.u32 %v11523_v11, 30  ;;  %14867 = vst [vmem:[#allocation119_spill] sm:$0xff] %v11532_v10  ;;  %v5175_v59 = vand.u32 2147483647, %v5174_v24  ;;  %v5177_v6 = vcvt.s32.f32 %v5170_v58  ;;  %v1071_v2 = vshll.u32 %v1031_v44, 8 }
 0x357   :  { %v1054_v21 = vor.u32 %v1053_v35, %v1052_v48  ;;  %v5375_v23 = vsub.s32 32, %v11509_v32  ;;  %vm1055_vm10 = vcmp.lt.s32.totalorder %v1036_v16, 1  ;;  %v6913_v25 = vadd.s32 4294967169, %v2795_v42 }
 0x358   :  { %v11535_v39 = vsub.s32 %v4427_v15, %v4430_v38  ;;  %v5380_v8 = vadd.s32 127, %v5379_v61  ;;  %v1039_v26 = vshrl.u32 %v14655_v56, %v1038_v51  ;;  %vm1058_vm1 = vcmp.lt.s32.totalorder %v1036_v16, 4 }
 0x359   :  { %v1063_v53 = vsel %vm1055_vm10, %v1042_v57, %v1045_v31  ;;  %vm1057_vm14 = vcmp.lt.s32.totalorder %v1036_v16, 3  ;;  %v1060_v17 = vsel %vm1058_vm1, %v1048_v50, 2102212464  ;;  %v1064_v24 = vsel %vm1058_vm1, %v1051_v14, 920167782 }
 0x35a   :  { %v4433_v7 = vsub.s32 0, %v11535_v39  ;;  %v11540_v58 = vpop.eup %7655  ;;  %vm5305_vm5 = vcmp.lt.s32.totalorder %v11226_v29, 0  ;;  %vm1056_vm12 = vcmp.lt.s32.totalorder %v1036_v16, 2  ;;  %v1065_v15 = vsel %vm1057_vm14, %v1048_v50, %v1064_v24 }
 0x35b   :  { %14868 = vst [vmem:[#allocation120_spill] sm:$0xff] %v11540_v58  ;;  %v1067_v44 = vsel %vm1055_vm10, %v1045_v31, %v1048_v50  ;;  %v1068_v42 = vsel %vm1058_vm1, %v1054_v21, 1326507024  ;;  %v11544_v61 = vpop.eup %7657  ;;  %v5178_v51 = vmul.f32 %v5177_v6, %v5175_v59  ;;  %v1059_v19 = vsel %vm1055_vm10, %v1039_v26, %v1042_v57 }
 0x35c   :  { %14869 = vst [vmem:[#allocation121_spill] sm:$0xff] %v11544_v61  ;;  %v6970_v27 = vmin.u32 %v4433_v7, %v11535_v39  ;;  %v1066_v1 = vsel %vm1056_vm12, %v1063_v53, %v1065_v15  ;;  %v1061_v36 = vsel %vm1057_vm14, %v1045_v31, %v1060_v17  ;;  %v1069_v48 = vsel %vm1057_vm14, %v1051_v14, %v1068_v42 }
 0x35d   :  { %v11549_v35 = vmul.u32.u64.low %v1071_v2, %v1066_v1  ;;  %v11550_v38 = vmul.u32.u64.high %v1071_v2, %v1066_v1, %v11549_v35  ;;  %v5376_v50 = vshll.u32 %v11447_v33, %v11509_v32  ;;  %v5377_v21 = vshrl.u32 %v5359_v60, %v5375_v23 }
 0x35e   :  { %v4435_v24 = vclz %v6970_v27  ;;  %v1070_v59 = vsel %vm1056_vm12, %v1067_v44, %v1069_v48  ;;  %v5381_v6 = vshll.u32 %v5380_v8, 23  ;;  %v2801_v57 = vadd.s32 1, %v6913_v25 }
 0x35f   :  { %v11556_v7 = vmul.u32.u64.low %v1071_v2, %v1070_v59  ;;  %v11557_v47 = vmul.u32.u64.high %v1071_v2, %v1070_v59, %v11556_v7  ;;  %v14870_v31 = vsel %vm11457_vm3, 0, %v11493_v18  ;;  %v1062_v53 = vsel %vm1056_vm12, %v1059_v19, %v1061_v36 }
 0x360   :  { %v5188_v14 = vadd.s32 3, %v14870_v31  ;;  %v6971_v26 = vadd.s32 4294967294, %v4435_v24  ;;  %v1932_v17 = vmul.f32 %v14809_v20, %v1893_v43  ;;  %v14871_v33 = vxor.u32 2147483648, %v11488_v28 }
 0x361   :  { %v1081_v60 = vadd.s32 1, %v11550_v38  ;;  %v14542_v23 = vand.u32 2147483647, %v11414_v40  ;;  %vm2802_vm13 = vcmp.gt.s32.totalorder %v2801_v57, 0  ;;  %v5179_v25 = vxor.u32 2147483648, %v5178_v51 }
 0x362   :  { %v2772_v32 = vsel %vm2689_vm4, %v14871_v33, %v11488_v28  ;;  %v5389_v18 = vsub.s32 4, %v11425_v0  ;;  %vm6972_vm11 = vcmp.lt.s32.totalorder %v6971_v26, 0  ;;  %v2803_v8 = vsel %vm2802_vm13, %v2801_v57, 0 }
 0x363   :  { %v5378_v16 = vor.u32 %v5377_v21, %v5376_v50  ;;  %v5382_v15 = vor.u32 4788187, %v5381_v6  ;;  %v1078_v44 = vmul.u32 %v1071_v2, %v1062_v53  ;;  %vm1080_vm6 = vc.u32 %v11557_v47, %v11549_v35 }
 0x364   :  { %7659 = vsinq.f32 %v11478_v45  ;;  %v11577_v28 = vand.u32 3, %v11507_v12  ;;  %v1082_v43 = vsel %vm1080_vm6, %v1081_v60, %v11550_v38  ;;  %v11581_v42 = vadd.f32 %v14812_v30, %v1932_v17 }
 0x365   :  { %v11583_v27 = vand.u32 3, %v5188_v14  ;;  %v11585_v19 = vsel %vm6972_vm11, 0, %v6971_v26  ;;  %v1083_v1 = vadd.s32 %v1082_v43, %v1078_v44  ;;  %v2805_v36 = vand.u32 31, %v2803_v8  ;;  %v14882_v26 = vld [vmem:[#allocation13_spill] sm:$0xff] }
 0x366   :  { %14872 = vst [vmem:[#allocation122_spill] sm:$0xff] %v11581_v42  ;;  %v11590_v2 = vsel %vm11441_vm9, %v11028_v5, %v2772_v32  ;;  %v11594_v45 = vsel %vm5097_vm0, %v5179_v25, %v5178_v51  ;;  %v11599_v12 = vsel %vm5305_vm5, %v5389_v18, %v11425_v0  ;;  %v2798_v48 = vand.u32 8388607, %v14542_v23 }
 0x367   :  { %14873 = vst [vmem:[#allocation123_spill] sm:$0xff] %v11583_v27  ;;  %v5383_v38 = vand.u32 2147483647, %v5382_v15  ;;  %v5385_v50 = vcvt.s32.f32 %v5378_v16  ;;  %v1084_v21 = vadd.s32 536870912, %v1083_v1  ;;  %v2806_v24 = vsub.s32 32, %v2805_v36 }
 0x368   :  { %v4443_v63 = vsub.s32 4294967266, %v11585_v19  ;;  %v11604_v59 = vshrl.u32 %v2803_v8, 5  ;;  %v2808_v6 = vshll.u32 %v14655_v56, %v2805_v36  ;;  %v2898_v51 = vand.u32 2139095040, %v11581_v42 }
 0x369   :  { %v11608_v7 = vshrl.u32 %v1084_v21, 30  ;;  %v2809_v0 = vshrl.u32 %v14646_v46, %v2806_v24  ;;  %v2811_v57 = vshll.u32 %v14646_v46, %v2805_v36  ;;  %v2812_v31 = vshrl.u32 %v14647_v34, %v2806_v24 }
 0x36a   :  { %v14874_v14 = vand.u32 2147483647, %v11226_v29  ;;  %v2814_v53 = vshll.u32 %v14647_v34, %v2805_v36  ;;  %v2815_v17 = vshrl.u32 %v14644_v3, %v2806_v24  ;;  %v2817_v33 = vshll.u32 %v14644_v3, %v2805_v36 }
 0x36b   :  { %v2818_v32 = vshrl.u32 %v14643_v62, %v2806_v24  ;;  %v4423_v60 = vadd.s32 %v11466_v9, %v11471_v49  ;;  %v1086_v25 = vshll.u32 %v11608_v7, 30  ;;  %v2810_v18 = vor.u32 %v2809_v0, %v2808_v6 }
 0x36c   :  { %vm11615_vm4 = vcmp.le.f32.partialorder %v14874_v14, 0.7853982  ;;  %v2813_v8 = vor.u32 %v2812_v31, %v2811_v57  ;;  %v5386_v16 = vmul.f32 %v5385_v50, %v5383_v38  ;;  %v2799_v15 = vor.u32 8388608, %v2798_v48 }
 0x36d   :  { %v2816_v44 = vor.u32 %v2815_v17, %v2814_v53  ;;  %v2819_v43 = vor.u32 %v2818_v32, %v2817_v33  ;;  %v11626_v21 = vsub.s32 %v1083_v1, %v1086_v25  ;;  %v2820_v14 = vshll.u32 %v14643_v62, %v2805_v36 }
 0x36e   :  { %v2821_v23 = vshrl.u32 %v14645_v13, %v2806_v24  ;;  %v2899_v27 = vshrl.u32 %v2898_v51, 23  ;;  %v4439_v61 = vsub.s32 32, %v11585_v19  ;;  %v4444_v54 = vadd.s32 127, %v4443_v63 }
 0x36f   :  { %vm2823_vm0 = vcmp.lt.s32.totalorder %v11604_v59, 1  ;;  %vm2824_vm9 = vcmp.lt.s32.totalorder %v11604_v59, 2  ;;  %v1089_v49 = vsub.s32 0, %v11626_v21  ;;  %vm2826_vm15 = vcmp.lt.s32.totalorder %v11604_v59, 4 }
 0x370   :  { %v2822_v9 = vor.u32 %v2821_v23, %v2820_v14  ;;  %v2831_v1 = vsel %vm2823_vm0, %v2810_v18, %v2813_v8  ;;  %vm4369_vm2 = vcmp.lt.s32.totalorder %v11296_v22, 0  ;;  %v2807_v36 = vshrl.u32 %v14655_v56, %v2806_v24 }
 0x371   :  { %vm2825_vm8 = vcmp.lt.s32.totalorder %v11604_v59, 3  ;;  %v2832_v48 = vsel %vm2826_vm15, %v2819_v43, 920167782  ;;  %v2835_v38 = vsel %vm2823_vm0, %v2813_v8, %v2816_v44  ;;  %v11642_v50 = vpop.eup %7659  ;;  %v6850_v63 = vmin.u32 %v1089_v49, %v11626_v21 }
 0x372   :  { %14877 = vst [vmem:[#allocation124_spill] sm:$0xff] %v11642_v50  ;;  %v2828_v23 = vsel %vm2826_vm15, %v2816_v44, 2102212464  ;;  %v2833_v6 = vsel %vm2825_vm8, %v2816_v44, %v2832_v48  ;;  %v2836_v51 = vsel %vm2826_vm15, %v2822_v9, 1326507024  ;;  %v4445_v0 = vshll.u32 %v4444_v54, 23 }
 0x373   :  { %v2834_v57 = vsel %vm2824_vm9, %v2831_v1, %v2833_v6  ;;  %v2837_v24 = vsel %vm2825_vm8, %v2819_v43, %v2836_v51  ;;  %v2839_v31 = vshll.u32 %v2799_v15, 8  ;;  %v4441_v53 = vshrl.u32 %v4423_v60, %v4439_v61 }
 0x374   :  { %v2827_v17 = vsel %vm2823_vm0, %v2807_v36, %v2810_v18  ;;  %v2838_v33 = vsel %vm2824_vm9, %v2835_v38, %v2837_v24  ;;  %v6917_v32 = vadd.s32 4294967169, %v2899_v27  ;;  %v14878_v25 = vand.u32 2147483647, %v11296_v22 }
 0x375   :  { %v1091_v54 = vclz %v6850_v63  ;;  %v2829_v14 = vsel %vm2825_vm8, %v2813_v8, %v2828_v23  ;;  %v11663_v43 = vmul.u32.u64.low %v2839_v31, %v2838_v33  ;;  %v11664_v15 = vmul.u32.u64.high %v2839_v31, %v2838_v33, %v11663_v43 }
 0x376   :  { %vm11657_vm7 = vcmp.le.f32.partialorder %v14878_v25, 0.7853982  ;;  %v5392_v61 = vsel %vm11615_vm4, 0, %v11599_v12  ;;  %v4453_v60 = vsub.s32 4, %v11523_v11  ;;  %v5387_v49 = vxor.u32 2147483648, %v5386_v16 }
 0x377   :  { %v11670_v27 = vmul.u32.u64.low %v2839_v31, %v2834_v57  ;;  %v11671_v18 = vmul.u32.u64.high %v2839_v31, %v2834_v57, %v11670_v27  ;;  %v4440_v9 = vshll.u32 %v11535_v39, %v11585_v19  ;;  %v4446_v1 = vor.u32 4788187, %v4445_v0  ;;  %v3673_v39 = vpop.permute.xlu1 %3672 }
 0x378   :  { %v2905_v36 = vadd.s32 1, %v6917_v32  ;;  %7661 = vcosq.f32 %v11590_v2  ;;  %v5183_v8 = vsel %vm11457_vm3, %v11135_v55, %v11594_v45  ;;  %v2830_v12 = vsel %vm2824_vm9, %v2827_v17, %v2829_v14 }
 0x379   :  { %v14546_v48 = vand.u32 2147483647, %v11581_v42  ;;  %v4442_v38 = vor.u32 %v4441_v53, %v4440_v9  ;;  %v6851_v63 = vadd.s32 4294967294, %v1091_v54  ;;  %vm2848_vm10 = vc.u32 %v11664_v15, %v11670_v27 }
 0x37a   :  { %vm2906_vm1 = vcmp.gt.s32.totalorder %v2905_v36, 0  ;;  %7663 = vsinq.f32 %v11590_v2  ;;  %v5396_v19 = vadd.s32 3, %v5392_v61  ;;  %v11690_v4 = vsel %vm4369_vm2, %v4453_v60, %v11523_v11 }
 0x37b   :  { %v2849_v45 = vadd.s32 1, %v11671_v18  ;;  %v5388_v59 = vsel %vm5305_vm5, %v5387_v49, %v5386_v16  ;;  %v4447_v23 = vand.u32 2147483647, %v4446_v1  ;;  %v2846_v6 = vmul.u32 %v2839_v31, %v2830_v12  ;;  %v124_v17 = vpop.permute.xlu1 %123 }
 0x37c   :  { %v2907_v51 = vsel %vm2906_vm1, %v2905_v36, 0  ;;  %7665 = vcosq.f32 %v5183_v8  ;;  %vm1025_vm3 = vcmp.lt.s32.totalorder %v11378_v52, 0  ;;  %v2902_v2 = vand.u32 8388607, %v14546_v48 }
 0x37d   :  { %v2850_v0 = vsel %vm2848_vm10, %v2849_v45, %v11671_v18  ;;  %v3715_v57 = vmul.f32 %v14700_v41, %v3673_v39  ;;  %v4449_v11 = vcvt.s32.f32 %v4442_v38  ;;  %vm6852_vm14 = vcmp.lt.s32.totalorder %v6851_v63, 0 }
 0x37e   :  { %v2851_v24 = vadd.s32 %v2850_v0, %v2846_v6  ;;  %v2909_v53 = vand.u32 31, %v2907_v51  ;;  %7667 = vsinq.f32 %v5183_v8  ;;  %v11703_v16 = vsel %vm11615_vm4, %v11226_v29, %v5388_v59 }
 0x37f   :  { %v11705_v31 = vand.u32 3, %v5396_v19  ;;  %v11710_v33 = vmul.f32 %v4449_v11, %v4447_v23  ;;  %v1109_v32 = vsub.s32 4, %v11608_v7  ;;  %v11713_v14 = vsel %vm6852_vm14, 0, %v6851_v63 }
 0x380   :  { %v2852_v25 = vadd.s32 536870912, %v2851_v24  ;;  %v2910_v54 = vsub.s32 32, %v2909_v53  ;;  %v2903_v43 = vor.u32 8388608, %v2902_v2  ;;  %v2912_v61 = vshll.u32 %v14655_v56, %v2909_v53 }
 0x381   :  { %14881 = vst [vmem:[#allocation125_spill] sm:$0xff] %v11705_v31  ;;  %v11717_v60 = vadd.f32 %v14882_v26, %v3715_v57  ;;  %v2915_v9 = vshll.u32 %v14646_v46, %v2909_v53  ;;  %v2918_v36 = vshll.u32 %v14647_v34, %v2909_v53  ;;  %v2921_v12 = vshll.u32 %v14644_v3, %v2909_v53 }
 0x382   :  { %v11719_v18 = vshrl.u32 %v2852_v25, 30  ;;  %v2913_v49 = vshrl.u32 %v14646_v46, %v2910_v54  ;;  %v2916_v1 = vshrl.u32 %v14647_v34, %v2910_v54  ;;  %v2919_v8 = vshrl.u32 %v14644_v3, %v2910_v54 }
 0x383   :  { %14883 = vst [vmem:[#allocation13_spill] sm:$0xff] %v11717_v60  ;;  %v2922_v38 = vshrl.u32 %v14643_v62, %v2910_v54  ;;  %v2908_v39 = vshrl.u32 %v2907_v51, 5  ;;  %v2924_v45 = vshll.u32 %v14643_v62, %v2909_v53  ;;  %v2925_v0 = vshrl.u32 %v14645_v13, %v2910_v54 }
 0x384   :  { %v2854_v63 = vshll.u32 %v11719_v18, 30  ;;  %v2914_v19 = vor.u32 %v2913_v49, %v2912_v61  ;;  %v2917_v59 = vor.u32 %v2916_v1, %v2915_v9  ;;  %v2920_v23 = vor.u32 %v2919_v8, %v2918_v36 }
 0x385   :  { %v2923_v6 = vor.u32 %v2922_v38, %v2921_v12  ;;  %v11731_v2 = vpop.eup %7661  ;;  %v14884_v57 = vand.u32 2147483647, %v11378_v52  ;;  %v1079_v25 = vadd.s32 %v11549_v35, %v11557_v47  ;;  %v1099_v51 = vsub.s32 4294967266, %v11713_v14 }
 0x386   :  { %v1110_v53 = vsel %vm1025_vm3, %v1109_v32, %v11608_v7  ;;  %v11745_v61 = vsub.s32 %v2851_v24, %v2854_v63  ;;  %v4451_v49 = vxor.u32 2147483648, %v11710_v33  ;;  %v1095_v9 = vsub.s32 32, %v11713_v14 }
 0x387   :  { %vm11735_vm5 = vcmp.le.f32.partialorder %v14884_v57, 0.7853982  ;;  %v2926_v1 = vor.u32 %v2925_v0, %v2924_v45  ;;  %v2943_v36 = vshll.u32 %v2903_v43, 8  ;;  %v11749_v8 = vpop.eup %7663  ;;  %vm2927_vm12 = vcmp.lt.s32.totalorder %v2908_v39, 1 }
 0x388   :  { %v2857_v12 = vsub.s32 0, %v11745_v61  ;;  %vm2930_vm13 = vcmp.lt.s32.totalorder %v2908_v39, 4  ;;  %v4578_v47 = vand.u32 2139095040, %v11717_v60  ;;  %v2911_v35 = vshrl.u32 %v14655_v56, %v2910_v54 }
 0x389   :  { %v2932_v38 = vsel %vm2930_vm13, %v2920_v23, 2102212464  ;;  %v2935_v7 = vsel %vm2927_vm12, %v2914_v19, %v2917_v59  ;;  %v2936_v24 = vsel %vm2930_vm13, %v2923_v6, 920167782  ;;  %v11754_v32 = vpop.eup %7665  ;;  %v1100_v63 = vadd.s32 127, %v1099_v51 }
 0x38a   :  { %14887 = vst [vmem:[#allocation126_spill] sm:$0xff] %v11754_v32  ;;  %v6914_v57 = vmin.u32 %v2857_v12, %v11745_v61  ;;  %vm2929_vm11 = vcmp.lt.s32.totalorder %v2908_v39, 3  ;;  %v2939_v43 = vsel %vm2927_vm12, %v2917_v59, %v2920_v23  ;;  %vm2928_vm6 = vcmp.lt.s32.totalorder %v2908_v39, 2 }
 0x38b   :  { %v2931_v45 = vsel %vm2927_vm12, %v2911_v35, %v2914_v19  ;;  %v2937_v0 = vsel %vm2929_vm11, %v2920_v23, %v2936_v24  ;;  %v2940_v48 = vsel %vm2930_vm13, %v2926_v1, 1326507024  ;;  %v11757_v29 = vpop.eup %7667  ;;  %v2933_v55 = vsel %vm2929_vm11, %v2917_v59, %v2932_v38  ;;  %v14889_v23 = vld [vmem:[#allocation3_spill] sm:$0xff] }
 0x38c   :  { %14888 = vst [vmem:[#allocation127_spill] sm:$0xff] %v11757_v29  ;;  %v2859_v31 = vclz %v6914_v57  ;;  %v2938_v54 = vsel %vm2928_vm6, %v2935_v7, %v2937_v0  ;;  %v2941_v50 = vsel %vm2929_vm11, %v2923_v6, %v2940_v48  ;;  %v4579_v12 = vshrl.u32 %v4578_v47, 23 }
 0x38d   :  { %v2942_v37 = vsel %vm2928_vm6, %v2939_v43, %v2941_v50  ;;  %v11761_v32 = vmul.u32.u64.low %v2943_v36, %v2938_v54  ;;  %v11762_v51 = vmul.u32.u64.high %v2943_v36, %v2938_v54, %v11761_v32  ;;  %v165_v1 = vmul.f32 %v14889_v23, %v124_v17 }
 0x38e   :  { %v6915_v10 = vadd.s32 4294967294, %v2859_v31  ;;  %v11765_v58 = vmul.u32.u64.low %v2943_v36, %v2942_v37  ;;  %v11766_v19 = vmul.u32.u64.high %v2943_v36, %v2942_v37, %v11765_v58  ;;  %v4452_v59 = vsel %vm4369_vm2, %v4451_v49, %v11710_v33  ;;  %v14891_v49 = vld [vmem:[#allocation5_spill] sm:$0xff] }
 0x38f   :  { %v1097_v35 = vshrl.u32 %v1079_v25, %v1095_v9  ;;  %v1112_v48 = vsel %vm11735_vm5, 0, %v1110_v53  ;;  %v6977_v50 = vadd.s32 4294967169, %v4579_v12  ;;  %v14890_v6 = vsel %vm11657_vm7, 0, %v11690_v4 }
 0x390   :  { %v4460_v47 = vadd.s32 3, %v14890_v6  ;;  %v1101_v31 = vshll.u32 %v1100_v63, 23  ;;  %v2934_v37 = vsel %vm2928_vm6, %v2931_v45, %v2933_v55  ;;  %v14557_v58 = vand.u32 2147483647, %v11717_v60 }
 0x391   :  { %7669 = vcosq.f32 %v11703_v16  ;;  %v1096_v17 = vshll.u32 %v11626_v21, %v11713_v14  ;;  %v2953_v33 = vadd.s32 1, %v11762_v51  ;;  %v4585_v25 = vadd.s32 1, %v6977_v50  ;;  %v1897_v21 = vpop.permute.xlu1 %1896 }
 0x392   :  { %v11787_v53 = vsel %vm11657_vm7, %v11296_v22, %v4452_v59  ;;  %v1116_v4 = vadd.s32 3, %v1112_v48  ;;  %vm6916_vm4 = vcmp.lt.s32.totalorder %v6915_v10, 0  ;;  %v11790_v39 = vadd.f32 %v14891_v49, %v165_v1 }
 0x393   :  { %v1098_v55 = vor.u32 %v1097_v35, %v1096_v17  ;;  %v2950_v9 = vmul.u32 %v2943_v36, %v2934_v37  ;;  %vm2952_vm0 = vc.u32 %v11766_v19, %v11761_v32  ;;  %vm4586_vm9 = vcmp.gt.s32.totalorder %v4585_v25, 0 }
 0x394   :  { %14892 = vst [vmem:[#allocation3_spill] sm:$0xff] %v11790_v39  ;;  %v1102_v14 = vor.u32 4788187, %v1101_v31  ;;  %v2954_v38 = vsel %vm2952_vm0, %v2953_v33, %v11762_v51  ;;  %v4582_v44 = vand.u32 8388607, %v14557_v58  ;;  %v4587_v7 = vsel %vm4586_vm9, %v4585_v25, 0 }
 0x395   :  { %7671 = vsinq.f32 %v11703_v16  ;;  %v11798_v24 = vsel %vm6916_vm4, 0, %v6915_v10  ;;  %v2955_v63 = vadd.s32 %v2954_v38, %v2950_v9  ;;  %v4589_v57 = vand.u32 31, %v4587_v7 }
 0x396   :  { %7673 = vcosq.f32 %v11787_v53  ;;  %v11801_v36 = vand.u32 3, %v4460_v47  ;;  %v11803_v43 = vand.u32 3, %v1116_v4  ;;  %v11806_v45 = vmul.f32 %v14809_v20, %v1897_v21 }
 0x397   :  { %v1105_v0 = vcvt.s32.f32 %v1098_v55  ;;  %v2956_v54 = vadd.s32 536870912, %v2955_v63  ;;  %v4590_v51 = vsub.s32 32, %v4589_v57  ;;  %v1234_v12 = vand.u32 2139095040, %v11790_v39 }
 0x398   :  { %14893 = vst [vmem:[#allocation5_spill] sm:$0xff] %v11801_v36  ;;  %14894 = vst [vmem:[#allocation128_spill] sm:$0xff] %v11803_v43  ;;  %v1103_v1 = vand.u32 2147483647, %v1102_v14  ;;  %v2863_v10 = vsub.s32 32, %v11798_v24  ;;  %v2867_v16 = vsub.s32 4294967266, %v11798_v24  ;;  %v4592_v48 = vshll.u32 %v14655_v56, %v4589_v57 }
 0x399   :  { %v4583_v59 = vor.u32 8388608, %v4582_v44  ;;  %v11811_v35 = vshrl.u32 %v2956_v54, 30  ;;  %v4593_v50 = vshrl.u32 %v14646_v46, %v4590_v51  ;;  %v4596_v6 = vshrl.u32 %v14647_v34, %v4590_v51 }
 0x39a   :  { %v4595_v47 = vshll.u32 %v14646_v46, %v4589_v57  ;;  %v4599_v31 = vshrl.u32 %v14644_v3, %v4590_v51  ;;  %v4601_v37 = vshll.u32 %v14644_v3, %v4589_v57  ;;  %v4602_v17 = vshrl.u32 %v14643_v62, %v4590_v51 }
 0x39b   :  { %v2958_v33 = vshll.u32 %v11811_v35, 30  ;;  %v4588_v25 = vshrl.u32 %v4587_v7, 5  ;;  %v4598_v4 = vshll.u32 %v14647_v34, %v4589_v57  ;;  %v1235_v55 = vshrl.u32 %v1234_v12, 23 }
 0x39c   :  { %v4594_v9 = vor.u32 %v4593_v50, %v4592_v48  ;;  %v4597_v21 = vor.u32 %v4596_v6, %v4595_v47  ;;  %v4603_v14 = vor.u32 %v4602_v17, %v4601_v37  ;;  %v4605_v38 = vshrl.u32 %v14645_v13, %v4590_v51 }
 0x39d   :  { %v2847_v44 = vadd.s32 %v11670_v27, %v11664_v15  ;;  %v11825_v54 = vsub.s32 %v2955_v63, %v2958_v33  ;;  %v4600_v58 = vor.u32 %v4599_v31, %v4598_v4  ;;  %v4604_v29 = vshll.u32 %v14643_v62, %v4589_v57 }
 0x39e   :  { %v11828_v43 = vpop.eup %7669  ;;  %v1106_v22 = vmul.f32 %v1105_v0, %v1103_v1  ;;  %v2868_v7 = vadd.s32 127, %v2867_v16  ;;  %v4623_v36 = vshll.u32 %v4583_v59, 8  ;;  %v14562_v12 = vand.u32 2147483647, %v11790_v39 }
 0x39f   :  { %14895 = vst [vmem:[#allocation129_spill] sm:$0xff] %v11828_v43  ;;  %v2961_v48 = vsub.s32 0, %v11825_v54  ;;  %v4606_v50 = vor.u32 %v4605_v38, %v4604_v29  ;;  %vm4607_vm15 = vcmp.lt.s32.totalorder %v4588_v25, 1  ;;  %vm4610_vm2 = vcmp.lt.s32.totalorder %v4588_v25, 4 }
 0x3a0   :  { %v2865_v6 = vshrl.u32 %v2847_v44, %v2863_v10  ;;  %v4615_v15 = vsel %vm4607_vm15, %v4594_v9, %v4597_v21  ;;  %v4616_v27 = vsel %vm4610_vm2, %v4603_v14, 920167782  ;;  %v6857_v63 = vadd.s32 4294967169, %v1235_v55 }
 0x3a1   :  { %vm2793_vm8 = vcmp.lt.s32.totalorder %v11414_v40, 0  ;;  %v6918_v57 = vmin.u32 %v2961_v48, %v11825_v54  ;;  %v4591_v0 = vshrl.u32 %v14655_v56, %v4590_v51  ;;  %vm4609_vm7 = vcmp.lt.s32.totalorder %v4588_v25, 3 }
 0x3a2   :  { %v4612_v1 = vsel %vm4610_vm2, %v4600_v58, 2102212464  ;;  %v11838_v16 = vpop.eup %7671  ;;  %v2869_v29 = vshll.u32 %v2868_v7, 23  ;;  %vm4608_vm10 = vcmp.lt.s32.totalorder %v4588_v25, 2  ;;  %v4617_v59 = vsel %vm4609_vm7, %v4600_v58, %v4616_v27 }
 0x3a3   :  { %14896 = vst [vmem:[#allocation130_spill] sm:$0xff] %v11838_v16  ;;  %v4619_v10 = vsel %vm4607_vm15, %v4597_v21, %v4600_v58  ;;  %v11841_v47 = vpop.eup %7673  ;;  %v2963_v31 = vclz %v6918_v57  ;;  %v4611_v37 = vsel %vm4607_vm15, %v4591_v0, %v4594_v9  ;;  %v4618_v17 = vsel %vm4608_vm10, %v4615_v15, %v4617_v59 }
 0x3a4   :  { %14897 = vst [vmem:[#allocation131_spill] sm:$0xff] %v11841_v47  ;;  %v4620_v33 = vsel %vm4610_vm2, %v4606_v50, 1326507024  ;;  %v4613_v51 = vsel %vm4609_vm7, %v4597_v21, %v4612_v1  ;;  %v11846_v55 = vmul.u32.u64.low %v4623_v36, %v4618_v17  ;;  %v11847_v38 = vmul.u32.u64.high %v4623_v36, %v4618_v17, %v11846_v55  ;;  %v1901_v50 = vpop.permute.xlu1 %1900 }
 0x3a5   :  { %v4621_v4 = vsel %vm4609_vm7, %v4603_v14, %v4620_v33  ;;  %v2864_v44 = vshll.u32 %v11745_v61, %v11798_v24  ;;  %v6919_v7 = vadd.s32 4294967294, %v2963_v31  ;;  %v1241_v48 = vadd.s32 1, %v6857_v63 }
 0x3a6   :  { %v4622_v58 = vsel %vm4608_vm10, %v4619_v10, %v4621_v4  ;;  %v1107_v27 = vxor.u32 2147483648, %v1106_v22  ;;  %v2877_v9 = vsub.s32 4, %v11719_v18  ;;  %v4614_v14 = vsel %vm4608_vm10, %v4611_v37, %v4613_v51 }
 0x3a7   :  { %v11854_v57 = vmul.u32.u64.low %v4623_v36, %v4622_v58  ;;  %v11855_v15 = vmul.u32.u64.high %v4623_v36, %v4622_v58, %v11854_v57  ;;  %v2866_v21 = vor.u32 %v2865_v6, %v2864_v44  ;;  %vm6920_vm1 = vcmp.lt.s32.totalorder %v6919_v7, 0 }
 0x3a8   :  { %vm1242_vm14 = vcmp.gt.s32.totalorder %v1241_v48, 0  ;;  %7675 = vsinq.f32 %v11787_v53  ;;  %v2870_v0 = vor.u32 4788187, %v2869_v29  ;;  %v4633_v61 = vadd.s32 1, %v11847_v38 }
 0x3a9   :  { %v1243_v24 = vsel %vm1242_vm14, %v1241_v48, 0  ;;  %v11860_v1 = vsel %vm6920_vm1, 0, %v6919_v7  ;;  %v1238_v63 = vand.u32 8388607, %v14562_v12  ;;  %v11866_v59 = vadd.f32 %v14812_v30, %v11806_v45 }
 0x3aa   :  { %v11869_v6 = vmul.f32 %v14809_v20, %v1901_v50  ;;  %v11874_v53 = vsel %vm2793_vm8, %v2877_v9, %v11719_v18  ;;  %v4630_v25 = vmul.u32 %v4623_v36, %v4614_v14  ;;  %vm4632_vm12 = vc.u32 %v11855_v15, %v11846_v55 }
 0x3ab   :  { %14898 = vst [vmem:[#allocation132_spill] sm:$0xff] %v11866_v59  ;;  %v1245_v29 = vand.u32 31, %v1243_v24  ;;  %v11880_v10 = vsel %vm1025_vm3, %v1107_v27, %v1106_v22  ;;  %v2873_v31 = vcvt.s32.f32 %v2866_v21  ;;  %v2951_v45 = vadd.s32 %v11761_v32, %v11766_v19 }
 0x3ac   :  { %v4634_v37 = vsel %vm4632_vm12, %v4633_v61, %v11847_v38  ;;  %v2871_v17 = vand.u32 2147483647, %v2870_v0  ;;  %v2971_v33 = vsub.s32 4294967266, %v11860_v1  ;;  %v1239_v36 = vor.u32 8388608, %v1238_v63 }
 0x3ad   :  { %v4635_v18 = vadd.s32 %v4634_v37, %v4630_v25  ;;  %v1246_v51 = vsub.s32 32, %v1245_v29  ;;  %v1244_v4 = vshrl.u32 %v1243_v24, 5  ;;  %v1248_v44 = vshll.u32 %v14655_v56, %v1245_v29 }
 0x3ae   :  { %v3002_v7 = vand.u32 2139095040, %v11866_v59  ;;  %v1251_v48 = vshll.u32 %v14646_v46, %v1245_v29  ;;  %v1254_v19 = vshll.u32 %v14647_v34, %v1245_v29  ;;  %v1257_v27 = vshll.u32 %v14644_v3, %v1245_v29 }
 0x3af   :  { %v4636_v58 = vadd.s32 536870912, %v4635_v18  ;;  %v1249_v22 = vshrl.u32 %v14646_v46, %v1246_v51  ;;  %v1252_v32 = vshrl.u32 %v14647_v34, %v1246_v51  ;;  %v1255_v38 = vshrl.u32 %v14644_v3, %v1246_v51 }
 0x3b0   :  { %v1258_v9 = vshrl.u32 %v14643_v62, %v1246_v51  ;;  %v2972_v57 = vadd.s32 127, %v2971_v33  ;;  %v14899_v0 = vand.u32 2147483647, %v11414_v40  ;;  %v1260_v25 = vshll.u32 %v14643_v62, %v1245_v29 }
 0x3b1   :  { %v11895_v50 = vshrl.u32 %v4636_v58, 30  ;;  %v1250_v21 = vor.u32 %v1249_v22, %v1248_v44  ;;  %v1253_v14 = vor.u32 %v1252_v32, %v1251_v48  ;;  %v1256_v24 = vor.u32 %v1255_v38, %v1254_v19 }
 0x3b2   :  { %vm11899_vm3 = vcmp.le.f32.partialorder %v14899_v0, 0.7853982  ;;  %v1259_v63 = vor.u32 %v1258_v9, %v1257_v27  ;;  %v1261_v37 = vshrl.u32 %v14645_v13, %v1246_v51  ;;  %v11905_v12 = vmul.f32 %v2873_v31, %v2871_v17 }
 0x3b3   :  { %v2981_v33 = vsub.s32 4, %v11811_v35  ;;  %v4638_v58 = vshll.u32 %v11895_v50, 30  ;;  %v1279_v44 = vshll.u32 %v1239_v36, 8  ;;  %vm2897_vm13 = vcmp.lt.s32.totalorder %v11581_v42, 0 }
 0x3b4   :  { %v2967_v22 = vsub.s32 32, %v11860_v1  ;;  %v2968_v48 = vshll.u32 %v11825_v54, %v11860_v1  ;;  %v1262_v32 = vor.u32 %v1261_v37, %v1260_v25  ;;  %vm1263_vm11 = vcmp.lt.s32.totalorder %v1244_v4, 1 }
 0x3b5   :  { %v11913_v19 = vsub.s32 %v4635_v18, %v4638_v58  ;;  %vm1266_vm6 = vcmp.lt.s32.totalorder %v1244_v4, 4  ;;  %v1271_v29 = vsel %vm1263_vm11, %v1250_v21, %v1253_v14  ;;  %v3003_v31 = vshrl.u32 %v3002_v7, 23  ;;  %v11916_v17 = vpop.eup %7675 }
 0x3b6   :  { %14902 = vst [vmem:[#allocation133_spill] sm:$0xff] %v11916_v17  ;;  %v2973_v38 = vshll.u32 %v2972_v57, 23  ;;  %vm1265_vm4 = vcmp.lt.s32.totalorder %v1244_v4, 3  ;;  %v1268_v36 = vsel %vm1266_vm6, %v1256_v24, 2102212464  ;;  %v1247_v54 = vshrl.u32 %v14655_v56, %v1246_v51 }
 0x3b7   :  { %v1272_v27 = vsel %vm1266_vm6, %v1259_v63, 920167782  ;;  %v4641_v9 = vsub.s32 0, %v11913_v19  ;;  %vm1264_vm0 = vcmp.lt.s32.totalorder %v1244_v4, 2  ;;  %v14903_v18 = vand.u32 2147483647, %v11581_v42 }
 0x3b8   :  { %v1273_v1 = vsel %vm1265_vm4, %v1256_v24, %v1272_v27  ;;  %v2969_v7 = vshrl.u32 %v2951_v45, %v2967_v22  ;;  %vm4577_vm15 = vcmp.lt.s32.totalorder %v11717_v60, 0  ;;  %v1275_v25 = vsel %vm1263_vm11, %v1253_v14, %v1256_v24 }
 0x3b9   :  { %vm11925_vm9 = vcmp.le.f32.partialorder %v14903_v18, 0.7853982  ;;  %v1274_v57 = vsel %vm1264_vm0, %v1271_v29, %v1273_v1  ;;  %v1276_v37 = vsel %vm1266_vm6, %v1262_v32, 1326507024  ;;  %v6978_v51 = vmin.u32 %v4641_v9, %v11913_v19 }
 0x3ba   :  { %v1267_v58 = vsel %vm1263_vm11, %v1247_v54, %v1250_v21  ;;  %v1269_v27 = vsel %vm1265_vm4, %v1253_v14, %v1268_v36  ;;  %v1277_v18 = vsel %vm1265_vm4, %v1259_v63, %v1276_v37  ;;  %v2974_v43 = vor.u32 4788187, %v2973_v38 }
 0x3bb   :  { %v1278_v16 = vsel %vm1264_vm0, %v1275_v25, %v1277_v18  ;;  %v11938_v45 = vmul.u32.u64.low %v1279_v44, %v1274_v57  ;;  %v11939_v22 = vmul.u32.u64.high %v1279_v44, %v1274_v57, %v11938_v45  ;;  %v1111_v24 = vsel %vm11735_vm5, %v11378_v52, %v11880_v10 }
 0x3bc   :  { %v2880_v21 = vsel %vm11899_vm3, 0, %v11874_v53  ;;  %v11949_v32 = vmul.u32.u64.low %v1279_v44, %v1278_v16  ;;  %v11950_v14 = vmul.u32.u64.high %v1279_v44, %v1278_v16, %v11949_v32  ;;  %v2970_v63 = vor.u32 %v2969_v7, %v2968_v48 }
 0x3bd   :  { %v4643_v29 = vclz %v6978_v51  ;;  %v1270_v38 = vsel %vm1264_vm0, %v1267_v58, %v1269_v27  ;;  %v6921_v36 = vadd.s32 4294967169, %v3003_v31  ;;  %v2982_v9 = vsel %vm2897_vm13, %v2981_v33, %v11811_v35 }
 0x3be   :  { %v4661_v54 = vsub.s32 4, %v11895_v50  ;;  %v14565_v11 = vand.u32 2147483647, %v11866_v59  ;;  %v11960_v10 = vadd.f32 %v14812_v30, %v11869_v6  ;;  %v2875_v16 = vxor.u32 2147483648, %v11905_v12 }
 0x3bf   :  { %v2975_v53 = vand.u32 2147483647, %v2974_v43  ;;  %v1289_v48 = vadd.s32 1, %v11939_v22  ;;  %v3009_v4 = vadd.s32 1, %v6921_v36  ;;  %7677 = vcosq.f32 %v1111_v24 }
 0x3c0   :  { %14906 = vst [vmem:[#allocation134_spill] sm:$0xff] %v11960_v10  ;;  %v2884_v31 = vadd.s32 3, %v2880_v21  ;;  %v1286_v1 = vmul.u32 %v1279_v44, %v1270_v38  ;;  %vm1288_vm5 = vc.u32 %v11950_v14, %v11938_v45  ;;  %v2977_v35 = vcvt.s32.f32 %v2970_v63 }
 0x3c1   :  { %v6979_v33 = vadd.s32 4294967294, %v4643_v29  ;;  %v1290_v7 = vsel %vm1288_vm5, %v1289_v48, %v11939_v22  ;;  %vm3010_vm2 = vcmp.gt.s32.totalorder %v3009_v4, 0  ;;  %v2984_v6 = vsel %vm11925_vm9, 0, %v2982_v9 }
 0x3c2   :  { %v4662_v43 = vsel %vm4577_vm15, %v4661_v54, %v11895_v50  ;;  %v1291_v57 = vadd.s32 %v1290_v7, %v1286_v1  ;;  %v3106_v25 = vand.u32 2139095040, %v11960_v10  ;;  %v2876_v44 = vsel %vm2793_vm8, %v2875_v16, %v11905_v12 }
 0x3c3   :  { %v11976_v37 = vmul.f32 %v2977_v35, %v2975_v53  ;;  %v3006_v51 = vand.u32 8388607, %v14565_v11  ;;  %v3011_v58 = vsel %vm3010_vm2, %v3009_v4, 0  ;;  %7679 = vsinq.f32 %v1111_v24 }
 0x3c4   :  { %v11980_v27 = vand.u32 3, %v2884_v31  ;;  %v14908_v18 = vand.u32 2147483647, %v11717_v60  ;;  %v1292_v22 = vadd.s32 536870912, %v1291_v57  ;;  %v11988_v21 = vadd.s32 3, %v2984_v6 }
 0x3c5   :  { %vm6980_vm10 = vcmp.lt.s32.totalorder %v6979_v33, 0  ;;  %v3013_v32 = vand.u32 31, %v3011_v58  ;;  %v11995_v24 = vsel %vm11899_vm3, %v11414_v40, %v2876_v44  ;;  %v4631_v63 = vadd.s32 %v11846_v55, %v11855_v15 }
 0x3c6   :  { %14907 = vst [vmem:[#allocation135_spill] sm:$0xff] %v11980_v27  ;;  %vm11984_vm7 = vcmp.le.f32.partialorder %v14908_v18, 0.7853982  ;;  %v11999_v29 = vshrl.u32 %v1292_v22, 30  ;;  %v3107_v38 = vshrl.u32 %v3106_v25, 23  ;;  %v2979_v36 = vxor.u32 2147483648, %v11976_v37 }
 0x3c7   :  { %v4664_v12 = vsel %vm11984_vm7, 0, %v4662_v43  ;;  %v3007_v9 = vor.u32 8388608, %v3006_v51  ;;  %v3014_v54 = vsub.s32 32, %v3013_v32  ;;  %v14566_v16 = vand.u32 2147483647, %v11960_v10 }
 0x3c8   :  { %v4646_v53 = vsel %vm6980_vm10, 0, %v6979_v33  ;;  %v12003_v48 = vadd.s32 3, %v4664_v12  ;;  %v1294_v4 = vshll.u32 %v11999_v29, 30  ;;  %v3016_v61 = vshll.u32 %v14655_v56, %v3013_v32 }
 0x3c9   :  { %v3017_v31 = vshrl.u32 %v14646_v46, %v3014_v54  ;;  %v3019_v55 = vshll.u32 %v14646_v46, %v3013_v32  ;;  %v3020_v15 = vshrl.u32 %v14647_v34, %v3014_v54  ;;  %v3023_v1 = vshrl.u32 %v14644_v3, %v3014_v54 }
 0x3ca   :  { %v12011_v35 = vsub.s32 %v1291_v57, %v1294_v4  ;;  %v3012_v7 = vshrl.u32 %v3011_v58, 5  ;;  %v3022_v6 = vshll.u32 %v14647_v34, %v3013_v32  ;;  %v6925_v33 = vadd.s32 4294967169, %v3107_v38 }
 0x3cb   :  { %v3018_v43 = vor.u32 %v3017_v31, %v3016_v61  ;;  %v3021_v25 = vor.u32 %v3020_v15, %v3019_v55  ;;  %v12014_v44 = vshll.u32 %v3007_v9, 8  ;;  %v3110_v51 = vand.u32 8388607, %v14566_v16 }
 0x3cc   :  { %v1297_v18 = vsub.s32 0, %v12011_v35  ;;  %v3024_v22 = vor.u32 %v3023_v1, %v3022_v6  ;;  %v3025_v12 = vshll.u32 %v14644_v3, %v3013_v32  ;;  %v3026_v11 = vshrl.u32 %v14643_v62, %v3014_v54  ;;  %v12021_v57 = vpop.eup %7677 }
 0x3cd   :  { %14911 = vst [vmem:[#allocation136_spill] sm:$0xff] %v12021_v57  ;;  %v4647_v58 = vsub.s32 32, %v4646_v53  ;;  %v4651_v4 = vsub.s32 4294967266, %v4646_v53  ;;  %v3028_v38 = vshll.u32 %v14643_v62, %v3013_v32  ;;  %v3029_v61 = vshrl.u32 %v14645_v13, %v3014_v54 }
 0x3ce   :  { %v6858_v9 = vmin.u32 %v1297_v18, %v12011_v35  ;;  %v3027_v31 = vor.u32 %v3026_v11, %v3025_v12  ;;  %vm3031_vm8 = vcmp.lt.s32.totalorder %v3012_v7, 1  ;;  %v3113_v55 = vadd.s32 1, %v6925_v33 }
 0x3cf   :  { %v3015_v15 = vshrl.u32 %v14655_v56, %v3014_v54  ;;  %v3030_v1 = vor.u32 %v3029_v61, %v3028_v38  ;;  %vm3034_vm1 = vcmp.lt.s32.totalorder %v3012_v7, 4  ;;  %v3039_v6 = vsel %vm3031_vm8, %v3018_v43, %v3021_v25 }
 0x3d0   :  { %v1299_v16 = vclz %v6858_v9  ;;  %vm3033_vm14 = vcmp.lt.s32.totalorder %v3012_v7, 3  ;;  %v3036_v27 = vsel %vm3034_vm1, %v3024_v22, 2102212464  ;;  %v3040_v40 = vsel %vm3034_vm1, %v3027_v31, 920167782  ;;  %v12030_v32 = vpop.eup %7679 }
 0x3d1   :  { %14912 = vst [vmem:[#allocation137_spill] sm:$0xff] %v12030_v32  ;;  %v4649_v52 = vshrl.u32 %v4631_v63, %v4647_v58  ;;  %v4652_v57 = vadd.s32 127, %v4651_v4  ;;  %vm3032_vm12 = vcmp.lt.s32.totalorder %v3012_v7, 2  ;;  %v3041_v11 = vsel %vm3033_vm14, %v3024_v22, %v3040_v40 }
 0x3d2   :  { %v3035_v33 = vsel %vm3031_vm8, %v3015_v15, %v3018_v43  ;;  %v3037_v54 = vsel %vm3033_vm14, %v3021_v25, %v3036_v27  ;;  %v3042_v18 = vsel %vm3032_vm12, %v3039_v6, %v3041_v11  ;;  %v3043_v12 = vsel %vm3031_vm8, %v3021_v25, %v3024_v22 }
 0x3d3   :  { %v6859_v38 = vadd.s32 4294967294, %v1299_v16  ;;  %v3044_v61 = vsel %vm3034_vm1, %v3030_v1, 1326507024  ;;  %v12039_v9 = vmul.u32.u64.low %v12014_v44, %v3042_v18  ;;  %v12040_v47 = vmul.u32.u64.high %v12014_v44, %v3042_v18, %v12039_v9 }
 0x3d4   :  { %v2980_v40 = vsel %vm2897_vm13, %v2979_v36, %v11976_v37  ;;  %v4648_v63 = vshll.u32 %v11913_v19, %v4646_v53  ;;  %v3045_v27 = vsel %vm3033_vm14, %v3027_v31, %v3044_v61  ;;  %vm3114_vm3 = vcmp.gt.s32.totalorder %v3113_v55, 0  ;;  %v14915_v31 = vld [vmem:[#allocation34_spill] sm:$0xff] }
 0x3d5   :  { %v4653_v43 = vshll.u32 %v4652_v57, 23  ;;  %v3046_v25 = vsel %vm3032_vm12, %v3043_v12, %v3045_v27  ;;  %v3111_v16 = vor.u32 8388608, %v3110_v51  ;;  %v3115_v22 = vsel %vm3114_vm3, %v3113_v55, 0  ;;  %v14916_v27 = vld [vmem:[#allocation29_spill] sm:$0xff] }
 0x3d6   :  { %7681 = vcosq.f32 %v11995_v24  ;;  %v12051_v58 = vand.u32 3, %v11988_v21  ;;  %v12053_v4 = vor.u32 %v4649_v52, %v4648_v63  ;;  %v3038_v15 = vsel %vm3032_vm12, %v3035_v33, %v3037_v54 }
 0x3d7   :  { %vm6860_vm13 = vcmp.lt.s32.totalorder %v6859_v38, 0  ;;  %v12057_v19 = vmul.u32.u64.low %v12014_v44, %v3046_v25  ;;  %v12058_v37 = vmul.u32.u64.high %v12014_v44, %v3046_v25, %v12057_v19  ;;  %v3117_v36 = vand.u32 31, %v3115_v22 }
 0x3d8   :  { %14913 = vst [vmem:[#allocation138_spill] sm:$0xff] %v12051_v58  ;;  %7683 = vsinq.f32 %v11995_v24  ;;  %v12064_v53 = vsel %vm11925_vm9, %v11581_v42, %v2980_v40  ;;  %v12067_v21 = vand.u32 3, %v12003_v48  ;;  %v3057_v52 = vadd.s32 1, %v12040_v47 }
 0x3d9   :  { %v4654_v7 = vor.u32 4788187, %v4653_v43  ;;  %v3118_v51 = vsub.s32 32, %v3117_v36  ;;  %v12070_v57 = vshll.u32 %v3111_v16, 8  ;;  %v4657_v1 = vcvt.s32.f32 %v12053_v4 }
 0x3da   :  { %14914 = vst [vmem:[#allocation139_spill] sm:$0xff] %v12067_v21  ;;  %v12074_v6 = vsel %vm6860_vm13, 0, %v6859_v38  ;;  %v3054_v24 = vmul.u32 %v12014_v44, %v3038_v15  ;;  %v3116_v0 = vshrl.u32 %v3115_v22, 5  ;;  %vm3056_vm11 = vc.u32 %v12058_v37, %v12039_v9 }
 0x3db   :  { %v3120_v48 = vshll.u32 %v14655_v56, %v3117_v36  ;;  %v3121_v11 = vshrl.u32 %v14646_v46, %v3118_v51  ;;  %v3123_v33 = vshll.u32 %v14646_v46, %v3117_v36  ;;  %v3058_v54 = vsel %vm3056_vm11, %v3057_v52, %v12040_v47 }
 0x3dc   :  { %v3124_v18 = vshrl.u32 %v14647_v34, %v3118_v51  ;;  %v3126_v12 = vshll.u32 %v14647_v34, %v3117_v36  ;;  %v3129_v38 = vshll.u32 %v14644_v3, %v3117_v36  ;;  %v3059_v61 = vadd.s32 %v3058_v54, %v3054_v24 }
 0x3dd   :  { %v3122_v44 = vor.u32 %v3121_v11, %v3120_v48  ;;  %v3127_v40 = vshrl.u32 %v14644_v3, %v3118_v51  ;;  %v3130_v63 = vshrl.u32 %v14643_v62, %v3118_v51  ;;  %vm287_vm6 = vcmp.eq.s32.totalorder %v14916_v27, 0 }
 0x3de   :  { %v1307_v43 = vsub.s32 4294967266, %v12074_v6  ;;  %v3125_v25 = vor.u32 %v3124_v18, %v3123_v33  ;;  %v3132_v16 = vshll.u32 %v14643_v62, %v3117_v36  ;;  %v3133_v47 = vshrl.u32 %v14645_v13, %v3118_v51 }
 0x3df   :  { %v3060_v22 = vadd.s32 536870912, %v3059_v61  ;;  %v3128_v4 = vor.u32 %v3127_v40, %v3126_v12  ;;  %v3131_v15 = vor.u32 %v3130_v63, %v3129_v38  ;;  %vm3135_vm4 = vcmp.lt.s32.totalorder %v3116_v0, 1 }
 0x3e0   :  { %v3119_v19 = vshrl.u32 %v14655_v56, %v3118_v51  ;;  %v3134_v52 = vor.u32 %v3133_v47, %v3132_v16  ;;  %vm3138_vm0 = vcmp.lt.s32.totalorder %v3116_v0, 4  ;;  %v3143_v24 = vsel %vm3135_vm4, %v3122_v44, %v3125_v25 }
 0x3e1   :  { %v12094_v48 = vshrl.u32 %v3060_v22, 30  ;;  %vm3137_vm9 = vcmp.lt.s32.totalorder %v3116_v0, 3  ;;  %v3140_v11 = vsel %vm3138_vm0, %v3128_v4, 2102212464  ;;  %v3144_v54 = vsel %vm3138_vm0, %v3131_v15, 920167782 }
 0x3e2   :  { %vm3136_vm5 = vcmp.lt.s32.totalorder %v3116_v0, 2  ;;  %v3145_v33 = vsel %vm3137_vm9, %v3128_v4, %v3144_v54  ;;  %v3147_v36 = vsel %vm3135_vm4, %v3125_v25, %v3128_v4  ;;  %v3148_v18 = vsel %vm3138_vm0, %v3134_v52, 1326507024  ;;  %v14922_v0 = vld [vmem:[#allocation18_spill] sm:$0xff] }
 0x3e3   :  { %v12097_v55 = vpop.eup %7681  ;;  %v4655_v12 = vand.u32 2147483647, %v4654_v7  ;;  %v3062_v38 = vshll.u32 %v12094_v48, 30  ;;  %v3139_v51 = vsel %vm3135_vm4, %v3119_v19, %v3122_v44  ;;  %v3146_v40 = vsel %vm3136_vm5, %v3143_v24, %v3145_v33 }
 0x3e4   :  { %14917 = vst [vmem:[#allocation34_spill] sm:$0xff] %v12097_v55  ;;  %v3141_v63 = vsel %vm3137_vm9, %v3125_v25, %v3140_v11  ;;  %v3149_v16 = vsel %vm3137_vm9, %v3131_v15, %v3148_v18  ;;  %v12103_v47 = vmul.u32.u64.low %v12070_v57, %v3146_v40  ;;  %v12104_v22 = vmul.u32.u64.high %v12070_v57, %v3146_v40, %v12103_v47 }
 0x3e5   :  { %v12107_v54 = vpop.eup %7683  ;;  %v1303_v4 = vsub.s32 32, %v12074_v6  ;;  %v1308_v52 = vadd.s32 127, %v1307_v43  ;;  %v12110_v21 = vsub.s32 %v3059_v61, %v3062_v38  ;;  %v3150_v7 = vsel %vm3136_vm5, %v3147_v36, %v3149_v16  ;;  %v14919_v43 = vld [vmem:[#allocation10_spill] sm:$0xff] }
 0x3e6   :  { %14918 = vst [vmem:[#allocation29_spill] sm:$0xff] %v12107_v54  ;;  %v1287_v44 = vadd.s32 %v11938_v45, %v11950_v14  ;;  %v12116_v25 = vmul.u32.u64.low %v12070_v57, %v3150_v7  ;;  %v12117_v15 = vmul.u32.u64.high %v12070_v57, %v3150_v7, %v12116_v25  ;;  %vm286_vm2 = vcmp.lt.s32.totalorder %v14916_v27, 2  ;;  %v14921_v14 = vld [vmem:[#allocation33_spill] sm:$0xff]  ;;  %v3681_v7 = vpop.permute.xlu1 %3680 }
 0x3e7   :  { %v12120_v19 = vmul.f32 %v4657_v1, %v4655_v12  ;;  %v1317_v24 = vsub.s32 4, %v11999_v29  ;;  %v3065_v11 = vsub.s32 0, %v12110_v21  ;;  %v3142_v61 = vsel %vm3136_vm5, %v3139_v51, %v3141_v63  ;;  %v14923_v63 = vld [vmem:[#allocation25_spill] sm:$0xff] }
 0x3e8   :  { %vm283_vm10 = vweird.f32 %v14919_v43  ;;  %v3161_v33 = vadd.s32 1, %v12104_v22  ;;  %v14920_v45 = vxor.u32 2147483648, %v14915_v31  ;;  %vm290_vm8 = vcmp.eq.s32.totalorder %v14916_v27, 2 }
 0x3e9   :  { %v291_v1 = vxor.u32 2147483648, %v14921_v14  ;;  %v1305_v18 = vshrl.u32 %v1287_v44, %v1303_v4  ;;  %v1309_v12 = vshll.u32 %v1308_v52, 23  ;;  %v6922_v38 = vmin.u32 %v3065_v11, %v12110_v21 }
 0x3ea   :  { %v289_v36 = vsel %vm287_vm6, %v14921_v14, %v14920_v45  ;;  %vm2055_vm1 = vcmp.eq.s32.totalorder %v14922_v0, 0  ;;  %v3158_v51 = vmul.u32 %v12070_v57, %v3142_v61  ;;  %vm3160_vm14 = vc.u32 %v12117_v15, %v12103_v47  ;;  %v14924_v57 = vld [vmem:[#allocation24_spill] sm:$0xff] }
 0x3eb   :  { %v292_v40 = vsel %vm290_vm8, %v291_v1, %v14915_v31  ;;  %v2056_v16 = vxor.u32 2147483648, %v14923_v63  ;;  %v1304_v25 = vshll.u32 %v12011_v35, %v12074_v6  ;;  %v3067_v45 = vclz %v6922_v38  ;;  %v14925_v1 = vld [vmem:[#allocation8_spill] sm:$0xff] }
 0x3ec   :  { %v3162_v4 = vsel %vm3160_vm14, %v3161_v33, %v12104_v22  ;;  %vm2058_vm12 = vcmp.eq.s32.totalorder %v14922_v0, 2  ;;  %vm1233_vm3 = vcmp.lt.s32.totalorder %v11790_v39, 0  ;;  %vm2054_vm13 = vcmp.lt.s32.totalorder %v14922_v0, 2  ;;  %v14926_v33 = vld [vmem:[#allocation40_spill] sm:$0xff] }
 0x3ed   :  { %v3163_v52 = vadd.s32 %v3162_v4, %v3158_v51  ;;  %v2057_v44 = vsel %vm2055_vm1, %v14924_v57, %v2056_v16  ;;  %v2059_v31 = vxor.u32 2147483648, %v14924_v57  ;;  %v1306_v11 = vor.u32 %v1305_v18, %v1304_v25  ;;  %v14931_v16 = vld [vmem:[#allocation38_spill] sm:$0xff] }
 0x3ee   :  { %v1310_v61 = vor.u32 4788187, %v1309_v12  ;;  %v6923_v14 = vadd.s32 4294967294, %v3067_v45  ;;  %v293_v35 = vsel %vm286_vm2, %v289_v36, %v292_v40  ;;  %vm2051_vm11 = vweird.f32 %v14925_v1  ;;  %v14930_v12 = vld [vmem:[#allocation31_spill] sm:$0xff]  ;;  %v134_v45 = vpop.permute.xlu1 %133  ;;  %v14932_v57 = vld [vmem:[#allocation14_spill] sm:$0xff] }
 0x3ef   :  { %v3164_v6 = vadd.s32 536870912, %v3163_v52  ;;  %v2060_v22 = vsel %vm2058_vm12, %v2059_v31, %v14923_v63  ;;  %v3840_v38 = vxor.u32 2147483648, %v14926_v33  ;;  %v14927_v51 = vand.u32 2147483647, %v11790_v39 }
 0x3f0   :  { %vm6924_vm4 = vcmp.lt.s32.totalorder %v6923_v14, 0  ;;  %v2061_v18 = vsel %vm2054_vm13, %v2057_v44, %v2060_v22  ;;  %vm3839_vm0 = vcmp.eq.s32.totalorder %v14930_v12, 0  ;;  %v3843_v27 = vxor.u32 2147483648, %v14931_v16 }
 0x3f1   :  { %vm12156_vm6 = vcmp.le.f32.partialorder %v14927_v51, 0.7853982  ;;  %v12162_v36 = vsel %vm6924_vm4, 0, %v6923_v14  ;;  %v12164_v40 = vshrl.u32 %v3164_v6, 30  ;;  %v294_v63 = vsel %vm283_vm10, nan, %v293_v35 }
 0x3f2   :  { %v3841_v25 = vsel %vm3839_vm0, %v14931_v16, %v3840_v38  ;;  %v3075_v4 = vsub.s32 4294967266, %v12162_v36  ;;  %vm3835_vm9 = vweird.f32 %v14932_v57  ;;  %vm3838_vm5 = vcmp.lt.s32.totalorder %v14930_v12, 2 }
 0x3f3   :  { %vm3842_vm2 = vcmp.eq.s32.totalorder %v14930_v12, 2  ;;  %v3166_v44 = vshll.u32 %v12164_v40, 30  ;;  %v2062_v31 = vsel %vm2051_vm11, nan, %v2061_v18  ;;  %v3717_v43 = vmul.f32 %v14700_v41, %v3681_v7 }
 0x3f4   :  { %v3844_v14 = vsel %vm3842_vm2, %v3843_v27, %v14926_v33  ;;  %v3076_v35 = vadd.s32 127, %v3075_v4  ;;  %v3623_v6 = vmul.f32 %v2062_v31, %v294_v63  ;;  %v167_v38 = vmul.f32 %v14889_v23, %v134_v45 }
 0x3f5   :  { %v3845_v22 = vsel %vm3838_vm5, %v3841_v25, %v3844_v14  ;;  %v12179_v51 = vsub.s32 %v3163_v52, %v3166_v44  ;;  %vm5662_vm10 = vcmask 261120   ;;  %v12182_v12 = vadd.f32 %v14882_v26, %v3717_v43 }
 0x3f6   :  { %v3846_v16 = vsel %vm3835_vm9, nan, %v3845_v22  ;;  %v4659_v57 = vxor.u32 2147483648, %v12120_v19  ;;  %v1311_v1 = vand.u32 2147483647, %v1310_v61  ;;  %v1318_v7 = vsel %vm1233_vm3, %v1317_v24, %v11999_v29 }
 0x3f7   :  { %v12190_v33 = vmul.f32 %v3846_v16, %v3623_v6  ;;  %7685 = vcosq.f32 %v12064_v53  ;;  %v1313_v52 = vcvt.s32.f32 %v1306_v11  ;;  %vm3001_vm8 = vcmp.lt.s32.totalorder %v11866_v59, 0 }
 0x3f8   :  { %v3071_v18 = vsub.s32 32, %v12162_v36  ;;  %v3169_v27 = vsub.s32 0, %v12179_v51  ;;  %v3077_v63 = vshll.u32 %v3076_v35, 23  ;;  %v14575_v29 = vand.u32 2147483647, %v12182_v12 }
 0x3f9   :  { %14933 = vst [vmem:[#allocation10_spill] sm:$0xff] %v12190_v33  ;;  %5872 = vrot.lane.b32.xlu1 %v12190_v33, %s7750_s1  ;;  %7222 = vmatprep.mubr.msk.f32.mxu1 %vm5662_vm10, %v12190_v33  ;;  %v4786_v24 = vand.u32 2139095040, %v12182_v12  ;;  %v12203_v11 = vadd.f32 %v14891_v49, %v167_v38  ;;  %v1320_v61 = vsel %vm12156_vm6, 0, %v1318_v7  ;;  %v3055_v25 = vadd.s32 %v12039_v9, %v12058_v37 }
 0x3fa   :  { %vm3105_vm1 = vcmp.lt.s32.totalorder %v11960_v10, 0  ;;  %v6926_v45 = vmin.u32 %v3169_v27, %v12179_v51  ;;  %v4660_v4 = vsel %vm4577_vm15, %v4659_v57, %v12120_v19  ;;  %v1314_v44 = vmul.f32 %v1313_v52, %v1311_v1  ;;  %v5656_v57 = vld [vmem:[%s14348_s4 + $0x18] sm:$0xff] }
 0x3fb   :  { %14934 = vst [vmem:[#allocation33_spill] sm:$0xff] %v12203_v11  ;;  %v3085_v31 = vsub.s32 4, %v12094_v48  ;;  %v4787_v14 = vshrl.u32 %v4786_v24, 23  ;;  %v14935_v43 = vand.u32 2147483647, %v11866_v59  ;;  %v3073_v6 = vshrl.u32 %v3055_v25, %v3071_v18  ;;  %7214 = vmatprep.subr.mxu1 %v5656_v57  ;;  %v1905_v25 = vpop.permute.xlu1 %1904 }
 0x3fc   :  { %v3171_v9 = vclz %v6926_v45  ;;  %v3189_v37 = vsub.s32 4, %v12164_v40  ;;  %v1442_v22 = vand.u32 2139095040, %v12203_v11  ;;  %7687 = vsinq.f32 %v12064_v53  ;;  %v5655_v53 = vld [vmem:[%s14348_s4 + $0x10] sm:$0xff]  ;;  %7215 = vmatpush3.msra.mxu1 %v5656_v57  ;;  %v5654_v45 = vld [vmem:[%s14348_s4 + $0x8] sm:$0xff] }
 0x3fd   :  { %vm12217_vm14 = vcmp.le.f32.partialorder %v14935_v43, 0.7853982  ;;  %v3078_v38 = vor.u32 4788187, %v3077_v63  ;;  %v6985_v19 = vadd.s32 4294967169, %v4787_v14  ;;  %v3072_v1 = vshll.u32 %v12110_v21, %v12162_v36  ;;  %7216 = vmatprep.subr.mxu1 %v5655_v53 }
 0x3fe   :  { %v4790_v16 = vand.u32 8388607, %v14575_v29  ;;  %v6927_v7 = vadd.s32 4294967294, %v3171_v9  ;;  %v14574_v52 = vand.u32 2147483647, %v12203_v11  ;;  %v1443_v18 = vshrl.u32 %v1442_v22, 23  ;;  %7217 = vmatpush3.msra.mxu1 %v5655_v53 }
 0x3ff   :  { %v12238_v27 = vsel %vm11984_vm7, %v11717_v60, %v4660_v4  ;;  %v12240_v63 = vadd.s32 3, %v1320_v61  ;;  %v14938_v24 = vand.u32 2147483647, %v11960_v10  ;;  %v4793_v36 = vadd.s32 1, %v6985_v19  ;;  %7218 = vmatprep.subr.mxu1 %v5654_v45 }
 0x400   :  { %v1315_v14 = vxor.u32 2147483648, %v1314_v44  ;;  %v3074_v43 = vor.u32 %v3073_v6, %v3072_v1  ;;  %vm6928_vm12 = vcmp.lt.s32.totalorder %v6927_v7, 0  ;;  %v6865_v50 = vadd.s32 4294967169, %v1443_v18  ;;  %7219 = vmatpush3.msra.mxu1 %v5654_v45 }
 0x401   :  { %vm12244_vm15 = vcmp.le.f32.partialorder %v14938_v24, 0.7853982  ;;  %v12254_v61 = vsel %vm3001_vm8, %v3085_v31, %v12094_v48  ;;  %v12256_v4 = vsel %vm6928_vm12, 0, %v6927_v7  ;;  %v12261_v9 = vsel %vm3105_vm1, %v3189_v37, %v12164_v40 }
 0x402   :  { %vm4794_vm7 = vcmp.gt.s32.totalorder %v4793_v36, 0  ;;  %v3079_v22 = vand.u32 2147483647, %v3078_v38  ;;  %v4791_v19 = vor.u32 8388608, %v4790_v16  ;;  %v12265_v6 = vand.u32 8388607, %v14574_v52 }
 0x403   :  { %v1935_v57 = vmul.f32 %v14809_v20, %v1905_v25  ;;  %v3175_v48 = vsub.s32 32, %v12256_v4  ;;  %v3179_v31 = vsub.s32 4294967266, %v12256_v4  ;;  %v4795_v1 = vsel %vm4794_vm7, %v4793_v36, 0 }
 0x404   :  { %v1449_v7 = vadd.s32 1, %v6865_v50  ;;  %7689 = vcosq.f32 %v12238_v27  ;;  %v12273_v40 = vsel %vm1233_vm3, %v1315_v14, %v1314_v44  ;;  %v3081_v37 = vcvt.s32.f32 %v3074_v43  ;;  %v12275_v16 = vpop.eup %7685 }
 0x405   :  { %v4796_v38 = vshrl.u32 %v4795_v1, 5  ;;  %14941 = vst [vmem:[#allocation18_spill] sm:$0xff] %v12275_v16  ;;  %v3159_v53 = vadd.s32 %v12103_v47, %v12117_v15  ;;  %v4797_v36 = vand.u32 31, %v4795_v1  ;;  %v12287_v44 = vshll.u32 %v4791_v19, 8 }
 0x406   :  { %v12285_v25 = vmul.f32 %v3081_v37, %v3079_v22  ;;  %v1447_v45 = vor.u32 8388608, %v12265_v6  ;;  %v12291_v14 = vadd.f32 %v14812_v30, %v1935_v57  ;;  %v3180_v50 = vadd.s32 127, %v3179_v31 }
 0x407   :  { %v3177_v43 = vshrl.u32 %v3159_v53, %v3175_v48  ;;  %v4798_v52 = vsub.s32 32, %v4797_v36  ;;  %vm1450_vm3 = vcmp.gt.s32.totalorder %v1449_v7, 0  ;;  %v4800_v47 = vshll.u32 %v14655_v56, %v4797_v36 }
 0x408   :  { %v4803_v15 = vshll.u32 %v14646_v46, %v4797_v36  ;;  %v4806_v29 = vshll.u32 %v14647_v34, %v4797_v36  ;;  %vm4815_vm13 = vcmp.lt.s32.totalorder %v4796_v38, 1  ;;  %v4809_v57 = vshll.u32 %v14644_v3, %v4797_v36 }
 0x409   :  { %v4801_v22 = vshrl.u32 %v14646_v46, %v4798_v52  ;;  %v4804_v19 = vshrl.u32 %v14647_v34, %v4798_v52  ;;  %v4807_v6 = vshrl.u32 %v14644_v3, %v4798_v52  ;;  %v12300_v1 = vpop.eup %7687  ;;  %v4799_v48 = vshrl.u32 %v14655_v56, %v4798_v52 }
 0x40a   :  { %14942 = vst [vmem:[#allocation25_spill] sm:$0xff] %v12300_v1  ;;  %v4810_v31 = vshrl.u32 %v14643_v62, %v4798_v52  ;;  %v4812_v37 = vshll.u32 %v14643_v62, %v4797_v36  ;;  %v4813_v53 = vshrl.u32 %v14645_v13, %v4798_v52  ;;  %vm4817_vm11 = vcmp.lt.s32.totalorder %v4796_v38, 3 }
 0x40b   :  { %v4802_v24 = vor.u32 %v4801_v22, %v4800_v47  ;;  %v4805_v18 = vor.u32 %v4804_v19, %v4803_v15  ;;  %v4808_v33 = vor.u32 %v4807_v6, %v4806_v29  ;;  %vm4818_vm4 = vcmp.lt.s32.totalorder %v4796_v38, 4 }
 0x40c   :  { %v4811_v60 = vor.u32 %v4810_v31, %v4809_v57  ;;  %v4814_v55 = vor.u32 %v4813_v53, %v4812_v37  ;;  %v1451_v54 = vsel %vm1450_vm3, %v1449_v7, 0  ;;  %v3181_v1 = vshll.u32 %v3180_v50, 23 }
 0x40d   :  { %v4819_v32 = vsel %vm4815_vm13, %v4799_v48, %v4802_v24  ;;  %v4820_v42 = vsel %vm4818_vm4, %v4808_v33, 2102212464  ;;  %v4823_v16 = vsel %vm4815_vm13, %v4802_v24, %v4805_v18  ;;  %v4827_v58 = vsel %vm4815_vm13, %v4805_v18, %v4808_v33 }
 0x40e   :  { %v4821_v36 = vsel %vm4817_vm11, %v4805_v18, %v4820_v42  ;;  %v4824_v17 = vsel %vm4818_vm4, %v4811_v60, 920167782  ;;  %v4828_v52 = vsel %vm4818_vm4, %v4814_v55, 1326507024  ;;  %vm4816_vm0 = vcmp.lt.s32.totalorder %v4796_v38, 2 }
 0x40f   :  { %v4825_v47 = vsel %vm4817_vm11, %v4808_v33, %v4824_v17  ;;  %v4829_v29 = vsel %vm4817_vm11, %v4811_v60, %v4828_v52  ;;  %v12310_v15 = vshrl.u32 %v1451_v54, 5  ;;  %v3176_v22 = vshll.u32 %v12179_v51, %v12256_v4 }
 0x410   :  { %v4822_v7 = vsel %vm4816_vm0, %v4819_v32, %v4821_v36  ;;  %v4826_v19 = vsel %vm4816_vm0, %v4823_v16, %v4825_v47  ;;  %v4830_v6 = vsel %vm4816_vm0, %v4827_v58, %v4829_v29  ;;  %v1453_v42 = vand.u32 31, %v1451_v54 }
 0x411   :  { %v12314_v57 = vpop.eup %7689  ;;  %v12317_v24 = vmul.u32.u64.low %v12287_v44, %v4830_v6  ;;  %v12318_v48 = vmul.u32.u64.high %v12287_v44, %v4830_v6, %v12317_v24  ;;  %v12320_v18 = vshll.u32 %v1447_v45, 8  ;;  %v12322_v55 = vor.u32 %v3177_v43, %v3176_v22 }
 0x412   :  { %14943 = vst [vmem:[#allocation24_spill] sm:$0xff] %v12314_v57  ;;  %v12325_v60 = vmul.u32.u64.low %v12287_v44, %v4826_v19  ;;  %v12326_v17 = vmul.u32.u64.high %v12287_v44, %v4826_v19, %v12325_v60  ;;  %v3210_v32 = vand.u32 2139095040, %v12291_v14  ;;  %v12330_v51 = vor.u32 4788187, %v3181_v1 }
 0x413   :  { %v4838_v58 = vmul.u32 %v12287_v44, %v4822_v7  ;;  %v1454_v33 = vsub.s32 32, %v1453_v42  ;;  %vm1471_vm9 = vcmp.lt.s32.totalorder %v12310_v15, 1  ;;  %v1456_v54 = vshll.u32 %v14655_v56, %v1453_v42 }
 0x414   :  { %v1459_v4 = vshll.u32 %v14646_v46, %v1453_v42  ;;  %v1462_v38 = vshll.u32 %v14647_v34, %v1453_v42  ;;  %v1465_v16 = vshll.u32 %v14644_v3, %v1453_v42  ;;  %vm4840_vm5 = vc.u32 %v12318_v48, %v12325_v60 }
 0x415   :  { %v1457_v45 = vshrl.u32 %v14646_v46, %v1454_v33  ;;  %v1468_v43 = vshll.u32 %v14643_v62, %v1453_v42  ;;  %vm1472_vm2 = vcmp.lt.s32.totalorder %v12310_v15, 2  ;;  %v4841_v44 = vadd.s32 1, %v12326_v17 }
 0x416   :  { %v1460_v50 = vshrl.u32 %v14647_v34, %v1454_v33  ;;  %v1463_v1 = vshrl.u32 %v14644_v3, %v1454_v33  ;;  %v1466_v31 = vshrl.u32 %v14643_v62, %v1454_v33  ;;  %v1455_v37 = vshrl.u32 %v14655_v56, %v1454_v33 }
 0x417   :  { %v1458_v53 = vor.u32 %v1457_v45, %v1456_v54  ;;  %v1469_v36 = vshrl.u32 %v14645_v13, %v1454_v33  ;;  %vm1473_vm12 = vcmp.lt.s32.totalorder %v12310_v15, 3  ;;  %v4842_v52 = vsel %vm4840_vm5, %v4841_v44, %v12326_v17 }
 0x418   :  { %v1461_v47 = vor.u32 %v1460_v50, %v1459_v4  ;;  %v1464_v29 = vor.u32 %v1463_v1, %v1462_v38  ;;  %v1467_v22 = vor.u32 %v1466_v31, %v1465_v16  ;;  %v4843_v7 = vadd.s32 %v4842_v52, %v4838_v58 }
 0x419   :  { %v1470_v19 = vor.u32 %v1469_v36, %v1468_v43  ;;  %vm1474_vm7 = vcmp.lt.s32.totalorder %v12310_v15, 4  ;;  %v3211_v6 = vshrl.u32 %v3210_v32, 23  ;;  %v1475_v17 = vsel %vm1471_vm9, %v1455_v37, %v1458_v53 }
 0x41a   :  { %v1476_v24 = vsel %vm1474_vm7, %v1464_v29, 2102212464  ;;  %v1479_v42 = vsel %vm1471_vm9, %v1458_v53, %v1461_v47  ;;  %v1480_v57 = vsel %vm1474_vm7, %v1467_v22, 920167782  ;;  %v1483_v33 = vsel %vm1471_vm9, %v1461_v47, %v1464_v29  ;;  %v5653_v53 = vld [vmem:[%s14348_s4] sm:$0xff] }
 0x41b   :  { %v4844_v54 = vadd.s32 536870912, %v4843_v7  ;;  %v1481_v4 = vsel %vm1473_vm12, %v1464_v29, %v1480_v57  ;;  %v1484_v58 = vsel %vm1474_vm7, %v1470_v19, 1326507024  ;;  %v1477_v38 = vsel %vm1473_vm12, %v1461_v47, %v1476_v24  ;;  %7220 = vmatprep.subr.mxu1 %v5653_v53 }
 0x41c   :  { %v1482_v32 = vsel %vm1472_vm2, %v1479_v42, %v1481_v4  ;;  %v1485_v16 = vsel %vm1473_vm12, %v1467_v22, %v1484_v58  ;;  %v6929_v45 = vadd.s32 4294967169, %v3211_v6  ;;  %7691 = vsinq.f32 %v12238_v27  ;;  %7221 = vmatpush3.msra.mxu1 %v5653_v53 }
 0x41d   :  { %v12366_v43 = vshrl.u32 %v4844_v54, 30  ;;  %v1486_v44 = vsel %vm1472_vm2, %v1483_v33, %v1485_v16  ;;  %v12371_v50 = vmul.u32.u64.low %v12320_v18, %v1482_v32  ;;  %v12372_v1 = vmul.u32.u64.high %v12320_v18, %v1482_v32, %v12371_v50  ;;  %v1909_v33 = vpop.permute.xlu1 %1908 }
 0x41e   :  { %v3183_v57 = vand.u32 2147483647, %v12330_v51  ;;  %v12378_v31 = vmul.u32.u64.low %v12320_v18, %v1486_v44  ;;  %v12379_v37 = vmul.u32.u64.high %v12320_v18, %v1486_v44, %v12378_v31  ;;  %v1478_v52 = vsel %vm1472_vm2, %v1475_v17, %v1477_v38 }
 0x41f   :  { %v4846_v36 = vshll.u32 %v12366_v43, 30  ;;  %v14589_v47 = vand.u32 2147483647, %v12291_v14  ;;  %v3217_v29 = vadd.s32 1, %v6929_v45  ;;  %v1319_v27 = vsel %vm12156_vm6, %v11790_v39, %v12273_v40 }
 0x420   :  { %v14944_v51 = vsel %vm12217_vm14, 0, %v12254_v61  ;;  %v3185_v19 = vcvt.s32.f32 %v12322_v55  ;;  %v14945_v15 = vsel %vm12244_vm15, 0, %v12261_v9  ;;  %v3083_v24 = vxor.u32 2147483648, %v12285_v25 }
 0x421   :  { %v3092_v22 = vadd.s32 3, %v14944_v51  ;;  %v3196_v6 = vadd.s32 3, %v14945_v15  ;;  %v12402_v42 = vsub.s32 %v4843_v7, %v4846_v36  ;;  %v1497_v0 = vadd.s32 1, %v12372_v1 }
 0x422   :  { %vm3218_vm6 = vcmp.gt.s32.totalorder %v3217_v29, 0  ;;  %v12405_v40 = vmul.f32 %v3185_v19, %v3183_v57  ;;  %v1494_v61 = vmul.u32 %v12320_v18, %v1478_v52  ;;  %vm1496_vm3 = vc.u32 %v12379_v37, %v12371_v50 }
 0x423   :  { %v3219_v55 = vsel %vm3218_vm6, %v3217_v29, 0  ;;  %7693 = vcosq.f32 %v1319_v27  ;;  %v4849_v9 = vsub.s32 0, %v12402_v42  ;;  %v1498_v54 = vsel %vm1496_vm3, %v1497_v0, %v12372_v1 }
 0x424   :  { %v3214_v7 = vand.u32 8388607, %v14589_v47  ;;  %7695 = vsinq.f32 %v1319_v27  ;;  %v12415_v17 = vand.u32 3, %v12240_v63  ;;  %v1499_v4 = vadd.s32 %v1498_v54, %v1494_v61 }
 0x425   :  { %v3221_v58 = vand.u32 31, %v3219_v55  ;;  %v12417_v18 = vand.u32 3, %v3092_v22  ;;  %v12419_v38 = vand.u32 3, %v3196_v6  ;;  %v6986_v32 = vmin.u32 %v4849_v9, %v12402_v42 }
 0x426   :  { %14946 = vst [vmem:[#allocation8_spill] sm:$0xff] %v12415_v17  ;;  %v1936_v16 = vmul.f32 %v14809_v20, %v1909_v33  ;;  %v12426_v45 = vsel %vm3001_vm8, %v3083_v24, %v12285_v25  ;;  %v1500_v1 = vadd.s32 536870912, %v1499_v4  ;;  %v4839_v57 = vadd.s32 %v12325_v60, %v12318_v48 }
 0x427   :  { %14947 = vst [vmem:[#allocation40_spill] sm:$0xff] %v12417_v18  ;;  %14948 = vst [vmem:[#allocation31_spill] sm:$0xff] %v12419_v38  ;;  %v3222_v63 = vsub.s32 32, %v3221_v58  ;;  %v4851_v31 = vclz %v6986_v32  ;;  %v3215_v53 = vor.u32 8388608, %v3214_v7  ;;  %v12431_v36 = vshrl.u32 %v3219_v55, 5 }
 0x428   :  { %v12433_v52 = vshrl.u32 %v1500_v1, 30  ;;  %v3224_v29 = vshll.u32 %v14655_v56, %v3221_v58  ;;  %v3227_v22 = vshll.u32 %v14646_v46, %v3221_v58  ;;  %v3230_v60 = vshll.u32 %v14647_v34, %v3221_v58 }
 0x429   :  { %v3225_v27 = vshrl.u32 %v14646_v46, %v3222_v63  ;;  %v3228_v25 = vshrl.u32 %v14647_v34, %v3222_v63  ;;  %v6987_v51 = vadd.s32 4294967294, %v4851_v31  ;;  %v3231_v19 = vshrl.u32 %v14644_v3, %v3222_v63  ;;  %v12445_v0 = vpop.eup %7691 }
 0x42a   :  { %v3234_v15 = vshrl.u32 %v14643_v62, %v3222_v63  ;;  %v1502_v48 = vshll.u32 %v12433_v52, 30  ;;  %v3233_v6 = vshll.u32 %v14644_v3, %v3221_v58  ;;  %v3237_v24 = vshrl.u32 %v14645_v13, %v3222_v63 }
 0x42b   :  { %vm6988_vm8 = vcmp.lt.s32.totalorder %v6987_v51, 0  ;;  %v3226_v61 = vor.u32 %v3225_v27, %v3224_v29  ;;  %v3229_v55 = vor.u32 %v3228_v25, %v3227_v22  ;;  %v3236_v33 = vshll.u32 %v14643_v62, %v3221_v58 }
 0x42c   :  { %v4854_v9 = vsel %vm6988_vm8, 0, %v6987_v51  ;;  %v12448_v54 = vsub.s32 %v1499_v4, %v1502_v48  ;;  %v3232_v7 = vor.u32 %v3231_v19, %v3230_v60  ;;  %v3235_v32 = vor.u32 %v3234_v15, %v3233_v6 }
 0x42d   :  { %v4855_v1 = vsub.s32 32, %v4854_v9  ;;  %v4859_v31 = vsub.s32 4294967266, %v4854_v9  ;;  %v3255_v47 = vshll.u32 %v3215_v53, 8  ;;  %v12451_v44 = vadd.f32 %v14812_v30, %v1936_v16 }
 0x42e   :  { %v1505_v18 = vsub.s32 0, %v12448_v54  ;;  %v3238_v17 = vor.u32 %v3237_v24, %v3236_v33  ;;  %vm3239_vm13 = vcmp.lt.s32.totalorder %v12431_v36, 1  ;;  %vm3240_vm11 = vcmp.lt.s32.totalorder %v12431_v36, 2 }
 0x42f   :  { %v4860_v29 = vadd.s32 127, %v4859_v31  ;;  %v3223_v58 = vshrl.u32 %v14655_v56, %v3222_v63  ;;  %vm3242_vm4 = vcmp.lt.s32.totalorder %v12431_v36, 4  ;;  %v3247_v4 = vsel %vm3239_vm13, %v3226_v61, %v3229_v55 }
 0x430   :  { %v12460_v27 = vpop.eup %7693  ;;  %v6866_v16 = vmin.u32 %v1505_v18, %v12448_v54  ;;  %vm3241_vm0 = vcmp.lt.s32.totalorder %v12431_v36, 3  ;;  %v3244_v53 = vsel %vm3242_vm4, %v3232_v7, 2102212464  ;;  %v3248_v25 = vsel %vm3242_vm4, %v3235_v32, 920167782 }
 0x431   :  { %14949 = vst [vmem:[#allocation38_spill] sm:$0xff] %v12460_v27  ;;  %v12468_v51 = vpop.eup %7695  ;;  %v4856_v63 = vshll.u32 %v12402_v42, %v4854_v9  ;;  %v4857_v22 = vshrl.u32 %v4839_v57, %v4855_v1  ;;  %v4861_v19 = vshll.u32 %v4860_v29, 23  ;;  %v3249_v15 = vsel %vm3241_vm0, %v3232_v7, %v3248_v25 }
 0x432   :  { %14950 = vst [vmem:[#allocation14_spill] sm:$0xff] %v12468_v51  ;;  %vm4785_vm9 = vcmp.lt.s32.totalorder %v12182_v12, 0  ;;  %v1507_v18 = vclz %v6866_v16  ;;  %v3250_v48 = vsel %vm3240_vm11, %v3247_v4, %v3249_v15  ;;  %v3251_v60 = vsel %vm3239_vm13, %v3229_v55, %v3232_v7 }
 0x433   :  { %v3252_v6 = vsel %vm3242_vm4, %v3238_v17, 1326507024  ;;  %v4862_v24 = vor.u32 4788187, %v4861_v19  ;;  %v3243_v42 = vsel %vm3239_vm13, %v3223_v58, %v3226_v61  ;;  %v3245_v57 = vsel %vm3241_vm0, %v3229_v55, %v3244_v53 }
 0x434   :  { %v3253_v33 = vsel %vm3241_vm0, %v3235_v32, %v3252_v6  ;;  %v6867_v9 = vadd.s32 4294967294, %v1507_v18  ;;  %v12488_v31 = vmul.u32.u64.low %v3255_v47, %v3250_v48  ;;  %v12489_v29 = vmul.u32.u64.high %v3255_v47, %v3250_v48, %v12488_v31 }
 0x435   :  { %v3254_v1 = vsel %vm3240_vm11, %v3251_v60, %v3253_v33  ;;  %v14951_v7 = vand.u32 2147483647, %v12182_v12  ;;  %v4858_v61 = vor.u32 %v4857_v22, %v4856_v63  ;;  %v3087_v55 = vsel %vm12217_vm14, %v11866_v59, %v12426_v45  ;;  %v14962_v59 = vld [vmem:[#allocation17_spill] sm:$0xff] }
 0x436   :  { %v12497_v58 = vmul.u32.u64.low %v3255_v47, %v3254_v1  ;;  %v12498_v4 = vmul.u32.u64.high %v3255_v47, %v3254_v1, %v12497_v58  ;;  %vm6868_vm2 = vcmp.lt.s32.totalorder %v6867_v9, 0  ;;  %v3246_v32 = vsel %vm3240_vm11, %v3243_v42, %v3245_v57 }
 0x437   :  { %vm12493_vm5 = vcmp.le.f32.partialorder %v14951_v7, 0.7853982  ;;  %v3314_v16 = vand.u32 2139095040, %v12451_v44  ;;  %v14954_v53 = vxor.u32 2147483648, %v12405_v40  ;;  %v4863_v63 = vand.u32 2147483647, %v4862_v24 }
 0x438   :  { %v4869_v22 = vsub.s32 4, %v12366_v43  ;;  %v1510_v19 = vsel %vm6868_vm2, 0, %v6867_v9  ;;  %v3265_v35 = vadd.s32 1, %v12489_v29  ;;  %v14592_v45 = vand.u32 2147483647, %v12451_v44 }
 0x439   :  { %v3188_v25 = vsel %vm3105_vm1, %v14954_v53, %v12405_v40  ;;  %v1511_v15 = vsub.s32 32, %v1510_v19  ;;  %v1515_v18 = vsub.s32 4294967266, %v1510_v19  ;;  %v4865_v36 = vcvt.s32.f32 %v4858_v61  ;;  %v14955_v61 = vld [vmem:[#allocation50_spill] sm:$0xff] }
 0x43a   :  { %v3262_v48 = vmul.u32 %v3255_v47, %v3246_v32  ;;  %vm3264_vm14 = vc.u32 %v12498_v4, %v12488_v31  ;;  %v3315_v60 = vshrl.u32 %v3314_v16, 23  ;;  %7697 = vcosq.f32 %v3087_v55  ;;  %v14956_v16 = vld [vmem:[#allocation46_spill] sm:$0xff] }
 0x43b   :  { %v12519_v40 = vsel %vm12244_vm15, %v11960_v10, %v3188_v25  ;;  %v1495_v6 = vadd.s32 %v12371_v50, %v12379_v37  ;;  %v3266_v24 = vsel %vm3264_vm14, %v3265_v35, %v12489_v29  ;;  %v4866_v42 = vmul.f32 %v4865_v36, %v4863_v63  ;;  %v14957_v36 = vld [vmem:[#allocation44_spill] sm:$0xff] }
 0x43c   :  { %v4870_v57 = vsel %vm4785_vm9, %v4869_v22, %v12366_v43  ;;  %v3267_v47 = vadd.s32 %v3266_v24, %v3262_v48  ;;  %v6933_v33 = vadd.s32 4294967169, %v3315_v60  ;;  %7699 = vsinq.f32 %v3087_v55 }
 0x43d   :  { %v1513_v9 = vshrl.u32 %v1495_v6, %v1511_v15  ;;  %v1516_v1 = vadd.s32 127, %v1515_v18  ;;  %v3318_v21 = vand.u32 8388607, %v14592_v45  ;;  %7701 = vcosq.f32 %v12519_v40 }
 0x43e   :  { %vm1441_vm1 = vcmp.lt.s32.totalorder %v12203_v11, 0  ;;  %v3268_v50 = vadd.s32 536870912, %v3267_v47  ;;  %v3321_v37 = vadd.s32 1, %v6933_v33  ;;  %v4872_v29 = vsel %vm12493_vm5, 0, %v4870_v57 }
 0x43f   :  { %v1512_v7 = vshll.u32 %v12448_v54, %v1510_v19  ;;  %v1525_v43 = vsub.s32 4, %v12433_v52  ;;  %v496_v58 = vxor.u32 2147483648, %v14955_v61  ;;  %v4867_v55 = vxor.u32 2147483648, %v4866_v42 }
 0x440   :  { %v12536_v32 = vshrl.u32 %v3268_v50, 30  ;;  %vm3322_vm15 = vcmp.gt.s32.totalorder %v3321_v37, 0  ;;  %v499_v53 = vxor.u32 2147483648, %v14956_v16  ;;  %v1517_v63 = vshll.u32 %v1516_v1, 23 }
 0x441   :  { %v12539_v25 = vor.u32 %v1513_v9, %v1512_v7  ;;  %v3319_v22 = vor.u32 8388608, %v3318_v21  ;;  %v3323_v15 = vsel %vm3322_vm15, %v3321_v37, 0  ;;  %vm494_vm12 = vcmp.lt.s32.totalorder %v14957_v36, 2 }
 0x442   :  { %v3270_v18 = vshll.u32 %v12536_v32, 30  ;;  %v3325_v35 = vand.u32 31, %v3323_v15  ;;  %vm495_vm7 = vcmp.eq.s32.totalorder %v14957_v36, 0  ;;  %v12544_v54 = vadd.s32 3, %v4872_v29 }
 0x443   :  { %v12549_v19 = vsel %vm1441_vm1, %v1525_v43, %v12433_v52  ;;  %v3263_v48 = vadd.s32 %v12488_v31, %v12498_v4  ;;  %vm498_vm6 = vcmp.eq.s32.totalorder %v14957_v36, 2  ;;  %v12555_v60 = vsel %vm4785_vm9, %v4867_v55, %v4866_v42  ;;  %v14959_v55 = vld [vmem:[#allocation57_spill] sm:$0xff] }
 0x444   :  { %v12557_v6 = vsub.s32 %v3267_v47, %v3270_v18  ;;  %v3326_v24 = vsub.s32 32, %v3325_v35  ;;  %v497_v57 = vsel %vm495_vm7, %v14956_v16, %v496_v58  ;;  %v12560_v33 = vor.u32 4788187, %v1517_v63  ;;  %v14960_v18 = vld [vmem:[#allocation48_spill] sm:$0xff]  ;;  %v14963_v36 = vld [vmem:[#allocation53_spill] sm:$0xff] }
 0x445   :  { %v12563_v1 = vshll.u32 %v3319_v22, 8  ;;  %v500_v52 = vsel %vm498_vm6, %v499_v53, %v14955_v61  ;;  %v3324_v4 = vshrl.u32 %v3323_v15, 5  ;;  %v3328_v21 = vshll.u32 %v14655_v56, %v3325_v35 }
 0x446   :  { %v3273_v31 = vsub.s32 0, %v12557_v6  ;;  %v3329_v42 = vshrl.u32 %v14646_v46, %v3326_v24  ;;  %v3331_v47 = vshll.u32 %v14646_v46, %v3325_v35  ;;  %v3332_v50 = vshrl.u32 %v14647_v34, %v3326_v24 }
 0x447   :  { %v3334_v37 = vshll.u32 %v14647_v34, %v3325_v35  ;;  %v3335_v29 = vshrl.u32 %v14644_v3, %v3326_v24  ;;  %v12573_v7 = vpop.eup %7697  ;;  %v3337_v61 = vshll.u32 %v14644_v3, %v3325_v35  ;;  %v501_v58 = vsel %vm494_vm12, %v497_v57, %v500_v52 }
 0x448   :  { %14958 = vst [vmem:[#allocation50_spill] sm:$0xff] %v12573_v7  ;;  %v6930_v43 = vmin.u32 %v3273_v31, %v12557_v6  ;;  %v2264_v16 = vxor.u32 2147483648, %v14959_v55  ;;  %v3330_v53 = vor.u32 %v3329_v42, %v3328_v21  ;;  %v3333_v63 = vor.u32 %v3332_v50, %v3331_v47 }
 0x449   :  { %v3336_v22 = vor.u32 %v3335_v29, %v3334_v37  ;;  %v3338_v15 = vshrl.u32 %v14643_v62, %v3326_v24  ;;  %vm2263_vm3 = vcmp.eq.s32.totalorder %v14960_v18, 0  ;;  %v12582_v45 = vpop.eup %7699  ;;  %v3340_v7 = vshll.u32 %v14643_v62, %v3325_v35 }
 0x44a   :  { %14961 = vst [vmem:[#allocation46_spill] sm:$0xff] %v12582_v45  ;;  %v3275_v9 = vclz %v6930_v43  ;;  %v3341_v31 = vshrl.u32 %v14645_v13, %v3326_v24  ;;  %vm491_vm8 = vweird.f32 %v14962_v59  ;;  %v2267_v57 = vxor.u32 2147483648, %v14963_v36  ;;  %v12588_v52 = vpop.eup %7701 }
 0x44b   :  { %14964 = vst [vmem:[#allocation44_spill] sm:$0xff] %v12588_v52  ;;  %v3327_v21 = vshrl.u32 %v14655_v56, %v3326_v24  ;;  %v3339_v42 = vor.u32 %v3338_v15, %v3337_v61  ;;  %vm3343_vm13 = vcmp.lt.s32.totalorder %v3324_v4, 1  ;;  %vm3344_vm11 = vcmp.lt.s32.totalorder %v3324_v4, 2 }
 0x44c   :  { %v6931_v47 = vadd.s32 4294967294, %v3275_v9  ;;  %v3342_v50 = vor.u32 %v3341_v31, %v3340_v7  ;;  %vm3345_vm4 = vcmp.lt.s32.totalorder %v3324_v4, 3  ;;  %vm3346_vm0 = vcmp.lt.s32.totalorder %v3324_v4, 4 }
 0x44d   :  { %v3348_v37 = vsel %vm3346_vm0, %v3336_v22, 2102212464  ;;  %v3351_v29 = vsel %vm3343_vm13, %v3330_v53, %v3333_v63  ;;  %v3352_v35 = vsel %vm3346_vm0, %v3339_v42, 920167782  ;;  %v3355_v43 = vsel %vm3343_vm13, %v3333_v63, %v3336_v22 }
 0x44e   :  { %vm6932_vm9 = vcmp.lt.s32.totalorder %v6931_v47, 0  ;;  %v3347_v45 = vsel %vm3343_vm13, %v3327_v21, %v3330_v53  ;;  %v3353_v27 = vsel %vm3345_vm4, %v3336_v22, %v3352_v35  ;;  %v3356_v39 = vsel %vm3346_vm0, %v3342_v50, 1326507024  ;;  %v3689_v50 = vpop.permute.xlu1 %3688 }
 0x44f   :  { %v3278_v51 = vsel %vm6932_vm9, 0, %v6931_v47  ;;  %v3349_v10 = vsel %vm3345_vm4, %v3333_v63, %v3348_v37  ;;  %v3354_v52 = vsel %vm3344_vm11, %v3351_v29, %v3353_v27  ;;  %v3357_v24 = vsel %vm3345_vm4, %v3339_v42, %v3356_v39  ;;  %v14974_v29 = vld [vmem:[#allocation70_spill] sm:$0xff]  ;;  %v14984_v42 = vld [vmem:[#allocation21_spill] sm:$0xff] }
 0x450   :  { %v3279_v61 = vsub.s32 32, %v3278_v51  ;;  %v3283_v15 = vsub.s32 4294967266, %v3278_v51  ;;  %v3358_v9 = vsel %vm3344_vm11, %v3355_v43, %v3357_v24  ;;  %vm2266_vm2 = vcmp.eq.s32.totalorder %v14960_v18, 2 }
 0x451   :  { %v12595_v7 = vmul.u32.u64.low %v12563_v1, %v3358_v9  ;;  %v12596_v31 = vmul.u32.u64.high %v12563_v1, %v3358_v9, %v12595_v7  ;;  %v12599_v38 = vmul.u32.u64.low %v12563_v1, %v3354_v52  ;;  %v12600_v53 = vmul.u32.u64.high %v12563_v1, %v3354_v52, %v12599_v38 }
 0x452   :  { %v3281_v22 = vshrl.u32 %v3263_v48, %v3279_v61  ;;  %v3284_v63 = vadd.s32 127, %v3283_v15  ;;  %v3350_v27 = vsel %vm3344_vm11, %v3347_v45, %v3349_v10  ;;  %v2265_v39 = vsel %vm2263_vm3, %v14963_v36, %v2264_v16  ;;  %v14968_v16 = vld [vmem:[#allocation71_spill] sm:$0xff] }
 0x453   :  { %v14965_v21 = vand.u32 2147483647, %v12203_v11  ;;  %v1519_v47 = vand.u32 2147483647, %v12560_v33  ;;  %v502_v52 = vsel %vm491_vm8, nan, %v501_v58  ;;  %vm2262_vm15 = vcmp.lt.s32.totalorder %v14960_v18, 2 }
 0x454   :  { %v2268_v48 = vsel %vm2266_vm2, %v2267_v57, %v14959_v55  ;;  %vm3209_vm12 = vcmp.lt.s32.totalorder %v12291_v14, 0  ;;  %v3280_v10 = vshll.u32 %v12557_v6, %v3278_v51  ;;  %v3285_v45 = vshll.u32 %v3284_v63, 23  ;;  %v14969_v33 = vld [vmem:[#allocation23_spill] sm:$0xff] }
 0x455   :  { %vm12609_vm14 = vcmp.le.f32.partialorder %v14965_v21, 0.7853982  ;;  %v2269_v4 = vsel %vm2262_vm15, %v2265_v39, %v2268_v48  ;;  %v4048_v36 = vxor.u32 2147483648, %v14968_v16  ;;  %v3366_v37 = vmul.u32 %v12563_v1, %v3350_v27  ;;  %v14970_v57 = vld [vmem:[#allocation67_spill] sm:$0xff]  ;;  %v14977_v21 = vld [vmem:[#allocation12_spill] sm:$0xff] }
 0x456   :  { %vm3368_vm7 = vc.u32 %v12596_v31, %v12599_v38  ;;  %v3369_v59 = vadd.s32 1, %v12600_v53  ;;  %vm2259_vm6 = vweird.f32 %v14969_v33  ;;  %v3282_v58 = vor.u32 %v3281_v22, %v3280_v10 }
 0x457   :  { %v3286_v55 = vor.u32 4788187, %v3285_v45  ;;  %v2270_v18 = vsel %vm2259_vm6, nan, %v2269_v4  ;;  %vm4047_vm3 = vcmp.eq.s32.totalorder %v14970_v57, 0  ;;  %v14971_v51 = vand.u32 2147483647, %v12291_v14 }
 0x458   :  { %v3370_v1 = vsel %vm3368_vm7, %v3369_v59, %v12600_v53  ;;  %v4049_v35 = vsel %vm4047_vm3, %v14974_v29, %v4048_v36  ;;  %v4051_v43 = vxor.u32 2147483648, %v14974_v29  ;;  %v3719_v24 = vmul.f32 %v14700_v41, %v3689_v50 }
 0x459   :  { %vm12629_vm8 = vcmp.le.f32.partialorder %v14971_v51, 0.7853982  ;;  %v14975_v61 = vcvt.s32.f32 %v12539_v25  ;;  %v3293_v9 = vsub.s32 4, %v12536_v32  ;;  %v3371_v7 = vadd.s32 %v3370_v1, %v3366_v37 }
 0x45a   :  { %vm4050_vm13 = vcmp.eq.s32.totalorder %v14970_v57, 2  ;;  %v3287_v22 = vand.u32 2147483647, %v3286_v55  ;;  %vm4046_vm11 = vcmp.lt.s32.totalorder %v14970_v57, 2  ;;  %v12644_v53 = vadd.f32 %v14882_v26, %v3719_v24  ;;  %v14979_v55 = vld [vmem:[#allocation22_spill] sm:$0xff]  ;;  %v14980_v57 = vld [vmem:[#allocation19_spill] sm:$0xff] }
 0x45b   :  { %v1522_v15 = vmul.f32 %v14975_v61, %v1519_v47  ;;  %v4052_v63 = vsel %vm4050_vm13, %v4051_v43, %v14968_v16  ;;  %v3372_v27 = vadd.s32 536870912, %v3371_v7  ;;  %v3625_v39 = vmul.f32 %v2270_v18, %v502_v52  ;;  %v14982_v61 = vld [vmem:[#allocation15_spill] sm:$0xff] }
 0x45c   :  { %14976 = vst [vmem:[#allocation57_spill] sm:$0xff] %v12644_v53  ;;  %vm4043_vm4 = vweird.f32 %v14977_v21  ;;  %v4053_v48 = vsel %vm4046_vm11, %v4049_v35, %v4052_v63  ;;  %v3289_v25 = vcvt.s32.f32 %v3282_v58  ;;  %v14604_v10 = vand.u32 2147483647, %v12644_v53 }
 0x45d   :  { %v4054_v47 = vsel %vm4043_vm4, nan, %v4053_v48  ;;  %v4994_v45 = vand.u32 2139095040, %v12644_v53  ;;  %v1523_v4 = vxor.u32 2147483648, %v1522_v15  ;;  %v1528_v36 = vsel %vm12609_vm14, 0, %v12549_v19 }
 0x45e   :  { %v12652_v16 = vshrl.u32 %v3372_v27, 30  ;;  %v12654_v50 = vmul.f32 %v4054_v47, %v3625_v39  ;;  %v4871_v52 = vsel %vm12493_vm5, %v12182_v12, %v12555_v60  ;;  %v3290_v37 = vmul.f32 %v3289_v25, %v3287_v22 }
 0x45f   :  { %v3294_v59 = vsel %vm3209_vm12, %v3293_v9, %v12536_v32  ;;  %v4995_v33 = vshrl.u32 %v4994_v45, 23  ;;  %v4998_v19 = vand.u32 8388607, %v14604_v10  ;;  %v392_v18 = vxor.u32 2147483648, %v14979_v55 }
 0x460   :  { %14978 = vst [vmem:[#allocation48_spill] sm:$0xff] %v12654_v50  ;;  %v3374_v58 = vshll.u32 %v12652_v16, 30  ;;  %5876 = vrot.lane.b32.xlu0 %v12654_v50, %s7750_s1  ;;  %v395_v51 = vxor.u32 2147483648, %v14980_v57  ;;  %7703 = vsinq.f32 %v12519_v40  ;;  %v12672_v17 = vand.u32 3, %v12544_v54 }
 0x461   :  { %v1532_v60 = vadd.s32 3, %v1528_v36  ;;  %v6993_v32 = vadd.s32 4294967169, %v4995_v33  ;;  %7705 = vcosq.f32 %v4871_v52  ;;  %v1524_v1 = vsel %vm1441_vm1, %v1523_v4, %v1522_v15  ;;  %v14985_v36 = vld [vmem:[#allocation28_spill] sm:$0xff] }
 0x462   :  { %14981 = vst [vmem:[#allocation17_spill] sm:$0xff] %v12672_v17  ;;  %v3296_v29 = vsel %vm12629_vm8, 0, %v3294_v59  ;;  %v12678_v35 = vsub.s32 %v3371_v7, %v3374_v58  ;;  %v3291_v43 = vxor.u32 2147483648, %v3290_v37  ;;  %vm391_vm5 = vcmp.eq.s32.totalorder %v14982_v61, 0  ;;  %v14986_v58 = vld [vmem:[#allocation26_spill] sm:$0xff] }
 0x463   :  { %v5001_v24 = vadd.s32 1, %v6993_v32  ;;  %vm394_vm0 = vcmp.eq.s32.totalorder %v14982_v61, 2  ;;  %v4999_v54 = vor.u32 8388608, %v4998_v19  ;;  %v393_v9 = vsel %vm391_vm5, %v14980_v57, %v392_v18 }
 0x464   :  { %v3377_v40 = vsub.s32 0, %v12678_v35  ;;  %v396_v22 = vsel %vm394_vm0, %v395_v51, %v14979_v55  ;;  %7707 = vsinq.f32 %v4871_v52  ;;  %v12685_v15 = vand.u32 3, %v1532_v60 }
 0x465   :  { %v12687_v63 = vadd.s32 3, %v3296_v29  ;;  %vm5002_vm1 = vcmp.gt.s32.totalorder %v5001_v24, 0  ;;  %v12692_v7 = vsel %vm12609_vm14, %v12203_v11, %v1524_v1  ;;  %vm390_vm9 = vcmp.lt.s32.totalorder %v14982_v61, 2 }
 0x466   :  { %14983 = vst [vmem:[#allocation53_spill] sm:$0xff] %v12685_v15  ;;  %v6934_v27 = vmin.u32 %v3377_v40, %v12678_v35  ;;  %v5003_v39 = vsel %vm5002_vm1, %v5001_v24, 0  ;;  %v12698_v21 = vsel %vm3209_vm12, %v3291_v43, %v3290_v37  ;;  %v3367_v48 = vadd.s32 %v12599_v38, %v12596_v31 }
 0x467   :  { %v5005_v25 = vand.u32 31, %v5003_v39  ;;  %v12702_v47 = vsel %vm390_vm9, %v393_v9, %v396_v22  ;;  %v12704_v4 = vshll.u32 %v4999_v54, 8  ;;  %vm2159_vm2 = vcmp.eq.s32.totalorder %v14984_v42, 0 }
 0x468   :  { %v3379_v45 = vclz %v6934_v27  ;;  %v2160_v52 = vxor.u32 2147483648, %v14985_v36  ;;  %v5004_v59 = vshrl.u32 %v5003_v39, 5  ;;  %vm2162_vm14 = vcmp.eq.s32.totalorder %v14984_v42, 2  ;;  %v14987_v27 = vld [vmem:[#allocation9_spill] sm:$0xff] }
 0x469   :  { %v5006_v33 = vsub.s32 32, %v5005_v25  ;;  %v2163_v37 = vxor.u32 2147483648, %v14986_v58  ;;  %v5008_v55 = vshll.u32 %v14655_v56, %v5005_v25  ;;  %v5011_v38 = vshll.u32 %v14646_v46, %v5005_v25 }
 0x46a   :  { %v6935_v19 = vadd.s32 4294967294, %v3379_v45  ;;  %v5014_v31 = vshll.u32 %v14647_v34, %v5005_v25  ;;  %v5017_v60 = vshll.u32 %v14644_v3, %v5005_v25  ;;  %vm2158_vm15 = vcmp.lt.s32.totalorder %v14984_v42, 2 }
 0x46b   :  { %v5009_v18 = vshrl.u32 %v14646_v46, %v5006_v33  ;;  %v5012_v57 = vshrl.u32 %v14647_v34, %v5006_v33  ;;  %v5015_v51 = vshrl.u32 %v14644_v3, %v5006_v33  ;;  %v5018_v32 = vshrl.u32 %v14643_v62, %v5006_v33 }
 0x46c   :  { %vm6936_vm12 = vcmp.lt.s32.totalorder %v6935_v19, 0  ;;  %v5020_v1 = vshll.u32 %v14643_v62, %v5005_v25  ;;  %v5021_v29 = vshrl.u32 %v14645_v13, %v5006_v33  ;;  %vm2155_vm7 = vweird.f32 %v14987_v27 }
 0x46d   :  { %v3382_v43 = vsel %vm6936_vm12, 0, %v6935_v19  ;;  %v5010_v24 = vor.u32 %v5009_v18, %v5008_v55  ;;  %v5013_v61 = vor.u32 %v5012_v57, %v5011_v38  ;;  %v5016_v40 = vor.u32 %v5015_v51, %v5014_v31  ;;  %v12721_v54 = vpop.eup %7703  ;;  %v14989_v38 = vld [vmem:[#allocation7_spill] sm:$0xff]  ;;  %v14990_v31 = vld [vmem:[#allocation77_spill] sm:$0xff] }
 0x46e   :  { %v3387_v9 = vsub.s32 4294967266, %v3382_v43  ;;  %v5019_v22 = vor.u32 %v5018_v32, %v5017_v60  ;;  %v2161_v39 = vsel %vm2159_vm2, %v14986_v58, %v2160_v52  ;;  %v2164_v25 = vsel %vm2162_vm14, %v2163_v37, %v14985_v36  ;;  %v12730_v45 = vpop.eup %7705 }
 0x46f   :  { %14988 = vst [vmem:[#allocation71_spill] sm:$0xff] %v12730_v45  ;;  %v3383_v19 = vsub.s32 32, %v3382_v43  ;;  %v5022_v55 = vor.u32 %v5021_v29, %v5020_v1  ;;  %vm5023_vm6 = vcmp.lt.s32.totalorder %v5004_v59, 1  ;;  %vm5026_vm3 = vcmp.lt.s32.totalorder %v5004_v59, 4 }
 0x470   :  { %vm387_vm13 = vweird.f32 %v14989_v38  ;;  %vm3942_vm11 = vcmp.lt.s32.totalorder %v14990_v31, 2  ;;  %v3388_v18 = vadd.s32 127, %v3387_v9  ;;  %v5007_v57 = vshrl.u32 %v14655_v56, %v5006_v33 }
 0x471   :  { %v5028_v51 = vsel %vm5026_vm3, %v5016_v40, 2102212464  ;;  %v5031_v60 = vsel %vm5023_vm6, %v5010_v24, %v5013_v61  ;;  %vm5025_vm4 = vcmp.lt.s32.totalorder %v5004_v59, 3  ;;  %v5032_v52 = vsel %vm5026_vm3, %v5019_v22, 920167782  ;;  %v12735_v36 = vpop.eup %7707 }
 0x472   :  { %v5035_v58 = vsel %vm5023_vm6, %v5013_v61, %v5016_v40  ;;  %v5036_v32 = vsel %vm5026_vm3, %v5022_v55, 1326507024  ;;  %v3389_v37 = vshll.u32 %v3388_v18, 23  ;;  %vm5024_vm5 = vcmp.lt.s32.totalorder %v5004_v59, 2  ;;  %v144_v55 = vpop.permute.xlu1 %143  ;;  %v14993_v59 = vld [vmem:[#allocation56_spill] sm:$0xff] }
 0x473   :  { %v5027_v1 = vsel %vm5023_vm6, %v5007_v57, %v5010_v24  ;;  %v5033_v29 = vsel %vm5025_vm4, %v5016_v40, %v5032_v52  ;;  %v3385_v10 = vshrl.u32 %v3367_v48, %v3383_v19  ;;  %v5029_v11 = vsel %vm5025_vm4, %v5013_v61, %v5028_v51 }
 0x474   :  { %v5034_v15 = vsel %vm5024_vm5, %v5031_v60, %v5033_v29  ;;  %v5037_v17 = vsel %vm5025_vm4, %v5019_v22, %v5036_v32  ;;  %v3384_v9 = vshll.u32 %v12678_v35, %v3382_v43  ;;  %v2165_v45 = vsel %vm2158_vm15, %v2161_v39, %v2164_v25  ;;  %v14991_v43 = vld [vmem:[#allocation89_spill] sm:$0xff] }
 0x475   :  { %v5038_v33 = vsel %vm5024_vm5, %v5035_v58, %v5037_v17  ;;  %vm3943_vm0 = vcmp.eq.s32.totalorder %v14990_v31, 0  ;;  %vm3313_vm1 = vcmp.lt.s32.totalorder %v12451_v44, 0  ;;  %v3390_v35 = vor.u32 4788187, %v3389_v37  ;;  %v14992_v25 = vld [vmem:[#allocation85_spill] sm:$0xff] }
 0x476   :  { %v12745_v24 = vmul.u32.u64.low %v12704_v4, %v5038_v33  ;;  %v12746_v40 = vmul.u32.u64.high %v12704_v4, %v5038_v33, %v12745_v24  ;;  %v12749_v48 = vmul.u32.u64.low %v12704_v4, %v5034_v15  ;;  %v12750_v61 = vmul.u32.u64.high %v12704_v4, %v5034_v15, %v12749_v48 }
 0x477   :  { %v5030_v17 = vsel %vm5024_vm5, %v5027_v1, %v5029_v11  ;;  %v3944_v42 = vxor.u32 2147483648, %v14991_v43  ;;  %vm3946_vm9 = vcmp.eq.s32.totalorder %v14990_v31, 2  ;;  %v3386_v22 = vor.u32 %v3385_v10, %v3384_v9  ;;  %v14997_v9 = vld [vmem:[#allocation35_spill] sm:$0xff] }
 0x478   :  { %v2166_v39 = vsel %vm2155_vm7, nan, %v2165_v45  ;;  %v3947_v19 = vxor.u32 2147483648, %v14992_v25  ;;  %v169_v18 = vmul.f32 %v14889_v23, %v144_v55  ;;  %v3397_v57 = vsub.s32 4, %v12652_v16 }
 0x479   :  { %v398_v15 = vsel %vm387_vm13, nan, %v12702_v47  ;;  %vm3939_vm2 = vweird.f32 %v14993_v59  ;;  %v3945_v11 = vsel %vm3943_vm0, %v14992_v25, %v3944_v42  ;;  %v5046_v10 = vmul.u32 %v12704_v4, %v5030_v17  ;;  %v14995_v4 = vld [vmem:[#allocation36_spill] sm:$0xff]  ;;  %v15005_v59 = vld [vmem:[#allocation62_spill] sm:$0xff] }
 0x47a   :  { %vm5048_vm14 = vc.u32 %v12746_v40, %v12749_v48  ;;  %v5049_v27 = vadd.s32 1, %v12750_v61  ;;  %v3948_v23 = vsel %vm3946_vm9, %v3947_v19, %v14991_v43  ;;  %v3391_v45 = vand.u32 2147483647, %v3390_v35  ;;  %v15002_v43 = vld [vmem:[#allocation30_spill] sm:$0xff]  ;;  %v15003_v25 = vld [vmem:[#allocation64_spill] sm:$0xff] }
 0x47b   :  { %v3624_v51 = vmul.f32 %v2166_v39, %v398_v15  ;;  %v3949_v47 = vsel %vm3942_vm11, %v3945_v11, %v3948_v23  ;;  %v12776_v38 = vadd.f32 %v14891_v49, %v169_v18  ;;  %v3393_v60 = vcvt.s32.f32 %v3386_v22  ;;  %v15004_v15 = vld [vmem:[#allocation55_spill] sm:$0xff] }
 0x47c   :  { %v5050_v52 = vsel %vm5048_vm14, %v5049_v27, %v12750_v61  ;;  %v3950_v58 = vsel %vm3939_vm2, nan, %v3949_v47  ;;  %v600_v32 = vxor.u32 2147483648, %v14995_v4  ;;  %v603_v33 = vxor.u32 2147483648, %v14997_v9 }
 0x47d   :  { %14994 = vst [vmem:[#allocation23_spill] sm:$0xff] %v12776_v38  ;;  %v5051_v37 = vadd.s32 %v5050_v52, %v5046_v10  ;;  %v12780_v1 = vmul.f32 %v3950_v58, %v3624_v51  ;;  %v14610_v29 = vand.u32 2147483647, %v12776_v38  ;;  %7709 = vcosq.f32 %v12692_v7  ;;  %v15007_v58 = vld [vmem:[#allocation93_spill] sm:$0xff] }
 0x47e   :  { %v12786_v31 = vand.u32 3, %v12687_v63  ;;  %v14999_v49 = vand.u32 2147483647, %v12451_v44  ;;  %v1650_v24 = vand.u32 2139095040, %v12776_v38  ;;  %7711 = vsinq.f32 %v12692_v7 }
 0x47f   :  { %14996 = vst [vmem:[#allocation67_spill] sm:$0xff] %v12780_v1  ;;  %v3394_v61 = vmul.f32 %v3393_v60, %v3391_v45  ;;  %v12799_v35 = vsel %vm3313_vm1, %v3397_v57, %v12652_v16  ;;  %v5052_v17 = vadd.s32 536870912, %v5051_v37  ;;  %5874 = vrot.lane.b32.xlu1 %v12780_v1, %s7750_s1  ;;  %7223 = vmatmul.mubr.msk.f32.vlgmr.msra.gmra.mxu1 %vm5662_vm10, %v12780_v1  ;;  %vm599_vm12 = vcmp.eq.s32.totalorder %v15002_v43, 0  ;;  %v15006_v60 = vld [vmem:[#allocation32_spill] sm:$0xff] }
 0x480   :  { %14998 = vst [vmem:[#allocation70_spill] sm:$0xff] %v12786_v31  ;;  %vm12790_vm15 = vcmp.le.f32.partialorder %v14999_v49, 0.7853982  ;;  %v12809_v63 = vsel %vm12629_vm8, %v12291_v14, %v12698_v21  ;;  %v1651_v7 = vshrl.u32 %v1650_v24, 23  ;;  %7225 = vmatprep.mubr.msk.f32.mxu1 %vm5662_vm10, %v12654_v50  ;;  %vm602_vm7 = vcmp.eq.s32.totalorder %v15002_v43, 2 }
 0x481   :  { %v12815_v16 = vshrl.u32 %v5052_v17, 30  ;;  %v1654_v42 = vand.u32 8388607, %v14610_v29  ;;  %v601_v22 = vsel %vm599_vm12, %v14997_v9, %v600_v32  ;;  %v604_v39 = vsel %vm602_vm7, %v603_v33, %v14995_v4  ;;  %v15008_v33 = vld [vmem:[#allocation11_spill] sm:$0xff] }
 0x482   :  { %v6873_v21 = vadd.s32 4294967169, %v1651_v7  ;;  %vm598_vm8 = vcmp.lt.s32.totalorder %v15002_v43, 2  ;;  %v2368_v19 = vxor.u32 2147483648, %v15003_v25  ;;  %v3395_v18 = vxor.u32 2147483648, %v3394_v61 }
 0x483   :  { %v5054_v57 = vshll.u32 %v12815_v16, 30  ;;  %vm2367_vm6 = vcmp.eq.s32.totalorder %v15004_v15, 0  ;;  %v2371_v11 = vxor.u32 2147483648, %v15005_v59  ;;  %v605_v27 = vsel %vm598_vm8, %v601_v22, %v604_v39  ;;  %v15009_v39 = vld [vmem:[#allocation88_spill] sm:$0xff] }
 0x484   :  { %v1657_v10 = vadd.s32 1, %v6873_v21  ;;  %v2369_v23 = vsel %vm2367_vm6, %v15005_v59, %v2368_v19  ;;  %vm2370_vm3 = vcmp.eq.s32.totalorder %v15004_v15, 2  ;;  %v1655_v51 = vor.u32 8388608, %v1654_v42 }
 0x485   :  { %v12831_v45 = vsub.s32 %v5051_v37, %v5054_v57  ;;  %vm2366_vm13 = vcmp.lt.s32.totalorder %v15004_v15, 2  ;;  %v2372_v47 = vsel %vm2370_vm3, %v2371_v11, %v15003_v25  ;;  %vm2363_vm4 = vweird.f32 %v15006_v60 }
 0x486   :  { %vm1658_vm11 = vcmp.gt.s32.totalorder %v1657_v10, 0  ;;  %v2373_v52 = vsel %vm2366_vm13, %v2369_v23, %v2372_v47  ;;  %v4152_v4 = vxor.u32 2147483648, %v15007_v58  ;;  %vm595_vm5 = vweird.f32 %v15008_v33 }
 0x487   :  { %v5057_v32 = vsub.s32 0, %v12831_v45  ;;  %v1659_v9 = vsel %vm1658_vm11, %v1657_v10, 0  ;;  %v2374_v49 = vsel %vm2363_vm4, nan, %v2373_v52  ;;  %v12841_v37 = vsel %vm3313_vm1, %v3395_v18, %v3394_v61  ;;  %v15010_v61 = vld [vmem:[#allocation92_spill] sm:$0xff] }
 0x488   :  { %v5047_v24 = vadd.s32 %v12749_v48, %v12746_v40  ;;  %v1661_v17 = vand.u32 31, %v1659_v9  ;;  %v606_v7 = vsel %vm595_vm5, nan, %v605_v27  ;;  %v12847_v22 = vshll.u32 %v1655_v51, 8 }
 0x489   :  { %v6994_v43 = vmin.u32 %v5057_v32, %v12831_v45  ;;  %vm4151_vm0 = vcmp.eq.s32.totalorder %v15009_v39, 0  ;;  %v12850_v21 = vshrl.u32 %v1659_v9, 5  ;;  %v12852_v19 = vmul.f32 %v2374_v49, %v606_v7  ;;  %v15011_v49 = vld [vmem:[#allocation63_spill] sm:$0xff] }
 0x48a   :  { %v1662_v25 = vsub.s32 32, %v1661_v17  ;;  %v4153_v18 = vsel %vm4151_vm0, %v15010_v61, %v4152_v4  ;;  %v12855_v57 = vpop.eup %7709  ;;  %v1664_v48 = vshll.u32 %v14655_v56, %v1661_v17  ;;  %v1667_v15 = vshll.u32 %v14646_v46, %v1661_v17 }
 0x48b   :  { %v5059_v40 = vclz %v6994_v43  ;;  %v1670_v59 = vshll.u32 %v14647_v34, %v1661_v17  ;;  %vm4154_vm1 = vcmp.eq.s32.totalorder %v15009_v39, 2  ;;  %v12861_v11 = vpop.eup %7711  ;;  %v1673_v51 = vshll.u32 %v14644_v3, %v1661_v17 }
 0x48c   :  { %v1665_v10 = vshrl.u32 %v14646_v46, %v1662_v25  ;;  %v1668_v27 = vshrl.u32 %v14647_v34, %v1662_v25  ;;  %v1671_v23 = vshrl.u32 %v14644_v3, %v1662_v25  ;;  %v1674_v60 = vshrl.u32 %v14643_v62, %v1662_v25 }
 0x48d   :  { %v6995_v47 = vadd.s32 4294967294, %v5059_v40  ;;  %v1676_v52 = vshll.u32 %v14643_v62, %v1661_v17  ;;  %v1677_v4 = vshrl.u32 %v14645_v13, %v1662_v25  ;;  %vm4150_vm9 = vcmp.lt.s32.totalorder %v15009_v39, 2 }
 0x48e   :  { %v1666_v32 = vor.u32 %v1665_v10, %v1664_v48  ;;  %v1669_v9 = vor.u32 %v1668_v27, %v1667_v15  ;;  %v1672_v33 = vor.u32 %v1671_v23, %v1670_v59  ;;  %vm4147_vm2 = vweird.f32 %v15011_v49 }
 0x48f   :  { %v4155_v7 = vxor.u32 2147483648, %v15010_v61  ;;  %vm6996_vm14 = vcmp.lt.s32.totalorder %v6995_v47, 0  ;;  %v1675_v43 = vor.u32 %v1674_v60, %v1673_v51  ;;  %v1678_v29 = vor.u32 %v1677_v4, %v1676_v52 }
 0x490   :  { %vm1679_vm12 = vcmp.lt.s32.totalorder %v12850_v21, 1  ;;  %vm4993_vm7 = vcmp.lt.s32.totalorder %v12644_v53, 0  ;;  %v5062_v40 = vsel %vm6996_vm14, 0, %v6995_v47  ;;  %v1663_v17 = vshrl.u32 %v14655_v56, %v1662_v25  ;;  %v1913_v47 = vpop.permute.xlu1 %1912 }
 0x491   :  { %vm1680_vm8 = vcmp.lt.s32.totalorder %v12850_v21, 2  ;;  %vm1682_vm6 = vcmp.lt.s32.totalorder %v12850_v21, 4  ;;  %v5063_v48 = vsub.s32 32, %v5062_v40  ;;  %v5067_v15 = vsub.s32 4294967266, %v5062_v40 }
 0x492   :  { %v1684_v59 = vsel %vm1682_vm6, %v1672_v33, 2102212464  ;;  %v1687_v10 = vsel %vm1679_vm12, %v1666_v32, %v1669_v9  ;;  %vm1681_vm3 = vcmp.lt.s32.totalorder %v12850_v21, 3  ;;  %v1688_v61 = vsel %vm1682_vm6, %v1675_v43, 920167782 }
 0x493   :  { %v1691_v27 = vsel %vm1679_vm12, %v1669_v9, %v1672_v33  ;;  %v1692_v23 = vsel %vm1682_vm6, %v1678_v29, 1326507024  ;;  %v5068_v51 = vadd.s32 127, %v5067_v15  ;;  %v1683_v60 = vsel %vm1679_vm12, %v1663_v17, %v1666_v32 }
 0x494   :  { %v1689_v52 = vsel %vm1681_vm3, %v1672_v33, %v1688_v61  ;;  %v1693_v4 = vsel %vm1681_vm3, %v1675_v43, %v1692_v23  ;;  %v1685_v42 = vsel %vm1681_vm3, %v1669_v9, %v1684_v59  ;;  %v4156_v50 = vsel %vm4154_vm1, %v4155_v7, %v15007_v58  ;;  %v15019_v59 = vld [vmem:[#allocation41_spill] sm:$0xff]  ;;  %v15039_v7 = vld [vmem:[#allocation75_spill] sm:$0xff] }
 0x495   :  { %v1690_v25 = vsel %vm1680_vm8, %v1687_v10, %v1689_v52  ;;  %v1694_v6 = vsel %vm1680_vm8, %v1691_v27, %v1693_v4  ;;  %v5065_v1 = vshrl.u32 %v5047_v24, %v5063_v48  ;;  %v5069_v31 = vshll.u32 %v5068_v51, 23  ;;  %v15020_v4 = vld [vmem:[#allocation39_spill] sm:$0xff] }
 0x496   :  { %v12887_v29 = vmul.u32.u64.low %v12847_v22, %v1694_v6  ;;  %v12888_v15 = vmul.u32.u64.high %v12847_v22, %v1694_v6, %v12887_v29  ;;  %v12891_v32 = vmul.u32.u64.low %v12847_v22, %v1690_v25  ;;  %v12892_v33 = vmul.u32.u64.high %v12847_v22, %v1690_v25, %v12891_v32 }
 0x497   :  { %v4157_v9 = vsel %vm4150_vm9, %v4153_v18, %v4156_v50  ;;  %v1937_v43 = vmul.f32 %v14809_v20, %v1913_v47  ;;  %v15012_v17 = vsel %vm12790_vm15, 0, %v12799_v35  ;;  %v15013_v24 = vand.u32 2147483647, %v12644_v53 }
 0x498   :  { %v3404_v58 = vadd.s32 3, %v15012_v17  ;;  %v5064_v6 = vshll.u32 %v12831_v45, %v5062_v40  ;;  %v4158_v48 = vsel %vm4147_vm2, nan, %v4157_v9  ;;  %v5070_v39 = vor.u32 4788187, %v5069_v31  ;;  %v15021_v17 = vld [vmem:[#allocation98_spill] sm:$0xff] }
 0x499   :  { %vm12903_vm13 = vcmp.le.f32.partialorder %v15013_v24, 0.7853982  ;;  %v1686_v50 = vsel %vm1680_vm8, %v1683_v60, %v1685_v42  ;;  %v12913_v18 = vmul.f32 %v4158_v48, %v12852_v19  ;;  %v12916_v35 = vadd.f32 %v14812_v30, %v1937_v43  ;;  %v15022_v48 = vld [vmem:[#allocation94_spill] sm:$0xff] }
 0x49a   :  { %7713 = vcosq.f32 %v12809_v63  ;;  %v3399_v45 = vsel %vm12790_vm15, %v12451_v44, %v12841_v37  ;;  %v15017_v49 = vsub.s32 4, %v12815_v16  ;;  %vm1704_vm11 = vc.u32 %v12888_v15, %v12891_v32 }
 0x49b   :  { %15016 = vst [vmem:[#allocation12_spill] sm:$0xff] %v12913_v18  ;;  %v5066_v42 = vor.u32 %v5065_v1, %v5064_v6  ;;  %v1705_v21 = vadd.s32 1, %v12892_v33  ;;  %5878 = vrot.lane.b32.xlu1 %v12913_v18, %s7750_s1  ;;  %7226 = vmatmul.mubr.msk.f32.gmra.mxu1 %vm5662_vm10, %v12913_v18  ;;  %v14616_v55 = vand.u32 2147483647, %v12916_v35  ;;  %v3418_v37 = vand.u32 2139095040, %v12916_v35 }
 0x49c   :  { %v5078_v31 = vsel %vm4993_vm7, %v15017_v49, %v12815_v16  ;;  %7715 = vsinq.f32 %v12809_v63  ;;  %v1702_v19 = vmul.u32 %v12847_v22, %v1686_v50  ;;  %v15018_v16 = vld [vmem:[#allocation42_spill] sm:$0xff]  ;;  %v811_v1 = vxor.u32 2147483648, %v15019_v59 }
 0x49d   :  { %v808_v40 = vxor.u32 2147483648, %v15018_v16  ;;  %v12940_v10 = vand.u32 3, %v3404_v58  ;;  %v5071_v61 = vand.u32 2147483647, %v5070_v39  ;;  %v1706_v27 = vsel %vm1704_vm11, %v1705_v21, %v12892_v33 }
 0x49e   :  { %v3419_v23 = vshrl.u32 %v3418_v37, 23  ;;  %7717 = vcosq.f32 %v3399_v45  ;;  %v5080_v51 = vsel %vm12903_vm13, 0, %v5078_v31  ;;  %v1707_v60 = vadd.s32 %v1706_v27, %v1702_v19 }
 0x49f   :  { %v3422_v63 = vand.u32 8388607, %v14616_v55  ;;  %v5073_v52 = vcvt.s32.f32 %v5066_v42  ;;  %vm807_vm15 = vcmp.eq.s32.totalorder %v15020_v4, 0  ;;  %vm810_vm4 = vcmp.eq.s32.totalorder %v15020_v4, 2 }
 0x4a0   :  { %v6937_v22 = vadd.s32 4294967169, %v3419_v23  ;;  %7719 = vsinq.f32 %v3399_v45  ;;  %v1708_v47 = vadd.s32 536870912, %v1707_v60  ;;  %v809_v25 = vsel %vm807_vm15, %v15019_v59, %v808_v40  ;;  %v15023_v45 = vld [vmem:[#allocation4_spill] sm:$0xff] }
 0x4a1   :  { %v812_v29 = vsel %vm810_vm4, %v811_v1, %v15018_v16  ;;  %v12951_v33 = vmul.f32 %v5073_v52, %v5071_v61  ;;  %v12953_v9 = vadd.s32 3, %v5080_v51  ;;  %v2576_v58 = vxor.u32 2147483648, %v15021_v17  ;;  %v15024_v40 = vld [vmem:[#allocation16_spill] sm:$0xff] }
 0x4a2   :  { %v3425_v43 = vadd.s32 1, %v6937_v22  ;;  %v12956_v24 = vshrl.u32 %v1708_v47, 30  ;;  %v3423_v6 = vor.u32 8388608, %v3422_v63  ;;  %vm806_vm5 = vcmp.lt.s32.totalorder %v15020_v4, 2  ;;  %v15026_v52 = vld [vmem:[#allocation68_spill] sm:$0xff] }
 0x4a3   :  { %v2579_v39 = vxor.u32 2147483648, %v15022_v48  ;;  %v813_v50 = vsel %vm806_vm5, %v809_v25, %v812_v29  ;;  %vm2575_vm1 = vcmp.eq.s32.totalorder %v15023_v45, 0  ;;  %vm2578_vm9 = vcmp.eq.s32.totalorder %v15023_v45, 2 }
 0x4a4   :  { %vm3426_vm0 = vcmp.gt.s32.totalorder %v3425_v43, 0  ;;  %v1710_v49 = vshll.u32 %v12956_v24, 30  ;;  %v2577_v42 = vsel %vm2575_vm1, %v15022_v48, %v2576_v58  ;;  %v12967_v19 = vadd.s32 %v12891_v32, %v12888_v15 }
 0x4a5   :  { %v3427_v31 = vsel %vm3426_vm0, %v3425_v43, 0  ;;  %v2580_v21 = vsel %vm2578_vm9, %v2579_v39, %v15021_v17  ;;  %vm803_vm2 = vweird.f32 %v15024_v40  ;;  %v12972_v1 = vshll.u32 %v3423_v6, 8 }
 0x4a6   :  { %v3429_v16 = vand.u32 31, %v3427_v31  ;;  %v12970_v59 = vsub.s32 %v1707_v60, %v1710_v49  ;;  %v12974_v61 = vsel %vm803_vm2, nan, %v813_v50  ;;  %vm2574_vm14 = vcmp.lt.s32.totalorder %v15023_v45, 2 }
 0x4a7   :  { %v12977_v27 = vpop.eup %7713  ;;  %v3428_v51 = vshrl.u32 %v3427_v31, 5  ;;  %vm2571_vm12 = vweird.f32 %v15026_v52  ;;  %v2581_v15 = vsel %vm2574_vm14, %v2577_v42, %v2580_v21  ;;  %vm1649_vm3 = vcmp.lt.s32.totalorder %v12776_v38, 0 }
 0x4a8   :  { %15025 = vst [vmem:[#allocation22_spill] sm:$0xff] %v12977_v27  ;;  %v3430_v63 = vsub.s32 32, %v3429_v16  ;;  %v1713_v32 = vsub.s32 0, %v12970_v59  ;;  %v3432_v60 = vshll.u32 %v14655_v56, %v3429_v16  ;;  %v3435_v22 = vshll.u32 %v14646_v46, %v3429_v16 }
 0x4a9   :  { %v3438_v4 = vshll.u32 %v14647_v34, %v3429_v16  ;;  %v12985_v47 = vpop.eup %7715  ;;  %v3441_v17 = vshll.u32 %v14644_v3, %v3429_v16  ;;  %v3444_v39 = vshll.u32 %v14643_v62, %v3429_v16  ;;  %vm3447_vm8 = vcmp.lt.s32.totalorder %v3428_v51, 1 }
 0x4aa   :  { %v3433_v25 = vshrl.u32 %v14646_v46, %v3430_v63  ;;  %v3436_v29 = vshrl.u32 %v14647_v34, %v3430_v63  ;;  %v3439_v43 = vshrl.u32 %v14644_v3, %v3430_v63  ;;  %v6874_v58 = vmin.u32 %v1713_v32, %v12970_v59 }
 0x4ab   :  { %v3431_v6 = vshrl.u32 %v14655_v56, %v3430_v63  ;;  %v3442_v48 = vshrl.u32 %v14643_v62, %v3430_v63  ;;  %v12995_v50 = vpop.eup %7717  ;;  %v3445_v42 = vshrl.u32 %v14645_v13, %v3430_v63  ;;  %vm3448_vm6 = vcmp.lt.s32.totalorder %v3428_v51, 2 }
 0x4ac   :  { %v3434_v45 = vor.u32 %v3433_v25, %v3432_v60  ;;  %v3437_v49 = vor.u32 %v3436_v29, %v3435_v22  ;;  %v3440_v31 = vor.u32 %v3439_v43, %v3438_v4  ;;  %v1715_v21 = vclz %v6874_v58  ;;  %v15027_v22 = vld [vmem:[#allocation95_spill] sm:$0xff]  ;;  %v15028_v43 = vld [vmem:[#allocation73_spill] sm:$0xff] }
 0x4ad   :  { %v3443_v40 = vor.u32 %v3442_v48, %v3441_v17  ;;  %v12998_v55 = vpop.eup %7719  ;;  %v3446_v32 = vor.u32 %v3445_v42, %v3444_v39  ;;  %vm3449_vm11 = vcmp.lt.s32.totalorder %v3428_v51, 3  ;;  %vm3450_vm15 = vcmp.lt.s32.totalorder %v3428_v51, 4 }
 0x4ae   :  { %v3451_v37 = vsel %vm3447_vm8, %v3431_v6, %v3434_v45  ;;  %v6875_v16 = vadd.s32 4294967294, %v1715_v21  ;;  %v3452_v23 = vsel %vm3450_vm15, %v3440_v31, 2102212464  ;;  %v3455_v18 = vsel %vm3447_vm8, %v3434_v45, %v3437_v49 }
 0x4af   :  { %v3456_v60 = vsel %vm3450_vm15, %v3443_v40, 920167782  ;;  %vm4358_vm4 = vcmp.lt.s32.totalorder %v15027_v22, 2  ;;  %v3453_v63 = vsel %vm3449_vm11, %v3437_v49, %v3452_v23  ;;  %v3459_v25 = vsel %vm3447_vm8, %v3437_v49, %v3440_v31 }
 0x4b0   :  { %v3457_v4 = vsel %vm3449_vm11, %v3440_v31, %v3456_v60  ;;  %v3460_v29 = vsel %vm3450_vm15, %v3446_v32, 1326507024  ;;  %vm4355_vm5 = vweird.f32 %v15028_v43  ;;  %v15029_v17 = vand.u32 2147483647, %v12776_v38 }
 0x4b1   :  { %vm6876_vm1 = vcmp.lt.s32.totalorder %v6875_v16, 0  ;;  %v3458_v6 = vsel %vm3448_vm6, %v3455_v18, %v3457_v4  ;;  %v3461_v48 = vsel %vm3449_vm11, %v3443_v40, %v3460_v29  ;;  %v2582_v23 = vsel %vm2571_vm12, nan, %v2581_v15  ;;  %v1917_v18 = vpop.permute.xlu1 %1916 }
 0x4b2   :  { %vm13007_vm0 = vcmp.le.f32.partialorder %v15029_v17, 0.7853982  ;;  %v1718_v39 = vsel %vm6876_vm1, 0, %v6875_v16  ;;  %v3462_v45 = vsel %vm3448_vm6, %v3459_v25, %v3461_v48  ;;  %v3454_v32 = vsel %vm3448_vm6, %v3451_v37, %v3453_v63  ;;  %v15032_v16 = vld [vmem:[#allocation100_spill] sm:$0xff]  ;;  %v15033_v17 = vld [vmem:[#allocation99_spill] sm:$0xff] }
 0x4b3   :  { %v13017_v49 = vmul.u32.u64.low %v12972_v1, %v3458_v6  ;;  %v13018_v31 = vmul.u32.u64.high %v12972_v1, %v3458_v6, %v13017_v49  ;;  %v1719_v42 = vsub.s32 32, %v1718_v39  ;;  %v1723_v21 = vsub.s32 4294967266, %v1718_v39 }
 0x4b4   :  { %vm4359_vm9 = vcmp.eq.s32.totalorder %v15027_v22, 0  ;;  %v1720_v40 = vshll.u32 %v12970_v59, %v1718_v39  ;;  %v13025_v52 = vmul.u32.u64.low %v12972_v1, %v3462_v45  ;;  %v13026_v15 = vmul.u32.u64.high %v12972_v1, %v3462_v45, %v13025_v52 }
 0x4b5   :  { %v4360_v60 = vxor.u32 2147483648, %v15032_v16  ;;  %v1721_v4 = vshrl.u32 %v12967_v19, %v1719_v42  ;;  %v1724_v25 = vadd.s32 127, %v1723_v21  ;;  %v3628_v29 = vmul.f32 %v2582_v23, %v12974_v61 }
 0x4b6   :  { %v4363_v6 = vxor.u32 2147483648, %v15033_v17  ;;  %v3473_v37 = vadd.s32 1, %v13018_v31  ;;  %vm4362_vm2 = vcmp.eq.s32.totalorder %v15027_v22, 2  ;;  %v1938_v59 = vmul.f32 %v14809_v20, %v1917_v18 }
 0x4b7   :  { %v4361_v51 = vsel %vm4359_vm9, %v15033_v17, %v4360_v60  ;;  %v1722_v63 = vor.u32 %v1721_v4, %v1720_v40  ;;  %v1725_v48 = vshll.u32 %v1724_v25, 23  ;;  %v15034_v39 = vsub.s32 4, %v12956_v24  ;;  %v15036_v4 = vld [vmem:[#allocation83_spill] sm:$0xff] }
 0x4b8   :  { %v4364_v61 = vsel %vm4362_vm2, %v4363_v6, %v15032_v16  ;;  %v3470_v23 = vmul.u32 %v12972_v1, %v3454_v32  ;;  %vm3472_vm14 = vc.u32 %v13026_v15, %v13017_v49  ;;  %v13048_v20 = vadd.f32 %v14812_v30, %v1938_v59 }
 0x4b9   :  { %v1734_v19 = vsel %vm1649_vm3, %v15034_v39, %v12956_v24  ;;  %v4365_v45 = vsel %vm4358_vm4, %v4361_v51, %v4364_v61  ;;  %v15035_v42 = vxor.u32 2147483648, %v12951_v33  ;;  %v1726_v24 = vor.u32 4788187, %v1725_v48 }
 0x4ba   :  { %v3474_v18 = vsel %vm3472_vm14, %v3473_v37, %v13018_v31  ;;  %v4366_v1 = vsel %vm4355_vm5, nan, %v4365_v45  ;;  %v1736_v32 = vsel %vm13007_vm0, 0, %v1734_v19  ;;  %v14619_v30 = vand.u32 2147483647, %v13048_v20  ;;  %v15038_v37 = vld [vmem:[#allocation81_spill] sm:$0xff] }
 0x4bb   :  { %v5076_v21 = vsel %vm4993_vm7, %v15035_v42, %v12951_v33  ;;  %v3475_v22 = vadd.s32 %v3474_v18, %v3470_v23  ;;  %v13060_v40 = vmul.f32 %v4366_v1, %v3628_v29  ;;  %v1727_v52 = vand.u32 2147483647, %v1726_v24 }
 0x4bc   :  { %v1729_v16 = vcvt.s32.f32 %v1722_v63  ;;  %v3522_v60 = vand.u32 2139095040, %v13048_v20  ;;  %v704_v33 = vxor.u32 2147483648, %v15036_v4  ;;  %v5079_v31 = vsel %vm12903_vm13, %v12644_v53, %v5076_v21 }
 0x4bd   :  { %v13069_v43 = vand.u32 3, %v12953_v9  ;;  %vm3417_vm7 = vcmp.lt.s32.totalorder %v12916_v35, 0  ;;  %v3476_v25 = vadd.s32 536870912, %v3475_v22  ;;  %5882 = vrot.lane.b32.xlu1 %v13060_v40, %s7750_s1  ;;  %v3526_v6 = vand.u32 8388607, %v14619_v30 }
 0x4be   :  { %v1730_v29 = vmul.f32 %v1729_v16, %v1727_v52  ;;  %v3523_v17 = vshrl.u32 %v3522_v60, 23  ;;  %v707_v51 = vxor.u32 2147483648, %v15038_v37  ;;  %v1740_v59 = vadd.s32 3, %v1736_v32 }
 0x4bf   :  { %15037 = vst [vmem:[#allocation19_spill] sm:$0xff] %v13069_v43  ;;  %v3477_v63 = vshrl.u32 %v3476_v25, 30  ;;  %vm703_vm13 = vcmp.eq.s32.totalorder %v15039_v7, 0  ;;  %vm706_vm12 = vcmp.eq.s32.totalorder %v15039_v7, 2  ;;  %7721 = vcosq.f32 %v5079_v31 }
 0x4c0   :  { %v1731_v9 = vxor.u32 2147483648, %v1730_v29  ;;  %v6941_v48 = vadd.s32 4294967169, %v3523_v17  ;;  %v705_v39 = vsel %vm703_vm13, %v15038_v37, %v704_v33  ;;  %v708_v19 = vsel %vm706_vm12, %v707_v51, %v15036_v4  ;;  %v15044_v4 = vld [vmem:[#allocation91_spill] sm:$0xff] }
 0x4c1   :  { %v15040_v61 = vand.u32 2147483647, %v12916_v35  ;;  %v3478_v45 = vshll.u32 %v3477_v63, 30  ;;  %v3501_v42 = vsub.s32 4, %v3477_v63  ;;  %v3527_v24 = vor.u32 8388608, %v3526_v6  ;;  %v15046_v37 = vld [vmem:[#allocation87_spill] sm:$0xff] }
 0x4c2   :  { %v1732_v21 = vsel %vm1649_vm3, %v1731_v9, %v1730_v29  ;;  %v3529_v18 = vadd.s32 1, %v6941_v48  ;;  %vm702_vm6 = vcmp.lt.s32.totalorder %v15039_v7, 2  ;;  %7723 = vsinq.f32 %v5079_v31  ;;  %v15045_v29 = vld [vmem:[#allocation54_spill] sm:$0xff] }
 0x4c3   :  { %vm13083_vm8 = vcmp.le.f32.partialorder %v15040_v61, 0.7853982  ;;  %v13090_v1 = vand.u32 3, %v1740_v59  ;;  %v13092_v32 = vsub.s32 %v3475_v22, %v3478_v45  ;;  %v709_v52 = vsel %vm702_vm6, %v705_v39, %v708_v19  ;;  %v15047_v7 = vld [vmem:[#allocation90_spill] sm:$0xff] }
 0x4c4   :  { %v13097_v16 = vsel %vm13007_vm0, %v12776_v38, %v1732_v21  ;;  %v13101_v60 = vsel %vm3417_vm7, %v3501_v42, %v3477_v63  ;;  %vm3530_vm3 = vcmp.gt.s32.totalorder %v3529_v18, 0  ;;  %v2472_v33 = vxor.u32 2147483648, %v15044_v4  ;;  %v15048_v38 = vld [vmem:[#allocation60_spill] sm:$0xff] }
 0x4c5   :  { %15043 = vst [vmem:[#allocation15_spill] sm:$0xff] %v13090_v1  ;;  %v3471_v31 = vadd.s32 %v13017_v49, %v13026_v15  ;;  %v3481_v25 = vsub.s32 0, %v13092_v32  ;;  %v3531_v22 = vsel %vm3530_vm3, %v3529_v18, 0  ;;  %vm699_vm11 = vweird.f32 %v15045_v29 }
 0x4c6   :  { %v3533_v17 = vand.u32 31, %v3531_v22  ;;  %v13108_v6 = vshll.u32 %v3527_v24, 8  ;;  %v13110_v58 = vsel %vm699_vm11, nan, %v709_v52  ;;  %vm2471_vm15 = vcmp.eq.s32.totalorder %v15046_v37, 0 }
 0x4c7   :  { %7725 = vcosq.f32 %v13097_v16  ;;  %v6938_v51 = vmin.u32 %v3481_v25, %v13092_v32  ;;  %v3532_v15 = vshrl.u32 %v3531_v22, 5  ;;  %v2473_v9 = vsel %vm2471_vm15, %v15047_v7, %v2472_v33 }
 0x4c8   :  { %v3534_v59 = vsub.s32 32, %v3533_v17  ;;  %v3536_v63 = vshll.u32 %v14655_v56, %v3533_v17  ;;  %v2475_v48 = vxor.u32 2147483648, %v15047_v7  ;;  %v3539_v19 = vshll.u32 %v14646_v46, %v3533_v17 }
 0x4c9   :  { %v3483_v39 = vclz %v6938_v51  ;;  %v3542_v61 = vshll.u32 %v14647_v34, %v3533_v17  ;;  %v3545_v45 = vshll.u32 %v14644_v3, %v3533_v17  ;;  %vm2474_vm4 = vcmp.eq.s32.totalorder %v15046_v37, 2 }
 0x4ca   :  { %v3537_v42 = vshrl.u32 %v14646_v46, %v3534_v59  ;;  %v3540_v21 = vshrl.u32 %v14647_v34, %v3534_v59  ;;  %v3543_v24 = vshrl.u32 %v14644_v3, %v3534_v59  ;;  %v3548_v18 = vshll.u32 %v14643_v62, %v3533_v17 }
 0x4cb   :  { %v6939_v52 = vadd.s32 4294967294, %v3483_v39  ;;  %v3546_v33 = vshrl.u32 %v14643_v62, %v3534_v59  ;;  %v3549_v25 = vshrl.u32 %v14645_v13, %v3534_v59  ;;  %vm3551_vm5 = vcmp.lt.s32.totalorder %v3532_v15, 1 }
 0x4cc   :  { %vm2470_vm0 = vcmp.lt.s32.totalorder %v15046_v37, 2  ;;  %v3535_v22 = vshrl.u32 %v14655_v56, %v3534_v59  ;;  %v3538_v29 = vor.u32 %v3537_v42, %v3536_v63  ;;  %v3541_v51 = vor.u32 %v3540_v21, %v3539_v19  ;;  %v13134_v17 = vpop.eup %7721 }
 0x4cd   :  { %v3544_v7 = vor.u32 %v3543_v24, %v3542_v61  ;;  %vm6940_vm1 = vcmp.lt.s32.totalorder %v6939_v52, 0  ;;  %v3547_v49 = vor.u32 %v3546_v33, %v3545_v45  ;;  %v3550_v30 = vor.u32 %v3549_v25, %v3548_v18 }
 0x4ce   :  { %vm3552_vm9 = vcmp.lt.s32.totalorder %v3532_v15, 2  ;;  %vm2467_vm2 = vweird.f32 %v15048_v38  ;;  %v3486_v39 = vsel %vm6940_vm1, 0, %v6939_v52  ;;  %vm3553_vm14 = vcmp.lt.s32.totalorder %v3532_v15, 3 }
 0x4cf   :  { %vm3554_vm13 = vcmp.lt.s32.totalorder %v3532_v15, 4  ;;  %v3555_v1 = vsel %vm3551_vm5, %v3535_v22, %v3538_v29  ;;  %v3487_v43 = vsub.s32 32, %v3486_v39  ;;  %v3491_v53 = vsub.s32 4294967266, %v3486_v39  ;;  %v13138_v63 = vpop.eup %7723 }
 0x4d0   :  { %v3556_v27 = vsel %vm3554_vm13, %v3544_v7, 2102212464  ;;  %v3559_v59 = vsel %vm3551_vm5, %v3538_v29, %v3541_v51  ;;  %v3488_v19 = vshll.u32 %v13092_v32, %v3486_v39  ;;  %v3560_v61 = vsel %vm3554_vm13, %v3547_v49, 920167782 }
 0x4d1   :  { %v3563_v45 = vsel %vm3551_vm5, %v3541_v51, %v3544_v7  ;;  %v3564_v42 = vsel %vm3554_vm13, %v3550_v30, 1326507024  ;;  %v3489_v21 = vshrl.u32 %v3471_v31, %v3487_v43  ;;  %v3492_v24 = vadd.s32 127, %v3491_v53  ;;  %v3697_v53 = vpop.permute.xlu1 %3696 }
 0x4d2   :  { %v3561_v18 = vsel %vm3553_vm14, %v3544_v7, %v3560_v61  ;;  %v3565_v52 = vsel %vm3553_vm14, %v3547_v49, %v3564_v42  ;;  %v3557_v33 = vsel %vm3553_vm14, %v3541_v51, %v3556_v27  ;;  %v2476_v32 = vsel %vm2474_vm4, %v2475_v48, %v15044_v4  ;;  %v15049_v7 = vld [vmem:[#allocation105_spill] sm:$0xff]  ;;  %v15050_v48 = vld [vmem:[#allocation76_spill] sm:$0xff] }
 0x4d3   :  { %v3562_v25 = vsel %vm3552_vm9, %v3559_v59, %v3561_v18  ;;  %v3566_v22 = vsel %vm3552_vm9, %v3563_v45, %v3565_v52  ;;  %v3490_v29 = vor.u32 %v3489_v21, %v3488_v19  ;;  %v3493_v39 = vshll.u32 %v3492_v24, 23  ;;  %v15051_v19 = vld [vmem:[#allocation97_spill] sm:$0xff]  ;;  %v15052_v42 = vld [vmem:[#allocation104_spill] sm:$0xff] }
 0x4d4   :  { %v13151_v30 = vmul.u32.u64.low %v13108_v6, %v3566_v22  ;;  %v13152_v43 = vmul.u32.u64.high %v13108_v6, %v3566_v22, %v13151_v30  ;;  %v13154_v31 = vpop.eup %7725  ;;  %v13157_v49 = vmul.u32.u64.low %v13108_v6, %v3562_v25  ;;  %v13158_v27 = vmul.u32.u64.high %v13108_v6, %v3562_v25, %v13157_v49 }
 0x4d5   :  { %v2477_v51 = vsel %vm2470_vm0, %v2473_v9, %v2476_v32  ;;  %v4256_v59 = vxor.u32 2147483648, %v15049_v7  ;;  %v3494_v61 = vor.u32 4788187, %v3493_v39  ;;  %v3558_v4 = vsel %vm3552_vm9, %v3555_v1, %v3557_v33  ;;  %v15053_v39 = vld [vmem:[#allocation52_spill] sm:$0xff] }
 0x4d6   :  { %vm4251_vm12 = vweird.f32 %v15050_v48  ;;  %vm4255_vm6 = vcmp.eq.s32.totalorder %v15051_v19, 0  ;;  %v2478_v45 = vsel %vm2467_vm2, nan, %v2477_v51  ;;  %v4259_v24 = vxor.u32 2147483648, %v15052_v42 }
 0x4d7   :  { %v4257_v21 = vsel %vm4255_vm6, %v15052_v42, %v4256_v59  ;;  %v3721_v18 = vmul.f32 %v14700_v41, %v3697_v53  ;;  %v3495_v37 = vand.u32 2147483647, %v3494_v61  ;;  %v3497_v9 = vcvt.s32.f32 %v3490_v29 }
 0x4d8   :  { %vm3576_vm3 = vc.u32 %v13152_v43, %v13157_v49  ;;  %vm4258_vm11 = vcmp.eq.s32.totalorder %v15051_v19, 2  ;;  %v3577_v1 = vadd.s32 1, %v13158_v27  ;;  %vm4254_vm15 = vcmp.lt.s32.totalorder %v15051_v19, 2 }
 0x4d9   :  { %v4260_v15 = vsel %vm4258_vm11, %v4259_v24, %v15049_v7  ;;  %v13177_v38 = vadd.f32 %v14882_v26, %v3721_v18  ;;  %v3498_v52 = vmul.f32 %v3497_v9, %v3495_v37  ;;  %v3574_v33 = vmul.u32 %v13108_v6, %v3558_v4  ;;  %v15057_v4 = vld [vmem:[#allocation51_spill] sm:$0xff] }
 0x4da   :  { %v3627_v41 = vmul.f32 %v2478_v45, %v13110_v58  ;;  %v4261_v25 = vsel %vm4254_vm15, %v4257_v21, %v4260_v15  ;;  %v3578_v22 = vsel %vm3576_vm3, %v3577_v1, %v13158_v27  ;;  %v1016_v30 = vxor.u32 2147483648, %v15053_v39  ;;  %v15059_v21 = vld [vmem:[#allocation45_spill] sm:$0xff] }
 0x4db   :  { %v4262_v32 = vsel %vm4251_vm12, nan, %v4261_v25  ;;  %v5199_v29 = vand.u32 2147483647, %v13177_v38  ;;  %v3499_v53 = vxor.u32 2147483648, %v3498_v52  ;;  %v3579_v51 = vadd.s32 %v3578_v22, %v3574_v33 }
 0x4dc   :  { %v13186_v7 = vmul.f32 %v4262_v32, %v3627_v41  ;;  %v5202_v26 = vand.u32 2139095040, %v13177_v38  ;;  %7727 = vsinq.f32 %v13097_v16  ;;  %v15054_v6 = vand.u32 2147483647, %v13048_v20 }
 0x4dd   :  { %vm3521_vm5 = vcmp.lt.s32.totalorder %v13048_v20, 0  ;;  %v5206_v27 = vand.u32 8388607, %v5199_v29  ;;  %v3500_v59 = vsel %vm3417_vm7, %v3499_v53, %v3498_v52  ;;  %v3580_v61 = vadd.s32 536870912, %v3579_v51 }
 0x4de   :  { %vm13192_vm4 = vcmp.le.f32.partialorder %v15054_v6, 0.7853982  ;;  %5880 = vrot.lane.b32.xlu0 %v13186_v7, %s7750_s1  ;;  %7228 = vmatprep.mubr.msk.f32.mxu1 %vm5662_vm10, %v13186_v7  ;;  %v5203_v16 = vshrl.u32 %v5202_v26, 23  ;;  %v1019_v48 = vxor.u32 2147483648, %v15057_v4  ;;  %v3503_v19 = vsel %vm13083_vm8, %v12916_v35, %v3500_v59 }
 0x4df   :  { %v15058_v45 = vsel %vm13083_vm8, 0, %v13101_v60  ;;  %7229 = vmatmul.mubr.msk.f32.gmra.mxu1 %vm5662_vm10, %v13060_v40  ;;  %vm1015_vm7 = vcmp.eq.s32.totalorder %v15059_v21, 0  ;;  %vm1018_vm0 = vcmp.eq.s32.totalorder %v15059_v21, 2  ;;  %v3581_v24 = vshrl.u32 %v3580_v61, 30  ;;  %v15060_v60 = vld [vmem:[#allocation20_spill] sm:$0xff] }
 0x4e0   :  { %v13213_v42 = vadd.s32 3, %v15058_v45  ;;  %v7001_v18 = vadd.s32 4294967169, %v5203_v16  ;;  %v1017_v37 = vsel %vm1015_vm7, %v15057_v4, %v1016_v30  ;;  %v1020_v9 = vsel %vm1018_vm0, %v1019_v48, %v15053_v39 }
 0x4e1   :  { %v13222_v1 = vadd.s32 %v13157_v49, %v13152_v43  ;;  %v5207_v23 = vor.u32 8388608, %v5206_v27  ;;  %vm1011_vm8 = vweird.f32 %v15060_v60  ;;  %vm1014_vm1 = vcmp.lt.s32.totalorder %v15059_v21, 2 }
 0x4e2   :  { %7729 = vcosq.f32 %v3503_v19  ;;  %v3582_v15 = vshll.u32 %v3581_v24, 30  ;;  %v3605_v52 = vsub.s32 4, %v3581_v24  ;;  %v5209_v33 = vadd.s32 1, %v7001_v18 }
 0x4e3   :  { %v1021_v41 = vsel %vm1014_vm1, %v1017_v37, %v1020_v9  ;;  %vm2783_vm9 = vcmp.eq.s32.totalorder %v11577_v28, 0  ;;  %v2784_v25 = vxor.u32 2147483648, %v11749_v8  ;;  %v2787_v22 = vxor.u32 2147483648, %v11731_v2 }
 0x4e4   :  { %v13229_v32 = vsub.s32 %v3579_v51, %v3582_v15  ;;  %v3606_v43 = vsel %vm3521_vm5, %v3605_v52, %v3581_v24  ;;  %vm5210_vm2 = vcmp.gt.s32.totalorder %v5209_v33, 0  ;;  %vm2786_vm14 = vcmp.eq.s32.totalorder %v11577_v28, 2 }
 0x4e5   :  { %v3608_v49 = vsel %vm13192_vm4, 0, %v3606_v43  ;;  %v5211_v39 = vsel %vm5210_vm2, %v5209_v33, 0  ;;  %v2785_v30 = vsel %vm2783_vm9, %v11731_v2, %v2784_v25  ;;  %v2788_v53 = vsel %vm2786_vm14, %v2787_v22, %v11749_v8  ;;  %v15061_v8 = vld [vmem:[#allocation107_spill] sm:$0xff]  ;;  %v15062_v43 = vld [vmem:[#allocation101_spill] sm:$0xff] }
 0x4e6   :  { %7731 = vsinq.f32 %v3503_v19  ;;  %v3585_v26 = vsub.s32 0, %v13229_v32  ;;  %v5213_v6 = vand.u32 31, %v5211_v39  ;;  %vm2782_vm13 = vcmp.lt.s32.totalorder %v11577_v28, 2 }
 0x4e7   :  { %v13240_v51 = vadd.s32 3, %v3608_v49  ;;  %v5212_v27 = vshrl.u32 %v5211_v39, 5  ;;  %v13242_v59 = vshll.u32 %v5207_v23, 8  ;;  %v13246_v61 = vsel %vm1011_vm8, nan, %v1021_v41 }
 0x4e8   :  { %v6942_v16 = vmin.u32 %v3585_v26, %v13229_v32  ;;  %v5214_v2 = vsub.s32 32, %v5213_v6  ;;  %v2789_v4 = vsel %vm2782_vm13, %v2785_v30, %v2788_v53  ;;  %v4568_v48 = vxor.u32 2147483648, %v15061_v8 }
 0x4e9   :  { %v5216_v19 = vshll.u32 %v14655_v56, %v5213_v6  ;;  %v5219_v45 = vshll.u32 %v14646_v46, %v5213_v6  ;;  %v5222_v28 = vshll.u32 %v14647_v34, %v5213_v6  ;;  %v5225_v21 = vshll.u32 %v14644_v3, %v5213_v6  ;;  %v13254_v24 = vpop.eup %7727 }
 0x4ea   :  { %v3587_v18 = vclz %v6942_v16  ;;  %v5217_v37 = vshrl.u32 %v14646_v46, %v5214_v2  ;;  %v5220_v9 = vshrl.u32 %v14647_v34, %v5214_v2  ;;  %v5228_v23 = vshll.u32 %v14643_v62, %v5213_v6 }
 0x4eb   :  { %vm2779_vm12 = vweird.f32 %v11028_v5  ;;  %v5215_v60 = vshrl.u32 %v14655_v56, %v5214_v2  ;;  %v5223_v15 = vshrl.u32 %v14644_v3, %v5214_v2  ;;  %v5226_v52 = vshrl.u32 %v14643_v62, %v5214_v2 }
 0x4ec   :  { %v5229_v33 = vshrl.u32 %v14645_v13, %v5214_v2  ;;  %v6943_v41 = vadd.s32 4294967294, %v3587_v18  ;;  %v5218_v25 = vor.u32 %v5217_v37, %v5216_v19  ;;  %v5221_v22 = vor.u32 %v5220_v9, %v5219_v45 }
 0x4ed   :  { %vm5231_vm6 = vcmp.lt.s32.totalorder %v5212_v27, 1  ;;  %vm4567_vm3 = vcmp.eq.s32.totalorder %v15062_v43, 0  ;;  %v5224_v46 = vor.u32 %v5223_v15, %v5222_v28  ;;  %v5227_v34 = vor.u32 %v5226_v52, %v5225_v21 }
 0x4ee   :  { %v5230_v49 = vor.u32 %v5229_v33, %v5228_v23  ;;  %vm5232_vm11 = vcmp.lt.s32.totalorder %v5212_v27, 2  ;;  %vm6944_vm15 = vcmp.lt.s32.totalorder %v6943_v41, 0  ;;  %vm5233_vm7 = vcmp.lt.s32.totalorder %v5212_v27, 3 }
 0x4ef   :  { %vm5234_vm0 = vcmp.lt.s32.totalorder %v5212_v27, 4  ;;  %v5235_v56 = vsel %vm5231_vm6, %v5215_v60, %v5218_v25  ;;  %v13266_v3 = vpop.eup %7729  ;;  %v3590_v62 = vsel %vm6944_vm15, 0, %v6943_v41  ;;  %v5239_v13 = vsel %vm5231_vm6, %v5218_v25, %v5221_v22 }
 0x4f0   :  { %v5236_v39 = vsel %vm5234_vm0, %v5224_v46, 2102212464  ;;  %v5240_v30 = vsel %vm5234_vm0, %v5227_v34, 920167782  ;;  %v3591_v53 = vsub.s32 32, %v3590_v62  ;;  %v3595_v26 = vsub.s32 4294967266, %v3590_v62 }
 0x4f1   :  { %v5237_v6 = vsel %vm5233_vm7, %v5221_v22, %v5236_v39  ;;  %v5243_v16 = vsel %vm5231_vm6, %v5221_v22, %v5224_v46  ;;  %v3592_v2 = vshll.u32 %v13229_v32, %v3590_v62  ;;  %v5241_v45 = vsel %vm5233_vm7, %v5224_v46, %v5240_v30  ;;  %v15063_v22 = vld [vmem:[#allocation82_spill] sm:$0xff] }
 0x4f2   :  { %v5238_v19 = vsel %vm5232_vm11, %v5235_v56, %v5237_v6  ;;  %v5244_v28 = vsel %vm5234_vm0, %v5230_v49, 1326507024  ;;  %v3593_v21 = vshrl.u32 %v13222_v1, %v3591_v53  ;;  %v3596_v18 = vadd.s32 127, %v3595_v26  ;;  %v15064_v46 = vld [vmem:[#allocation106_spill] sm:$0xff] }
 0x4f3   :  { %v5242_v37 = vsel %vm5232_vm11, %v5239_v13, %v5241_v45  ;;  %v5245_v9 = vsel %vm5233_vm7, %v5227_v34, %v5244_v28  ;;  %v13277_v23 = vpop.eup %7731  ;;  %v2790_v32 = vsel %vm2779_vm12, nan, %v2789_v4  ;;  %vm4563_vm8 = vweird.f32 %v15063_v22  ;;  %v15065_v13 = vld [vmem:[#allocation110_spill] sm:$0xff] }
 0x4f4   :  { %v5246_v60 = vsel %vm5232_vm11, %v5243_v16, %v5245_v9  ;;  %v13281_v15 = vmul.u32.u64.low %v13242_v59, %v5242_v37  ;;  %v13282_v52 = vmul.u32.u64.high %v13242_v59, %v5242_v37, %v13281_v15  ;;  %v3594_v33 = vor.u32 %v3593_v21, %v3592_v2  ;;  %v15066_v6 = vld [vmem:[#allocation102_spill] sm:$0xff]  ;;  %v15069_v21 = vld [vmem:[#allocation120_spill] sm:$0xff] }
 0x4f5   :  { %v3597_v41 = vshll.u32 %v3596_v18, 23  ;;  %v13287_v1 = vmul.u32.u64.low %v13242_v59, %v5246_v60  ;;  %v13288_v25 = vmul.u32.u64.high %v13242_v59, %v5246_v60, %v13287_v1  ;;  %vm4566_vm1 = vcmp.lt.s32.totalorder %v15062_v43, 2  ;;  %v15070_v60 = vld [vmem:[#allocation113_spill] sm:$0xff] }
 0x4f6   :  { %v4569_v27 = vsel %vm4567_vm3, %v15064_v46, %v4568_v48  ;;  %v4571_v34 = vxor.u32 2147483648, %v15064_v46  ;;  %v13297_v5 = vand.u32 3, %v13240_v51  ;;  %v3630_v4 = vmul.f32 %v2790_v32, %v13246_v61  ;;  %v15071_v32 = vld [vmem:[#allocation6_spill] sm:$0xff] }
 0x4f7   :  { %v3598_v49 = vor.u32 4788187, %v3597_v41  ;;  %vm4570_vm9 = vcmp.eq.s32.totalorder %v15062_v43, 2  ;;  %v5254_v56 = vmul.u32 %v13242_v59, %v5238_v19  ;;  %v5257_v62 = vadd.s32 1, %v13282_v52  ;;  %v15067_v43 = vld [vmem:[#allocation109_spill] sm:$0xff]  ;;  %v15068_v19 = vld [vmem:[#allocation84_spill] sm:$0xff] }
 0x4f8   :  { %v4572_v39 = vsel %vm4570_vm9, %v4571_v34, %v15061_v8  ;;  %v912_v30 = vxor.u32 2147483648, %v15065_v13  ;;  %v3601_v48 = vcvt.s32.f32 %v3594_v33  ;;  %vm5256_vm2 = vc.u32 %v13288_v25, %v13281_v15  ;;  %v15072_v33 = vld [vmem:[#allocation119_spill] sm:$0xff] }
 0x4f9   :  { %v3599_v53 = vand.u32 2147483647, %v3598_v49  ;;  %v4573_v26 = vsel %vm4566_vm1, %v4569_v27, %v4572_v39  ;;  %v5258_v51 = vsel %vm5256_vm2, %v5257_v62, %v13282_v52  ;;  %vm911_vm14 = vcmp.eq.s32.totalorder %v15066_v6, 0  ;;  %v15075_v49 = vld [vmem:[#allocation133_spill] sm:$0xff] }
 0x4fa   :  { %v4574_v61 = vsel %vm4563_vm8, nan, %v4573_v26  ;;  %v915_v59 = vxor.u32 2147483648, %v15067_v43  ;;  %vm5201_vm13 = vcmp.lt.s32.totalorder %v13177_v38, 0  ;;  %v5259_v8 = vadd.s32 %v5258_v51, %v5254_v56  ;;  %v15076_v39 = vld [vmem:[#allocation5_spill] sm:$0xff]  ;;  %v15078_v51 = vld [vmem:[#allocation111_spill] sm:$0xff] }
 0x4fb   :  { %v3602_v16 = vmul.f32 %v3601_v48, %v3599_v53  ;;  %v13312_v2 = vmul.f32 %v4574_v61, %v3630_v4  ;;  %vm914_vm12 = vcmp.eq.s32.totalorder %v15066_v6, 2  ;;  %vm907_vm6 = vweird.f32 %v15068_v19  ;;  %v15077_v53 = vld [vmem:[#allocation131_spill] sm:$0xff] }
 0x4fc   :  { %v913_v45 = vsel %vm911_vm14, %v15067_v43, %v912_v30  ;;  %v916_v28 = vsel %vm914_vm12, %v915_v59, %v15065_v13  ;;  %v2680_v18 = vxor.u32 2147483648, %v15069_v21  ;;  %v5260_v9 = vadd.s32 536870912, %v5259_v8  ;;  %v15079_v19 = vld [vmem:[#allocation59_spill] sm:$0xff] }
 0x4fd   :  { %v3603_v37 = vxor.u32 2147483648, %v3602_v16  ;;  %5886 = vrot.lane.b32.xlu1 %v13312_v2, %s7750_s1  ;;  %vm910_vm3 = vcmp.lt.s32.totalorder %v15066_v6, 2  ;;  %vm2679_vm11 = vcmp.eq.s32.totalorder %v15070_v60, 0  ;;  %v13324_v52 = vadd.s32 %v13281_v15, %v13288_v25 }
 0x4fe   :  { %vm2675_vm15 = vweird.f32 %v15071_v32  ;;  %v2681_v41 = vsel %vm2679_vm11, %v15072_v33, %v2680_v18  ;;  %v2683_v1 = vxor.u32 2147483648, %v15072_v33  ;;  %vm13333_vm7 = vcmp.le.f32.partialorder %v5199_v29, 0.7853982  ;;  %v15082_v18 = vld [vmem:[#allocation58_spill] sm:$0xff] }
 0x4ff   :  { %v3604_v22 = vsel %vm3521_vm5, %v3603_v37, %v3602_v16  ;;  %v5261_v27 = vshrl.u32 %v5260_v9, 30  ;;  %v917_v34 = vsel %vm910_vm3, %v913_v45, %v916_v28  ;;  %vm2682_vm0 = vcmp.eq.s32.totalorder %v15070_v60, 2  ;;  %v15080_v28 = vld [vmem:[#allocation27_spill] sm:$0xff] }
 0x500   :  { %v3607_v15 = vsel %vm13192_vm4, %v13048_v20, %v3604_v22  ;;  %vm2678_vm8 = vcmp.lt.s32.totalorder %v15070_v60, 2  ;;  %v2684_v25 = vsel %vm2682_vm0, %v2683_v1, %v15069_v21  ;;  %v4464_v4 = vxor.u32 2147483648, %v15075_v49  ;;  %v15081_v21 = vld [vmem:[#allocation49_spill] sm:$0xff] }
 0x501   :  { %v5262_v56 = vshll.u32 %v5261_v27, 30  ;;  %v5285_v62 = vsub.s32 4, %v5261_v27  ;;  %v2685_v29 = vsel %vm2678_vm8, %v2681_v41, %v2684_v25  ;;  %vm4463_vm5 = vcmp.eq.s32.totalorder %v15076_v39, 0  ;;  %v15083_v1 = vld [vmem:[#allocation25_spill] sm:$0xff]  ;;  %v15085_v25 = vld [vmem:[#allocation18_spill] sm:$0xff] }
 0x502   :  { %v918_v13 = vsel %vm907_vm6, nan, %v917_v34  ;;  %v2686_v30 = vsel %vm2675_vm15, nan, %v2685_v29  ;;  %v4465_v58 = vsel %vm4463_vm5, %v15077_v53, %v4464_v4  ;;  %v4467_v48 = vxor.u32 2147483648, %v15077_v53  ;;  %v15086_v4 = vld [vmem:[#allocation122_spill] sm:$0xff] }
 0x503   :  { %7733 = vcosq.f32 %v3607_v15  ;;  %v13351_v26 = vsub.s32 %v5259_v8, %v5262_v56  ;;  %vm4459_vm4 = vweird.f32 %v15078_v51  ;;  %vm4466_vm1 = vcmp.eq.s32.totalorder %v15076_v39, 2  ;;  %v15090_v51 = vld [vmem:[#allocation114_spill] sm:$0xff] }
 0x504   :  { %7735 = vsinq.f32 %v3607_v15  ;;  %v13357_v61 = vsel %vm5201_vm13, %v5285_v62, %v5261_v27  ;;  %vm4462_vm9 = vcmp.lt.s32.totalorder %v15076_v39, 2  ;;  %v4468_v6 = vsel %vm4466_vm1, %v4467_v48, %v15075_v49  ;;  %v15084_v15 = vld [vmem:[#allocation138_spill] sm:$0xff]  ;;  %v15089_v48 = vld [vmem:[#allocation112_spill] sm:$0xff] }
 0x505   :  { %v5265_v43 = vsub.s32 0, %v13351_v26  ;;  %v3629_v59 = vmul.f32 %v2686_v30, %v918_v13  ;;  %v4469_v16 = vsel %vm4462_vm9, %v4465_v58, %v4468_v6  ;;  %v1224_v8 = vxor.u32 2147483648, %v15079_v19  ;;  %v15087_v13 = vld [vmem:[#allocation115_spill] sm:$0xff]  ;;  %v15088_v58 = vld [vmem:[#allocation86_spill] sm:$0xff] }
 0x506   :  { %v4470_v45 = vsel %vm4459_vm4, nan, %v4469_v16  ;;  %vm1219_vm2 = vweird.f32 %v15080_v28  ;;  %vm1223_vm14 = vcmp.eq.s32.totalorder %v15081_v21, 0  ;;  %v1227_v37 = vxor.u32 2147483648, %v15082_v18 }
 0x507   :  { %v7002_v9 = vmin.u32 %v5265_v43, %v13351_v26  ;;  %v13367_v60 = vmul.f32 %v4470_v45, %v3629_v59  ;;  %v1225_v32 = vsel %vm1223_vm14, %v15082_v18, %v1224_v8  ;;  %vm1226_vm12 = vcmp.eq.s32.totalorder %v15081_v21, 2  ;;  %v15091_v18 = vld [vmem:[#allocation128_spill] sm:$0xff] }
 0x508   :  { %v5288_v33 = vsel %vm13333_vm7, 0, %v13357_v61  ;;  %vm1222_vm6 = vcmp.lt.s32.totalorder %v15081_v21, 2  ;;  %v1228_v41 = vsel %vm1226_vm12, %v1227_v37, %v15079_v19  ;;  %v2992_v22 = vxor.u32 2147483648, %v15083_v1 }
 0x509   :  { %v5267_v27 = vclz %v7002_v9  ;;  %5884 = vrot.lane.b32.xlu0 %v13367_v60, %s7750_s1  ;;  %7231 = vmatprep.mubr.msk.f32.mxu1 %vm5662_vm10, %v13367_v60  ;;  %v1229_v34 = vsel %vm1222_vm6, %v1225_v32, %v1228_v41  ;;  %vm2991_vm3 = vcmp.eq.s32.totalorder %v15084_v15, 0  ;;  %v2995_v49 = vxor.u32 2147483648, %v15085_v25  ;;  %v15092_v41 = vld [vmem:[#allocation137_spill] sm:$0xff] }
 0x50a   :  { %7232 = vmatmul.mubr.msk.f32.gmra.mxu1 %vm5662_vm10, %v13312_v2  ;;  %vm2987_vm11 = vweird.f32 %v15086_v4  ;;  %vm2990_vm15 = vcmp.lt.s32.totalorder %v15084_v15, 2  ;;  %v2993_v56 = vsel %vm2991_vm3, %v15085_v25, %v2992_v22  ;;  %vm2994_vm0 = vcmp.eq.s32.totalorder %v15084_v15, 2  ;;  %v15093_v22 = vld [vmem:[#allocation136_spill] sm:$0xff] }
 0x50b   :  { %v7003_v62 = vadd.s32 4294967294, %v5267_v27  ;;  %v1230_v29 = vsel %vm1219_vm2, nan, %v1229_v34  ;;  %v2996_v39 = vsel %vm2994_vm0, %v2995_v49, %v15083_v1  ;;  %v4776_v30 = vxor.u32 2147483648, %v15087_v13  ;;  %v15094_v4 = vld [vmem:[#allocation116_spill] sm:$0xff] }
 0x50c   :  { %v2997_v53 = vsel %vm2990_vm15, %v2993_v56, %v2996_v39  ;;  %vm4771_vm8 = vweird.f32 %v15088_v58  ;;  %vm4775_vm5 = vcmp.eq.s32.totalorder %v15089_v48, 0  ;;  %v4779_v6 = vxor.u32 2147483648, %v15090_v51  ;;  %v15098_v58 = vld [vmem:[#allocation34_spill] sm:$0xff] }
 0x50d   :  { %vm7004_vm4 = vcmp.lt.s32.totalorder %v7003_v62, 0  ;;  %v2998_v43 = vsel %vm2987_vm11, nan, %v2997_v53  ;;  %v4777_v59 = vsel %vm4775_vm5, %v15090_v51, %v4776_v30  ;;  %vm4778_vm1 = vcmp.eq.s32.totalorder %v15089_v48, 2  ;;  %v15096_v30 = vld [vmem:[#allocation117_spill] sm:$0xff]  ;;  %v15097_v53 = vld [vmem:[#allocation135_spill] sm:$0xff] }
 0x50e   :  { %v5270_v16 = vsel %vm7004_vm4, 0, %v7003_v62  ;;  %v3632_v19 = vmul.f32 %v2998_v43, %v1230_v29  ;;  %vm4774_vm9 = vcmp.lt.s32.totalorder %v15089_v48, 2  ;;  %v4780_v8 = vsel %vm4778_vm1, %v4779_v6, %v15087_v13 }
 0x50f   :  { %v5271_v45 = vsub.s32 32, %v5270_v16  ;;  %v5275_v28 = vsub.s32 4294967266, %v5270_v16  ;;  %v4781_v21 = vsel %vm4774_vm9, %v4777_v59, %v4780_v8  ;;  %vm1119_vm2 = vcmp.eq.s32.totalorder %v15091_v18, 0 }
 0x510   :  { %v13401_v37 = vpop.eup %7733  ;;  %v5272_v9 = vshll.u32 %v13351_v26, %v5270_v16  ;;  %v4782_v32 = vsel %vm4771_vm8, nan, %v4781_v21  ;;  %v1120_v1 = vxor.u32 2147483648, %v15092_v41  ;;  %v1123_v27 = vxor.u32 2147483648, %v15093_v22  ;;  %v15100_v21 = vld [vmem:[#allocation139_spill] sm:$0xff] }
 0x511   :  { %v13408_v34 = vpop.eup %7735  ;;  %v5273_v15 = vshrl.u32 %v13324_v52, %v5271_v45  ;;  %v5276_v25 = vadd.s32 127, %v5275_v28  ;;  %v13411_v49 = vmul.f32 %v4782_v32, %v3632_v19  ;;  %vm1122_vm14 = vcmp.eq.s32.totalorder %v15091_v18, 2  ;;  %v15095_v52 = vld [vmem:[#allocation29_spill] sm:$0xff] }
 0x512   :  { %vm1115_vm12 = vweird.f32 %v15094_v4  ;;  %vm1118_vm6 = vcmp.lt.s32.totalorder %v15091_v18, 2  ;;  %v1121_v26 = vsel %vm1119_vm2, %v15093_v22, %v1120_v1  ;;  %v1124_v56 = vsel %vm1122_vm14, %v1123_v27, %v15092_v41  ;;  %v15099_v19 = vld [vmem:[#allocation13_spill] sm:$0xff]  ;;  %v15101_v18 = vld [vmem:[#allocation24_spill] sm:$0xff] }
 0x513   :  { %v5274_v62 = vor.u32 %v5273_v15, %v5272_v9  ;;  %v5277_v29 = vshll.u32 %v5276_v25, 23  ;;  %5890 = vrot.lane.b32.xlu1 %v13411_v49, %s7750_s1  ;;  %v1125_v39 = vsel %vm1118_vm6, %v1121_v26, %v1124_v56  ;;  %v2888_v13 = vxor.u32 2147483648, %v15095_v52  ;;  %v15102_v27 = vld [vmem:[#allocation37_spill] sm:$0xff]  ;;  %v15103_v15 = vld [vmem:[#allocation66_spill] sm:$0xff] }
 0x514   :  { %vm2883_vm3 = vweird.f32 %v15096_v30  ;;  %vm2886_vm11 = vcmp.lt.s32.totalorder %v15097_v53, 2  ;;  %vm2887_vm15 = vcmp.eq.s32.totalorder %v15097_v53, 0  ;;  %v2891_v48 = vxor.u32 2147483648, %v15098_v58  ;;  %v15104_v56 = vld [vmem:[#allocation61_spill] sm:$0xff] }
 0x515   :  { %v5278_v51 = vor.u32 4788187, %v5277_v29  ;;  %v1126_v6 = vsel %vm1115_vm12, nan, %v1125_v39  ;;  %v2889_v43 = vsel %vm2887_vm15, %v15098_v58, %v2888_v13  ;;  %vm2890_vm0 = vcmp.eq.s32.totalorder %v15097_v53, 2 }
 0x516   :  { %v5281_v59 = vcvt.s32.f32 %v5274_v62  ;;  %v2892_v16 = vsel %vm2890_vm0, %v2891_v48, %v15095_v52  ;;  %vm4667_vm8 = vweird.f32 %v15099_v19  ;;  %v4672_v8 = vxor.u32 2147483648, %v12445_v0  ;;  %v15105_v62 = vld [vmem:[#allocation65_spill] sm:$0xff] }
 0x517   :  { %v5279_v45 = vand.u32 2147483647, %v5278_v51  ;;  %v2893_v28 = vsel %vm2886_vm11, %v2889_v43, %v2892_v16  ;;  %vm4671_vm5 = vcmp.eq.s32.totalorder %v15100_v21, 0  ;;  %v4675_v9 = vxor.u32 2147483648, %v15101_v18  ;;  %v15106_v51 = vld [vmem:[#allocation31_spill] sm:$0xff]  ;;  %v15108_v16 = vld [vmem:[#allocation134_spill] sm:$0xff] }
 0x518   :  { %v2894_v32 = vsel %vm2883_vm3, nan, %v2893_v28  ;;  %vm4670_vm4 = vcmp.lt.s32.totalorder %v15100_v21, 2  ;;  %v4673_v41 = vsel %vm4671_vm5, %v15101_v18, %v4672_v8  ;;  %vm4674_vm1 = vcmp.eq.s32.totalorder %v15100_v21, 2  ;;  %v15109_v28 = vld [vmem:[#allocation96_spill] sm:$0xff]  ;;  %v15110_v18 = vld [vmem:[#allocation118_spill] sm:$0xff] }
 0x519   :  { %v5282_v1 = vmul.f32 %v5281_v59, %v5279_v45  ;;  %v4676_v22 = vsel %vm4674_vm1, %v4675_v9, %v12445_v0  ;;  %vm1427_vm9 = vweird.f32 %v15102_v27  ;;  %v1432_v25 = vxor.u32 2147483648, %v15103_v15  ;;  %v15111_v9 = vld [vmem:[#allocation124_spill] sm:$0xff] }
 0x51a   :  { %v3631_v4 = vmul.f32 %v2894_v32, %v1126_v6  ;;  %v4677_v26 = vsel %vm4670_vm4, %v4673_v41, %v4676_v22  ;;  %vm1431_vm2 = vcmp.eq.s32.totalorder %v15104_v56, 0  ;;  %v1435_v29 = vxor.u32 2147483648, %v15105_v62  ;;  %v15107_v6 = vld [vmem:[#allocation44_spill] sm:$0xff] }
 0x51b   :  { %v5283_v39 = vxor.u32 2147483648, %v5282_v1  ;;  %v4678_v52 = vsel %vm4667_vm8, nan, %v4677_v26  ;;  %v1433_v13 = vsel %vm1431_vm2, %v15105_v62, %v1432_v25  ;;  %vm1434_vm14 = vcmp.eq.s32.totalorder %v15104_v56, 2  ;;  %v15114_v26 = vld [vmem:[#allocation3_spill] sm:$0xff]  ;;  %v15116_v62 = vld [vmem:[#allocation38_spill] sm:$0xff] }
 0x51c   :  { %v13446_v30 = vmul.f32 %v4678_v52, %v3631_v4  ;;  %vm1430_vm12 = vcmp.lt.s32.totalorder %v15104_v56, 2  ;;  %v1436_v0 = vsel %vm1434_vm14, %v1435_v29, %v15103_v15  ;;  %v3200_v53 = vxor.u32 2147483648, %v12721_v54  ;;  %v15115_v56 = vld [vmem:[#allocation8_spill] sm:$0xff] }
 0x51d   :  { %v5284_v58 = vsel %vm5201_vm13, %v5283_v39, %v5282_v1  ;;  %v1437_v48 = vsel %vm1430_vm12, %v1433_v13, %v1436_v0  ;;  %vm3199_vm6 = vcmp.eq.s32.totalorder %v15106_v51, 0  ;;  %v3203_v43 = vxor.u32 2147483648, %v15107_v6  ;;  %v15112_v1 = vld [vmem:[#allocation121_spill] sm:$0xff] }
 0x51e   :  { %v5287_v59 = vsel %vm13333_vm7, %v13177_v38, %v5284_v58  ;;  %5888 = vrot.lane.b32.xlu0 %v13446_v30, %s7750_s1  ;;  %7234 = vmatprep.mubr.msk.f32.mxu1 %vm5662_vm10, %v13446_v30  ;;  %vm3195_vm3 = vweird.f32 %v15108_v16  ;;  %v3201_v19 = vsel %vm3199_vm6, %v15107_v6, %v3200_v53  ;;  %vm3202_vm13 = vcmp.eq.s32.totalorder %v15106_v51, 2  ;;  %v15117_v53 = vld [vmem:[#allocation132_spill] sm:$0xff]  ;;  %v15118_v58 = vld [vmem:[#allocation46_spill] sm:$0xff] }
 0x51f   :  { %7235 = vmatmul.mubr.msk.f32.gmra.mxu1 %vm5662_vm10, %v13411_v49  ;;  %v1438_v8 = vsel %vm1427_vm9, nan, %v1437_v48  ;;  %vm3198_vm11 = vcmp.lt.s32.totalorder %v15106_v51, 2  ;;  %v3204_v45 = vsel %vm3202_vm13, %v3203_v43, %v12721_v54  ;;  %vm4979_vm15 = vweird.f32 %v15109_v28  ;;  %v15113_v54 = vld [vmem:[#allocation14_spill] sm:$0xff]  ;;  %v15119_v43 = vld [vmem:[#allocation40_spill] sm:$0xff] }
 0x520   :  { %7737 = vcosq.f32 %v5287_v59  ;;  %v3205_v21 = vsel %vm3198_vm11, %v3201_v19, %v3204_v45  ;;  %vm4982_vm0 = vcmp.lt.s32.totalorder %v15110_v18, 2  ;;  %v4984_v32 = vxor.u32 2147483648, %v15111_v9 }
 0x521   :  { %7739 = vsinq.f32 %v5287_v59  ;;  %v3206_v41 = vsel %vm3195_vm3, nan, %v3205_v21  ;;  %vm4983_vm8 = vcmp.eq.s32.totalorder %v15110_v18, 0  ;;  %v4987_v22 = vxor.u32 2147483648, %v15112_v1  ;;  %v15120_v59 = vld [vmem:[#allocation50_spill] sm:$0xff]  ;;  %v15121_v21 = vld [vmem:[#allocation71_spill] sm:$0xff] }
 0x522   :  { %v3634_v27 = vmul.f32 %v3206_v41, %v1438_v8  ;;  %v4985_v15 = vsel %vm4983_vm8, %v15112_v1, %v4984_v32  ;;  %vm4986_vm5 = vcmp.eq.s32.totalorder %v15110_v18, 2  ;;  %v1328_v25 = vxor.u32 2147483648, %v15113_v54  ;;  %v7047_v32 = vld [vmem:[%s14348_s4 + $0x30] sm:$0xff] }
 0x523   :  { %v4988_v4 = vsel %vm4986_vm5, %v4987_v22, %v15111_v9  ;;  %vm1323_vm4 = vweird.f32 %v15114_v26  ;;  %vm1327_vm1 = vcmp.eq.s32.totalorder %v15115_v56, 0  ;;  %v1331_v29 = vxor.u32 2147483648, %v15116_v62  ;;  %v7048_v9 = vld [vmem:[%s14348_s4 + $0x38] sm:$0xff] }
 0x524   :  { %v4989_v39 = vsel %vm4982_vm0, %v4985_v15, %v4988_v4  ;;  %vm1326_vm9 = vcmp.lt.s32.totalorder %v15115_v56, 2  ;;  %v1329_v52 = vsel %vm1327_vm1, %v15116_v62, %v1328_v25  ;;  %vm1330_vm2 = vcmp.eq.s32.totalorder %v15115_v56, 2  ;;  %v15122_v1 = vld [vmem:[#allocation17_spill] sm:$0xff]  ;;  %7246 = vmatprep.subr.mxu1 %v7048_v9  ;;  %v15125_v62 = vld [vmem:[#allocation72_spill] sm:$0xff] }
 0x525   :  { %v4990_v13 = vsel %vm4979_vm15, nan, %v4989_v39  ;;  %v1332_v0 = vsel %vm1330_vm2, %v1331_v29, %v15113_v54  ;;  %vm3091_vm14 = vweird.f32 %v15117_v53  ;;  %v3096_v48 = vxor.u32 2147483648, %v15118_v58  ;;  %v15123_v54 = vld [vmem:[#allocation78_spill] sm:$0xff]  ;;  %7247 = vmatpush3.msra.mxu1 %v7048_v9  ;;  %v15124_v56 = vld [vmem:[#allocation69_spill] sm:$0xff] }
 0x526   :  { %v13491_v51 = vmul.f32 %v4990_v13, %v3634_v27  ;;  %v1333_v6 = vsel %vm1326_vm9, %v1329_v52, %v1332_v0  ;;  %vm3095_vm12 = vcmp.eq.s32.totalorder %v15119_v43, 0  ;;  %v3099_v16 = vxor.u32 2147483648, %v15120_v59  ;;  %7248 = vmatprep.subr.mxu1 %v7047_v32  ;;  %v15126_v52 = vld [vmem:[#allocation43_spill] sm:$0xff] }
 0x527   :  { %vm3094_vm6 = vcmp.lt.s32.totalorder %v15119_v43, 2  ;;  %v3097_v19 = vsel %vm3095_vm12, %v15120_v59, %v3096_v48  ;;  %vm3098_vm3 = vcmp.eq.s32.totalorder %v15119_v43, 2  ;;  %vm4875_vm13 = vweird.f32 %v12182_v12  ;;  %7249 = vmatpush3.msra.mxu1 %v7047_v32  ;;  %v7045_v48 = vld [vmem:[%s14348_s4 + $0x20] sm:$0xff] }
 0x528   :  { %5894 = vrot.lane.b32.xlu1 %v13491_v51, %s7750_s1  ;;  %v1334_v8 = vsel %vm1323_vm4, nan, %v1333_v6  ;;  %v3100_v45 = vsel %vm3098_vm3, %v3099_v16, %v15118_v58  ;;  %v4880_v28 = vxor.u32 2147483648, %v12735_v36  ;;  %v4883_v18 = vxor.u32 2147483648, %v15121_v21 }
 0x529   :  { %v3101_v41 = vsel %vm3094_vm6, %v3097_v19, %v3100_v45  ;;  %vm4878_vm11 = vcmp.lt.s32.totalorder %v15122_v1, 2  ;;  %vm4879_vm15 = vcmp.eq.s32.totalorder %v15122_v1, 0  ;;  %vm4882_vm0 = vcmp.eq.s32.totalorder %v15122_v1, 2  ;;  %v15127_v19 = vld [vmem:[#allocation103_spill] sm:$0xff] }
 0x52a   :  { %v3102_v22 = vsel %vm3091_vm14, nan, %v3101_v41  ;;  %v4881_v27 = vsel %vm4879_vm15, %v15121_v21, %v4880_v28  ;;  %v4884_v15 = vsel %vm4882_vm0, %v4883_v18, %v12735_v36  ;;  %v1640_v25 = vxor.u32 2147483648, %v15123_v54  ;;  %v7046_v36 = vld [vmem:[%s14348_s4 + $0x28] sm:$0xff]  ;;  %v15129_v18 = vld [vmem:[#allocation126_spill] sm:$0xff] }
 0x52b   :  { %v3633_v4 = vmul.f32 %v3102_v22, %v1334_v8  ;;  %v4885_v26 = vsel %vm4878_vm11, %v4881_v27, %v4884_v15  ;;  %vm1639_vm8 = vcmp.eq.s32.totalorder %v15124_v56, 0  ;;  %v1643_v29 = vxor.u32 2147483648, %v15125_v62  ;;  %7250 = vmatprep.subr.mxu1 %v7046_v36  ;;  %v15128_v28 = vld [vmem:[#allocation127_spill] sm:$0xff]  ;;  %v15131_v15 = vld [vmem:[#allocation53_spill] sm:$0xff] }
 0x52c   :  { %v4886_v39 = vsel %vm4875_vm13, nan, %v4885_v26  ;;  %vm1635_vm5 = vweird.f32 %v15126_v52  ;;  %v1641_v13 = vsel %vm1639_vm8, %v15125_v62, %v1640_v25  ;;  %vm1642_vm4 = vcmp.eq.s32.totalorder %v15124_v56, 2  ;;  %7251 = vmatpush3.msra.mxu1 %v7046_v36  ;;  %v15130_v41 = vld [vmem:[#allocation123_spill] sm:$0xff]  ;;  %v15134_v52 = vld [vmem:[#allocation22_spill] sm:$0xff]  ;;  %v15135_v36 = vld [vmem:[#allocation57_spill] sm:$0xff] }
 0x52d   :  { %v13530_v0 = vpop.eup %7737  ;;  %v13532_v53 = vmul.f32 %v4886_v39, %v3633_v4  ;;  %vm1638_vm1 = vcmp.lt.s32.totalorder %v15124_v56, 2  ;;  %v1644_v12 = vsel %vm1642_vm4, %v1643_v29, %v15123_v54  ;;  %v3408_v58 = vxor.u32 2147483648, %v12998_v55  ;;  %7252 = vmatprep.subr.mxu1 %v7045_v48  ;;  %v15132_v4 = vld [vmem:[#allocation33_spill] sm:$0xff]  ;;  %v15133_v39 = vld [vmem:[#allocation70_spill] sm:$0xff] }
 0x52e   :  { %v13540_v6 = vpop.eup %7739  ;;  %v1645_v43 = vsel %vm1638_vm1, %v1641_v13, %v1644_v12  ;;  %vm3403_vm9 = vweird.f32 %v12451_v44  ;;  %vm3407_vm2 = vcmp.eq.s32.totalorder %v12940_v10, 0  ;;  %v3411_v59 = vxor.u32 2147483648, %v12995_v50  ;;  %7253 = vmatpush3.msra.mxu1 %v7045_v48 }
 0x52f   :  { %5892 = vrot.lane.b32.xlu0 %v13532_v53, %s7750_s1  ;;  %7237 = vmatprep.mubr.msk.f32.mxu1 %vm5662_vm10, %v13532_v53  ;;  %vm3406_vm14 = vcmp.lt.s32.totalorder %v12940_v10, 2  ;;  %v3409_v16 = vsel %vm3407_vm2, %v12995_v50, %v3408_v58  ;;  %vm3410_vm12 = vcmp.eq.s32.totalorder %v12940_v10, 2  ;;  %vm5187_vm6 = vweird.f32 %v15127_v19 }
 0x530   :  { %7238 = vmatmul.mubr.msk.f32.gmra.mxu1 %vm5662_vm10, %v13491_v51  ;;  %v1646_v8 = vsel %vm1635_vm5, nan, %v1645_v43  ;;  %v3412_v45 = vsel %vm3410_vm12, %v3411_v59, %v12998_v55  ;;  %v5192_v21 = vxor.u32 2147483648, %v15128_v28  ;;  %v5195_v9 = vxor.u32 2147483648, %v15129_v18  ;;  %v15136_v59 = vld [vmem:[#allocation19_spill] sm:$0xff] }
 0x531   :  { %v3413_v32 = vsel %vm3406_vm14, %v3409_v16, %v3412_v45  ;;  %vm5190_vm3 = vcmp.lt.s32.totalorder %v15130_v41, 2  ;;  %vm5191_vm13 = vcmp.eq.s32.totalorder %v15130_v41, 0  ;;  %vm5194_vm11 = vcmp.eq.s32.totalorder %v15130_v41, 2  ;;  %v15137_v45 = vld [vmem:[#allocation80_spill] sm:$0xff] }
 0x532   :  { %v3414_v10 = vsel %vm3403_vm9, nan, %v3413_v32  ;;  %v5193_v50 = vsel %vm5191_vm13, %v15129_v18, %v5192_v21  ;;  %v5196_v55 = vsel %vm5194_vm11, %v5195_v9, %v15128_v28  ;;  %v1536_v1 = vxor.u32 2147483648, %v12861_v11  ;;  %v15138_v18 = vld [vmem:[#allocation74_spill] sm:$0xff]  ;;  %v15139_v9 = vld [vmem:[#allocation79_spill] sm:$0xff] }
 0x533   :  { %v3636_v22 = vmul.f32 %v3414_v10, %v1646_v8  ;;  %v5197_v27 = vsel %vm5190_vm3, %v5193_v50, %v5196_v55  ;;  %vm1535_vm15 = vcmp.eq.s32.totalorder %v15131_v15, 0  ;;  %v1539_v54 = vxor.u32 2147483648, %v12855_v57 }
 0x534   :  { %v5198_v25 = vsel %vm5187_vm6, nan, %v5197_v27  ;;  %vm1531_vm0 = vweird.f32 %v15132_v4  ;;  %v1537_v44 = vsel %vm1535_vm15, %v12855_v57, %v1536_v1  ;;  %vm1538_vm8 = vcmp.eq.s32.totalorder %v15131_v15, 2 }
 0x535   :  { %v13575_v26 = vmul.f32 %v5198_v25, %v3636_v22  ;;  %vm1534_vm5 = vcmp.lt.s32.totalorder %v15131_v15, 2  ;;  %v1540_v56 = vsel %vm1538_vm8, %v1539_v54, %v12861_v11  ;;  %v3304_v62 = vxor.u32 2147483648, %v12985_v47  ;;  %v15140_v22 = vld [vmem:[#allocation47_spill] sm:$0xff]  ;;  %v15142_v15 = vld [vmem:[#allocation129_spill] sm:$0xff] }
 0x536   :  { %v1541_v29 = vsel %vm1534_vm5, %v1537_v44, %v1540_v56  ;;  %vm3299_vm4 = vweird.f32 %v12291_v14  ;;  %vm3303_vm1 = vcmp.eq.s32.totalorder %v15133_v39, 0  ;;  %v3307_v13 = vxor.u32 2147483648, %v15134_v52  ;;  %v15143_v44 = vld [vmem:[#allocation125_spill] sm:$0xff] }
 0x537   :  { %5898 = vrot.lane.b32.xlu1 %v13575_v26, %s7750_s1  ;;  %vm3302_vm9 = vcmp.lt.s32.totalorder %v15133_v39, 2  ;;  %v3305_v57 = vsel %vm3303_vm1, %v15134_v52, %v3304_v62  ;;  %vm3306_vm2 = vcmp.eq.s32.totalorder %v15133_v39, 2  ;;  %vm5083_vm14 = vweird.f32 %v15135_v36  ;;  %v15144_v62 = vld [vmem:[#allocation108_spill] sm:$0xff]  ;;  %v15145_v36 = vld [vmem:[#allocation15_spill] sm:$0xff] }
 0x538   :  { %v1542_v11 = vsel %vm1531_vm0, nan, %v1541_v29  ;;  %v3308_v12 = vsel %vm3306_vm2, %v3307_v13, %v12985_v47  ;;  %v5088_v58 = vxor.u32 2147483648, %v13138_v63  ;;  %v5091_v48 = vxor.u32 2147483648, %v13134_v17  ;;  %v7192_v13 = vpop.f32.mrf.mxu0 }
 0x539   :  { %v3309_v43 = vsel %vm3302_vm9, %v3305_v57, %v3308_v12  ;;  %vm5086_vm12 = vcmp.lt.s32.totalorder %v15136_v59, 2  ;;  %vm5087_vm6 = vcmp.eq.s32.totalorder %v15136_v59, 0  ;;  %vm5090_vm3 = vcmp.eq.s32.totalorder %v15136_v59, 2  ;;  %v13646_v57 = vld [vmem:[%s14349_s7] ss:$0 sm:$0xff] }
 0x53a   :  { %v3310_v16 = vsel %vm3299_vm4, nan, %v3309_v43  ;;  %v5089_v19 = vsel %vm5087_vm6, %v13134_v17, %v5088_v58  ;;  %v5092_v8 = vsel %vm5090_vm3, %v5091_v48, %v13138_v63  ;;  %v1848_v47 = vxor.u32 2147483648, %v15137_v45 }
 0x53b   :  { %v3635_v28 = vmul.f32 %v3310_v16, %v1542_v11  ;;  %v5093_v21 = vsel %vm5086_vm12, %v5089_v19, %v5092_v8  ;;  %vm1847_vm13 = vcmp.eq.s32.totalorder %v15138_v18, 0  ;;  %v1851_v32 = vxor.u32 2147483648, %v15139_v9 }
 0x53c   :  { %v13605_v41 = vand.u32 3, %v13213_v42  ;;  %v5094_v10 = vsel %vm5083_vm14, nan, %v5093_v21  ;;  %v1849_v14 = vsel %vm1847_vm13, %v15139_v9, %v1848_v47  ;;  %vm1850_vm11 = vcmp.eq.s32.totalorder %v15138_v18, 2 }
 0x53d   :  { %v13611_v17 = vmul.f32 %v5094_v10, %v3635_v28  ;;  %vm1846_vm15 = vcmp.lt.s32.totalorder %v15138_v18, 2  ;;  %v1852_v63 = vsel %vm1850_vm11, %v1851_v32, %v15137_v45  ;;  %v3616_v50 = vxor.u32 2147483648, %v13408_v34  ;;  %v5553_v45 = vpop.f32.mrf.mxu0  ;;  %v15146_v18 = vld [vmem:[#allocation23_spill] sm:$0xff] }
 0x53e   :  { %v5292_v42 = vadd.s32 3, %v5288_v33  ;;  %v1853_v55 = vsel %vm1846_vm15, %v1849_v14, %v1852_v63  ;;  %vm3615_vm0 = vcmp.eq.s32.totalorder %v13297_v5, 0  ;;  %v3619_v1 = vxor.u32 2147483648, %v13401_v37  ;;  %v15141_v33 = vld [vmem:[#allocation130_spill] sm:$0xff] }
 0x53f   :  { %5896 = vrot.lane.b32.xlu0 %v13611_v17, %s7750_s1  ;;  %7240 = vmatprep.mubr.msk.f32.mxu1 %vm5662_vm10, %v13611_v17  ;;  %vm1843_vm8 = vweird.f32 %v15140_v22  ;;  %vm3611_vm5 = vweird.f32 %v13048_v20  ;;  %v3617_v46 = vsel %vm3615_vm0, %v13401_v37, %v3616_v50  ;;  %vm3618_vm7 = vcmp.eq.s32.totalorder %v13297_v5, 2  ;;  %v7224_v47 = vpop.f32.mrf.mxu1  ;;  %v7195_v32 = vpop.f32.mrf.mxu0  ;;  %v13680_v63 = vld [vmem:[%s14350_s5] ss:$0 sm:$0xff] }
 0x540   :  { %7241 = vmatmul.mubr.msk.f32.gmra.mxu1 %vm5662_vm10, %v13575_v26  ;;  %vm3614_vm4 = vcmp.lt.s32.totalorder %v13297_v5, 2  ;;  %v3620_v61 = vsel %vm3618_vm7, %v3619_v1, %v13408_v34  ;;  %v5400_v27 = vxor.u32 2147483648, %v15141_v33  ;;  %v5403_v54 = vxor.u32 2147483648, %v15142_v15  ;;  %v15147_v1 = vld [vmem:[#allocation67_spill] sm:$0xff] }
 0x541   :  { %v1854_v25 = vsel %vm1843_vm8, nan, %v1853_v55  ;;  %v3621_v4 = vsel %vm3614_vm4, %v3617_v46, %v3620_v61  ;;  %vm5399_vm1 = vcmp.eq.s32.totalorder %v15143_v44, 0  ;;  %vm5402_vm9 = vcmp.eq.s32.totalorder %v15143_v44, 2  ;;  %v5563_v14 = vpop.f32.mrf.mxu0  ;;  %v5873_v55 = vpop.permute.xlu1 %5872 }
 0x542   :  { %v3622_v20 = vsel %vm3611_vm5, nan, %v3621_v4  ;;  %vm5398_vm2 = vcmp.lt.s32.totalorder %v15143_v44, 2  ;;  %v5401_v37 = vsel %vm5399_vm1, %v15142_v15, %v5400_v27  ;;  %v5404_v56 = vsel %vm5402_vm9, %v5403_v54, %v15141_v33  ;;  %v15148_v44 = vld [vmem:[#allocation12_spill] sm:$0xff] }
 0x543   :  { %v3638_v5 = vmul.f32 %v3622_v20, %v1854_v25  ;;  %vm5395_vm14 = vweird.f32 %v15144_v62  ;;  %v5405_v34 = vsel %vm5398_vm2, %v5401_v37, %v5404_v56  ;;  %v1744_v29 = vxor.u32 2147483648, %v13254_v24  ;;  %v7198_v61 = vpop.f32.mrf.mxu0  ;;  %v15149_v20 = vld [vmem:[#allocation10_spill] sm:$0xff]  ;;  %v15150_v56 = vld [vmem:[#allocation48_spill] sm:$0xff] }
 0x544   :  { %v5293_v39 = vand.u32 3, %v5292_v42  ;;  %v5406_v52 = vsel %vm5395_vm14, nan, %v5405_v34  ;;  %vm1743_vm12 = vcmp.eq.s32.totalorder %v15145_v36, 0  ;;  %v1747_v11 = vxor.u32 2147483648, %v13154_v31 }
 0x545   :  { %v13650_v12 = vmul.f32 %v5406_v52, %v3638_v5  ;;  %v1745_v58 = vsel %vm1743_vm12, %v13154_v31, %v1744_v29  ;;  %vm1746_vm6 = vcmp.eq.s32.totalorder %v15145_v36, 2  ;;  %v3512_v48 = vxor.u32 2147483648, %v13277_v23  ;;  %v5875_v15 = vpop.permute.xlu1 %5874  ;;  %v5573_v25 = vpop.f32.mrf.mxu0 }
 0x546   :  { %v1748_v43 = vsel %vm1746_vm6, %v1747_v11, %v13254_v24  ;;  %vm3511_vm3 = vcmp.eq.s32.totalorder %v13605_v41, 0  ;;  %v3515_v59 = vxor.u32 2147483648, %v13266_v3  ;;  %v13661_v16 = vadd.f32 %v7192_v13, %v13646_v57 }
 0x547   :  { %5902 = vrot.lane.b32.xlu1 %v13650_v12, %s7750_s1  ;;  %vm1742_vm13 = vcmp.lt.s32.totalorder %v15145_v36, 2  ;;  %v3513_v31 = vsel %vm3511_vm3, %v13266_v3, %v3512_v48  ;;  %vm3514_vm11 = vcmp.eq.s32.totalorder %v13605_v41, 2  ;;  %vm3510_vm15 = vcmp.lt.s32.totalorder %v13605_v41, 2  ;;  %v7201_v37 = vpop.f32.mrf.mxu0  ;;  %v5877_v48 = vpop.permute.xlu0 %5876 }
 0x548   :  { %v1749_v19 = vsel %vm1742_vm13, %v1745_v58, %v1748_v43  ;;  %v3516_v24 = vsel %vm3514_vm11, %v3515_v59, %v13277_v23  ;;  %v5296_v8 = vxor.u32 2147483648, %v13540_v6  ;;  %vm3507_vm0 = vweird.f32 %v12916_v35 }
 0x549   :  { %v3517_v28 = vsel %vm3510_vm15, %v3513_v31, %v3516_v24  ;;  %vm5295_vm8 = vcmp.eq.s32.totalorder %v5293_v39, 0  ;;  %v5299_v21 = vxor.u32 2147483648, %v13530_v0  ;;  %vm1739_vm5 = vweird.f32 %v15146_v18  ;;  %v5583_v5 = vpop.f32.mrf.mxu0  ;;  %v5879_v43 = vpop.permute.xlu1 %5878 }
 0x54a   :  { %v3518_v3 = vsel %vm3507_vm0, nan, %v3517_v28  ;;  %v5297_v9 = vsel %vm5295_vm8, %v13530_v0, %v5296_v8  ;;  %vm5298_vm7 = vcmp.eq.s32.totalorder %v5293_v39, 2  ;;  %v1750_v41 = vsel %vm1739_vm5, nan, %v1749_v19  ;;  %v5777_v0 = vpop.f32.mrf.mxu1 }
 0x54b   :  { %vm5294_vm4 = vcmp.lt.s32.totalorder %v5293_v39, 2  ;;  %v5300_v23 = vsel %vm5298_vm7, %v5299_v21, %v13540_v6  ;;  %6194 = vrot.lane.b32.xlu1 %v13661_v16, %s7750_s1  ;;  %v3637_v10 = vmul.f32 %v3518_v3, %v1750_v41  ;;  %vm5291_vm1 = vweird.f32 %v13177_v38  ;;  %v7204_v34 = vpop.f32.mrf.mxu0 }
 0x54c   :  { %v5301_v35 = vsel %vm5294_vm4, %v5297_v9, %v5300_v23  ;;  %v13685_v6 = vadd.f32 %v13646_v57, %v5553_v45  ;;  %v13690_v38 = vadd.f32 %v7195_v32, %v13646_v57  ;;  %v5783_v22 = vadd.f32 %v7224_v47, %v13680_v63 }
 0x54d   :  { %v5302_v50 = vsel %vm5291_vm1, nan, %v5301_v35  ;;  %v5778_v46 = vadd.f32 %v13680_v63, %v5777_v0  ;;  %v5564_v52 = vadd.f32 %v13646_v57, %v5563_v14  ;;  %v5593_v11 = vpop.f32.mrf.mxu0  ;;  %v5579_v24 = vadd.f32 %v7198_v61, %v13646_v57  ;;  %v5883_v61 = vpop.permute.xlu1 %5882 }
 0x54e   :  { %v13682_v42 = vmul.f32 %v5302_v50, %v3637_v10  ;;  %v5857_v33 = vadd.f32 %v5783_v22, %v13661_v16  ;;  %v13752_v45 = vadd.f32 %v7201_v37, %v13646_v57  ;;  %v13758_v28 = vadd.f32 %v7204_v34, %v13646_v57  ;;  %v13869_v37 = vld [vmem:[%s14351_s8] ss:$0 sm:$0xff] }
 0x54f   :  { %6258 = vrot.lane.b32.xlu1 %v15147_v1, %s7751_s24  ;;  %v5856_v27 = vadd.f32 %v5778_v46, %v13685_v6  ;;  %v7207_v19 = vpop.f32.mrf.mxu0  ;;  %v5574_v21 = vadd.f32 %v13646_v57, %v5573_v25  ;;  %v13770_v9 = vadd.f32 %v13646_v57, %v5583_v5  ;;  %v13779_v23 = vadd.f32 %v13646_v57, %v5593_v11 }
 0x550   :  { %5900 = vrot.lane.b32.xlu0 %v13682_v42, %s7750_s1  ;;  %7243 = vmatprep.mubr.msk.f32.mxu1 %vm5662_vm10, %v13682_v42  ;;  %v13708_v4 = vmul.f32 %v5875_v15, %v5857_v33  ;;  %v13765_v3 = vadd.f32 %v7207_v19, %v13646_v57  ;;  %v5881_v46 = vpop.permute.xlu0 %5880  ;;  %v13859_v15 = vld [vmem:[%s14351_s8 + $0x1] ss:$0 sm:$0xff]  ;;  %v5641_v34 = vmul.f32 %v13869_v37, %v13186_v7  ;;  %vm6796_vm9 = vcmask 7168  }
 0x551   :  { %7244 = vmatmul.mubr.msk.f32.gmra.mxu1 %vm5662_vm10, %v13650_v12  ;;  %v13704_v54 = vmul.f32 %v5873_v55, %v5856_v27  ;;  %v5603_v8 = vpop.f32.mrf.mxu0 }
 0x552   :  { %v13789_v14 = vadd.f32 %v13646_v57, %v5603_v8 }
 0x553   :  { %6198 = vrot.lane.b32.xlu1 %v13690_v38, %s7750_s1  ;;  %7254 = vmatprep.mubr.msk.f32.mxu1 %vm5662_vm10, %v13704_v54  ;;  %v7210_v47 = vpop.f32.mrf.mxu0 }
 0x554   :  { %6192 = vrot.lane.b32.xlu0 %v13685_v6, %s7750_s1  ;;  %v13796_v0 = vadd.f32 %v7210_v47, %v13646_v57 }
 0x555   :  { %7255 = vmatmul.mubr.msk.f32.vlgmr.msra.gmra.mxu1 %vm5662_vm10, %v13708_v4  ;;  %v5613_v18 = vpop.f32.mrf.mxu0 }
 0x556   :  { %v13803_v50 = vadd.f32 %v13646_v57, %v5613_v18 }
 0x557   :  { %6262 = vrot.lane.b32.xlu1 %v15148_v44, %s7751_s24  ;;  %v7213_v32 = vpop.f32.mrf.mxu0 }
 0x558   :  { %6256 = vrot.lane.b32.xlu0 %v15149_v20, %s7751_s24  ;;  %v13776_v41 = vadd.f32 %v7213_v32, %v13646_v57  ;;  %v5644_v32 = vmul.f32 %v13869_v37, %v13312_v2 }
 0x559   :  { %v5623_v10 = vpop.f32.mrf.mxu0 }
 0x55a   :  { %v13786_v35 = vadd.f32 %v13646_v57, %v5623_v10 }
 0x55b   :  { %6266 = vrot.lane.b32.xlu1 %v13060_v40, %s7751_s24  ;;  %v7227_v62 = vpop.f32.mrf.mxu1 }
 0x55c   :  { %6260 = vrot.lane.b32.xlu0 %v15150_v56, %s7751_s24  ;;  %v5793_v29 = vadd.f32 %v7227_v62, %v13680_v63  ;;  %v5642_v62 = vmul.f32 %v13869_v37, %v13060_v40 }
 0x55d   :  { %v5787_v39 = vpop.f32.mrf.mxu1 }
 0x55e   :  { %v5788_v13 = vadd.f32 %v13680_v63, %v5787_v39  ;;  %v5859_v36 = vadd.f32 %v5793_v29, %v13690_v38 }
 0x55f   :  { %6270 = vrot.lane.b32.xlu1 %v13312_v2, %s7751_s24 }
 0x560   :  { %6264 = vrot.lane.b32.xlu0 %v13186_v7, %s7751_s24  ;;  %v5858_v58 = vadd.f32 %v5788_v13, %v5564_v52  ;;  %v13738_v31 = vmul.f32 %v5879_v43, %v5859_v36  ;;  %v7067_v13 = vld [vmem:[%s14348_s4 + $0x40] sm:$0xff] }
 0x562   :  { %v13734_v59 = vmul.f32 %v5877_v48, %v5858_v58 }
 0x563   :  { %6274 = vrot.lane.b32.xlu1 %v13411_v49, %s7751_s24 }
 0x564   :  { %6268 = vrot.lane.b32.xlu0 %v13367_v60, %s7751_s24  ;;  %7257 = vmatprep.mubr.msk.f32.mxu1 %vm5662_vm10, %v13734_v59 }
 0x565   :  { %7258 = vmatmul.mubr.msk.f32.gmra.mxu1 %vm5662_vm10, %v13738_v31 }
 0x567   :  { %6278 = vrot.lane.b32.xlu1 %v13491_v51, %s7751_s24 }
 0x568   :  { %6272 = vrot.lane.b32.xlu0 %v13446_v30, %s7751_s24 }
 0x56b   :  { %6284 = vrot.lane.b32.xlu1 %v13682_v42, %s7751_s24 }
 0x56c   :  { %6276 = vrot.lane.b32.xlu0 %v13532_v53, %s7751_s24 }
 0x56f   :  { %6202 = vrot.lane.b32.xlu1 %v5579_v24, %s7750_s1  ;;  %v5887_v19 = vpop.permute.xlu1 %5886 }
 0x570   :  { %6280 = vrot.lane.b32.xlu0 %v13611_v17, %s7751_s24 }
 0x573   :  { %6206 = vrot.lane.b32.xlu1 %v13752_v45, %s7750_s1 }
 0x574   :  { %6196 = vrot.lane.b32.xlu0 %v5564_v52, %s7750_s1 }
 0x577   :  { %6210 = vrot.lane.b32.xlu1 %v13758_v28, %s7750_s1 }
 0x578   :  { %6200 = vrot.lane.b32.xlu0 %v5574_v21, %s7750_s1 }
 0x57b   :  { %6214 = vrot.lane.b32.xlu1 %v13765_v3, %s7750_s1  ;;  %v5885_v47 = vpop.permute.xlu0 %5884 }
 0x57c   :  { %6204 = vrot.lane.b32.xlu0 %v13770_v9, %s7750_s1 }
 0x57f   :  { %6222 = vrot.lane.b32.xlu1 %v13776_v41, %s7750_s1 }
 0x580   :  { %6208 = vrot.lane.b32.xlu0 %v13779_v23, %s7750_s1 }
 0x583   :  { %6220 = vrot.lane.b32.xlu1 %v13786_v35, %s7750_s1 }
 0x584   :  { %6212 = vrot.lane.b32.xlu0 %v13789_v14, %s7750_s1 }
 0x587   :  { %6286 = vrot.lane.b32.xlu1 %v13650_v12, %s7751_s24 }
 0x588   :  { %6218 = vrot.lane.b32.xlu0 %v13796_v0, %s7750_s1 }
 0x58b   :  { %6562 = vrot.lane.b32.xlu1 %v13661_v16, %s7751_s24 }
 0x58c   :  { %6216 = vrot.lane.b32.xlu0 %v13803_v50, %s7750_s1 }
 0x58f   :  { %6566 = vrot.lane.b32.xlu1 %v13690_v38, %s7751_s24 }
 0x590   :  { %6282 = vrot.lane.b32.xlu0 %v13575_v26, %s7751_s24 }
 0x593   :  { %6570 = vrot.lane.b32.xlu1 %v5579_v24, %s7751_s24 }
 0x594   :  { %6560 = vrot.lane.b32.xlu0 %v13685_v6, %s7751_s24 }
 0x597   :  { %6574 = vrot.lane.b32.xlu1 %v13752_v45, %s7751_s24 }
 0x598   :  { %6564 = vrot.lane.b32.xlu0 %v5564_v52, %s7751_s24  ;;  %v7070_v52 = vld [vmem:[%s14348_s4 + $0x58] sm:$0xff] }
 0x599   :  { %7278 = vmatprep.subr.mxu0 %v7070_v52  ;;  %7310 = vmatprep.subr.mxu1 %v7070_v52 }
 0x59a   :  { %7279 = vmatpush3.msra.mxu0 %v7070_v52  ;;  %7314 = vmatpush3.msra.mxu1 %v7070_v52 }
 0x59b   :  { %6578 = vrot.lane.b32.xlu1 %v13758_v28, %s7751_s24 }
 0x59c   :  { %6568 = vrot.lane.b32.xlu0 %v5574_v21, %s7751_s24 }
 0x59f   :  { %6582 = vrot.lane.b32.xlu1 %v13765_v3, %s7751_s24  ;;  %v7230_v57 = vpop.f32.mrf.mxu1 }
 0x5a0   :  { %6572 = vrot.lane.b32.xlu0 %v13770_v9, %s7751_s24  ;;  %v5803_v16 = vadd.f32 %v7230_v57, %v13680_v63  ;;  %v5643_v57 = vmul.f32 %v13869_v37, %v13367_v60 }
 0x5a1   :  { %v5797_v55 = vpop.f32.mrf.mxu1 }
 0x5a2   :  { %v5798_v6 = vadd.f32 %v13680_v63, %v5797_v55  ;;  %v5861_v38 = vadd.f32 %v5803_v16, %v5579_v24 }
 0x5a3   :  { %6586 = vrot.lane.b32.xlu1 %v13796_v0, %s7751_s24 }
 0x5a4   :  { %6576 = vrot.lane.b32.xlu0 %v13779_v23, %s7751_s24  ;;  %v5860_v22 = vadd.f32 %v5798_v6, %v5574_v21  ;;  %v5925_v27 = vmul.f32 %v5883_v61, %v5861_v38 }
 0x5a6   :  { %v5924_v33 = vmul.f32 %v5881_v46, %v5860_v22  ;;  %v5946_v25 = vmul.f32 %v13859_v15, %v5925_v27  ;;  %v5891_v22 = vpop.permute.xlu1 %5890 }
 0x5a7   :  { %6590 = vrot.lane.b32.xlu1 %v13776_v41, %s7751_s24 }
 0x5a8   :  { %6580 = vrot.lane.b32.xlu0 %v13789_v14, %s7751_s24  ;;  %7260 = vmatprep.mubr.msk.f32.mxu1 %vm5662_vm10, %v5924_v33  ;;  %v5945_v5 = vmul.f32 %v13859_v15, %v5924_v33  ;;  %v13878_v29 = vadd.f32 %v5946_v25, %v5642_v62  ;;  %v5889_v33 = vpop.permute.xlu0 %5888  ;;  %v5646_v25 = vmul.f32 %v13869_v37, %v13411_v49 }
 0x5a9   :  { %7261 = vmatmul.mubr.msk.f32.gmra.mxu1 %vm5662_vm10, %v5925_v27 }
 0x5aa   :  { %v13882_v39 = vadd.f32 %v5945_v5, %v5641_v34 }
 0x5ab   :  { %6626 = vrot.lane.b32.xlu1 %v15147_v1, %s7752_s25 }
 0x5ac   :  { %6584 = vrot.lane.b32.xlu0 %v13803_v50, %s7751_s24 }
 0x5af   :  { %6630 = vrot.lane.b32.xlu1 %v15148_v44, %s7752_s25 }
 0x5b0   :  { %6588 = vrot.lane.b32.xlu0 %v13786_v35, %s7751_s24 }
 0x5b3   :  { %6634 = vrot.lane.b32.xlu1 %v13060_v40, %s7752_s25  ;;  %v7069_v40 = vld [vmem:[%s14348_s4 + $0x50] sm:$0xff] }
 0x5b4   :  { %6624 = vrot.lane.b32.xlu0 %v15149_v20, %s7752_s25  ;;  %7280 = vmatprep.subr.mxu0 %v7069_v40 }
 0x5b5   :  { %7281 = vmatpush3.msra.mxu0 %v7069_v40  ;;  %7311 = vmatprep.subr.mxu1 %v7069_v40 }
 0x5b6   :  { %7315 = vmatpush3.msra.mxu1 %v7069_v40 }
 0x5b7   :  { %6638 = vrot.lane.b32.xlu1 %v13312_v2, %s7752_s25 }
 0x5b8   :  { %6628 = vrot.lane.b32.xlu0 %v15150_v56, %s7752_s25 }
 0x5bb   :  { %6642 = vrot.lane.b32.xlu1 %v13411_v49, %s7752_s25 }
 0x5bc   :  { %6632 = vrot.lane.b32.xlu0 %v13186_v7, %s7752_s25  ;;  %v7068_v7 = vld [vmem:[%s14348_s4 + $0x48] sm:$0xff] }
 0x5bd   :  { %7282 = vmatprep.subr.mxu0 %v7068_v7  ;;  %7312 = vmatprep.subr.mxu1 %v7068_v7 }
 0x5be   :  { %7283 = vmatpush3.msra.mxu0 %v7068_v7  ;;  %7316 = vmatpush3.msra.mxu1 %v7068_v7 }
 0x5bf   :  { %6646 = vrot.lane.b32.xlu1 %v13491_v51, %s7752_s25  ;;  %7284 = vmatprep.subr.mxu0 %v7067_v13 }
 0x5c0   :  { %6636 = vrot.lane.b32.xlu0 %v13367_v60, %s7752_s25  ;;  %7285 = vmatpush3.msra.mxu0 %v7067_v13 }
 0x5c1   :  { %7313 = vmatprep.subr.mxu1 %v7067_v13 }
 0x5c2   :  { %7317 = vmatpush3.msra.mxu1 %v7067_v13 }
 0x5c3   :  { %6650 = vrot.lane.b32.xlu1 %v13575_v26, %s7752_s25 }
 0x5c4   :  { %6640 = vrot.lane.b32.xlu0 %v13446_v30, %s7752_s25 }
 0x5c7   :  { %6654 = vrot.lane.b32.xlu1 %v13650_v12, %s7752_s25 }
 0x5c8   :  { %6644 = vrot.lane.b32.xlu0 %v13532_v53, %s7752_s25 }
 0x5ca   :  { %v7233_v36 = vpop.f32.mrf.mxu1 }
 0x5cb   :  { %v5813_v11 = vadd.f32 %v7233_v36, %v13680_v63 }
 0x5cc   :  { %v5807_v58 = vpop.f32.mrf.mxu1  ;;  %6648 = vrot.lane.b32.xlu0 %v13611_v17, %s7752_s25 }
 0x5cd   :  { %v5863_v48 = vadd.f32 %v5813_v11, %v13752_v45  ;;  %v5808_v43 = vadd.f32 %v13680_v63, %v5807_v58  ;;  %v5895_v11 = vpop.permute.xlu1 %5894 }
 0x5cf   :  { %v5927_v24 = vmul.f32 %v5887_v19, %v5863_v48  ;;  %v5862_v8 = vadd.f32 %v5808_v43, %v13770_v9 }
 0x5d0   :  { %6652 = vrot.lane.b32.xlu0 %v13682_v42, %s7752_s25 }
 0x5d1   :  { %v5948_v21 = vmul.f32 %v13859_v15, %v5927_v24  ;;  %v5926_v18 = vmul.f32 %v5885_v47, %v5862_v8 }
 0x5d3   :  { %v5947_v45 = vmul.f32 %v13859_v15, %v5926_v18  ;;  %7263 = vmatprep.mubr.msk.f32.mxu1 %vm5662_vm10, %v5926_v18  ;;  %v13917_v10 = vadd.f32 %v5948_v21, %v5644_v32 }
 0x5d4   :  { %7264 = vmatmul.mubr.msk.f32.gmra.mxu1 %vm5662_vm10, %v5927_v24  ;;  %v5648_v24 = vmul.f32 %v13869_v37, %v13491_v51 }
 0x5d5   :  { %v13922_v9 = vadd.f32 %v5947_v45, %v5643_v57 }
 0x5df   :  { %v7236_v16 = vpop.f32.mrf.mxu1 }
 0x5e0   :  { %v5823_v55 = vadd.f32 %v7236_v16, %v13680_v63 }
 0x5e1   :  { %v5817_v6 = vpop.f32.mrf.mxu1 }
 0x5e2   :  { %v5865_v38 = vadd.f32 %v5823_v55, %v13758_v28  ;;  %v5818_v2 = vadd.f32 %v13680_v63, %v5817_v6  ;;  %v5645_v28 = vmul.f32 %v13869_v37, %v13446_v30  ;;  %v5899_v55 = vpop.permute.xlu1 %5898 }
 0x5e4   :  { %v5929_v46 = vmul.f32 %v5891_v22, %v5865_v38  ;;  %v5864_v61 = vadd.f32 %v5818_v2, %v13779_v23  ;;  %v5893_v23 = vpop.permute.xlu0 %5892 }
 0x5e6   :  { %v5950_v27 = vmul.f32 %v13859_v15, %v5929_v46  ;;  %v5928_v60 = vmul.f32 %v5889_v33, %v5864_v61  ;;  %v5650_v61 = vmul.f32 %v13869_v37, %v13575_v26  ;;  %v5649_v33 = vmul.f32 %v13869_v37, %v13611_v17  ;;  %v13978_v26 = vld [vmem:[%s14350_s5 + $0x1] ss:$0 sm:$0xff] }
 0x5e8   :  { %v5949_v5 = vmul.f32 %v13859_v15, %v5928_v60  ;;  %7266 = vmatprep.mubr.msk.f32.mxu1 %vm5662_vm10, %v5928_v60  ;;  %v13933_v62 = vadd.f32 %v5950_v27, %v5646_v25  ;;  %v5897_v13 = vpop.permute.xlu0 %5896  ;;  %v5903_v60 = vpop.permute.xlu1 %5902 }
 0x5e9   :  { %7267 = vmatmul.mubr.msk.f32.gmra.mxu1 %vm5662_vm10, %v5929_v46 }
 0x5ea   :  { %v13938_v34 = vadd.f32 %v5949_v5, %v5645_v28 }
 0x5ec   :  { %v5901_v43 = vpop.permute.xlu0 %5900 }
 0x5f0   :  { %v7239_v52 = vpop.f32.mrf.mxu1 }
 0x5f1   :  { %v5833_v40 = vadd.f32 %v7239_v52, %v13680_v63 }
 0x5f2   :  { %v5827_v7 = vpop.f32.mrf.mxu1 }
 0x5f3   :  { %v5867_v49 = vadd.f32 %v5833_v40, %v13765_v3  ;;  %v5828_v36 = vadd.f32 %v13680_v63, %v5827_v7  ;;  %v5647_v3 = vmul.f32 %v13869_v37, %v13532_v53 }
 0x5f5   :  { %v5931_v58 = vmul.f32 %v5895_v11, %v5867_v49  ;;  %v5866_v48 = vadd.f32 %v5828_v36, %v13789_v14  ;;  %v6193_v14 = vpop.permute.xlu0 %6192  ;;  %v6195_v49 = vpop.permute.xlu1 %6194 }
 0x5f7   :  { %v5952_v30 = vmul.f32 %v13859_v15, %v5931_v58  ;;  %v5930_v19 = vmul.f32 %v5893_v23, %v5866_v48 }
 0x5f9   :  { %v5951_v8 = vmul.f32 %v13859_v15, %v5930_v19  ;;  %7269 = vmatprep.mubr.msk.f32.mxu1 %vm5662_vm10, %v5930_v19  ;;  %v13949_v47 = vadd.f32 %v5952_v30, %v5648_v24  ;;  %v6257_v57 = vpop.permute.xlu0 %6256  ;;  %v5652_v24 = vmul.f32 %v13869_v37, %v13650_v12 }
 0x5fa   :  { %7270 = vmatmul.mubr.msk.f32.gmra.mxu1 %vm5662_vm10, %v5931_v58 }
 0x5fb   :  { %v13954_v21 = vadd.f32 %v5951_v8, %v5647_v3  ;;  %v6259_v8 = vpop.permute.xlu1 %6258 }
 0x5fd   :  { %v6261_v22 = vpop.permute.xlu0 %6260 }
 0x5ff   :  { %v6199_v12 = vpop.permute.xlu1 %6198 }
 0x600   :  { %v7242_v18 = vpop.f32.mrf.mxu1 }
 0x601   :  { %v5843_v32 = vadd.f32 %v7242_v18, %v13680_v63 }
 0x602   :  { %v5837_v45 = vpop.f32.mrf.mxu1 }
 0x603   :  { %v5869_v51 = vadd.f32 %v5843_v32, %v13796_v0  ;;  %v5838_v16 = vadd.f32 %v13680_v63, %v5837_v45  ;;  %v5651_v32 = vmul.f32 %v13869_v37, %v13682_v42 }
 0x605   :  { %v5933_v6 = vmul.f32 %v5899_v55, %v5869_v51  ;;  %v5868_v38 = vadd.f32 %v5838_v16, %v13803_v50  ;;  %v6265_v50 = vpop.permute.xlu0 %6264 }
 0x607   :  { %v5954_v53 = vmul.f32 %v13859_v15, %v5933_v6  ;;  %v5932_v2 = vmul.f32 %v5897_v13, %v5868_v38 }
 0x609   :  { %v5953_v46 = vmul.f32 %v13859_v15, %v5932_v2  ;;  %7272 = vmatprep.mubr.msk.f32.mxu1 %vm5662_vm10, %v5932_v2  ;;  %v13966_v0 = vadd.f32 %v5954_v53, %v5650_v61  ;;  %v13980_v40 = vpop.permute.xlu0 %6268  ;;  %v6263_v2 = vpop.permute.xlu1 %6262 }
 0x60a   :  { %7273 = vmatmul.mubr.msk.f32.gmra.mxu1 %vm5662_vm10, %v5933_v6 }
 0x60b   :  { %v13970_v27 = vadd.f32 %v5953_v46, %v5649_v33 }
 0x60d   :  { %v13987_v30 = vpop.permute.xlu0 %6272  ;;  %v6267_v33 = vpop.permute.xlu1 %6266 }
 0x611   :  { %v7245_v25 = vpop.f32.mrf.mxu1 }
 0x612   :  { %v5853_v5 = vadd.f32 %v7245_v25, %v13680_v63 }
 0x613   :  { %v5847_v28 = vpop.f32.mrf.mxu1 }
 0x614   :  { %v5871_v23 = vadd.f32 %v5853_v5, %v13776_v41  ;;  %v5848_v52 = vadd.f32 %v13680_v63, %v5847_v28 }
 0x615   :  { %v7256_v13 = vpop.f32.mrf.mxu1 }
 0x616   :  { %v5935_v17 = vmul.f32 %v5903_v60, %v5871_v23  ;;  %v5870_v7 = vadd.f32 %v5848_v52, %v13786_v35  ;;  %v6103_v36 = vadd.f32 %v7256_v13, %v13978_v26  ;;  %v6271_v60 = vpop.permute.xlu1 %6270 }
 0x617   :  { %v6097_v58 = vpop.f32.mrf.mxu1 }
 0x618   :  { %v5934_v11 = vmul.f32 %v5901_v43, %v5870_v7  ;;  %v6098_v41 = vadd.f32 %v13978_v26, %v6097_v58  ;;  %v5956_v63 = vmul.f32 %v13859_v15, %v5935_v17  ;;  %v6241_v48 = vadd.f32 %v6195_v49, %v6103_v36 }
 0x61a   :  { %7275 = vmatprep.mubr.msk.f32.mxu1 %vm5662_vm10, %v5934_v11  ;;  %v6240_v19 = vadd.f32 %v6193_v14, %v6098_v41  ;;  %v5955_v35 = vmul.f32 %v13859_v15, %v5934_v11  ;;  %v6305_v3 = vmul.f32 %v6259_v8, %v6241_v48  ;;  %v13993_v18 = vadd.f32 %v5956_v63, %v5652_v24  ;;  %v14001_v14 = vpop.permute.xlu0 %6276  ;;  %v14009_v25 = vpop.permute.xlu1 %6274  ;;  %v14020_v11 = vld [vmem:[%s14351_s8 + $0x2] ss:$0 sm:$0xff] }
 0x61b   :  { %7276 = vmatmul.mubr.msk.f32.gmra.mxu1 %vm5662_vm10, %v5935_v17  ;;  %v5942_v41 = vmul.f32 %v13859_v15, %v13708_v4  ;;  %v5941_v8 = vmul.f32 %v13859_v15, %v13704_v54 }
 0x61c   :  { %v6304_v43 = vmul.f32 %v6257_v57, %v6240_v19  ;;  %v13999_v45 = vadd.f32 %v5955_v35, %v5651_v32  ;;  %v6326_v48 = vmul.f32 %v14020_v11, %v6305_v3  ;;  %v5638_v19 = vmul.f32 %v13869_v37, %v15147_v1 }
 0x61d   :  { %v5637_v32 = vmul.f32 %v13869_v37, %v15149_v20 }
 0x61e   :  { %7286 = vmatprep.mubr.msk.f32.mxu0 %vm5662_vm10, %v6304_v43  ;;  %v14003_v51 = vpop.permute.xlu0 %6280  ;;  %v14011_v5 = vpop.permute.xlu1 %6278  ;;  %v5958_v35 = vadd.f32 %v5942_v41, %v5638_v19  ;;  %v6325_v4 = vmul.f32 %v14020_v11, %v6304_v43 }
 0x61f   :  { %7287 = vmatmul.mubr.msk.f32.vlgmr.msra.gmra.mxu0 %vm5662_vm10, %v6305_v3  ;;  %v5943_v3 = vmul.f32 %v13859_v15, %v13734_v59  ;;  %v5957_v1 = vadd.f32 %v5941_v8, %v5637_v32 }
 0x620   :  { %v14029_v24 = vadd.f32 %v6326_v48, %v5958_v35 }
 0x621   :  { %v14044_v54 = vadd.f32 %v6325_v4, %v5957_v1 }
 0x622   :  { %v6197_v38 = vpop.permute.xlu0 %6196  ;;  %v14013_v28 = vpop.permute.xlu1 %6284 }
 0x625   :  { %v7259_v16 = vpop.f32.mrf.mxu1 }
 0x626   :  { %v6113_v57 = vadd.f32 %v7259_v16, %v13978_v26  ;;  %v6203_v7 = vpop.permute.xlu1 %6202  ;;  %v6201_v13 = vpop.permute.xlu0 %6200 }
 0x627   :  { %v6107_v55 = vpop.f32.mrf.mxu1 }
 0x628   :  { %v6108_v6 = vadd.f32 %v13978_v26, %v6107_v55  ;;  %v6243_v53 = vadd.f32 %v6199_v12, %v6113_v57  ;;  %v5640_v12 = vmul.f32 %v13869_v37, %v15148_v44 }
 0x62a   :  { %v6242_v42 = vadd.f32 %v6197_v38, %v6108_v6  ;;  %v6307_v61 = vmul.f32 %v6263_v2, %v6243_v53  ;;  %v6207_v53 = vpop.permute.xlu1 %6206 }
 0x62c   :  { %v6306_v46 = vmul.f32 %v6261_v22, %v6242_v42  ;;  %v6328_v16 = vmul.f32 %v14020_v11, %v6307_v61  ;;  %v6205_v42 = vpop.permute.xlu0 %6204 }
 0x62e   :  { %7289 = vmatprep.mubr.msk.f32.mxu0 %vm5662_vm10, %v6306_v46  ;;  %v6327_v57 = vmul.f32 %v14020_v11, %v6306_v46 }
 0x62f   :  { %7290 = vmatmul.mubr.msk.f32.gmra.mxu0 %vm5662_vm10, %v6307_v61 }
 0x669   :  { %v7262_v23 = vpop.f32.mrf.mxu1 }
 0x66a   :  { %v6123_v52 = vadd.f32 %v7262_v23, %v13978_v26  ;;  %v6209_v23 = vpop.permute.xlu0 %6208 }
 0x66b   :  { %v6117_v17 = vpop.f32.mrf.mxu1 }
 0x66c   :  { %v6118_v22 = vadd.f32 %v13978_v26, %v6117_v17  ;;  %v6245_v49 = vadd.f32 %v6203_v7, %v6123_v52 }
 0x66e   :  { %v6244_v36 = vadd.f32 %v6201_v13, %v6118_v22  ;;  %v6309_v63 = vmul.f32 %v6267_v33, %v6245_v49  ;;  %v6213_v49 = vpop.permute.xlu0 %6212 }
 0x670   :  { %v6308_v58 = vmul.f32 %v6265_v50, %v6244_v36  ;;  %v5944_v50 = vmul.f32 %v13859_v15, %v13738_v31  ;;  %v5639_v31 = vmul.f32 %v13869_v37, %v15150_v56  ;;  %v6330_v59 = vmul.f32 %v14020_v11, %v6309_v63  ;;  %v6211_v37 = vpop.permute.xlu1 %6210 }
 0x672   :  { %7292 = vmatprep.mubr.msk.f32.mxu0 %vm5662_vm10, %v6308_v58  ;;  %v5960_v55 = vadd.f32 %v5944_v50, %v5640_v12  ;;  %v5959_v20 = vadd.f32 %v5943_v3, %v5639_v31  ;;  %v6329_v15 = vmul.f32 %v14020_v11, %v6308_v58  ;;  %v14055_v38 = vadd.f32 %v6330_v59, %v13878_v29  ;;  %v6219_v58 = vpop.permute.xlu0 %6218 }
 0x673   :  { %7293 = vmatmul.mubr.msk.f32.gmra.mxu0 %vm5662_vm10, %v6309_v63 }
 0x674   :  { %v14048_v43 = vadd.f32 %v6328_v16, %v5960_v55  ;;  %v14050_v6 = vadd.f32 %v6327_v57, %v5959_v20  ;;  %v14058_v44 = vadd.f32 %v6329_v15, %v13882_v39  ;;  %v6215_v22 = vpop.permute.xlu1 %6214 }
 0x676   :  { %v6217_v63 = vpop.permute.xlu0 %6216 }
 0x67a   :  { %v6283_v32 = vpop.permute.xlu0 %6282 }
 0x694   :  { %v7265_v2 = vpop.f32.mrf.mxu1 }
 0x695   :  { %v6133_v56 = vadd.f32 %v7265_v2, %v13978_v26 }
 0x696   :  { %v6127_v46 = vpop.f32.mrf.mxu1 }
 0x697   :  { %v6247_v61 = vadd.f32 %v6207_v53, %v6133_v56  ;;  %v6128_v33 = vadd.f32 %v13978_v26, %v6127_v46 }
 0x699   :  { %v6311_v52 = vmul.f32 %v6271_v60, %v6247_v61  ;;  %v6246_v17 = vadd.f32 %v6205_v42, %v6128_v33  ;;  %v14073_v60 = vpop.permute.xlu1 %6222 }
 0x69b   :  { %v6332_v7 = vmul.f32 %v14020_v11, %v6311_v52  ;;  %v6310_v29 = vmul.f32 %v13980_v40, %v6246_v17 }
 0x69d   :  { %v6331_v39 = vmul.f32 %v14020_v11, %v6310_v29  ;;  %7295 = vmatprep.mubr.msk.f32.mxu0 %vm5662_vm10, %v6310_v29  ;;  %v14067_v13 = vadd.f32 %v6332_v7, %v13917_v10  ;;  %v14075_v41 = vpop.permute.xlu1 %6220 }
 0x69e   :  { %7296 = vmatmul.mubr.msk.f32.gmra.mxu0 %vm5662_vm10, %v6311_v52 }
 0x69f   :  { %v14071_v36 = vadd.f32 %v6331_v39, %v13922_v9 }
 0x6a1   :  { %v6287_v8 = vpop.permute.xlu1 %6286 }
 0x6a5   :  { %v6563_v12 = vpop.permute.xlu1 %6562 }
 0x6a9   :  { %v7268_v40 = vpop.f32.mrf.mxu1  ;;  %v14093_v55 = vpop.permute.xlu1 %6566 }
 0x6aa   :  { %v6143_v48 = vadd.f32 %v7268_v40, %v13978_v26 }
 0x6ab   :  { %v6137_v19 = vpop.f32.mrf.mxu1 }
 0x6ac   :  { %v6249_v35 = vadd.f32 %v6211_v37, %v6143_v48  ;;  %v6138_v10 = vadd.f32 %v13978_v26, %v6137_v19 }
 0x6ad   :  { %v14100_v2 = vpop.permute.xlu1 %6570 }
 0x6ae   :  { %v6313_v50 = vmul.f32 %v14009_v25, %v6249_v35  ;;  %v6248_v4 = vadd.f32 %v6209_v23, %v6138_v10  ;;  %v14091_v25 = vpop.permute.xlu0 %6560 }
 0x6b0   :  { %v6334_v9 = vmul.f32 %v14020_v11, %v6313_v50  ;;  %v6312_v3 = vmul.f32 %v13987_v30, %v6248_v4 }
 0x6b1   :  { %v14115_v33 = vpop.permute.xlu1 %6574 }
 0x6b2   :  { %v6333_v16 = vmul.f32 %v14020_v11, %v6312_v3  ;;  %7298 = vmatprep.mubr.msk.f32.mxu0 %vm5662_vm10, %v6312_v3  ;;  %v14085_v1 = vadd.f32 %v6334_v9, %v13933_v62  ;;  %v14096_v20 = vpop.permute.xlu0 %6564 }
 0x6b3   :  { %7299 = vmatmul.mubr.msk.f32.gmra.mxu0 %vm5662_vm10, %v6313_v50 }
 0x6b4   :  { %v14089_v57 = vadd.f32 %v6333_v16, %v13938_v34 }
 0x6b5   :  { %v14120_v17 = vpop.permute.xlu1 %6578 }
 0x6b6   :  { %v14104_v37 = vpop.permute.xlu0 %6568 }
 0x6b9   :  { %v14127_v48 = vpop.permute.xlu1 %6582 }
 0x6ba   :  { %v7271_v31 = vpop.f32.mrf.mxu1  ;;  %v14117_v23 = vpop.permute.xlu0 %6572 }
 0x6bb   :  { %v6153_v30 = vadd.f32 %v7271_v31, %v13978_v26 }
 0x6bc   :  { %v6147_v59 = vpop.f32.mrf.mxu1 }
 0x6bd   :  { %v6251_v15 = vadd.f32 %v6215_v22, %v6153_v30  ;;  %v6148_v62 = vadd.f32 %v13978_v26, %v6147_v59 }
 0x6bf   :  { %v6315_v53 = vmul.f32 %v14011_v5, %v6251_v15  ;;  %v6250_v42 = vadd.f32 %v6213_v49, %v6148_v62 }
 0x6c1   :  { %v6336_v34 = vmul.f32 %v14020_v11, %v6315_v53  ;;  %v6314_v56 = vmul.f32 %v14001_v14, %v6250_v42 }
 0x6c3   :  { %v6335_v46 = vmul.f32 %v14020_v11, %v6314_v56  ;;  %7301 = vmatprep.mubr.msk.f32.mxu0 %vm5662_vm10, %v6314_v56  ;;  %v14109_v61 = vadd.f32 %v6336_v34, %v13949_v47  ;;  %v14123_v47 = vpop.permute.xlu0 %6576 }
 0x6c4   :  { %7302 = vmatmul.mubr.msk.f32.gmra.mxu0 %vm5662_vm10, %v6315_v53 }
 0x6c5   :  { %v14113_v5 = vadd.f32 %v6335_v46, %v13954_v21 }
 0x6c7   :  { %v14131_v35 = vpop.permute.xlu0 %6580 }
 0x6ca   :  { %v7274_v52 = vpop.f32.mrf.mxu1 }
 0x6cb   :  { %v6163_v14 = vadd.f32 %v7274_v52, %v13978_v26  ;;  %v14142_v50 = vpop.permute.xlu0 %6584 }
 0x6cc   :  { %v6157_v7 = vpop.f32.mrf.mxu1 }
 0x6cd   :  { %v6253_v29 = vadd.f32 %v6219_v58, %v6163_v14  ;;  %v6158_v22 = vadd.f32 %v13978_v26, %v6157_v7 }
 0x6cf   :  { %v6317_v39 = vmul.f32 %v6283_v32, %v6253_v29  ;;  %v6252_v49 = vadd.f32 %v6217_v63, %v6158_v22  ;;  %v14140_v63 = vpop.permute.xlu1 %6586 }
 0x6d1   :  { %v6338_v21 = vmul.f32 %v14020_v11, %v6317_v39  ;;  %v6316_v40 = vmul.f32 %v14003_v51, %v6252_v49 }
 0x6d3   :  { %v6337_v19 = vmul.f32 %v14020_v11, %v6316_v40  ;;  %7304 = vmatprep.mubr.msk.f32.mxu0 %vm5662_vm10, %v6316_v40  ;;  %v14135_v58 = vadd.f32 %v6338_v21, %v13966_v0  ;;  %v14145_v9 = vpop.permute.xlu1 %6590  ;;  %v14152_v0 = vld [vmem:[%s14350_s5 + $0x2] ss:$0 sm:$0xff] }
 0x6d4   :  { %7305 = vmatmul.mubr.msk.f32.gmra.mxu0 %vm5662_vm10, %v6317_v39 }
 0x6d5   :  { %v14138_v10 = vadd.f32 %v6337_v19, %v13970_v27  ;;  %v14154_v27 = vpop.permute.xlu0 %6588 }
 0x6db   :  { %v7277_v51 = vpop.f32.mrf.mxu1 }
 0x6dc   :  { %v6173_v4 = vadd.f32 %v7277_v51, %v13978_v26 }
 0x6dd   :  { %v6167_v32 = vpop.f32.mrf.mxu1 }
 0x6de   :  { %v6255_v3 = vadd.f32 %v14073_v60, %v6173_v4  ;;  %v6168_v16 = vadd.f32 %v13978_v26, %v6167_v32  ;;  %v6627_v26 = vpop.permute.xlu1 %6626 }
 0x6df   :  { %v7288_v59 = vpop.f32.mrf.mxu0 }
 0x6e0   :  { %v6319_v31 = vmul.f32 %v6287_v8, %v6255_v3  ;;  %v6254_v30 = vadd.f32 %v14075_v41, %v6168_v16  ;;  %v6487_v15 = vadd.f32 %v7288_v59, %v14152_v0  ;;  %v14165_v8 = vld [vmem:[%s14351_s8 + $0x3] ss:$0 sm:$0xff] }
 0x6e1   :  { %v6481_v53 = vpop.f32.mrf.mxu0 }
 0x6e2   :  { %v6318_v62 = vmul.f32 %v14013_v28, %v6254_v30  ;;  %v6609_v42 = vadd.f32 %v6563_v12, %v6487_v15  ;;  %v6482_v60 = vadd.f32 %v14152_v0, %v6481_v53  ;;  %v6340_v34 = vmul.f32 %v14020_v11, %v6319_v31  ;;  %v6625_v28 = vpop.permute.xlu0 %6624  ;;  %v6631_v19 = vpop.permute.xlu1 %6630 }
 0x6e4   :  { %7307 = vmatprep.mubr.msk.f32.mxu1 %vm5662_vm10, %v6318_v62  ;;  %v6673_v41 = vmul.f32 %v6627_v26, %v6609_v42  ;;  %v6608_v56 = vadd.f32 %v14091_v25, %v6482_v60  ;;  %v6339_v12 = vmul.f32 %v14020_v11, %v6318_v62  ;;  %v14172_v14 = vadd.f32 %v6340_v34, %v13993_v18 }
 0x6e5   :  { %7308 = vmatmul.mubr.msk.f32.vlgmr.msra.gmra.mxu1 %vm5662_vm10, %v6319_v31 }
 0x6e6   :  { %v6672_v46 = vmul.f32 %v6625_v28, %v6608_v56  ;;  %v6694_v52 = vmul.f32 %v14165_v8, %v6673_v41  ;;  %v14177_v22 = vadd.f32 %v6339_v12, %v13999_v45  ;;  %v6629_v4 = vpop.permute.xlu0 %6628  ;;  %v6635_v42 = vpop.permute.xlu1 %6634 }
 0x6e8   :  { %v6710_v7 = vadd.f32 %v6694_v52, %v14029_v24  ;;  %v6693_v29 = vmul.f32 %v14165_v8, %v6672_v46 }
 0x6ea   :  { %v6728_v39 = vsel %vm5662_vm10, %v6710_v7, 0.0  ;;  %v6709_v25 = vadd.f32 %v6693_v29, %v14044_v54  ;;  %v6633_v26 = vpop.permute.xlu0 %6632  ;;  %v6639_v52 = vpop.permute.xlu1 %6638 }
 0x6eb   :  { %6729 = vadd.xlane.f32.xlu1 %v6728_v39 }
 0x6ec   :  { %v6725_v11 = vsel %vm5662_vm10, %v6709_v25, 0.0 }
 0x6ed   :  { %6726 = vadd.xlane.f32.xlu0 %v6725_v11 }
 0x6ee   :  { %v6637_v7 = vpop.permute.xlu0 %6636 }
 0x6ef   :  { %v7291_v49 = vpop.f32.mrf.mxu0 }
 0x6f0   :  { %v6497_v21 = vadd.f32 %v7291_v49, %v14152_v0 }
 0x6f1   :  { %v6491_v18 = vpop.f32.mrf.mxu0 }
 0x6f2   :  { %v6611_v40 = vadd.f32 %v14093_v55, %v6497_v21  ;;  %v6492_v24 = vadd.f32 %v14152_v0, %v6491_v18  ;;  %v6641_v11 = vpop.permute.xlu0 %6640 }
 0x6f4   :  { %v6675_v51 = vmul.f32 %v6631_v19, %v6611_v40  ;;  %v6610_v45 = vadd.f32 %v14096_v20, %v6492_v24  ;;  %v15_v20 = vstv %s14352_s9 }
 0x6f5   :  { %16 = vst [vmem:[#allocation2] sm:$0x1] %v15_v20 }
 0x6f6   :  { %v6674_v32 = vmul.f32 %v6629_v4, %v6610_v45  ;;  %v6696_v54 = vmul.f32 %v14165_v8, %v6675_v51  ;;  %v6645_v19 = vpop.permute.xlu0 %6644 }
 0x6f8   :  { %v6712_v3 = vadd.f32 %v6696_v54, %v14048_v43  ;;  %v6695_v16 = vmul.f32 %v14165_v8, %v6674_v32 }
 0x6fa   :  { %v6734_v31 = vsel %vm5662_vm10, %v6712_v3, 0.0  ;;  %v6711_v30 = vadd.f32 %v6695_v16, %v14050_v6  ;;  %v6649_v3 = vpop.permute.xlu0 %6648 }
 0x6fb   :  { %6735 = vadd.xlane.f32.xlu0 %v6734_v31 }
 0x6fc   :  { %v6731_v55 = vsel %vm5662_vm10, %v6711_v30, 0.0  ;;  %v14219_v30 = vld [vmem:[#allocation2] ss:$0 sm:$0xff] }
 0x6fe   :  { %v14217_v16 = vpop.permute.xlu0 %6652 }
 0x6ff   :  { %6732 = vadd.xlane.f32.xlu0 %v6731_v55 }
 0x733   :  { %v7294_v59 = vpop.f32.mrf.mxu0 }
 0x734   :  { %v6507_v15 = vadd.f32 %v7294_v59, %v14152_v0 }
 0x735   :  { %v6501_v62 = vpop.f32.mrf.mxu0 }
 0x736   :  { %v6613_v43 = vadd.f32 %v14100_v2, %v6507_v15  ;;  %v6502_v53 = vadd.f32 %v14152_v0, %v6501_v62 }
 0x738   :  { %v6677_v60 = vmul.f32 %v6635_v42, %v6613_v43  ;;  %v6612_v6 = vadd.f32 %v14104_v37, %v6502_v53  ;;  %v6643_v37 = vpop.permute.xlu1 %6642 }
 0x73a   :  { %v6676_v34 = vmul.f32 %v6633_v26, %v6612_v6  ;;  %v6698_v41 = vmul.f32 %v14165_v8, %v6677_v60 }
 0x73c   :  { %v6697_v56 = vmul.f32 %v14165_v8, %v6676_v34  ;;  %v6714_v28 = vadd.f32 %v6698_v41, %v14055_v38  ;;  %v6647_v18 = vpop.permute.xlu1 %6646 }
 0x73e   :  { %v6713_v12 = vadd.f32 %v6697_v56, %v14058_v44  ;;  %v6740_v46 = vsel %vm5662_vm10, %v6714_v28, 0.0 }
 0x73f   :  { %6741 = vadd.xlane.f32.xlu0 %v6740_v46 }
 0x740   :  { %v6737_v2 = vsel %vm5662_vm10, %v6713_v12, 0.0 }
 0x741   :  { %6738 = vadd.xlane.f32.xlu1 %v6737_v2 }
 0x75e   :  { %v7297_v29 = vpop.f32.mrf.mxu0 }
 0x75f   :  { %v6517_v39 = vadd.f32 %v7297_v29, %v14152_v0 }
 0x760   :  { %v6511_v25 = vpop.f32.mrf.mxu0 }
 0x761   :  { %v6615_v49 = vadd.f32 %v14115_v33, %v6517_v39  ;;  %v6512_v38 = vadd.f32 %v14152_v0, %v6511_v25  ;;  %v6651_v33 = vpop.permute.xlu1 %6650 }
 0x763   :  { %v6679_v21 = vmul.f32 %v6639_v52, %v6615_v49  ;;  %v6614_v44 = vadd.f32 %v14117_v23, %v6512_v38 }
 0x765   :  { %v6678_v40 = vmul.f32 %v6637_v7, %v6614_v44  ;;  %v6700_v24 = vmul.f32 %v14165_v8, %v6679_v21  ;;  %v14215_v23 = vpop.permute.xlu1 %6654 }
 0x767   :  { %v6716_v51 = vadd.f32 %v6700_v24, %v14067_v13  ;;  %v6699_v45 = vmul.f32 %v14165_v8, %v6678_v40 }
 0x769   :  { %v6746_v4 = vsel %vm5662_vm10, %v6716_v51, 0.0  ;;  %v6715_v32 = vadd.f32 %v6699_v45, %v14071_v36 }
 0x76a   :  { %6747 = vadd.xlane.f32.xlu0 %v6746_v4 }
 0x76b   :  { %v6743_v54 = vsel %vm5662_vm10, %v6715_v32, 0.0 }
 0x76c   :  { %6744 = vadd.xlane.f32.xlu1 %v6743_v54 }
 0x773   :  { %v7300_v31 = vpop.f32.mrf.mxu0 }
 0x774   :  { %v6527_v13 = vadd.f32 %v7300_v31, %v14152_v0  ;;  %v6730_v59 = vpop.xlane.xlu1 %6729 }
 0x775   :  { %v6521_v55 = vpop.f32.mrf.mxu0  ;;  %v6781_v15 = vadd.f32 %v14219_v30, %v6730_v59 }
 0x776   :  { %v6617_v36 = vadd.f32 %v14120_v17, %v6527_v13  ;;  %v6522_v20 = vadd.f32 %v14152_v0, %v6521_v55  ;;  %v6727_v62 = vpop.xlane.xlu0 %6726 }
 0x777   :  { %6798 = vst.msk [vmem:[%s14353_s10 + $0x8] sm:$0xff] %vm6796_vm9, %v6781_v15  ;;  %v6780_v42 = vadd.f32 %v14219_v30, %v6727_v62 }
 0x778   :  { %v6681_v43 = vmul.f32 %v6643_v37, %v6617_v36  ;;  %v6616_v53 = vadd.f32 %v14123_v47, %v6522_v20 }
 0x779   :  { %6797 = vst.msk [vmem:[%s14353_s10] sm:$0xff] %vm6796_vm9, %v6780_v42 }
 0x77a   :  { %v6680_v60 = vmul.f32 %v6641_v11, %v6616_v53  ;;  %v6702_v6 = vmul.f32 %v14165_v8, %v6681_v43 }
 0x77c   :  { %v6718_v17 = vadd.f32 %v6702_v6, %v14085_v1  ;;  %v6701_v26 = vmul.f32 %v14165_v8, %v6680_v60 }
 0x77e   :  { %v6752_v47 = vsel %vm5662_vm10, %v6718_v17, 0.0  ;;  %v6717_v34 = vadd.f32 %v6701_v26, %v14089_v57 }
 0x77f   :  { %6753 = vadd.xlane.f32.xlu0 %v6752_v47 }
 0x780   :  { %v6749_v41 = vsel %vm5662_vm10, %v6717_v34, 0.0 }
 0x781   :  { %6750 = vadd.xlane.f32.xlu1 %v6749_v41 }
 0x784   :  { %v7303_v56 = vpop.f32.mrf.mxu0  ;;  %v6736_v52 = vpop.xlane.xlu0 %6735 }
 0x785   :  { %v6537_v28 = vadd.f32 %v7303_v56, %v14152_v0  ;;  %v6783_v29 = vadd.f32 %v14219_v30, %v6736_v52 }
 0x786   :  { %v6531_v12 = vpop.f32.mrf.mxu0 }
 0x787   :  { %v6619_v46 = vadd.f32 %v14127_v48, %v6537_v28  ;;  %v6532_v2 = vadd.f32 %v14152_v0, %v6531_v12  ;;  %6800 = vst.msk [vmem:[%s14353_s10 + $0x18] sm:$0xff] %vm6796_vm9, %v6783_v29 }
 0x788   :  { %v6733_v39 = vpop.xlane.xlu0 %6732 }
 0x789   :  { %v6683_v1 = vmul.f32 %v6647_v18, %v6619_v46  ;;  %v6618_v7 = vadd.f32 %v14131_v35, %v6532_v2  ;;  %v6782_v11 = vadd.f32 %v14219_v30, %v6733_v39 }
 0x78b   :  { %v6682_v37 = vmul.f32 %v6645_v19, %v6618_v7  ;;  %v6704_v57 = vmul.f32 %v14165_v8, %v6683_v1  ;;  %6799 = vst.msk [vmem:[%s14353_s10 + $0x10] sm:$0xff] %vm6796_vm9, %v6782_v11 }
 0x78d   :  { %v6720_v25 = vadd.f32 %v6704_v57, %v14109_v61  ;;  %v6703_v48 = vmul.f32 %v14165_v8, %v6682_v37 }
 0x78f   :  { %v6758_v49 = vsel %vm5662_vm10, %v6720_v25, 0.0  ;;  %v6719_v35 = vadd.f32 %v6703_v48, %v14113_v5 }
 0x790   :  { %6759 = vadd.xlane.f32.xlu0 %v6758_v49 }
 0x791   :  { %v6755_v38 = vsel %vm5662_vm10, %v6719_v35, 0.0 }
 0x792   :  { %6756 = vadd.xlane.f32.xlu1 %v6755_v38 }
 0x794   :  { %v7306_v21 = vpop.f32.mrf.mxu0 }
 0x795   :  { %v6547_v61 = vadd.f32 %v7306_v21, %v14152_v0 }
 0x796   :  { %v6541_v44 = vpop.f32.mrf.mxu0 }
 0x797   :  { %v6621_v18 = vadd.f32 %v14140_v63, %v6547_v61  ;;  %v6542_v40 = vadd.f32 %v14152_v0, %v6541_v44 }
 0x799   :  { %v6685_v24 = vmul.f32 %v6651_v33, %v6621_v18  ;;  %v6620_v5 = vadd.f32 %v14142_v50, %v6542_v40 }
 0x79b   :  { %v6684_v19 = vmul.f32 %v6649_v3, %v6620_v5  ;;  %v6706_v51 = vmul.f32 %v14165_v8, %v6685_v24 }
 0x79d   :  { %v6722_v45 = vadd.f32 %v6706_v51, %v14135_v58  ;;  %v6705_v4 = vmul.f32 %v14165_v8, %v6684_v19 }
 0x79f   :  { %v6764_v32 = vsel %vm5662_vm10, %v6722_v45, 0.0  ;;  %v6721_v54 = vadd.f32 %v6705_v4, %v14138_v10 }
 0x7a0   :  { %6765 = vadd.xlane.f32.xlu0 %v6764_v32 }
 0x7a1   :  { %v6761_v31 = vsel %vm5662_vm10, %v6721_v54, 0.0 }
 0x7a2   :  { %6762 = vadd.xlane.f32.xlu1 %v6761_v31 }
 0x7a5   :  { %v7309_v63 = vpop.f32.mrf.mxu1 }
 0x7a6   :  { %v6557_v33 = vadd.f32 %v7309_v63, %v14152_v0 }
 0x7a7   :  { %v6551_v13 = vpop.f32.mrf.mxu1 }
 0x7a8   :  { %v6623_v50 = vadd.f32 %v14145_v9, %v6557_v33  ;;  %v6552_v3 = vadd.f32 %v14152_v0, %v6551_v13 }
 0x7aa   :  { %v6687_v58 = vmul.f32 %v14215_v23, %v6623_v50  ;;  %v6622_v55 = vadd.f32 %v14154_v27, %v6552_v3 }
 0x7ac   :  { %v6686_v59 = vmul.f32 %v14217_v16, %v6622_v55  ;;  %v6708_v10 = vmul.f32 %v14165_v8, %v6687_v58 }
 0x7ae   :  { %v6724_v36 = vadd.f32 %v6708_v10, %v14172_v14  ;;  %v6707_v20 = vmul.f32 %v14165_v8, %v6686_v59 }
 0x7b0   :  { %v6770_v15 = vsel %vm5662_vm10, %v6724_v36, 0.0  ;;  %v6723_v62 = vadd.f32 %v6707_v20, %v14177_v22 }
 0x7b1   :  { %6771 = vadd.xlane.f32.xlu0 %v6770_v15 }
 0x7b2   :  { %v6767_v9 = vsel %vm5662_vm10, %v6723_v62, 0.0 }
 0x7b3   :  { %6768 = vadd.xlane.f32.xlu1 %v6767_v9 }
 0x7c8   :  { %v6742_v0 = vpop.xlane.xlu0 %6741 }
 0x7c9   :  { %v6785_v23 = vadd.f32 %v14219_v30, %v6742_v0 }
 0x7ca   :  { %v6739_v27 = vpop.xlane.xlu1 %6738 }
 0x7cb   :  { %v6784_v16 = vadd.f32 %v14219_v30, %v6739_v27  ;;  %6802 = vst.msk [vmem:[%s14353_s10 + $0x28] sm:$0xff] %vm6796_vm9, %v6785_v23 }
 0x7cd   :  { %6801 = vst.msk [vmem:[%s14353_s10 + $0x20] sm:$0xff] %vm6796_vm9, %v6784_v16 }
 0x7f3   :  { %v6748_v8 = vpop.xlane.xlu0 %6747 }
 0x7f4   :  { %v6787_v14 = vadd.f32 %v14219_v30, %v6748_v8 }
 0x7f5   :  { %v6745_v22 = vpop.xlane.xlu1 %6744 }
 0x7f6   :  { %6804 = vst.msk [vmem:[%s14353_s10 + $0x38] sm:$0xff] %vm6796_vm9, %v6787_v14  ;;  %v6786_v43 = vadd.f32 %v14219_v30, %v6745_v22 }
 0x7f8   :  { %6803 = vst.msk [vmem:[%s14353_s10 + $0x30] sm:$0xff] %vm6796_vm9, %v6786_v43 }
 0x808   :  { %v6754_v53 = vpop.xlane.xlu0 %6753 }
 0x809   :  { %v6789_v42 = vadd.f32 %v14219_v30, %v6754_v53 }
 0x80a   :  { %v6751_v60 = vpop.xlane.xlu1 %6750 }
 0x80b   :  { %6806 = vst.msk [vmem:[%s14353_s10 + $0x48] sm:$0xff] %vm6796_vm9, %v6789_v42  ;;  %v6788_v6 = vadd.f32 %v14219_v30, %v6751_v60 }
 0x80d   :  { %6805 = vst.msk [vmem:[%s14353_s10 + $0x40] sm:$0xff] %vm6796_vm9, %v6788_v6 }
 0x819   :  { %v6760_v17 = vpop.xlane.xlu0 %6759 }
 0x81a   :  { %v6791_v26 = vadd.f32 %v14219_v30, %v6760_v17 }
 0x81b   :  { %v6757_v47 = vpop.xlane.xlu1 %6756 }
 0x81c   :  { %6808 = vst.msk [vmem:[%s14353_s10 + $0x58] sm:$0xff] %vm6796_vm9, %v6791_v26  ;;  %v6790_v34 = vadd.f32 %v14219_v30, %v6757_v47 }
 0x81e   :  { %6807 = vst.msk [vmem:[%s14353_s10 + $0x50] sm:$0xff] %vm6796_vm9, %v6790_v34 }
 0x829   :  { %v6766_v41 = vpop.xlane.xlu0 %6765 }
 0x82a   :  { %v6793_v56 = vadd.f32 %v14219_v30, %v6766_v41 }
 0x82b   :  { %v6763_v28 = vpop.xlane.xlu1 %6762 }
 0x82c   :  { %6810 = vst.msk [vmem:[%s14353_s10 + $0x68] sm:$0xff] %vm6796_vm9, %v6793_v56  ;;  %v6792_v12 = vadd.f32 %v14219_v30, %v6763_v28 }
 0x82e   :  { %6809 = vst.msk [vmem:[%s14353_s10 + $0x60] sm:$0xff] %vm6796_vm9, %v6792_v12 }
 0x83a   :  { %v6772_v46 = vpop.xlane.xlu0 %6771 }
 0x83b   :  { %v6795_v2 = vadd.f32 %v14219_v30, %v6772_v46 }
 0x83c   :  { %v6769_v52 = vpop.xlane.xlu1 %6768 }
 0x83d   :  { %6812 = vst.msk [vmem:[%s14353_s10 + $0x78] sm:$0xff] %vm6796_vm9, %v6795_v2  ;;  %v6794_v1 = vadd.f32 %v14219_v30, %v6769_v52 }
 0x83f   :  { %6811 = vst.msk [vmem:[%s14353_s10 + $0x70] sm:$0xff] %vm6796_vm9, %v6794_v1 }

</bundles_post_ra>
